<compile_context>
chip_gen: v5e
topology: v5e:2x2
jax: 0.10.0
libtpu: 0.0.40
codegen_flags: <defaults>
</compile_context>

<pallas_src>
import functools
import math

import jax
import jax.numpy as jnp
from jax.experimental import pallas as pl
from jax.experimental.pallas import tpu as pltpu


# ---------------------------------------------------------------------------
# Tile planning (shared by prepare_params and the wrappers so weights can be
# pre-padded once, outside the jitted step)
# ---------------------------------------------------------------------------

TM_PREF = 1024            # M = B*S is small for UViT -> usually one M tile
TK_PREF = 1024
TN_PREF = 512
LINEAR_VMEM_BYTES = 48 * 1024 * 1024   # fits v7x 64 MiB physical VMEM
SMALL_VMEM_BYTES = 32 * 1024 * 1024
LN_EPS = 1e-5


def _round_up(v, m):
    return (v + m - 1) // m * m


def _split(dim, align, pref):
    """(padded_total, tile, num_tiles): tile % align == 0, tile <= ~pref,
    num_tiles * tile == padded_total (no over-padding beyond `align`)."""
    padded = _round_up(dim, align)
    if padded <= pref:
        return padded, padded, 1
    tile = align
    for cand in range(pref - pref % align, align - 1, -align):
        if padded % cand == 0:
            tile = cand
            break
    return padded, tile, padded // tile


def _plan_kn(K, N):
    return _split(K, 128, TK_PREF)[0], _split(N, 128, TN_PREF)[0]


# ---------------------------------------------------------------------------
# Pallas kernels
# ---------------------------------------------------------------------------

def _gelu(y):
    # TODO(synk): torch nn.GELU defaults to the exact erf form; the tanh
    # approximation is used for robust Mosaic lowering (|diff| ~1e-3).
    c = jnp.float32(math.sqrt(2.0 / math.pi))
    return 0.5 * y * (1.0 + jnp.tanh(c * (y + 0.044715 * y * y * y)))


def _linear_nk1_kernel(x_ref, w_ref, b_ref, *rest,
                       activation, has_residual, fused_ln, d_real, eps):
    """Single-K-tile y = [LN](x) @ w + b (+GELU) (+residual); no scratch."""
    i = 0
    if fused_ln:
        g_ref, be_ref = rest[0], rest[1]
        i = 2
    if has_residual:
        r_ref = rest[i]
        i += 1
    o_ref = rest[i]

    x = x_ref[...]
    if fused_ln:
        xf = x.astype(jnp.float32)
        inv_d = jnp.float32(1.0 / d_real)
        mu = jnp.sum(xf, axis=-1, keepdims=True) * inv_d
        msq = jnp.sum(xf * xf, axis=-1, keepdims=True) * inv_d
        var = msq - mu * mu
        xn = (xf - mu) * jax.lax.rsqrt(var + jnp.float32(eps))
        xn = xn * g_ref[...] + be_ref[...]          # padded cols: gamma/beta=0
        xb = xn.astype(jnp.bfloat16)
    else:
        xb = x.astype(jnp.bfloat16)
    y = jnp.dot(xb, w_ref[...], preferred_element_type=jnp.float32)
    y = y + b_ref[...]                               # (1, tn) broadcasts
    if activation == "gelu":
        y = _gelu(y)
    if has_residual:
        y = y + r_ref[...].astype(jnp.float32)
    o_ref[...] = y.astype(o_ref.dtype)


def _linear_mk_kernel(x_ref, w_ref, b_ref, *rest, activation, has_residual):
    """Tiled y = x @ w + b (+GELU) (+residual). K-reduction over grid axis 2."""
    if has_residual:
        r_ref, o_ref, acc_ref = rest
    else:
        o_ref, acc_ref = rest

    @pl.when(pl.program_id(2) == 0)
    def _init():
        acc_ref[...] = jnp.zeros_like(acc_ref)

    acc_ref[...] += jnp.dot(x_ref[...].astype(jnp.bfloat16), w_ref[...],
                            preferred_element_type=jnp.float32)

    @pl.when(pl.program_id(2) == pl.num_programs(2) - 1)
    def _finalize():
        y = acc_ref[...] + b_ref[...]
        if activation == "gelu":
            y = _gelu(y)
        if has_residual:
            y = y + r_ref[...].astype(jnp.float32)
        o_ref[...] = y.astype(o_ref.dtype)


def _layernorm_kernel(x_ref, g_ref, b_ref, o_ref, *, eps):
    x = x_ref[...].astype(jnp.float32)
    mu = jnp.mean(x, axis=-1, keepdims=True)
    xc = x - mu
    var = jnp.mean(xc * xc, axis=-1, keepdims=True)
    y = xc * jax.lax.rsqrt(var + eps)
    y = y * g_ref[...].astype(jnp.float32) + b_ref[...].astype(jnp.float32)
    o_ref[...] = y.astype(o_ref.dtype)


def _attn_kernel(qkv_ref, o_ref, *, dh, n_real, s_pad):
    """Softmax attention for one (batch, head); q is pre-scaled via qkv_w."""
    # TODO(synk): for S beyond ~1-2k tokens switch to a KV-tiled online-softmax
    # (flash) accumulator to bound VMEM to O(S*dh).
    qkv = qkv_ref[0, 0]                                  # (S, 3*dh) bf16
    q = qkv[:, :dh]
    k = qkv[:, dh:2 * dh]
    v = qkv[:, 2 * dh:3 * dh]
    s = jax.lax.dot_general(q, k, (((1,), (1,)), ((), ())),
                            preferred_element_type=jnp.float32)
    if n_real < s_pad:                                   # mask padded key rows
        col = jax.lax.broadcasted_iota(jnp.int32, s.shape, 1)
        s = jnp.where(col < n_real, s, jnp.float32(-1e30))
    s = s - jnp.max(s, axis=-1, keepdims=True)
    e = jnp.exp(s)
    p = e * pl.reciprocal(jnp.sum(e, axis=-1, keepdims=True), approx=True)
    o = jnp.dot(p.astype(jnp.bfloat16), v, preferred_element_type=jnp.float32)
    o_ref[0, 0] = o.astype(o_ref.dtype)


# ---------------------------------------------------------------------------
# Pallas wrappers
# ---------------------------------------------------------------------------

def layernorm(x2d, g, b, eps=LN_EPS, out_dtype=jnp.bfloat16, tm_pref=1024):
    """Standalone LN (fallback only; normally LN is fused into linear())."""
    M, D = x2d.shape
    Mp, tm, nm = _split(M, 16, tm_pref)
    xp = jnp.pad(x2d, ((0, Mp - M), (0, 0))) if Mp != M else x2d
    out = pl.pallas_call(
        functools.partial(_layernorm_kernel, eps=eps),
        grid=(nm,),
        in_specs=[
            pl.BlockSpec((tm, D), lambda i: (i, 0)),
            pl.BlockSpec((1, D), lambda i: (0, 0)),
            pl.BlockSpec((1, D), lambda i: (0, 0)),
        ],
        out_specs=pl.BlockSpec((tm, D), lambda i: (i, 0)),
        out_shape=jax.ShapeDtypeStruct((Mp, D), out_dtype),
        compiler_params=pltpu.CompilerParams(
            dimension_semantics=("parallel",),
            vmem_limit_bytes=SMALL_VMEM_BYTES),
    )(xp, g.reshape(1, D), b.reshape(1, D))
    return out[:M] if Mp != M else out


def linear(x2d, w, b, *, n_out, activation=None, residual=None, ln=None,
           out_dtype=jnp.float32):
    """x2d:[M,K] un-padded (f32 or bf16), w:[Kp,Np] bf16 (pre-padded once),
    b:[1,Np] f32.  ln=(gamma[1,Kp], beta[1,Kp], d_real, eps) fuses LayerNorm(x)
    into the matmul prologue (requires a single K tile).  Bias/GELU/residual
    are fused into the epilogue; f32 accumulation, bf16 MXU operands."""
    M, K = x2d.shape
    Mp, tm, nm = _split(M, 16, TM_PREF)
    Kp, tk, nk = _split(K, 128, TK_PREF)
    Np, tn, nn = _split(n_out, 128, TN_PREF)
    assert w.shape == (Kp, Np), (w.shape, (Kp, Np))
    assert b.shape == (1, Np), (b.shape, (1, Np))

    if ln is not None and nk > 1:
        # Rare fallback (K > TK_PREF): standalone LN, then un-fused matmul.
        g, be, _, eps = ln
        x2d = layernorm(x2d, g[0, :K], be[0, :K], eps=eps,
                        out_dtype=jnp.bfloat16)
        ln = None

    x = x2d
    if (Mp, Kp) != (M, K):
        x = jnp.pad(x, ((0, Mp - M), (0, Kp - K)))
    r = residual
    if r is not None and r.shape != (Mp, Np):
        r = jnp.pad(r, ((0, Mp - r.shape[0]), (0, Np - r.shape[1])))

    inputs = [x, w, b]
    if nk == 1:
        in_specs = [
            pl.BlockSpec((tm, tk), lambda i, j: (i, 0)),
            pl.BlockSpec((tk, tn), lambda i, j: (0, j)),
            pl.BlockSpec((1, tn), lambda i, j: (0, j)),
        ]
        if ln is not None:
            inputs += [ln[0], ln[1]]
            in_specs += [pl.BlockSpec((1, tk), lambda i, j: (0, 0)),
                         pl.BlockSpec((1, tk), lambda i, j: (0, 0))]
        if r is not None:
            inputs.append(r)
            in_specs.append(pl.BlockSpec((tm, tn), lambda i, j: (i, j)))
        kern = functools.partial(
            _linear_nk1_kernel, activation=activation,
            has_residual=r is not None, fused_ln=ln is not None,
            d_real=float(ln[2]) if ln is not None else 1.0,
            eps=float(ln[3]) if ln is not None else LN_EPS)
        out = pl.pallas_call(
            kern,
            grid=(nm, nn),
            in_specs=in_specs,
            out_specs=pl.BlockSpec((tm, tn), lambda i, j: (i, j)),
            out_shape=jax.ShapeDtypeStruct((Mp, Np), out_dtype),
            compiler_params=pltpu.CompilerParams(
                dimension_semantics=("parallel", "parallel"),
                vmem_limit_bytes=LINEAR_VMEM_BYTES),
        )(*inputs)
    else:
        in_specs = [
            pl.BlockSpec((tm, tk), lambda i, j, kk: (i, kk)),
            pl.BlockSpec((tk, tn), lambda i, j, kk: (kk, j)),
            pl.BlockSpec((1, tn), lambda i, j, kk: (0, j)),
        ]
        if r is not None:
            inputs.append(r)
            in_specs.append(pl.BlockSpec((tm, tn), lambda i, j, kk: (i, j)))
        kern = functools.partial(_linear_mk_kernel, activation=activation,
                                 has_residual=r is not None)
        out = pl.pallas_call(
            kern,
            grid=(nm, nn, nk),
            in_specs=in_specs,
            out_specs=pl.BlockSpec((tm, tn), lambda i, j, kk: (i, j)),
            out_shape=jax.ShapeDtypeStruct((Mp, Np), out_dtype),
            scratch_shapes=[pltpu.VMEM((tm, tn), jnp.float32)],
            compiler_params=pltpu.CompilerParams(
                dimension_semantics=("parallel", "parallel", "arbitrary"),
                vmem_limit_bytes=LINEAR_VMEM_BYTES),
        )(*inputs)

    if (Mp, Np) != (M, n_out):
        out = out[:M, :n_out]
    return out


def attention(qkv_bh, n_real, out_dtype=jnp.bfloat16):
    """qkv_bh: [B, H, S, 3*dh] head-major (q|k|v per head, q pre-scaled)."""
    B, H, S, threedh = qkv_bh.shape
    dh = threedh // 3
    kern = functools.partial(_attn_kernel, dh=dh, n_real=n_real, s_pad=S)
    return pl.pallas_call(
        kern,
        grid=(B, H),
        in_specs=[pl.BlockSpec((1, 1, S, threedh), lambda b, h: (b, h, 0, 0))],
        out_specs=pl.BlockSpec((1, 1, S, dh), lambda b, h: (b, h, 0, 0)),
        out_shape=jax.ShapeDtypeStruct((B, H, S, dh), out_dtype),
        compiler_params=pltpu.CompilerParams(
            dimension_semantics=("parallel", "parallel"),
            vmem_limit_bytes=SMALL_VMEM_BYTES),
    )(qkv_bh)


# ---------------------------------------------------------------------------
# JAX glue (reshapes / patching / sinusoids / conv)
# ---------------------------------------------------------------------------

def timestep_embedding(timesteps, dim, max_period=10000):
    half = dim // 2
    freqs = jnp.exp(-math.log(max_period) *
                    jnp.arange(half, dtype=jnp.float32) / half)
    args = timesteps[:, None].astype(jnp.float32) * freqs[None]
    emb = jnp.concatenate([jnp.cos(args), jnp.sin(args)], axis=-1)
    if dim % 2:
        emb = jnp.concatenate([emb, jnp.zeros_like(emb[:, :1])], axis=-1)
    return emb


def patchify(x, patch):
    """NCHW image -> [B, L, C*p*p] with (c, i, j) flattening (matches conv)."""
    B, C, H, W = x.shape
    hp, wp = H // patch, W // patch
    x = x.reshape(B, C, hp, patch, wp, patch)
    x = x.transpose(0, 2, 4, 1, 3, 5)               # B, hp, wp, C, p, p
    return x.reshape(B, hp * wp, C * patch * patch)


def unpatchify(x, channels):
    """'B (h w) (p1 p2 C) -> B C (h p1) (w p2)'."""
    B, L, ppc = x.shape
    patch = int((ppc // channels) ** 0.5)
    h = w = int(L ** 0.5)
    x = x.reshape(B, h, w, patch, patch, channels)
    x = x.transpose(0, 5, 1, 3, 2, 4)
    return x.reshape(B, channels, h * patch, w * patch)


def conv3x3(x, w, b):
    """3x3 same-padding conv (NCHW, OIHW)."""
    # TODO(synk): C=3 in/out channels is too lane-sparse for an efficient
    # Pallas im2col matmul (~2% MXU utilization); use XLA's native conv.
    y = jax.lax.conv_general_dilated(
        x, w, window_strides=(1, 1), padding=((1, 1), (1, 1)),
        dimension_numbers=("NCHW", "OIHW", "NCHW"))
    return y + b[None, :, None, None]


# ---------------------------------------------------------------------------
# Model (forward)
# ---------------------------------------------------------------------------

def block_forward(p, x, heads, dh, n_real, skip=None):
    B, S, D = x.shape
    M = B * S
    if skip is not None:
        xc = jnp.concatenate([x, skip], axis=-1).reshape(M, 2 * D)
        x = linear(xc, p["skip_w"], p["skip_b"], n_out=D).reshape(B, S, D)

    # --- attention (LN fused into qkv; residual fused into proj epilogue) ---
    qkv = linear(x.reshape(M, D), p["qkv_w"], p["qkv_b"], n_out=3 * D,
                 ln=(p["ln1_g"], p["ln1_b"], D, LN_EPS),
                 out_dtype=jnp.bfloat16)
    qkv = qkv.reshape(B, S, heads, 3 * dh).transpose(0, 2, 1, 3)  # [B,H,S,3dh]
    o = attention(qkv, n_real)                                    # [B,H,S,dh]
    o = o.transpose(0, 2, 1, 3).reshape(M, D)                     # head-major D
    x = linear(o, p["proj_w"], p["proj_b"], n_out=D,
               residual=x.reshape(M, D)).reshape(B, S, D)

    # --- MLP (LN fused into fc1; residual fused into fc2 epilogue) ---
    h1 = linear(x.reshape(M, D), p["fc1_w"], p["fc1_b"], n_out=4 * D,
                activation="gelu", ln=(p["ln2_g"], p["ln2_b"], D, LN_EPS),
                out_dtype=jnp.bfloat16)
    x = linear(h1, p["fc2_w"], p["fc2_b"], n_out=D,
               residual=x.reshape(M, D)).reshape(B, S, D)
    return x


@functools.partial(jax.jit, static_argnames=("patch", "heads", "extras"))
def uvit_forward(params, x, timesteps, *, patch, heads, extras):
    assert extras == 1  # TODO(synk): class-conditional label token not implemented
    B, C, H, W = x.shape
    D = params["pos_embed"].shape[-1]
    dh = D // heads

    # patch embedding (conv k=p, s=p  ==  patchify + linear)
    tokens = patchify(x, patch)                      # [B, L, C*p*p]
    L = tokens.shape[1]
    tokens = linear(tokens.reshape(B * L, C * patch * patch),
                    params["patch_w"], params["patch_b"],
                    n_out=D).reshape(B, L, D)

    if timesteps.shape[0] == 1:
        timesteps = jnp.repeat(timesteps, B)
    time_token = timestep_embedding(timesteps, D)[:, None, :]   # [B, 1, D]
    h = jnp.concatenate([time_token, tokens], axis=1)           # [B, 1+L, D]

    # pad the sequence ONCE to a 16-multiple so every per-layer kernel sees
    # aligned rows (padded key rows are masked inside the attention kernel).
    n_real = extras + L
    s_pad = _round_up(n_real, 16)
    assert params["pos_embed"].shape[1] == s_pad
    if s_pad != n_real:
        h = jnp.pad(h, ((0, 0), (0, s_pad - n_real), (0, 0)))
    h = h + params["pos_embed"]

    skips = []
    for blk in params["in_blocks"]:
        h = block_forward(blk, h, heads, dh, n_real)
        skips.append(h)
    h = block_forward(params["mid_block"], h, heads, dh, n_real)
    for blk in params["out_blocks"]:
        h = block_forward(blk, h, heads, dh, n_real, skip=skips.pop())

    # final layer: (fused LN ->) linear -> drop extras & pad rows -> conv
    M = B * s_pad
    out_feat = patch * patch * C
    hf = linear(h.reshape(M, D), params["final_w"], params["final_b"],
                n_out=out_feat,
                ln=(params["final_ln_g"], params["final_ln_b"], D, LN_EPS))
    hf = hf.reshape(B, s_pad, out_feat)[:, extras:n_real, :]
    img = unpatchify(hf, C)
    img = conv3x3(img, params["conv_w"], params["conv_b"])
    return img


# ---------------------------------------------------------------------------
# Parameter init (canonical f32, ~trunc_normal std=0.02, zero bias) and
# one-time conversion to kernel layout (outside jit).
# ---------------------------------------------------------------------------

def init_params(key, *, C, img_hw, D, patch, depth, heads):
    num_patches = (img_hw // patch) ** 2
    extras = 1
    keys = iter(jax.random.split(key, 512))

    def nrm(shape, std=0.02):
        return std * jax.random.normal(next(keys), shape, dtype=jnp.float32)

    def init_block(skip=False):
        blk = dict(
            ln1_g=jnp.ones((D,), jnp.float32), ln1_b=jnp.zeros((D,), jnp.float32),
            qkv_w=nrm((D, 3 * D)), qkv_b=jnp.zeros((3 * D,), jnp.float32),
            proj_w=nrm((D, D)), proj_b=jnp.zeros((D,), jnp.float32),
            ln2_g=jnp.ones((D,), jnp.float32), ln2_b=jnp.zeros((D,), jnp.float32),
            fc1_w=nrm((D, 4 * D)), fc1_b=jnp.zeros((4 * D,), jnp.float32),
            fc2_w=nrm((4 * D, D)), fc2_b=jnp.zeros((D,), jnp.float32),
        )
        if skip:
            blk["skip_w"] = nrm((2 * D, D))
            blk["skip_b"] = jnp.zeros((D,), jnp.float32)
        return blk

    params = dict(
        patch_w=nrm((C * patch * patch, D)),
        patch_b=jnp.zeros((D,), jnp.float32),
        pos_embed=nrm((1, extras + num_patches, D)),
        in_blocks=[init_block(False) for _ in range(depth // 2)],
        mid_block=init_block(False),
        out_blocks=[init_block(True) for _ in range(depth // 2)],
        final_ln_g=jnp.ones((D,), jnp.float32),
        final_ln_b=jnp.zeros((D,), jnp.float32),
        final_w=nrm((D, patch * patch * C)),
        final_b=jnp.zeros((patch * patch * C,), jnp.float32),
        conv_w=nrm((C, C, 3, 3)),
        conv_b=jnp.zeros((C,), jnp.float32),
    )
    return params, extras


def prepare_params(params, *, heads):
    """One-time conversion to kernel layout: bf16 weights pre-padded to the
    tile plan, f32 biases [1,Np], head-major + pre-scaled qkv columns, padded
    LN params and pos_embed.  Run once, outside the jitted step."""
    D = params["pos_embed"].shape[-1]
    n_real = params["pos_embed"].shape[1]
    s_pad = _round_up(n_real, 16)
    Kp_D = _split(D, 128, TK_PREF)[0]
    dh = D // heads

    def prep_lin(w, b):
        K, N = w.shape
        Kp, Np = _plan_kn(K, N)
        wp = jnp.zeros((Kp, Np), jnp.bfloat16).at[:K, :N].set(
            w.astype(jnp.bfloat16))
        bp = jnp.zeros((1, Np), jnp.float32).at[:, :N].set(
            b.astype(jnp.float32))
        return wp, bp

    def prep_ln(g, b):
        gp = jnp.zeros((1, Kp_D), jnp.float32).at[:, :D].set(g)
        bp = jnp.zeros((1, Kp_D), jnp.float32).at[:, :D].set(b)
        return gp, bp

    def prep_qkv(w, b):
        scale = float(dh) ** -0.5           # fold 1/sqrt(dh) into q columns
        w = jnp.concatenate([w[:, :D] * scale, w[:, D:]], axis=1)
        b = jnp.concatenate([b[:D] * scale, b[D:]])
        perm = []
        for h in range(heads):              # head-major [q_h | k_h | v_h]
            for part in range(3):
                perm.extend(range(part * D + h * dh, part * D + (h + 1) * dh))
        perm = jnp.asarray(perm, jnp.int32)
        return prep_lin(w[:, perm], b[perm])

    def prep_block(blk):
        out = {}
        out["ln1_g"], out["ln1_b"] = prep_ln(blk["ln1_g"], blk["ln1_b"])
        out["ln2_g"], out["ln2_b"] = prep_ln(blk["ln2_g"], blk["ln2_b"])
        out["qkv_w"], out["qkv_b"] = prep_qkv(blk["qkv_w"], blk["qkv_b"])
        out["proj_w"], out["proj_b"] = prep_lin(blk["proj_w"], blk["proj_b"])
        out["fc1_w"], out["fc1_b"] = prep_lin(blk["fc1_w"], blk["fc1_b"])
        out["fc2_w"], out["fc2_b"] = prep_lin(blk["fc2_w"], blk["fc2_b"])
        if "skip_w" in blk:
            out["skip_w"], out["skip_b"] = prep_lin(blk["skip_w"],
                                                    blk["skip_b"])
        return out

    pos_p = jnp.zeros((1, s_pad, D), jnp.float32).at[:, :n_real, :].set(
        params["pos_embed"])
    patch_w, patch_b = prep_lin(params["patch_w"], params["patch_b"])
    final_w, final_b = prep_lin(params["final_w"], params["final_b"])
    fg, fb = prep_ln(params["final_ln_g"], params["final_ln_b"])

    return dict(
        patch_w=patch_w, patch_b=patch_b,
        pos_embed=pos_p,
        in_blocks=[prep_block(b) for b in params["in_blocks"]],
        mid_block=prep_block(params["mid_block"]),
        out_blocks=[prep_block(b) for b in params["out_blocks"]],
        final_ln_g=fg, final_ln_b=fb,
        final_w=final_w, final_b=final_b,
        conv_w=params["conv_w"], conv_b=params["conv_b"],
    )


# ---------------------------------------------------------------------------
# Demo
# ---------------------------------------------------------------------------

if __name__ == "__main__":
    B, C, HW = 2, 3, 16
    D, patch, depth, heads = 128, 2, 4, 4

    key = jax.random.PRNGKey(0)
    kx, kt, kp = jax.random.split(key, 3)
    x = jax.random.normal(kx, (B, C, HW, HW), dtype=jnp.float32)
    timesteps = jax.random.uniform(kt, (B,), dtype=jnp.float32) * 1000.0

    params, extras = init_params(kp, C=C, img_hw=HW, D=D, patch=patch,
                                 depth=depth, heads=heads)
    prepped = prepare_params(params, heads=heads)   # once, outside jit

    out = uvit_forward(prepped, x, timesteps, patch=patch, heads=heads,
                       extras=extras)
    out = jax.block_until_ready(out)
    assert out.shape == (B, C, HW, HW), out.shape
    assert bool(jnp.all(jnp.isfinite(out)))
    print("KERNEL_OK")
</pallas_src>

<mosaic_0001>
module attributes {stable_mosaic.version = 11 : i64} {
  func.func @_linear_nk1_kernel(%arg0: i32, %arg1: i32, %arg2: memref<128x128xf32, #tpu.memory_space<vmem>>, %arg3: memref<128x128xbf16, #tpu.memory_space<vmem>>, %arg4: memref<1x128xf32, #tpu.memory_space<vmem>>, %arg5: memref<128x128xf32, #tpu.memory_space<vmem>>) attributes {dimension_semantics = [#tpu.dimension_semantics<parallel>, #tpu.dimension_semantics<parallel>], iteration_bounds = array<i64: 1, 1>, scalar_prefetch = 0 : i64, scratch_operands = 0 : i64, tpu.core_type = #tpu.core_type<tc>, window_params = [{transform_indices = @transform_0, window_bounds = array<i64: 128, 128>}, {transform_indices = @transform_1, window_bounds = array<i64: 128, 128>}, {transform_indices = @transform_2, window_bounds = array<i64: 1, 128>}, {transform_indices = @transform_3, window_bounds = array<i64: 128, 128>}]} {
    %c0 = arith.constant 0 : index
    %c0_0 = arith.constant 0 : index
    %0 = vector.load %arg2[%c0, %c0_0] : memref<128x128xf32, #tpu.memory_space<vmem>>, vector<128x128xf32>
    %1 = arith.truncf %0 : vector<128x128xf32> to vector<128x128xbf16>
    %c0_1 = arith.constant 0 : index
    %c0_2 = arith.constant 0 : index
    %2 = vector.load %arg3[%c0_1, %c0_2] : memref<128x128xbf16, #tpu.memory_space<vmem>>, vector<128x128xbf16>
    %cst = arith.constant dense<0.000000e+00> : vector<128x128xf32>
    %3 = tpu.matmul %1, %2, %cst {dimension_numbers = #tpu.dot_dimension_numbers<[1], [0], [0], [1], [0, 0, 1, 1], [], []>} : vector<128x128xbf16>, vector<128x128xbf16>, vector<128x128xf32> -> vector<128x128xf32>
    %c0_3 = arith.constant 0 : index
    %c0_4 = arith.constant 0 : index
    %4 = vector.load %arg4[%c0_3, %c0_4] : memref<1x128xf32, #tpu.memory_space<vmem>>, vector<1x128xf32>
    %5 = vector.broadcast %4 : vector<1x128xf32> to vector<128x128xf32>
    %6 = arith.addf %3, %5 : vector<128x128xf32>
    %c0_5 = arith.constant 0 : index
    %c0_6 = arith.constant 0 : index
    %7 = vector.load %arg5[%c0_5, %c0_6] : memref<128x128xf32, #tpu.memory_space<vmem>>, vector<128x128xf32>
    tpu.vector_store %arg5[%c0_5, %c0_6], %6 {strides = array<i32>} : memref<128x128xf32, #tpu.memory_space<vmem>>, vector<128x128xf32>,
    return
  }
  func.func @transform_0(%arg0: i32, %arg1: i32) -> (i32, i32) {
    %c0_i32 = arith.constant 0 : i32
    %c0_i32_0 = arith.constant 0 : i32
    return %arg0, %c0_i32 : i32, i32
  }
  func.func @transform_1(%arg0: i32, %arg1: i32) -> (i32, i32) {
    %c0_i32 = arith.constant 0 : i32
    %c0_i32_0 = arith.constant 0 : i32
    return %c0_i32, %arg1 : i32, i32
  }
  func.func @transform_2(%arg0: i32, %arg1: i32) -> (i32, i32) {
    %c0_i32 = arith.constant 0 : i32
    %c0_i32_0 = arith.constant 0 : i32
    return %c0_i32, %arg1 : i32, i32
  }
  func.func @transform_3(%arg0: i32, %arg1: i32) -> (i32, i32) {
    %c0_i32 = arith.constant 0 : i32
    return %arg0, %arg1 : i32, i32
  }
}

module attributes {stable_mosaic.version = 11 : i64} {
  func.func @_linear_nk1_kernel(%arg0: i32, %arg1: i32, %arg2: memref<160x128xf32, #tpu.memory_space<vmem>>, %arg3: memref<128x384xbf16, #tpu.memory_space<vmem>>, %arg4: memref<1x384xf32, #tpu.memory_space<vmem>>, %arg5: memref<1x128xf32, #tpu.memory_space<vmem>>, %arg6: memref<1x128xf32, #tpu.memory_space<vmem>>, %arg7: memref<160x384xbf16, #tpu.memory_space<vmem>>) attributes {dimension_semantics = [#tpu.dimension_semantics<parallel>, #tpu.dimension_semantics<parallel>], iteration_bounds = array<i64: 1, 1>, scalar_prefetch = 0 : i64, scratch_operands = 0 : i64, tpu.core_type = #tpu.core_type<tc>, window_params = [{transform_indices = @transform_0, window_bounds = array<i64: 160, 128>}, {transform_indices = @transform_1, window_bounds = array<i64: 128, 384>}, {transform_indices = @transform_2, window_bounds = array<i64: 1, 384>}, {pipeline_mode = #tpu.pipeline_mode<synchronous>, transform_indices = @transform_3, window_bounds = array<i64: 1, 128>}, {pipeline_mode = #tpu.pipeline_mode<synchronous>, transform_indices = @transform_4, window_bounds = array<i64: 1, 128>}, {transform_indices = @transform_5, window_bounds = array<i64: 160, 384>}]} {
    %c0 = arith.constant 0 : index
    %c0_0 = arith.constant 0 : index
    %0 = vector.load %arg2[%c0, %c0_0] : memref<160x128xf32, #tpu.memory_space<vmem>>, vector<160x128xf32>
    %cst = arith.constant dense<0.000000e+00> : vector<160xf32>
    %1 = vector.multi_reduction <add>, %0, %cst [1] : vector<160x128xf32> to vector<160xf32>
    %2 = vector.shape_cast %1 : vector<160xf32> to vector<160x1xf32>
    %cst_1 = arith.constant 7.812500e-03 : f32
    %3 = vector.broadcast %cst_1 : f32 to vector<160x1xf32>
    %4 = arith.mulf %2, %3 : vector<160x1xf32>
    %5 = arith.mulf %0, %0 : vector<160x128xf32>
    %cst_2 = arith.constant dense<0.000000e+00> : vector<160xf32>
    %6 = vector.multi_reduction <add>, %5, %cst_2 [1] : vector<160x128xf32> to vector<160xf32>
    %7 = vector.shape_cast %6 : vector<160xf32> to vector<160x1xf32>
    %cst_3 = arith.constant 7.812500e-03 : f32
    %8 = vector.broadcast %cst_3 : f32 to vector<160x1xf32>
    %9 = arith.mulf %7, %8 : vector<160x1xf32>
    %10 = arith.mulf %4, %4 : vector<160x1xf32>
    %11 = arith.subf %9, %10 : vector<160x1xf32>
    %12 = vector.broadcast %4 : vector<160x1xf32> to vector<160x128xf32>
    %13 = arith.subf %0, %12 : vector<160x128xf32>
    %cst_4 = arith.constant 9.99999974E-6 : f32
    %14 = vector.broadcast %cst_4 : f32 to vector<160x1xf32>
    %15 = arith.addf %11, %14 : vector<160x1xf32>
    %16 = math.rsqrt %15 : vector<160x1xf32>
    %17 = vector.broadcast %16 : vector<160x1xf32> to vector<160x128xf32>
    %18 = arith.mulf %13, %17 : vector<160x128xf32>
    %c0_5 = arith.constant 0 : index
    %c0_6 = arith.constant 0 : index
    %19 = vector.load %arg5[%c0_5, %c0_6] : memref<1x128xf32, #tpu.memory_space<vmem>>, vector<1x128xf32>
    %20 = vector.broadcast %19 : vector<1x128xf32> to vector<160x128xf32>
    %21 = arith.mulf %18, %20 : vector<160x128xf32>
    %c0_7 = arith.constant 0 : index
    %c0_8 = arith.constant 0 : index
    %22 = vector.load %arg6[%c0_7, %c0_8] : memref<1x128xf32, #tpu.memory_space<vmem>>, vector<1x128xf32>
    %23 = vector.broadcast %22 : vector<1x128xf32> to vector<160x128xf32>
    %24 = arith.addf %21, %23 : vector<160x128xf32>
    %25 = arith.truncf %24 : vector<160x128xf32> to vector<160x128xbf16>
    %c0_9 = arith.constant 0 : index
    %c0_10 = arith.constant 0 : index
    %26 = vector.load %arg3[%c0_9, %c0_10] : memref<128x384xbf16, #tpu.memory_space<vmem>>, vector<128x384xbf16>
    %cst_11 = arith.constant dense<0.000000e+00> : vector<160x384xf32>
    %27 = tpu.matmul %25, %26, %cst_11 {dimension_numbers = #tpu.dot_dimension_numbers<[1], [0], [0], [1], [0, 0, 1, 1], [], []>} : vector<160x128xbf16>, vector<128x384xbf16>, vector<160x384xf32> -> vector<160x384xf32>
    %c0_12 = arith.constant 0 : index
    %c0_13 = arith.constant 0 : index
    %28 = vector.load %arg4[%c0_12, %c0_13] : memref<1x384xf32, #tpu.memory_space<vmem>>, vector<1x384xf32>
    %29 = vector.broadcast %28 : vector<1x384xf32> to vector<160x384xf32>
    %30 = arith.addf %27, %29 : vector<160x384xf32>
    %31 = arith.truncf %30 : vector<160x384xf32> to vector<160x384xbf16>
    %c0_14 = arith.constant 0 : index
    %c0_15 = arith.constant 0 : index
    %32 = vector.load %arg7[%c0_14, %c0_15] : memref<160x384xbf16, #tpu.memory_space<vmem>>, vector<160x384xbf16>
    tpu.vector_store %arg7[%c0_14, %c0_15], %31 {strides = array<i32>} : memref<160x384xbf16, #tpu.memory_space<vmem>>, vector<160x384xbf16>,
    return
  }
  func.func @transform_0(%arg0: i32, %arg1: i32) -> (i32, i32) {
    %c0_i32 = arith.constant 0 : i32
    %c0_i32_0 = arith.constant 0 : i32
    return %arg0, %c0_i32 : i32, i32
  }
  func.func @transform_1(%arg0: i32, %arg1: i32) -> (i32, i32) {
    %c0_i32 = arith.constant 0 : i32
    %c0_i32_0 = arith.constant 0 : i32
    return %c0_i32, %arg1 : i32, i32
  }
  func.func @transform_2(%arg0: i32, %arg1: i32) -> (i32, i32) {
    %c0_i32 = arith.constant 0 : i32
    %c0_i32_0 = arith.constant 0 : i32
    return %c0_i32, %arg1 : i32, i32
  }
  func.func @transform_3(%arg0: i32, %arg1: i32) -> (i32, i32) {
    %c0_i32 = arith.constant 0 : i32
    %c0_i32_0 = arith.constant 0 : i32
    %c0_i32_1 = arith.constant 0 : i32
    return %c0_i32, %c0_i32_0 : i32, i32
  }
  func.func @transform_4(%arg0: i32, %arg1: i32) -> (i32, i32) {
    %c0_i32 = arith.constant 0 : i32
    %c0_i32_0 = arith.constant 0 : i32
    %c0_i32_1 = arith.constant 0 : i32
    return %c0_i32, %c0_i32_0 : i32, i32
  }
  func.func @transform_5(%arg0: i32, %arg1: i32) -> (i32, i32) {
    %c0_i32 = arith.constant 0 : i32
    return %arg0, %arg1 : i32, i32
  }
}

module attributes {stable_mosaic.version = 11 : i64} {
  func.func @_attn_kernel(%arg0: i32, %arg1: i32, %arg2: memref<1x1x80x96xbf16, #tpu.memory_space<vmem>>, %arg3: memref<1x1x80x32xbf16, #tpu.memory_space<vmem>>) attributes {dimension_semantics = [#tpu.dimension_semantics<parallel>, #tpu.dimension_semantics<parallel>], iteration_bounds = array<i64: 2, 4>, scalar_prefetch = 0 : i64, scratch_operands = 0 : i64, tpu.core_type = #tpu.core_type<tc>, window_params = [{transform_indices = @transform_0, window_bounds = array<i64: 1, 1, 80, 96>}, {transform_indices = @transform_1, window_bounds = array<i64: 1, 1, 80, 32>}]} {
    %c0 = arith.constant 0 : index
    %c0_0 = arith.constant 0 : index
    %c0_1 = arith.constant 0 : index
    %c0_2 = arith.constant 0 : index
    %0 = vector.load %arg2[%c0, %c0_0, %c0_1, %c0_2] : memref<1x1x80x96xbf16, #tpu.memory_space<vmem>>, vector<1x1x80x96xbf16>
    %1 = vector.shape_cast %0 : vector<1x1x80x96xbf16> to vector<80x96xbf16>
    %2 = vector.extract_strided_slice %1 {offsets = [0, 0], sizes = [80, 32], strides = [1, 1]} : vector<80x96xbf16> to vector<80x32xbf16>
    %3 = vector.extract_strided_slice %1 {offsets = [0, 32], sizes = [80, 32], strides = [1, 1]} : vector<80x96xbf16> to vector<80x32xbf16>
    %4 = vector.extract_strided_slice %1 {offsets = [0, 64], sizes = [80, 32], strides = [1, 1]} : vector<80x96xbf16> to vector<80x32xbf16>
    %cst = arith.constant dense<0.000000e+00> : vector<80x80xf32>
    %5 = tpu.matmul %2, %3, %cst {dimension_numbers = #tpu.dot_dimension_numbers<[1], [1], [0], [0], [0, 0, 1, 0], [], []>} : vector<80x32xbf16>, vector<80x32xbf16>, vector<80x80xf32> -> vector<80x80xf32>
    %6 = tpu.iota {dimensions = array<i32: 1>} : vector<80x80xi32>
    %c65_i32 = arith.constant 65 : i32
    %7 = vector.broadcast %c65_i32 : i32 to vector<80x80xi32>
    %8 = arith.cmpi slt, %6, %7 : vector<80x80xi32>
    %cst_3 = arith.constant -1.000000e+30 : f32
    %9 = vector.broadcast %cst_3 : f32 to vector<80x80xf32>
    %10 = arith.select %8, %5, %9 : vector<80x80xi1>, vector<80x80xf32>
    %cst_4 = arith.constant dense<0xFF800000> : vector<80xf32>
    %11 = vector.multi_reduction <maximumf>, %10, %cst_4 [1] : vector<80x80xf32> to vector<80xf32>
    %12 = vector.shape_cast %11 : vector<80xf32> to vector<80x1xf32>
    %13 = vector.broadcast %12 : vector<80x1xf32> to vector<80x80xf32>
    %14 = arith.subf %10, %13 : vector<80x80xf32>
    %15 = math.exp %14 : vector<80x80xf32>
    %cst_5 = arith.constant dense<0.000000e+00> : vector<80xf32>
    %16 = vector.multi_reduction <add>, %15, %cst_5 [1] : vector<80x80xf32> to vector<80xf32>
    %17 = vector.shape_cast %16 : vector<80xf32> to vector<80x1xf32>
    %18 = tpu.reciprocal %17 {approx = true} : vector<80x1xf32> -> vector<80x1xf32>
    %19 = vector.broadcast %18 : vector<80x1xf32> to vector<80x80xf32>
    %20 = arith.mulf %15, %19 : vector<80x80xf32>
    %21 = arith.truncf %20 : vector<80x80xf32> to vector<80x80xbf16>
    %cst_6 = arith.constant dense<0.000000e+00> : vector<80x32xf32>
    %22 = tpu.matmul %21, %4, %cst_6 {dimension_numbers = #tpu.dot_dimension_numbers<[1], [0], [0], [1], [0, 0, 1, 1], [], []>} : vector<80x80xbf16>, vector<80x32xbf16>, vector<80x32xf32> -> vector<80x32xf32>
    %23 = arith.truncf %22 : vector<80x32xf32> to vector<80x32xbf16>
    %c0_7 = arith.constant 0 : index
    %c0_8 = arith.constant 0 : index
    %c0_9 = arith.constant 0 : index
    %c0_10 = arith.constant 0 : index
    %24 = vector.load %arg3[%c0_7, %c0_8, %c0_9, %c0_10] : memref<1x1x80x32xbf16, #tpu.memory_space<vmem>>, vector<1x1x80x32xbf16>
    %25 = vector.shape_cast %24 : vector<1x1x80x32xbf16> to vector<80x32xbf16>
    %26 = vector.shape_cast %23 : vector<80x32xbf16> to vector<1x1x80x32xbf16>
    tpu.vector_store %arg3[%c0_7, %c0_8, %c0_9, %c0_10], %26 {strides = array<i32>} : memref<1x1x80x32xbf16, #tpu.memory_space<vmem>>, vector<1x1x80x32xbf16>,
    return
  }
  func.func @transform_0(%arg0: i32, %arg1: i32) -> (i32, i32, i32, i32) {
    %c0_i32 = arith.constant 0 : i32
    %c0_i32_0 = arith.constant 0 : i32
    %c0_i32_1 = arith.constant 0 : i32
    return %arg0, %arg1, %c0_i32, %c0_i32_0 : i32, i32, i32, i32
  }
  func.func @transform_1(%arg0: i32, %arg1: i32) -> (i32, i32, i32, i32) {
    %c0_i32 = arith.constant 0 : i32
    %c0_i32_0 = arith.constant 0 : i32
    %c0_i32_1 = arith.constant 0 : i32
    return %arg0, %arg1, %c0_i32, %c0_i32_0 : i32, i32, i32, i32
  }
}

module attributes {stable_mosaic.version = 11 : i64} {
  func.func @_linear_nk1_kernel(%arg0: i32, %arg1: i32, %arg2: memref<160x128xbf16, #tpu.memory_space<vmem>>, %arg3: memref<128x128xbf16, #tpu.memory_space<vmem>>, %arg4: memref<1x128xf32, #tpu.memory_space<vmem>>, %arg5: memref<160x128xf32, #tpu.memory_space<vmem>>, %arg6: memref<160x128xf32, #tpu.memory_space<vmem>>) attributes {dimension_semantics = [#tpu.dimension_semantics<parallel>, #tpu.dimension_semantics<parallel>], iteration_bounds = array<i64: 1, 1>, scalar_prefetch = 0 : i64, scratch_operands = 0 : i64, tpu.core_type = #tpu.core_type<tc>, window_params = [{transform_indices = @transform_0, window_bounds = array<i64: 160, 128>}, {transform_indices = @transform_1, window_bounds = array<i64: 128, 128>}, {transform_indices = @transform_2, window_bounds = array<i64: 1, 128>}, {transform_indices = @transform_3, window_bounds = array<i64: 160, 128>}, {transform_indices = @transform_4, window_bounds = array<i64: 160, 128>}]} {
    %c0 = arith.constant 0 : index
    %c0_0 = arith.constant 0 : index
    %0 = vector.load %arg2[%c0, %c0_0] : memref<160x128xbf16, #tpu.memory_space<vmem>>, vector<160x128xbf16>
    %c0_1 = arith.constant 0 : index
    %c0_2 = arith.constant 0 : index
    %1 = vector.load %arg3[%c0_1, %c0_2] : memref<128x128xbf16, #tpu.memory_space<vmem>>, vector<128x128xbf16>
    %cst = arith.constant dense<0.000000e+00> : vector<160x128xf32>
    %2 = tpu.matmul %0, %1, %cst {dimension_numbers = #tpu.dot_dimension_numbers<[1], [0], [0], [1], [0, 0, 1, 1], [], []>} : vector<160x128xbf16>, vector<128x128xbf16>, vector<160x128xf32> -> vector<160x128xf32>
    %c0_3 = arith.constant 0 : index
    %c0_4 = arith.constant 0 : index
    %3 = vector.load %arg4[%c0_3, %c0_4] : memref<1x128xf32, #tpu.memory_space<vmem>>, vector<1x128xf32>
    %4 = vector.broadcast %3 : vector<1x128xf32> to vector<160x128xf32>
    %5 = arith.addf %2, %4 : vector<160x128xf32>
    %c0_5 = arith.constant 0 : index
    %c0_6 = arith.constant 0 : index
    %6 = vector.load %arg5[%c0_5, %c0_6] : memref<160x128xf32, #tpu.memory_space<vmem>>, vector<160x128xf32>
    %7 = arith.addf %5, %6 : vector<160x128xf32>
    %c0_7 = arith.constant 0 : index
    %c0_8 = arith.constant 0 : index
    %8 = vector.load %arg6[%c0_7, %c0_8] : memref<160x128xf32, #tpu.memory_space<vmem>>, vector<160x128xf32>
    tpu.vector_store %arg6[%c0_7, %c0_8], %7 {strides = array<i32>} : memref<160x128xf32, #tpu.memory_space<vmem>>, vector<160x128xf32>,
    return
  }
  func.func @transform_0(%arg0: i32, %arg1: i32) -> (i32, i32) {
    %c0_i32 = arith.constant 0 : i32
    %c0_i32_0 = arith.constant 0 : i32
    return %arg0, %c0_i32 : i32, i32
  }
  func.func @transform_1(%arg0: i32, %arg1: i32) -> (i32, i32) {
    %c0_i32 = arith.constant 0 : i32
    %c0_i32_0 = arith.constant 0 : i32
    return %c0_i32, %arg1 : i32, i32
  }
  func.func @transform_2(%arg0: i32, %arg1: i32) -> (i32, i32) {
    %c0_i32 = arith.constant 0 : i32
    %c0_i32_0 = arith.constant 0 : i32
    return %c0_i32, %arg1 : i32, i32
  }
  func.func @transform_3(%arg0: i32, %arg1: i32) -> (i32, i32) {
    %c0_i32 = arith.constant 0 : i32
    return %arg0, %arg1 : i32, i32
  }
  func.func @transform_4(%arg0: i32, %arg1: i32) -> (i32, i32) {
    %c0_i32 = arith.constant 0 : i32
    return %arg0, %arg1 : i32, i32
  }
}

module attributes {stable_mosaic.version = 11 : i64} {
  func.func @_linear_nk1_kernel(%arg0: i32, %arg1: i32, %arg2: memref<160x128xf32, #tpu.memory_space<vmem>>, %arg3: memref<128x512xbf16, #tpu.memory_space<vmem>>, %arg4: memref<1x512xf32, #tpu.memory_space<vmem>>, %arg5: memref<1x128xf32, #tpu.memory_space<vmem>>, %arg6: memref<1x128xf32, #tpu.memory_space<vmem>>, %arg7: memref<160x512xbf16, #tpu.memory_space<vmem>>) attributes {dimension_semantics = [#tpu.dimension_semantics<parallel>, #tpu.dimension_semantics<parallel>], iteration_bounds = array<i64: 1, 1>, scalar_prefetch = 0 : i64, scratch_operands = 0 : i64, tpu.core_type = #tpu.core_type<tc>, window_params = [{transform_indices = @transform_0, window_bounds = array<i64: 160, 128>}, {transform_indices = @transform_1, window_bounds = array<i64: 128, 512>}, {transform_indices = @transform_2, window_bounds = array<i64: 1, 512>}, {pipeline_mode = #tpu.pipeline_mode<synchronous>, transform_indices = @transform_3, window_bounds = array<i64: 1, 128>}, {pipeline_mode = #tpu.pipeline_mode<synchronous>, transform_indices = @transform_4, window_bounds = array<i64: 1, 128>}, {transform_indices = @transform_5, window_bounds = array<i64: 160, 512>}]} {
    %c0 = arith.constant 0 : index
    %c0_0 = arith.constant 0 : index
    %0 = vector.load %arg2[%c0, %c0_0] : memref<160x128xf32, #tpu.memory_space<vmem>>, vector<160x128xf32>
    %cst = arith.constant dense<0.000000e+00> : vector<160xf32>
    %1 = vector.multi_reduction <add>, %0, %cst [1] : vector<160x128xf32> to vector<160xf32>
    %2 = vector.shape_cast %1 : vector<160xf32> to vector<160x1xf32>
    %cst_1 = arith.constant 7.812500e-03 : f32
    %3 = vector.broadcast %cst_1 : f32 to vector<160x1xf32>
    %4 = arith.mulf %2, %3 : vector<160x1xf32>
    %5 = arith.mulf %0, %0 : vector<160x128xf32>
    %cst_2 = arith.constant dense<0.000000e+00> : vector<160xf32>
    %6 = vector.multi_reduction <add>, %5, %cst_2 [1] : vector<160x128xf32> to vector<160xf32>
    %7 = vector.shape_cast %6 : vector<160xf32> to vector<160x1xf32>
    %cst_3 = arith.constant 7.812500e-03 : f32
    %8 = vector.broadcast %cst_3 : f32 to vector<160x1xf32>
    %9 = arith.mulf %7, %8 : vector<160x1xf32>
    %10 = arith.mulf %4, %4 : vector<160x1xf32>
    %11 = arith.subf %9, %10 : vector<160x1xf32>
    %12 = vector.broadcast %4 : vector<160x1xf32> to vector<160x128xf32>
    %13 = arith.subf %0, %12 : vector<160x128xf32>
    %cst_4 = arith.constant 9.99999974E-6 : f32
    %14 = vector.broadcast %cst_4 : f32 to vector<160x1xf32>
    %15 = arith.addf %11, %14 : vector<160x1xf32>
    %16 = math.rsqrt %15 : vector<160x1xf32>
    %17 = vector.broadcast %16 : vector<160x1xf32> to vector<160x128xf32>
    %18 = arith.mulf %13, %17 : vector<160x128xf32>
    %c0_5 = arith.constant 0 : index
    %c0_6 = arith.constant 0 : index
    %19 = vector.load %arg5[%c0_5, %c0_6] : memref<1x128xf32, #tpu.memory_space<vmem>>, vector<1x128xf32>
    %20 = vector.broadcast %19 : vector<1x128xf32> to vector<160x128xf32>
    %21 = arith.mulf %18, %20 : vector<160x128xf32>
    %c0_7 = arith.constant 0 : index
    %c0_8 = arith.constant 0 : index
    %22 = vector.load %arg6[%c0_7, %c0_8] : memref<1x128xf32, #tpu.memory_space<vmem>>, vector<1x128xf32>
    %23 = vector.broadcast %22 : vector<1x128xf32> to vector<160x128xf32>
    %24 = arith.addf %21, %23 : vector<160x128xf32>
    %25 = arith.truncf %24 : vector<160x128xf32> to vector<160x128xbf16>
    %c0_9 = arith.constant 0 : index
    %c0_10 = arith.constant 0 : index
    %26 = vector.load %arg3[%c0_9, %c0_10] : memref<128x512xbf16, #tpu.memory_space<vmem>>, vector<128x512xbf16>
    %cst_11 = arith.constant dense<0.000000e+00> : vector<160x512xf32>
    %27 = tpu.matmul %25, %26, %cst_11 {dimension_numbers = #tpu.dot_dimension_numbers<[1], [0], [0], [1], [0, 0, 1, 1], [], []>} : vector<160x128xbf16>, vector<128x512xbf16>, vector<160x512xf32> -> vector<160x512xf32>
    %c0_12 = arith.constant 0 : index
    %c0_13 = arith.constant 0 : index
    %28 = vector.load %arg4[%c0_12, %c0_13] : memref<1x512xf32, #tpu.memory_space<vmem>>, vector<1x512xf32>
    %29 = vector.broadcast %28 : vector<1x512xf32> to vector<160x512xf32>
    %30 = arith.addf %27, %29 : vector<160x512xf32>
    %cst_14 = arith.constant 5.000000e-01 : f32
    %31 = vector.broadcast %cst_14 : f32 to vector<160x512xf32>
    %32 = arith.mulf %31, %30 : vector<160x512xf32>
    %cst_15 = arith.constant 4.471500e-02 : f32
    %33 = vector.broadcast %cst_15 : f32 to vector<160x512xf32>
    %34 = arith.mulf %33, %30 : vector<160x512xf32>
    %35 = arith.mulf %34, %30 : vector<160x512xf32>
    %36 = arith.mulf %35, %30 : vector<160x512xf32>
    %37 = arith.addf %30, %36 : vector<160x512xf32>
    %cst_16 = arith.constant 0.797884583 : f32
    %38 = vector.broadcast %cst_16 : f32 to vector<160x512xf32>
    %39 = arith.mulf %38, %37 : vector<160x512xf32>
    %40 = math.tanh %39 : vector<160x512xf32>
    %cst_17 = arith.constant 1.000000e+00 : f32
    %41 = vector.broadcast %cst_17 : f32 to vector<160x512xf32>
    %42 = arith.addf %41, %40 : vector<160x512xf32>
    %43 = arith.mulf %32, %42 : vector<160x512xf32>
    %44 = arith.truncf %43 : vector<160x512xf32> to vector<160x512xbf16>
    %c0_18 = arith.constant 0 : index
    %c0_19 = arith.constant 0 : index
    %45 = vector.load %arg7[%c0_18, %c0_19] : memref<160x512xbf16, #tpu.memory_space<vmem>>, vector<160x512xbf16>
    tpu.vector_store %arg7[%c0_18, %c0_19], %44 {strides = array<i32>} : memref<160x512xbf16, #tpu.memory_space<vmem>>, vector<160x512xbf16>,
    return
  }
  func.func @transform_0(%arg0: i32, %arg1: i32) -> (i32, i32) {
    %c0_i32 = arith.constant 0 : i32
    %c0_i32_0 = arith.constant 0 : i32
    return %arg0, %c0_i32 : i32, i32
  }
  func.func @transform_1(%arg0: i32, %arg1: i32) -> (i32, i32) {
    %c0_i32 = arith.constant 0 : i32
    %c0_i32_0 = arith.constant 0 : i32
    return %c0_i32, %arg1 : i32, i32
  }
  func.func @transform_2(%arg0: i32, %arg1: i32) -> (i32, i32) {
    %c0_i32 = arith.constant 0 : i32
    %c0_i32_0 = arith.constant 0 : i32
    return %c0_i32, %arg1 : i32, i32
  }
  func.func @transform_3(%arg0: i32, %arg1: i32) -> (i32, i32) {
    %c0_i32 = arith.constant 0 : i32
    %c0_i32_0 = arith.constant 0 : i32
    %c0_i32_1 = arith.constant 0 : i32
    return %c0_i32, %c0_i32_0 : i32, i32
  }
  func.func @transform_4(%arg0: i32, %arg1: i32) -> (i32, i32) {
    %c0_i32 = arith.constant 0 : i32
    %c0_i32_0 = arith.constant 0 : i32
    %c0_i32_1 = arith.constant 0 : i32
    return %c0_i32, %c0_i32_0 : i32, i32
  }
  func.func @transform_5(%arg0: i32, %arg1: i32) -> (i32, i32) {
    %c0_i32 = arith.constant 0 : i32
    return %arg0, %arg1 : i32, i32
  }
}

module attributes {stable_mosaic.version = 11 : i64} {
  func.func @_linear_nk1_kernel(%arg0: i32, %arg1: i32, %arg2: memref<160x512xbf16, #tpu.memory_space<vmem>>, %arg3: memref<512x128xbf16, #tpu.memory_space<vmem>>, %arg4: memref<1x128xf32, #tpu.memory_space<vmem>>, %arg5: memref<160x128xf32, #tpu.memory_space<vmem>>, %arg6: memref<160x128xf32, #tpu.memory_space<vmem>>) attributes {dimension_semantics = [#tpu.dimension_semantics<parallel>, #tpu.dimension_semantics<parallel>], iteration_bounds = array<i64: 1, 1>, scalar_prefetch = 0 : i64, scratch_operands = 0 : i64, tpu.core_type = #tpu.core_type<tc>, window_params = [{transform_indices = @transform_0, window_bounds = array<i64: 160, 512>}, {transform_indices = @transform_1, window_bounds = array<i64: 512, 128>}, {transform_indices = @transform_2, window_bounds = array<i64: 1, 128>}, {transform_indices = @transform_3, window_bounds = array<i64: 160, 128>}, {transform_indices = @transform_4, window_bounds = array<i64: 160, 128>}]} {
    %c0 = arith.constant 0 : index
    %c0_0 = arith.constant 0 : index
    %0 = vector.load %arg2[%c0, %c0_0] : memref<160x512xbf16, #tpu.memory_space<vmem>>, vector<160x512xbf16>
    %c0_1 = arith.constant 0 : index
    %c0_2 = arith.constant 0 : index
    %1 = vector.load %arg3[%c0_1, %c0_2] : memref<512x128xbf16, #tpu.memory_space<vmem>>, vector<512x128xbf16>
    %cst = arith.constant dense<0.000000e+00> : vector<160x128xf32>
    %2 = tpu.matmul %0, %1, %cst {dimension_numbers = #tpu.dot_dimension_numbers<[1], [0], [0], [1], [0, 0, 1, 1], [], []>} : vector<160x512xbf16>, vector<512x128xbf16>, vector<160x128xf32> -> vector<160x128xf32>
    %c0_3 = arith.constant 0 : index
    %c0_4 = arith.constant 0 : index
    %3 = vector.load %arg4[%c0_3, %c0_4] : memref<1x128xf32, #tpu.memory_space<vmem>>, vector<1x128xf32>
    %4 = vector.broadcast %3 : vector<1x128xf32> to vector<160x128xf32>
    %5 = arith.addf %2, %4 : vector<160x128xf32>
    %c0_5 = arith.constant 0 : index
    %c0_6 = arith.constant 0 : index
    %6 = vector.load %arg5[%c0_5, %c0_6] : memref<160x128xf32, #tpu.memory_space<vmem>>, vector<160x128xf32>
    %7 = arith.addf %5, %6 : vector<160x128xf32>
    %c0_7 = arith.constant 0 : index
    %c0_8 = arith.constant 0 : index
    %8 = vector.load %arg6[%c0_7, %c0_8] : memref<160x128xf32, #tpu.memory_space<vmem>>, vector<160x128xf32>
    tpu.vector_store %arg6[%c0_7, %c0_8], %7 {strides = array<i32>} : memref<160x128xf32, #tpu.memory_space<vmem>>, vector<160x128xf32>,
    return
  }
  func.func @transform_0(%arg0: i32, %arg1: i32) -> (i32, i32) {
    %c0_i32 = arith.constant 0 : i32
    %c0_i32_0 = arith.constant 0 : i32
    return %arg0, %c0_i32 : i32, i32
  }
  func.func @transform_1(%arg0: i32, %arg1: i32) -> (i32, i32) {
    %c0_i32 = arith.constant 0 : i32
    %c0_i32_0 = arith.constant 0 : i32
    return %c0_i32, %arg1 : i32, i32
  }
  func.func @transform_2(%arg0: i32, %arg1: i32) -> (i32, i32) {
    %c0_i32 = arith.constant 0 : i32
    %c0_i32_0 = arith.constant 0 : i32
    return %c0_i32, %arg1 : i32, i32
  }
  func.func @transform_3(%arg0: i32, %arg1: i32) -> (i32, i32) {
    %c0_i32 = arith.constant 0 : i32
    return %arg0, %arg1 : i32, i32
  }
  func.func @transform_4(%arg0: i32, %arg1: i32) -> (i32, i32) {
    %c0_i32 = arith.constant 0 : i32
    return %arg0, %arg1 : i32, i32
  }
}

module attributes {stable_mosaic.version = 11 : i64} {
  func.func @_linear_nk1_kernel(%arg0: i32, %arg1: i32, %arg2: memref<160x256xf32, #tpu.memory_space<vmem>>, %arg3: memref<256x128xbf16, #tpu.memory_space<vmem>>, %arg4: memref<1x128xf32, #tpu.memory_space<vmem>>, %arg5: memref<160x128xf32, #tpu.memory_space<vmem>>) attributes {dimension_semantics = [#tpu.dimension_semantics<parallel>, #tpu.dimension_semantics<parallel>], iteration_bounds = array<i64: 1, 1>, scalar_prefetch = 0 : i64, scratch_operands = 0 : i64, tpu.core_type = #tpu.core_type<tc>, window_params = [{transform_indices = @transform_0, window_bounds = array<i64: 160, 256>}, {transform_indices = @transform_1, window_bounds = array<i64: 256, 128>}, {transform_indices = @transform_2, window_bounds = array<i64: 1, 128>}, {transform_indices = @transform_3, window_bounds = array<i64: 160, 128>}]} {
    %c0 = arith.constant 0 : index
    %c0_0 = arith.constant 0 : index
    %0 = vector.load %arg2[%c0, %c0_0] : memref<160x256xf32, #tpu.memory_space<vmem>>, vector<160x256xf32>
    %1 = arith.truncf %0 : vector<160x256xf32> to vector<160x256xbf16>
    %c0_1 = arith.constant 0 : index
    %c0_2 = arith.constant 0 : index
    %2 = vector.load %arg3[%c0_1, %c0_2] : memref<256x128xbf16, #tpu.memory_space<vmem>>, vector<256x128xbf16>
    %cst = arith.constant dense<0.000000e+00> : vector<160x128xf32>
    %3 = tpu.matmul %1, %2, %cst {dimension_numbers = #tpu.dot_dimension_numbers<[1], [0], [0], [1], [0, 0, 1, 1], [], []>} : vector<160x256xbf16>, vector<256x128xbf16>, vector<160x128xf32> -> vector<160x128xf32>
    %c0_3 = arith.constant 0 : index
    %c0_4 = arith.constant 0 : index
    %4 = vector.load %arg4[%c0_3, %c0_4] : memref<1x128xf32, #tpu.memory_space<vmem>>, vector<1x128xf32>
    %5 = vector.broadcast %4 : vector<1x128xf32> to vector<160x128xf32>
    %6 = arith.addf %3, %5 : vector<160x128xf32>
    %c0_5 = arith.constant 0 : index
    %c0_6 = arith.constant 0 : index
    %7 = vector.load %arg5[%c0_5, %c0_6] : memref<160x128xf32, #tpu.memory_space<vmem>>, vector<160x128xf32>
    tpu.vector_store %arg5[%c0_5, %c0_6], %6 {strides = array<i32>} : memref<160x128xf32, #tpu.memory_space<vmem>>, vector<160x128xf32>,
    return
  }
  func.func @transform_0(%arg0: i32, %arg1: i32) -> (i32, i32) {
    %c0_i32 = arith.constant 0 : i32
    %c0_i32_0 = arith.constant 0 : i32
    return %arg0, %c0_i32 : i32, i32
  }
  func.func @transform_1(%arg0: i32, %arg1: i32) -> (i32, i32) {
    %c0_i32 = arith.constant 0 : i32
    %c0_i32_0 = arith.constant 0 : i32
    return %c0_i32, %arg1 : i32, i32
  }
  func.func @transform_2(%arg0: i32, %arg1: i32) -> (i32, i32) {
    %c0_i32 = arith.constant 0 : i32
    %c0_i32_0 = arith.constant 0 : i32
    return %c0_i32, %arg1 : i32, i32
  }
  func.func @transform_3(%arg0: i32, %arg1: i32) -> (i32, i32) {
    %c0_i32 = arith.constant 0 : i32
    return %arg0, %arg1 : i32, i32
  }
}

module attributes {stable_mosaic.version = 11 : i64} {
  func.func @_linear_nk1_kernel(%arg0: i32, %arg1: i32, %arg2: memref<160x128xf32, #tpu.memory_space<vmem>>, %arg3: memref<128x128xbf16, #tpu.memory_space<vmem>>, %arg4: memref<1x128xf32, #tpu.memory_space<vmem>>, %arg5: memref<1x128xf32, #tpu.memory_space<vmem>>, %arg6: memref<1x128xf32, #tpu.memory_space<vmem>>, %arg7: memref<160x128xf32, #tpu.memory_space<vmem>>) attributes {dimension_semantics = [#tpu.dimension_semantics<parallel>, #tpu.dimension_semantics<parallel>], iteration_bounds = array<i64: 1, 1>, scalar_prefetch = 0 : i64, scratch_operands = 0 : i64, tpu.core_type = #tpu.core_type<tc>, window_params = [{transform_indices = @transform_0, window_bounds = array<i64: 160, 128>}, {transform_indices = @transform_1, window_bounds = array<i64: 128, 128>}, {transform_indices = @transform_2, window_bounds = array<i64: 1, 128>}, {pipeline_mode = #tpu.pipeline_mode<synchronous>, transform_indices = @transform_3, window_bounds = array<i64: 1, 128>}, {pipeline_mode = #tpu.pipeline_mode<synchronous>, transform_indices = @transform_4, window_bounds = array<i64: 1, 128>}, {transform_indices = @transform_5, window_bounds = array<i64: 160, 128>}]} {
    %c0 = arith.constant 0 : index
    %c0_0 = arith.constant 0 : index
    %0 = vector.load %arg2[%c0, %c0_0] : memref<160x128xf32, #tpu.memory_space<vmem>>, vector<160x128xf32>
    %cst = arith.constant dense<0.000000e+00> : vector<160xf32>
    %1 = vector.multi_reduction <add>, %0, %cst [1] : vector<160x128xf32> to vector<160xf32>
    %2 = vector.shape_cast %1 : vector<160xf32> to vector<160x1xf32>
    %cst_1 = arith.constant 7.812500e-03 : f32
    %3 = vector.broadcast %cst_1 : f32 to vector<160x1xf32>
    %4 = arith.mulf %2, %3 : vector<160x1xf32>
    %5 = arith.mulf %0, %0 : vector<160x128xf32>
    %cst_2 = arith.constant dense<0.000000e+00> : vector<160xf32>
    %6 = vector.multi_reduction <add>, %5, %cst_2 [1] : vector<160x128xf32> to vector<160xf32>
    %7 = vector.shape_cast %6 : vector<160xf32> to vector<160x1xf32>
    %cst_3 = arith.constant 7.812500e-03 : f32
    %8 = vector.broadcast %cst_3 : f32 to vector<160x1xf32>
    %9 = arith.mulf %7, %8 : vector<160x1xf32>
    %10 = arith.mulf %4, %4 : vector<160x1xf32>
    %11 = arith.subf %9, %10 : vector<160x1xf32>
    %12 = vector.broadcast %4 : vector<160x1xf32> to vector<160x128xf32>
    %13 = arith.subf %0, %12 : vector<160x128xf32>
    %cst_4 = arith.constant 9.99999974E-6 : f32
    %14 = vector.broadcast %cst_4 : f32 to vector<160x1xf32>
    %15 = arith.addf %11, %14 : vector<160x1xf32>
    %16 = math.rsqrt %15 : vector<160x1xf32>
    %17 = vector.broadcast %16 : vector<160x1xf32> to vector<160x128xf32>
    %18 = arith.mulf %13, %17 : vector<160x128xf32>
    %c0_5 = arith.constant 0 : index
    %c0_6 = arith.constant 0 : index
    %19 = vector.load %arg5[%c0_5, %c0_6] : memref<1x128xf32, #tpu.memory_space<vmem>>, vector<1x128xf32>
    %20 = vector.broadcast %19 : vector<1x128xf32> to vector<160x128xf32>
    %21 = arith.mulf %18, %20 : vector<160x128xf32>
    %c0_7 = arith.constant 0 : index
    %c0_8 = arith.constant 0 : index
    %22 = vector.load %arg6[%c0_7, %c0_8] : memref<1x128xf32, #tpu.memory_space<vmem>>, vector<1x128xf32>
    %23 = vector.broadcast %22 : vector<1x128xf32> to vector<160x128xf32>
    %24 = arith.addf %21, %23 : vector<160x128xf32>
    %25 = arith.truncf %24 : vector<160x128xf32> to vector<160x128xbf16>
    %c0_9 = arith.constant 0 : index
    %c0_10 = arith.constant 0 : index
    %26 = vector.load %arg3[%c0_9, %c0_10] : memref<128x128xbf16, #tpu.memory_space<vmem>>, vector<128x128xbf16>
    %cst_11 = arith.constant dense<0.000000e+00> : vector<160x128xf32>
    %27 = tpu.matmul %25, %26, %cst_11 {dimension_numbers = #tpu.dot_dimension_numbers<[1], [0], [0], [1], [0, 0, 1, 1], [], []>} : vector<160x128xbf16>, vector<128x128xbf16>, vector<160x128xf32> -> vector<160x128xf32>
    %c0_12 = arith.constant 0 : index
    %c0_13 = arith.constant 0 : index
    %28 = vector.load %arg4[%c0_12, %c0_13] : memref<1x128xf32, #tpu.memory_space<vmem>>, vector<1x128xf32>
    %29 = vector.broadcast %28 : vector<1x128xf32> to vector<160x128xf32>
    %30 = arith.addf %27, %29 : vector<160x128xf32>
    %c0_14 = arith.constant 0 : index
    %c0_15 = arith.constant 0 : index
    %31 = vector.load %arg7[%c0_14, %c0_15] : memref<160x128xf32, #tpu.memory_space<vmem>>, vector<160x128xf32>
    tpu.vector_store %arg7[%c0_14, %c0_15], %30 {strides = array<i32>} : memref<160x128xf32, #tpu.memory_space<vmem>>, vector<160x128xf32>,
    return
  }
  func.func @transform_0(%arg0: i32, %arg1: i32) -> (i32, i32) {
    %c0_i32 = arith.constant 0 : i32
    %c0_i32_0 = arith.constant 0 : i32
    return %arg0, %c0_i32 : i32, i32
  }
  func.func @transform_1(%arg0: i32, %arg1: i32) -> (i32, i32) {
    %c0_i32 = arith.constant 0 : i32
    %c0_i32_0 = arith.constant 0 : i32
    return %c0_i32, %arg1 : i32, i32
  }
  func.func @transform_2(%arg0: i32, %arg1: i32) -> (i32, i32) {
    %c0_i32 = arith.constant 0 : i32
    %c0_i32_0 = arith.constant 0 : i32
    return %c0_i32, %arg1 : i32, i32
  }
  func.func @transform_3(%arg0: i32, %arg1: i32) -> (i32, i32) {
    %c0_i32 = arith.constant 0 : i32
    %c0_i32_0 = arith.constant 0 : i32
    %c0_i32_1 = arith.constant 0 : i32
    return %c0_i32, %c0_i32_0 : i32, i32
  }
  func.func @transform_4(%arg0: i32, %arg1: i32) -> (i32, i32) {
    %c0_i32 = arith.constant 0 : i32
    %c0_i32_0 = arith.constant 0 : i32
    %c0_i32_1 = arith.constant 0 : i32
    return %c0_i32, %c0_i32_0 : i32, i32
  }
  func.func @transform_5(%arg0: i32, %arg1: i32) -> (i32, i32) {
    %c0_i32 = arith.constant 0 : i32
    return %arg0, %arg1 : i32, i32
  }
}

</mosaic_0001>

<bundles_post_ra>
// kernel: uvit_forward.29
= control target key start
LH: loop header
LB: loop body
LE: loop exit
PB: predicated region body
PF: predicated region fallthrough
CT: control target
= control target key end

     0   :  { %s383_s1 = inlined_call_operand.vmem [shape: bf16[128,128], index: 1, kind: input, shape index: {}]   ;;  %s384_s2 = inlined_call_operand.vmem [shape: f32[1,128], index: 2, kind: input, shape index: {}]   ;;  %s385_s0 = inlined_call_operand.vmem [shape: f32[128,128], index: 0, kind: input, shape index: {}]   ;;  %s386_s3 = inlined_call_operand.vmem [shape: f32[128,128], index: 3, kind: output, shape index: {}]  }
   0x1   :  { %v214_v0 = vld [vmem:[%s383_s1 + $0x38] sm:$0xff]  ;;  %v213_v1 = vld [vmem:[%s383_s1 + $0x30] sm:$0xff]  ;;  %v212_v2 = vld [vmem:[%s383_s1 + $0x28] sm:$0xff] }
   0x2   :  { %106 = vmatpush.bf16.msra.mxu0 %v214_v0  ;;  %215 = vmatpush.bf16.msra.mxu1 %v214_v0  ;;  %v211_v3 = vld [vmem:[%s383_s1 + $0x20] sm:$0xff]  ;;  %v210_v4 = vld [vmem:[%s383_s1 + $0x18] sm:$0xff]  ;;  %v209_v5 = vld [vmem:[%s383_s1 + $0x10] sm:$0xff] }
   0x3   :  { %216 = vmatpush.bf16.msra.mxu2 %v214_v0  ;;  %217 = vmatpush.bf16.msra.mxu3 %v214_v0  ;;  %v208_v6 = vld [vmem:[%s383_s1 + $0x8] sm:$0xff]  ;;  %v207_v7 = vld [vmem:[%s383_s1] sm:$0xff]  ;;  %v16_v20 = vld [vmem:[%s385_s0 + $0x10] sm:$0xff] }
   0x4   :  { %v14_v8 = vld [vmem:[%s385_s0] sm:$0xff]  ;;  %v15_v9 = vld [vmem:[%s385_s0 + $0x8] sm:$0xff]  ;;  %v17_v21 = vld [vmem:[%s385_s0 + $0x18] sm:$0xff] }
   0x5   :  { %v18_v10 = vld [vmem:[%s385_s0 + $0x20] sm:$0xff]  ;;  %v19_v11 = vld [vmem:[%s385_s0 + $0x28] sm:$0xff]  ;;  %v30_v16 = vpack.c.bf16 %v15_v9, %v14_v8  ;;  %v20_v22 = vld [vmem:[%s385_s0 + $0x30] sm:$0xff]  ;;  %v31_v28 = vpack.c.bf16 %v17_v21, %v16_v20 }
   0x6   :  { %107 = vmatpush.bf16.msra.mxu0 %v213_v1  ;;  %218 = vmatpush.bf16.msra.mxu1 %v213_v1  ;;  %v22_v12 = vld [vmem:[%s385_s0 + $0x40] sm:$0xff]  ;;  %v23_v13 = vld [vmem:[%s385_s0 + $0x48] sm:$0xff]  ;;  %v32_v17 = vpack.c.bf16 %v19_v11, %v18_v10  ;;  %v21_v23 = vld [vmem:[%s385_s0 + $0x38] sm:$0xff] }
   0x7   :  { %219 = vmatpush.bf16.msra.mxu2 %v213_v1  ;;  %220 = vmatpush.bf16.msra.mxu3 %v213_v1  ;;  %v26_v14 = vld [vmem:[%s385_s0 + $0x60] sm:$0xff]  ;;  %v27_v15 = vld [vmem:[%s385_s0 + $0x68] sm:$0xff]  ;;  %v34_v18 = vpack.c.bf16 %v23_v13, %v22_v12  ;;  %v24_v24 = vld [vmem:[%s385_s0 + $0x50] sm:$0xff]  ;;  %v33_v29 = vpack.c.bf16 %v21_v23, %v20_v22 }
   0x8   :  { %v36_v19 = vpack.c.bf16 %v27_v15, %v26_v14  ;;  %v25_v25 = vld [vmem:[%s385_s0 + $0x58] sm:$0xff]  ;;  %v28_v26 = vld [vmem:[%s385_s0 + $0x70] sm:$0xff]  ;;  %v239_v32 = vld [vmem:[%s384_s2] ss:$0 sm:$0xff] }
   0x9   :  { %v29_v27 = vld [vmem:[%s385_s0 + $0x78] sm:$0xff]  ;;  %v35_v30 = vpack.c.bf16 %v25_v25, %v24_v24 }
   0xa   :  { %108 = vmatpush.bf16.msra.mxu0 %v212_v2  ;;  %221 = vmatpush.bf16.msra.mxu1 %v212_v2  ;;  %v37_v31 = vpack.c.bf16 %v29_v27, %v28_v26 }
   0xb   :  { %222 = vmatpush.bf16.msra.mxu2 %v212_v2  ;;  %223 = vmatpush.bf16.msra.mxu3 %v212_v2 }
   0xe   :  { %109 = vmatpush.bf16.msra.mxu0 %v211_v3  ;;  %224 = vmatpush.bf16.msra.mxu1 %v211_v3 }
   0xf   :  { %225 = vmatpush.bf16.msra.mxu2 %v211_v3  ;;  %226 = vmatpush.bf16.msra.mxu3 %v211_v3 }
  0x12   :  { %110 = vmatpush.bf16.msra.mxu0 %v210_v4  ;;  %227 = vmatpush.bf16.msra.mxu1 %v210_v4 }
  0x13   :  { %228 = vmatpush.bf16.msra.mxu2 %v210_v4  ;;  %229 = vmatpush.bf16.msra.mxu3 %v210_v4 }
  0x16   :  { %111 = vmatpush.bf16.msra.mxu0 %v209_v5  ;;  %230 = vmatpush.bf16.msra.mxu1 %v209_v5 }
  0x17   :  { %231 = vmatpush.bf16.msra.mxu2 %v209_v5  ;;  %232 = vmatpush.bf16.msra.mxu3 %v209_v5 }
  0x1a   :  { %112 = vmatpush.bf16.msra.mxu0 %v208_v6  ;;  %233 = vmatpush.bf16.msra.mxu1 %v208_v6 }
  0x1b   :  { %234 = vmatpush.bf16.msra.mxu2 %v208_v6  ;;  %235 = vmatpush.bf16.msra.mxu3 %v208_v6 }
  0x1e   :  { %113 = vmatpush.bf16.msra.mxu0 %v207_v7  ;;  %236 = vmatpush.bf16.msra.mxu1 %v207_v7 }
  0x1f   :  { %237 = vmatpush.bf16.msra.mxu2 %v207_v7  ;;  %238 = vmatpush.bf16.msra.mxu3 %v207_v7 }
  0x21   :  { %114 = vmatmul.bf16.vlgmr.msra.gmra.mxu0 %v30_v16  ;;  %124 = vmatmul.bf16.vlgmr.msra.gmra.mxu1 %v32_v17 }
  0x22   :  { %134 = vmatmul.bf16.vlgmr.msra.gmra.mxu2 %v34_v18  ;;  %144 = vmatmul.bf16.vlgmr.msra.gmra.mxu3 %v36_v19 }
  0x31   :  { %119 = vmatmul.bf16.gmra.mxu0 %v31_v28  ;;  %129 = vmatmul.bf16.gmra.mxu1 %v33_v29 }
  0x32   :  { %139 = vmatmul.bf16.gmra.mxu2 %v35_v30  ;;  %149 = vmatmul.bf16.gmra.mxu3 %v37_v31 }
  0x9e   :  { %v115_v33 = vpop.f32.mrf.mxu0  ;;  %v125_v34 = vpop.f32.mrf.mxu1 }
  0x9f   :  { %v116_v35 = vadd.f32 %v239_v32, %v115_v33  ;;  %v126_v36 = vadd.f32 %v239_v32, %v125_v34 }
  0xa1   :  { %155 = vst [vmem:[%s386_s3] sm:$0xff] %v116_v35 }
  0xa2   :  { %159 = vst [vmem:[%s386_s3 + $0x20] sm:$0xff] %v126_v36 }
  0xa5   :  { %v135_v37 = vpop.f32.mrf.mxu2  ;;  %v145_v38 = vpop.f32.mrf.mxu3 }
  0xa6   :  { %v136_v39 = vadd.f32 %v239_v32, %v135_v37  ;;  %v146_v40 = vadd.f32 %v239_v32, %v145_v38  ;;  %v117_v41 = vpop.f32.mrf.mxu0  ;;  %v127_v42 = vpop.f32.mrf.mxu1 }
  0xa7   :  { %v118_v43 = vadd.f32 %v239_v32, %v117_v41  ;;  %v128_v44 = vadd.f32 %v239_v32, %v127_v42 }
  0xa8   :  { %163 = vst [vmem:[%s386_s3 + $0x40] sm:$0xff] %v136_v39 }
  0xa9   :  { %167 = vst [vmem:[%s386_s3 + $0x60] sm:$0xff] %v146_v40 }
  0xaa   :  { %156 = vst [vmem:[%s386_s3 + $0x8] sm:$0xff] %v118_v43 }
  0xab   :  { %160 = vst [vmem:[%s386_s3 + $0x28] sm:$0xff] %v128_v44 }
  0xad   :  { %v137_v45 = vpop.f32.mrf.mxu2  ;;  %v147_v46 = vpop.f32.mrf.mxu3 }
  0xae   :  { %v138_v47 = vadd.f32 %v239_v32, %v137_v45  ;;  %v148_v48 = vadd.f32 %v239_v32, %v147_v46  ;;  %v120_v49 = vpop.f32.mrf.mxu0  ;;  %v130_v50 = vpop.f32.mrf.mxu1 }
  0xaf   :  { %v121_v51 = vadd.f32 %v239_v32, %v120_v49  ;;  %v131_v52 = vadd.f32 %v239_v32, %v130_v50 }
  0xb0   :  { %164 = vst [vmem:[%s386_s3 + $0x48] sm:$0xff] %v138_v47 }
  0xb1   :  { %168 = vst [vmem:[%s386_s3 + $0x68] sm:$0xff] %v148_v48 }
  0xb2   :  { %157 = vst [vmem:[%s386_s3 + $0x10] sm:$0xff] %v121_v51 }
  0xb3   :  { %161 = vst [vmem:[%s386_s3 + $0x30] sm:$0xff] %v131_v52 }
  0xb5   :  { %v140_v53 = vpop.f32.mrf.mxu2  ;;  %v150_v54 = vpop.f32.mrf.mxu3 }
  0xb6   :  { %v141_v55 = vadd.f32 %v239_v32, %v140_v53  ;;  %v151_v56 = vadd.f32 %v239_v32, %v150_v54  ;;  %v122_v57 = vpop.f32.mrf.mxu0  ;;  %v132_v58 = vpop.f32.mrf.mxu1 }
  0xb7   :  { %v123_v59 = vadd.f32 %v239_v32, %v122_v57  ;;  %v133_v60 = vadd.f32 %v239_v32, %v132_v58 }
  0xb8   :  { %165 = vst [vmem:[%s386_s3 + $0x50] sm:$0xff] %v141_v55 }
  0xb9   :  { %169 = vst [vmem:[%s386_s3 + $0x70] sm:$0xff] %v151_v56 }
  0xba   :  { %158 = vst [vmem:[%s386_s3 + $0x18] sm:$0xff] %v123_v59 }
  0xbb   :  { %162 = vst [vmem:[%s386_s3 + $0x38] sm:$0xff] %v133_v60 }
  0xbd   :  { %v142_v61 = vpop.f32.mrf.mxu2  ;;  %v152_v62 = vpop.f32.mrf.mxu3 }
  0xbe   :  { %v143_v63 = vadd.f32 %v239_v32, %v142_v61  ;;  %v153_v0 = vadd.f32 %v239_v32, %v152_v62 }
  0xc0   :  { %166 = vst [vmem:[%s386_s3 + $0x58] sm:$0xff] %v143_v63 }
  0xc1   :  { %170 = vst [vmem:[%s386_s3 + $0x78] sm:$0xff] %v153_v0 }

// kernel: uvit_forward.31
= control target key start
LH: loop header
LB: loop body
LE: loop exit
PB: predicated region body
PF: predicated region fallthrough
CT: control target
= control target key end

     0   :  { %s763_s6 = smov 0   ;;  %s765_s7 = smov 0   ;;  %s947_s0 = inlined_call_operand.vmem [shape: bf16[2,4,80,96], index: 0, kind: input, shape index: {}]   ;;  %s948_s1 = inlined_call_operand.vmem [shape: bf16[2,4,80,32], index: 1, kind: output, shape index: {}]  }
   0x1   :  { %s767_s8 = smov 0   ;;  %s769_s9 = smov 0  }
   0x2   :  { %s771_s10 = smov 0  }
   0x3 LB: > { %s20_s11 = sadd.s32 1, %s741_s8  ;;  %s23_s12 = sadd.s32 1, %s745_s9  ;;  %s749_s10 = sphi %s771_s10, %s11_s10   ;;  %s745_s9 = sphi %s769_s9, %s952_s9   ;;  %s741_s8 = sphi %s767_s8, %s951_s8   ;;  %s737_s7 = sphi %s765_s7, %s950_s7   ;;  %s733_s6 = sphi %s763_s6, %s949_s6  }
   0x4   : > { %p21_p0 = scmp.ge.s32.totalorder %s20_s11, 4  ;;  %p577_p1 = scmp.ge.s32.totalorder %s749_s10, 1 }
   0x5   : > { %p107_p2 = scmp.lt.s32.totalorder %s749_s10, 9 }
   0x6   : > { %s954_s11 = smov (%p21_p0, %s20_s11), 0  ;;  %s956_s12 = smov (!%p21_p0, %s23_s12), %s745_s9 }
   0x7   : > { %p108_p3 = pnand %p577_p1, %p107_p2  ;;  %p25_p4 = scmp.ge.s32.totalorder %s956_s12, 2 }
   0x8   : > { %p135_p5 = scmp.lt.s32.totalorder (!%p108_p3), %s737_s7, 1  ;;  %p137_p6 = scmp.lt.s32.totalorder (!%p108_p3), %s733_s6, 3 }
   0x9   : > { %s958_s12 = smov (%p25_p4, %s956_s12), 0  ;;  %111 = sbr.rel (%p108_p3) target bundleno = 827 (0x33b), region = 24 }
   0xa   : > { %s751_s20 = smov (!%p108_p3), 96   ;;  %s752_s21 = smov (!%p108_p3), 64  }
   0xe   : > { %s960_s7 = smov (!%p135_p5, %s737_s7), 1  ;;  %s962_s6 = smov (!%p137_p6, %s733_s6), 3  ;;  %vm199_vm0 = vcmask 261120   ;;  %v264_v15 = vlaneseq  ;;  %vm277_vm2 = vcmask 654336   ;;  %vm467_vm3 = vcmask 257024  }
   0xf   : > { %s628_s13 = smul.u32 40, %s960_s7 }
  0x10   : > { %s627_s14 = smul.u32 10, %s962_s6  ;;  %v265_v16 = vand.u32 127, %v264_v15 }
  0x12   : > { %s793_s15 = sadd.s32 %s628_s13, %s627_s14  ;;  %vm266_vm1 = vcmp.lt.s32.totalorder %v265_v16, 65 }
  0x13   : > { %s578_s16 = sshll.u32 %s793_s15, 2 }
  0x14   : > { %s143_s19 = scalar_lea.vmem %s947_s0, %s578_s16  ;;  %s910_s24 = scalar_lea.vmem %s948_s1, %s578_s16 }
  0x15   : > { %v616_v0 = vld [vmem:[%s143_s19 + $0x20] sm:$0xff]  ;;  %v801_v1 = vld [vmem:[%s143_s19 + $0x10] sm:$0xff]  ;;  %v615_v3 = vld [vmem:[%s143_s19 + $0x18] sm:$0xff] }
  0x16   : > { %v803_v2 = vld [vmem:[%s143_s19] sm:$0xff]  ;;  %197 = vrot.lane.b32.xlu0 %v616_v0, %s751_s20  ;;  %193 = vrot.lane.b32.xlu1 %v801_v1, %s751_s20  ;;  %v807_v4 = vld [vmem:[%s143_s19 + $0x8] sm:$0xff] }
  0x17   : > { %189 = vrot.lane.b32.xlu2 %v803_v2, %s751_s20 }
  0x1e   : > { %195 = vrot.lane.b32.xlu0 %v615_v3, %s751_s20  ;;  %191 = vrot.lane.b32.xlu1 %v807_v4, %s751_s20 }
  0x1f   : > { %399 = vrot.lane.b32.xlu2 %v615_v3, %s752_s21 }
  0x26   : > { %401 = vrot.lane.b32.xlu1 %v616_v0, %s752_s21 }
  0x71   : > { %v190_v13 = vpop.permute.xlu2 %189 }
  0x72   : > { %v216_v14 = vsel %vm199_vm0, %v190_v13, 0 }
  0x79   : > { %v400_v31 = vpop.permute.xlu2 %399 }
  0x88   : > { %v198_v5 = vpop.permute.xlu0 %197  ;;  %v194_v9 = vpop.permute.xlu1 %193 }
  0x89   : > { %v228_v6 = vsel %vm199_vm0, %v198_v5, 0  ;;  %v222_v10 = vsel %vm199_vm0, %v194_v9, 0 }
  0x8a   : > { %233 = vmatpush.bf16.xpose.msra.mxu0 %v228_v6  ;;  %617 = vmatpush.bf16.xpose.msra.mxu2 %v228_v6 }
  0x90   : > { %v196_v7 = vpop.permute.xlu0 %195  ;;  %v192_v11 = vpop.permute.xlu1 %191 }
  0x91   : > { %v225_v8 = vsel %vm199_vm0, %v196_v7, 0  ;;  %v219_v12 = vsel %vm199_vm0, %v192_v11, 0 }
  0x92   : > { %234 = vmatpush.bf16.xpose.msra.mxu0 %v225_v8  ;;  %618 = vmatpush.bf16.xpose.msra.mxu2 %v225_v8 }
  0x98   : > { %v402_v29 = vpop.permute.xlu1 %401 }
  0x99   : > { %426 = vmatpush.bf16.msra.mxu1 %v402_v29  ;;  %622 = vmatpush.bf16.msra.mxu3 %v402_v29 }
  0x9a   : > { %235 = vmatpush.bf16.xpose.msra.mxu0 %v222_v10  ;;  %619 = vmatpush.bf16.xpose.msra.mxu2 %v222_v10 }
  0x9d   : > { %427 = vmatpush.bf16.msra.mxu1 %v400_v31  ;;  %623 = vmatpush.bf16.msra.mxu3 %v400_v31 }
  0xa2   : > { %236 = vmatpush.bf16.xpose.msra.mxu0 %v219_v12  ;;  %620 = vmatpush.bf16.xpose.msra.mxu2 %v219_v12 }
  0xaa   : > { %237 = vmatpush.bf16.xpose.msra.mxu0 %v216_v14  ;;  %621 = vmatpush.bf16.xpose.msra.mxu2 %v216_v14 }
  0xb1   : > { %600 = vmatmul.msk.bf16.vlgmr.msra.gmra.mxu0 %vm199_vm0, %v803_v2  ;;  %602 = vmatmul.msk.bf16.vlgmr.msra.gmra.mxu2 %vm199_vm0, %v801_v1 }
  0xc1   : > { %601 = vmatmul.msk.bf16.gmra.mxu0 %vm199_vm0, %v807_v4  ;;  %603 = vmatmul.msk.bf16.gmra.mxu2 %vm199_vm0, %v615_v3 }
  0xd1   : > { %604 = vmatmul.msk.bf16.gmra.mxu2 %vm199_vm0, %v616_v0 }
 0x12e   : > { %v239_v17 = vpop.f32.mrf.mxu0 }
 0x12f   : > { %v826_v18 = vsel %vm266_vm1, %v239_v17, -1e+30 }
 0x130   : > { %v278_v19 = vsel %vm277_vm2, %v826_v18, -inf }
 0x131   : > { %279 = vmax.xlane.f32.xlu0 %v278_v19 }
 0x134   : > { %v249_v20 = vpop.f32.mrf.mxu2 }
 0x135   : > { %v271_v21 = vsel %vm266_vm1, %v249_v20, -1e+30 }
 0x136   : > { %v241_v22 = vpop.f32.mrf.mxu0  ;;  %v290_v23 = vsel %vm277_vm2, %v271_v21, -inf }
 0x137   : > { %v833_v24 = vsel %vm266_vm1, %v241_v22, -1e+30  ;;  %291 = vmax.xlane.f32.xlu1 %v290_v23 }
 0x138   : > { %v281_v48 = vsel %vm277_vm2, %v833_v24, -inf }
 0x13c   : > { %v251_v25 = vpop.f32.mrf.mxu2 }
 0x13d   : > { %v836_v26 = vsel %vm266_vm1, %v251_v25, -1e+30 }
 0x13e   : > { %v244_v27 = vpop.f32.mrf.mxu0  ;;  %v293_v28 = vsel %vm277_vm2, %v836_v26, -inf }
 0x13f   : > { %294 = vmax.xlane.f32.xlu2 %v293_v28  ;;  %v269_v30 = vsel %vm266_vm1, %v244_v27, -1e+30 }
 0x140   : > { %v284_v33 = vsel %vm277_vm2, %v269_v30, -inf }
 0x144   : > { %v254_v32 = vpop.f32.mrf.mxu2 }
 0x145   : > { %v273_v37 = vsel %vm266_vm1, %v254_v32, -1e+30 }
 0x146   : > { %v246_v34 = vpop.f32.mrf.mxu0  ;;  %v296_v39 = vsel %vm277_vm2, %v273_v37, -inf }
 0x147   : > { %v270_v35 = vsel %vm266_vm1, %v246_v34, -1e+30  ;;  %285 = vmax.xlane.f32.xlu2 %v284_v33 }
 0x148   : > { %v287_v36 = vsel %vm277_vm2, %v270_v35, -inf }
 0x149   : > { %288 = vmax.xlane.f32.xlu0 %v287_v36 }
 0x14c   : > { %v256_v38 = vpop.f32.mrf.mxu2 }
 0x14d   : > { %v274_v40 = vsel %vm266_vm1, %v256_v38, -1e+30 }
 0x14e   : > { %v299_v41 = vsel %vm277_vm2, %v274_v40, -inf }
 0x14f   : > { %297 = vmax.xlane.f32.xlu2 %v296_v39 }
 0x150   : > { %397 = vrot.lane.b32.xlu1 %v801_v1, %s752_s21 }
 0x151   : > { %300 = vmax.xlane.f32.xlu0 %v299_v41 }
 0x154   : > { %v259_v42 = vpop.f32.mrf.mxu2 }
 0x155   : > { %v275_v43 = vsel %vm266_vm1, %v259_v42, -1e+30 }
 0x156   : > { %v302_v44 = vsel %vm277_vm2, %v275_v43, -inf }
 0x157   : > { %303 = vmax.xlane.f32.xlu2 %v302_v44 }
 0x15c   : > { %v261_v45 = vpop.f32.mrf.mxu2 }
 0x15d   : > { %v276_v46 = vsel %vm266_vm1, %v261_v45, -1e+30 }
 0x15e   : > { %v305_v47 = vsel %vm277_vm2, %v276_v46, -inf }
 0x15f   : > { %306 = vmax.xlane.f32.xlu0 %v305_v47 }
 0x16f   : > { %395 = vrot.lane.b32.xlu2 %v807_v4, %s752_s21 }
 0x17a   : > { %282 = vmax.xlane.f32.xlu1 %v281_v48 }
 0x1a4   : > { %v280_v53 = vpop.xlane.xlu0 %279 }
 0x1a5   : > { %v308_v12 = vsub.f32 %v826_v18, %v280_v53 }
 0x1a7   : > { %v318_v16 = vmul.f32 1.442695, %v308_v12 }
 0x1aa   : > { %v292_v49 = vpop.xlane.xlu1 %291 }
 0x1ab   : > { %v312_v50 = vsub.f32 %v271_v21, %v292_v49 }
 0x1ad   : > { %v326_v51 = vmul.f32 1.442695, %v312_v50 }
 0x1af   : > { %671 = vpow2.f32 %v326_v51 }
 0x1b2   : > { %v858_v52 = vpop.xlane.xlu2 %294 }
 0x1b3   : > { %v313_v36 = vsub.f32 %v836_v26, %v858_v52 }
 0x1b5   : > { %v860_v54 = vpop.eup %671 }
 0x1b6   : > { %v350_v55 = vsel %vm277_vm2, %v860_v54, 0.0 }
 0x1b7   : > { %351 = vadd.xlane.f32.xlu2 %v350_v55 }
 0x1ba   : > { %v286_v56 = vpop.xlane.xlu2 %285 }
 0x1bb   : > { %v310_v57 = vsub.f32 %v269_v30, %v286_v56 }
 0x1bc   : > { %v289_v58 = vpop.xlane.xlu0 %288 }
 0x1bd   : > { %v322_v59 = vmul.f32 1.442695, %v310_v57  ;;  %v311_v60 = vsub.f32 %v270_v35, %v289_v58 }
 0x1bf   : > { %673 = vpow2.f32 %v322_v59  ;;  %v324_v61 = vmul.f32 1.442695, %v311_v60 }
 0x1c1   : > { %675 = vpow2.f32 %v324_v61 }
 0x1c2   : > { %v298_v62 = vpop.xlane.xlu2 %297  ;;  %v398_v0 = vpop.permute.xlu1 %397 }
 0x1c3   : > { %v314_v63 = vsub.f32 %v273_v37, %v298_v62  ;;  %428 = vmatpush.bf16.msra.mxu1 %v398_v0  ;;  %624 = vmatpush.bf16.msra.mxu3 %v398_v0  ;;  %v328_v37 = vmul.f32 1.442695, %v313_v36 }
 0x1c4   : > { %v301_v1 = vpop.xlane.xlu0 %300 }
 0x1c5   : > { %v864_v3 = vpop.eup %673  ;;  %v330_v4 = vmul.f32 1.442695, %v314_v63  ;;  %v315_v5 = vsub.f32 %v274_v40, %v301_v1 }
 0x1c6   : > { %v344_v6 = vsel %vm277_vm2, %v864_v3, 0.0 }
 0x1c7   : > { %677 = vpow2.f32 %v330_v4  ;;  %345 = vadd.xlane.f32.xlu0 %v344_v6  ;;  %v332_v7 = vmul.f32 1.442695, %v315_v5  ;;  %v676_v9 = vpop.eup %675 }
 0x1c8   : > { %v347_v14 = vsel %vm277_vm2, %v676_v9, 0.0 }
 0x1c9   : > { %679 = vpow2.f32 %v332_v7 }
 0x1ca   : > { %v304_v8 = vpop.xlane.xlu2 %303 }
 0x1cb   : > { %v316_v10 = vsub.f32 %v275_v43, %v304_v8 }
 0x1cd   : > { %v868_v11 = vpop.eup %677  ;;  %v334_v13 = vmul.f32 1.442695, %v316_v10 }
 0x1ce   : > { %v356_v15 = vsel %vm277_vm2, %v868_v11, 0.0 }
 0x1cf   : > { %681 = vpow2.f32 %v334_v13  ;;  %348 = vadd.xlane.f32.xlu0 %v347_v14  ;;  %357 = vadd.xlane.f32.xlu1 %v356_v15  ;;  %v874_v19 = vpop.eup %679 }
 0x1d0   : > { %683 = vpow2.f32 %v318_v16  ;;  %v359_v18 = vsel %vm277_vm2, %v874_v19, 0.0 }
 0x1d2   : > { %v307_v17 = vpop.xlane.xlu0 %306  ;;  %v396_v31 = vpop.permute.xlu2 %395 }
 0x1d3   : > { %v317_v20 = vsub.f32 %v276_v46, %v307_v17  ;;  %429 = vmatpush.bf16.msra.mxu1 %v396_v31  ;;  %625 = vmatpush.bf16.msra.mxu3 %v396_v31 }
 0x1d5   : > { %v876_v21 = vpop.eup %681  ;;  %v336_v22 = vmul.f32 1.442695, %v317_v20 }
 0x1d6   : > { %v362_v23 = vsel %vm277_vm2, %v876_v21, 0.0  ;;  %v684_v25 = vpop.eup %683 }
 0x1d7   : > { %685 = vpow2.f32 %v336_v22  ;;  %360 = vadd.xlane.f32.xlu1 %v359_v18  ;;  %363 = vadd.xlane.f32.xlu2 %v362_v23  ;;  %v338_v29 = vsel %vm277_vm2, %v684_v25, 0.0 }
 0x1dd   : > { %v882_v27 = vpop.eup %685 }
 0x1de   : > { %v365_v28 = vsel %vm277_vm2, %v882_v27, 0.0 }
 0x1df   : > { %366 = vadd.xlane.f32.xlu1 %v365_v28  ;;  %339 = vadd.xlane.f32.xlu2 %v338_v29 }
 0x1e3   : > { %393 = vrot.lane.b32.xlu0 %v803_v2, %s752_s21 }
 0x1ed   : > { %v283_v30 = vpop.xlane.xlu1 %282 }
 0x1ee   : > { %v309_v32 = vsub.f32 %v833_v24, %v283_v30 }
 0x1f0   : > { %v320_v33 = vmul.f32 1.442695, %v309_v32 }
 0x1f2   : > { %687 = vpow2.f32 %v320_v33 }
 0x1f3   : > { %689 = vpow2.f32 %v328_v37 }
 0x1f8   : > { %v688_v34 = vpop.eup %687 }
 0x1f9   : > { %v341_v35 = vsel %vm277_vm2, %v688_v34, 0.0  ;;  %v690_v38 = vpop.eup %689 }
 0x1fa   : > { %342 = vadd.xlane.f32.xlu1 %v341_v35  ;;  %v353_v2 = vsel %vm277_vm2, %v690_v38, 0.0 }
 0x20d   : > { %354 = vadd.xlane.f32.xlu0 %v353_v2 }
 0x22a   : > { %v352_v26 = vpop.xlane.xlu2 %351 }
 0x23a   : > { %v346_v39 = vpop.xlane.xlu0 %345 }
 0x242   : > { %v349_v40 = vpop.xlane.xlu0 %348  ;;  %v358_v41 = vpop.xlane.xlu1 %357 }
 0x243   : > { %691 = vrcp.f32 %v349_v40 }
 0x244   : > { %693 = vrcp.f32 %v346_v39 }
 0x249   : > { %v692_v24 = vpop.eup %691 }
 0x24a   : > { %v694_v42 = vpop.eup %693  ;;  %v381_v43 = vmul.f32 %v692_v24, %v676_v9  ;;  %v361_v47 = vpop.xlane.xlu1 %360 }
 0x24b   : > { %v380_v45 = vmul.f32 %v694_v42, %v864_v3  ;;  %v364_v48 = vpop.xlane.xlu2 %363 }
 0x24d   : > { %v389_v46 = vpack.c.bf16 %v381_v43, %v380_v45 }
 0x252   : > { %v367_v49 = vpop.xlane.xlu1 %366 }
 0x253   : > { %v340_v50 = vpop.xlane.xlu2 %339 }
 0x254   : > { %695 = vrcp.f32 %v340_v50 }
 0x255   : > { %v394_v44 = vpop.permute.xlu0 %393 }
 0x256   : > { %430 = vmatpush.bf16.msra.mxu1 %v394_v44  ;;  %626 = vmatpush.bf16.msra.mxu3 %v394_v44 }
 0x259   : > { %606 = vmatmul.msk.bf16.vlgmr.msra.gmra.mxu3 %vm277_vm2, %v389_v46 }
 0x25a   : > { %v696_v52 = vpop.eup %695 }
 0x25b   : > { %v378_v55 = vmul.f32 %v696_v52, %v684_v25 }
 0x26d   : > { %v343_v51 = vpop.xlane.xlu1 %342 }
 0x26e   : > { %697 = vrcp.f32 %v343_v51 }
 0x26f   : > { %699 = vrcp.f32 %v352_v26 }
 0x274   : > { %v698_v53 = vpop.eup %697 }
 0x275   : > { %v379_v56 = vmul.f32 %v698_v53, %v688_v34  ;;  %v700_v59 = vpop.eup %699 }
 0x276   : > { %v382_v61 = vmul.f32 %v700_v59, %v860_v54 }
 0x277   : > { %v388_v57 = vpack.c.bf16 %v379_v56, %v378_v55 }
 0x279   : > { %605 = vmatmul.msk.bf16.vlgmr.msra.gmra.mxu1 %vm277_vm2, %v388_v57 }
 0x280   : > { %v355_v58 = vpop.xlane.xlu0 %354 }
 0x281   : > { %701 = vrcp.f32 %v355_v58 }
 0x282   : > { %703 = vrcp.f32 %v361_v47 }
 0x283   : > { %705 = vrcp.f32 %v358_v41 }
 0x284   : > { %707 = vrcp.f32 %v367_v49 }
 0x285   : > { %709 = vrcp.f32 %v364_v48 }
 0x287   : > { %v702_v60 = vpop.eup %701 }
 0x288   : > { %v383_v62 = vmul.f32 %v702_v60, %v690_v38  ;;  %v704_v0 = vpop.eup %703 }
 0x289   : > { %v706_v1 = vpop.eup %705  ;;  %v385_v3 = vmul.f32 %v704_v0, %v874_v19 }
 0x28a   : > { %v390_v63 = vpack.c.bf16 %v383_v62, %v382_v61  ;;  %v384_v4 = vmul.f32 %v706_v1, %v868_v11  ;;  %v708_v6 = vpop.eup %707 }
 0x28b   : > { %v710_v54 = vpop.eup %709  ;;  %v387_v7 = vmul.f32 %v708_v6, %v882_v27 }
 0x28c   : > { %607 = vmatmul.msk.bf16.gmra.mxu3 %vm277_vm2, %v390_v63  ;;  %v391_v5 = vpack.c.bf16 %v385_v3, %v384_v4  ;;  %v386_v8 = vmul.f32 %v710_v54, %v876_v21 }
 0x28e   : > { %v392_v9 = vpack.c.bf16 %v387_v7, %v386_v8 }
 0x29c   : > { %608 = vmatmul.msk.bf16.gmra.mxu3 %vm277_vm2, %v391_v5 }
 0x2ac   : > { %609 = vmatmul.msk.bf16.gmra.mxu3 %vm277_vm2, %v392_v9 }
 0x2dc   : > { %v437_v10 = vpop.f32.mrf.mxu3 }
 0x2dd   : > { %v459_v11 = vpack.c.bf16 %v437_v10, %v437_v10 }
 0x2df   : > { %470 = vst.msk [vmem:[%s910_s24 + $0x8] sm:$0xf] %vm467_vm3, %v459_v11 }
 0x2e4   : > { %v439_v12 = vpop.f32.mrf.mxu3 }
 0x2e5   : > { %v460_v13 = vpack.c.bf16 %v439_v12, %v439_v12 }
 0x2e7   : > { %471 = vst.msk [vmem:[%s910_s24 + $0xc] sm:$0xf] %vm467_vm3, %v460_v13 }
 0x2f6   : > { %v432_v14 = vpop.f32.mrf.mxu1 }
 0x2f7   : > { %v457_v15 = vpack.c.bf16 %v432_v14, %v432_v14 }
 0x2f9   : > { %468 = vst.msk [vmem:[%s910_s24] sm:$0xf] %vm467_vm3, %v457_v15 }
 0x2fe   : > { %v434_v16 = vpop.f32.mrf.mxu1 }
 0x2ff   : > { %v458_v17 = vpack.c.bf16 %v434_v16, %v434_v16 }
 0x301   : > { %469 = vst.msk [vmem:[%s910_s24 + $0x4] sm:$0xf] %vm467_vm3, %v458_v17 }
 0x30f   : > { %v442_v19 = vpop.f32.mrf.mxu3 }
 0x310   : > { %v461_v20 = vpack.c.bf16 %v442_v19, %v442_v19 }
 0x312   : > { %472 = vst.msk [vmem:[%s910_s24 + $0x10] sm:$0xf] %vm467_vm3, %v461_v20 }
 0x317   : > { %v444_v21 = vpop.f32.mrf.mxu3 }
 0x318   : > { %v462_v22 = vpack.c.bf16 %v444_v21, %v444_v21 }
 0x31a   : > { %473 = vst.msk [vmem:[%s910_s24 + $0x14] sm:$0xf] %vm467_vm3, %v462_v22 }
 0x31f   : > { %v447_v18 = vpop.f32.mrf.mxu3 }
 0x320   : > { %v463_v23 = vpack.c.bf16 %v447_v18, %v447_v18 }
 0x322   : > { %474 = vst.msk [vmem:[%s910_s24 + $0x18] sm:$0xf] %vm467_vm3, %v463_v23 }
 0x327   : > { %v449_v25 = vpop.f32.mrf.mxu3 }
 0x328   : > { %v464_v27 = vpack.c.bf16 %v449_v25, %v449_v25 }
 0x32a   : > { %475 = vst.msk [vmem:[%s910_s24 + $0x1c] sm:$0xf] %vm467_vm3, %v464_v27 }
 0x32f   : > { %v452_v28 = vpop.f32.mrf.mxu3 }
 0x330   : > { %v465_v29 = vpack.c.bf16 %v452_v28, %v452_v28 }
 0x332   : > { %476 = vst.msk [vmem:[%s910_s24 + $0x20] sm:$0xf] %vm467_vm3, %v465_v29 }
 0x337   : > { %v454_v30 = vpop.f32.mrf.mxu3 }
 0x338   : > { %v466_v31 = vpack.c.bf16 %v454_v30, %v454_v30 }
 0x33a   : > { %477 = vst.msk [vmem:[%s910_s24 + $0x24] sm:$0xf] %vm467_vm3, %v466_v31 }
 0x33b PF: > { %s11_s10 = sadd.s32 1, %s749_s10   ;;  %s949_s6 = smov %s741_s8 }
 0x33c   : > { %p8_p7 = scmp.ge.s32.totalorder %s11_s10, 10   ;;  %s950_s7 = smov %s745_s9 }
 0x33d   : > { %s951_s8 = smov %s954_s11  ;;  %s952_s9 = smov %s958_s12 }
 0x33e   :  { %10 = sbr.rel (!%p8_p7) target bundleno = 3 (0x3), region = 54 }

// kernel: uvit_forward.30
= control target key start
LH: loop header
LB: loop body
LE: loop exit
PB: predicated region body
PF: predicated region fallthrough
CT: control target
= control target key end

     0   :  { %s2207_s0 = inlined_call_operand.vmem [shape: f32[160,128], index: 0, kind: input, shape index: {}]   ;;  %s2208_s3 = inlined_call_operand.vmem [shape: f32[1,128], index: 3, kind: input, shape index: {}]   ;;  %s2209_s4 = inlined_call_operand.vmem [shape: f32[1,128], index: 4, kind: input, shape index: {}]   ;;  %s2210_s1 = inlined_call_operand.vmem [shape: bf16[128,384], index: 1, kind: input, shape index: {}]   ;;  %s2211_s2 = inlined_call_operand.vmem [shape: f32[1,384], index: 2, kind: input, shape index: {}]   ;;  %s2212_s5 = inlined_call_operand.vmem [shape: bf16[160,384], index: 5, kind: output, shape index: {}]  }
   0x1   :  { %v1192_v0 = vld [vmem:[%s2207_s0 + $0x10] sm:$0xff]  ;;  %v1197_v1 = vld [vmem:[%s2207_s0] sm:$0xff]  ;;  %v1206_v3 = vld [vmem:[%s2207_s0 + $0x8] sm:$0xff] }
   0x2   :  { %44 = vadd.xlane.f32.xlu2 %v1192_v0  ;;  %40 = vadd.xlane.f32.xlu0 %v1197_v1  ;;  %v100_v2 = vmul.f32 %v1197_v1, %v1197_v1  ;;  %v1211_v4 = vld [vmem:[%s2207_s0 + $0x18] sm:$0xff]  ;;  %v101_v5 = vmul.f32 %v1206_v3, %v1206_v3  ;;  %v102_v6 = vmul.f32 %v1192_v0, %v1192_v0  ;;  %v1222_v7 = vld [vmem:[%s2207_s0 + $0x20] sm:$0xff]  ;;  %v1230_v9 = vld [vmem:[%s2207_s0 + $0x88] sm:$0xff] }
   0x3   :  { %v103_v8 = vmul.f32 %v1211_v4, %v1211_v4  ;;  %v1235_v10 = vld [vmem:[%s2207_s0 + $0x28] sm:$0xff]  ;;  %v1240_v11 = vld [vmem:[%s2207_s0 + $0x80] sm:$0xff]  ;;  %v104_v13 = vmul.f32 %v1222_v7, %v1222_v7  ;;  %v117_v15 = vmul.f32 %v1230_v9, %v1230_v9  ;;  %v1256_v16 = vld [vmem:[%s2207_s0 + $0x38] sm:$0xff] }
   0x4   :  { %120 = vadd.xlane.f32.xlu1 %v100_v2  ;;  %v116_v12 = vmul.f32 %v1240_v11, %v1240_v11  ;;  %v105_v14 = vmul.f32 %v1235_v10, %v1235_v10  ;;  %v1261_v17 = vld [vmem:[%s2207_s0 + $0x30] sm:$0xff]  ;;  %v1275_v20 = vld [vmem:[%s2207_s0 + $0x98] sm:$0xff]  ;;  %v107_v22 = vmul.f32 %v1256_v16, %v1256_v16  ;;  %v1288_v24 = vld [vmem:[%s2207_s0 + $0x40] sm:$0xff] }
   0x5   :  { %v106_v18 = vmul.f32 %v1261_v17, %v1261_v17  ;;  %v1270_v19 = vld [vmem:[%s2207_s0 + $0x90] sm:$0xff]  ;;  %v119_v21 = vmul.f32 %v1275_v20, %v1275_v20  ;;  %v108_v25 = vmul.f32 %v1288_v24, %v1288_v24  ;;  %v1295_v26 = vld [vmem:[%s2207_s0 + $0x48] sm:$0xff]  ;;  %v31_v28 = vld [vmem:[%s2207_s0 + $0x58] sm:$0xff] }
   0x6   :  { %v118_v23 = vmul.f32 %v1270_v19, %v1270_v19  ;;  %v109_v27 = vmul.f32 %v1295_v26, %v1295_v26  ;;  %v30_v29 = vld [vmem:[%s2207_s0 + $0x50] sm:$0xff]  ;;  %v32_v31 = vld [vmem:[%s2207_s0 + $0x60] sm:$0xff]  ;;  %v111_v32 = vmul.f32 %v31_v28, %v31_v28  ;;  %v33_v33 = vld [vmem:[%s2207_s0 + $0x68] sm:$0xff] }
   0x7   :  { %v110_v30 = vmul.f32 %v30_v29, %v30_v29  ;;  %v113_v34 = vmul.f32 %v33_v33, %v33_v33  ;;  %v112_v35 = vmul.f32 %v32_v31, %v32_v31  ;;  %v34_v36 = vld [vmem:[%s2207_s0 + $0x70] sm:$0xff]  ;;  %v1053_v38 = vld [vmem:[%s2210_s1 + $0xa8] sm:$0xf]  ;;  %v1084_v40 = vld [vmem:[%s2210_s1 + $0xac] sm:$0xf] }
   0x8   :  { %v114_v37 = vmul.f32 %v34_v36, %v34_v36  ;;  %v1085_v39 = vld [vmem:[%s2210_s1 + $0xb0] sm:$0xf0]  ;;  %v1055_v42 = vld [vmem:[%s2210_s1 + $0xb4] sm:$0xf0]  ;;  %v1061_v43 = vld [vmem:[%s2210_s1 + $0xb0] sm:$0xf] }
   0x9   :  { %v1054_v41 = vor.u32 %v1085_v39, %v1053_v38  ;;  %v1086_v44 = vld [vmem:[%s2210_s1 + $0xb8] sm:$0xf0]  ;;  %v1337_v46 = vor.u32 %v1084_v40, %v1055_v42  ;;  %v1041_v48 = vld [vmem:[%s2210_s1 + $0x90] sm:$0xf]  ;;  %v1081_v50 = vld [vmem:[%s2210_s1 + $0x94] sm:$0xf] }
   0xa   :  { %46 = vadd.xlane.f32.xlu2 %v1211_v4  ;;  %42 = vadd.xlane.f32.xlu0 %v1206_v3  ;;  %v35_v45 = vld [vmem:[%s2207_s0 + $0x78] sm:$0xff]  ;;  %v1339_v47 = vor.u32 %v1086_v44, %v1061_v43  ;;  %v1043_v52 = vld [vmem:[%s2210_s1 + $0x9c] sm:$0xf0]  ;;  %v1083_v54 = vld [vmem:[%s2210_s1 + $0xa0] sm:$0xf0] }
   0xb   :  { %706 = vmatpush.bf16.msra.mxu0 %v1054_v41  ;;  %765 = vmatpush.bf16.msra.mxu1 %v1337_v46  ;;  %v1082_v49 = vld [vmem:[%s2210_s1 + $0x98] sm:$0xf0]  ;;  %v1049_v53 = vld [vmem:[%s2210_s1 + $0x98] sm:$0xf]  ;;  %v1361_v55 = vor.u32 %v1081_v50, %v1043_v52  ;;  %v115_v57 = vmul.f32 %v35_v45, %v35_v45  ;;  %v1079_v59 = vld [vmem:[%s2210_s1 + $0x80] sm:$0xf0] }
   0xc   :  { %122 = vadd.xlane.f32.xlu1 %v101_v5  ;;  %824 = vmatpush.bf16.msra.mxu2 %v1339_v47  ;;  %v1042_v51 = vor.u32 %v1082_v49, %v1041_v48  ;;  %v1363_v56 = vor.u32 %v1083_v54, %v1049_v53  ;;  %v1029_v58 = vld [vmem:[%s2210_s1 + $0x78] sm:$0xf]  ;;  %v1078_v60 = vld [vmem:[%s2210_s1 + $0x7c] sm:$0xf]  ;;  %v1031_v62 = vld [vmem:[%s2210_s1 + $0x84] sm:$0xf0] }
   0xd   :  { %1087 = vmatpush.bf16.msra.mxu3 %v1054_v41  ;;  %v1030_v61 = vor.u32 %v1079_v59, %v1029_v58  ;;  %v1037_v63 = vld [vmem:[%s2210_s1 + $0x80] sm:$0xf]  ;;  %v1080_v2 = vld [vmem:[%s2210_s1 + $0x88] sm:$0xf0]  ;;  %v1385_v5 = vor.u32 %v1078_v60, %v1031_v62  ;;  %v1001_v40 = vld [vmem:[%s2210_s1 + $0x38] sm:$0xf] }
   0xe   :  { %v995_v39 = vld [vmem:[%s2210_s1 + $0x3c] sm:$0xf0]  ;;  %v1071_v41 = vld [vmem:[%s2210_s1 + $0x40] sm:$0xf0]  ;;  %v981_v50 = vld [vmem:[%s2210_s1 + $0x18] sm:$0xf] }
   0xf   :  { %707 = vmatpush.bf16.msra.mxu0 %v1042_v51  ;;  %766 = vmatpush.bf16.msra.mxu1 %v1361_v55  ;;  %v1066_v52 = vld [vmem:[%s2210_s1 + $0x1c] sm:$0xf]  ;;  %v983_v54 = vld [vmem:[%s2210_s1 + $0x24] sm:$0xf0]  ;;  %v1068_v58 = vld [vmem:[%s2210_s1 + $0x28] sm:$0xf0] }
  0x10   :  { %825 = vmatpush.bf16.msra.mxu2 %v1363_v56 }
  0x11   :  { %1088 = vmatpush.bf16.msra.mxu3 %v1042_v51  ;;  %v1067_v51 = vld [vmem:[%s2210_s1 + $0x20] sm:$0xf0] }
  0x12   :  { %48 = vadd.xlane.f32.xlu2 %v1222_v7  ;;  %124 = vadd.xlane.f32.xlu0 %v102_v6  ;;  %v1387_v6 = vor.u32 %v1080_v2, %v1037_v63  ;;  %v982_v60 = vor.u32 %v1067_v51, %v981_v50  ;;  %v969_v2 = vld [vmem:[%s2210_s1] sm:$0xf] }
  0x13   :  { %708 = vmatpush.bf16.msra.mxu0 %v1030_v61  ;;  %767 = vmatpush.bf16.msra.mxu1 %v1385_v5 }
  0x14   :  { %126 = vadd.xlane.f32.xlu1 %v103_v8  ;;  %v1017_v8 = vld [vmem:[%s2210_s1 + $0x60] sm:$0xf]  ;;  %826 = vmatpush.bf16.msra.mxu2 %v1387_v6 }
  0x15   :  { %1089 = vmatpush.bf16.msra.mxu3 %v1030_v61  ;;  %v1485_v61 = vor.u32 %v1066_v52, %v983_v54 }
  0x1a   :  { %74 = vadd.xlane.f32.xlu2 %v1230_v9  ;;  %50 = vadd.xlane.f32.xlu0 %v1235_v10 }
  0x1c   :  { %72 = vadd.xlane.f32.xlu1 %v1240_v11 }
  0x22   :  { %152 = vadd.xlane.f32.xlu2 %v116_v12  ;;  %128 = vadd.xlane.f32.xlu0 %v104_v13  ;;  %v1076_v12 = vld [vmem:[%s2210_s1 + $0x68] sm:$0xf0]  ;;  %v1075_v13 = vld [vmem:[%s2210_s1 + $0x64] sm:$0xf] }
  0x24   :  { %130 = vadd.xlane.f32.xlu1 %v105_v14  ;;  %v1018_v14 = vor.u32 %v1076_v12, %v1017_v8  ;;  %v1064_v8 = vld [vmem:[%s2210_s1 + $0x8] sm:$0xf0]  ;;  %v1063_v12 = vld [vmem:[%s2210_s1 + $0x4] sm:$0xf] }
  0x26   :  { %709 = vmatpush.bf16.msra.mxu0 %v1018_v14  ;;  %1090 = vmatpush.bf16.msra.mxu3 %v1018_v14  ;;  %v971_v14 = vld [vmem:[%s2210_s1 + $0xc] sm:$0xf0] }
  0x2a   :  { %54 = vadd.xlane.f32.xlu2 %v1256_v16  ;;  %154 = vadd.xlane.f32.xlu0 %v117_v15  ;;  %v1019_v15 = vld [vmem:[%s2210_s1 + $0x6c] sm:$0xf0] }
  0x2c   :  { %52 = vadd.xlane.f32.xlu1 %v1261_v17 }
  0x32   :  { %132 = vadd.xlane.f32.xlu2 %v106_v18  ;;  %76 = vadd.xlane.f32.xlu0 %v1270_v19  ;;  %v1025_v18 = vld [vmem:[%s2210_s1 + $0x68] sm:$0xf] }
  0x34   :  { %78 = vadd.xlane.f32.xlu1 %v1275_v20 }
  0x3a   :  { %158 = vadd.xlane.f32.xlu2 %v119_v21  ;;  %134 = vadd.xlane.f32.xlu0 %v107_v22  ;;  %v1077_v21 = vld [vmem:[%s2210_s1 + $0x70] sm:$0xf0]  ;;  %v1409_v22 = vor.u32 %v1075_v13, %v1019_v15  ;;  %v970_v13 = vor.u32 %v1064_v8, %v969_v2  ;;  %v977_v15 = vld [vmem:[%s2210_s1 + $0x8] sm:$0xf] }
  0x3c   :  { %156 = vadd.xlane.f32.xlu1 %v118_v23  ;;  %v1411_v23 = vor.u32 %v1077_v21, %v1025_v18  ;;  %768 = vmatpush.bf16.msra.mxu1 %v1409_v22  ;;  %v1065_v18 = vld [vmem:[%s2210_s1 + $0x10] sm:$0xf0] }
  0x3e   :  { %827 = vmatpush.bf16.msra.mxu2 %v1411_v23 }
  0x42   :  { %56 = vadd.xlane.f32.xlu0 %v1288_v24  ;;  %136 = vadd.xlane.f32.xlu2 %v108_v25  ;;  %v1005_v25 = vld [vmem:[%s2210_s1 + $0x48] sm:$0xf] }
  0x44   :  { %58 = vadd.xlane.f32.xlu1 %v1295_v26 }
  0x4a   :  { %138 = vadd.xlane.f32.xlu0 %v109_v27  ;;  %62 = vadd.xlane.f32.xlu2 %v31_v28  ;;  %v1073_v27 = vld [vmem:[%s2210_s1 + $0x50] sm:$0xf0]  ;;  %v1072_v28 = vld [vmem:[%s2210_s1 + $0x4c] sm:$0xf] }
  0x4c   :  { %60 = vadd.xlane.f32.xlu1 %v30_v29  ;;  %v1006_v29 = vor.u32 %v1073_v27, %v1005_v25 }
  0x4e   :  { %710 = vmatpush.bf16.msra.mxu0 %v1006_v29  ;;  %1091 = vmatpush.bf16.msra.mxu3 %v1006_v29  ;;  %v1511_v29 = vor.u32 %v1065_v18, %v977_v15 }
  0x52   :  { %140 = vadd.xlane.f32.xlu0 %v110_v30  ;;  %64 = vadd.xlane.f32.xlu2 %v32_v31  ;;  %v1007_v30 = vld [vmem:[%s2210_s1 + $0x54] sm:$0xf0]  ;;  %v1013_v31 = vld [vmem:[%s2210_s1 + $0x50] sm:$0xf] }
  0x54   :  { %142 = vadd.xlane.f32.xlu1 %v111_v32  ;;  %v1074_v32 = vld [vmem:[%s2210_s1 + $0x58] sm:$0xf0] }
  0x5a   :  { %66 = vadd.xlane.f32.xlu0 %v33_v33  ;;  %146 = vadd.xlane.f32.xlu2 %v113_v34  ;;  %v1433_v33 = vor.u32 %v1072_v28, %v1007_v30  ;;  %v1435_v34 = vor.u32 %v1074_v32, %v1013_v31  ;;  %v1509_v28 = vor.u32 %v1063_v12, %v971_v14 }
  0x5c   :  { %144 = vadd.xlane.f32.xlu1 %v112_v35  ;;  %769 = vmatpush.bf16.msra.mxu1 %v1433_v33  ;;  %v993_v35 = vld [vmem:[%s2210_s1 + $0x30] sm:$0xf] }
  0x5d   :  { %828 = vmatpush.bf16.msra.mxu2 %v1435_v34 }
  0x62   :  { %68 = vadd.xlane.f32.xlu0 %v34_v36  ;;  %148 = vadd.xlane.f32.xlu2 %v114_v37  ;;  %v1070_v36 = vld [vmem:[%s2210_s1 + $0x38] sm:$0xf0]  ;;  %v1069_v37 = vld [vmem:[%s2210_s1 + $0x34] sm:$0xf] }
  0x63   :  { %v994_v38 = vor.u32 %v1070_v36, %v993_v35  ;;  %v1457_v44 = vor.u32 %v1069_v37, %v995_v39 }
  0x64   :  { %70 = vadd.xlane.f32.xlu1 %v35_v45  ;;  %v1459_v45 = vor.u32 %v1071_v41, %v1001_v40 }
  0x65   :  { %711 = vmatpush.bf16.msra.mxu0 %v994_v38  ;;  %770 = vmatpush.bf16.msra.mxu1 %v1457_v44 }
  0x66   :  { %829 = vmatpush.bf16.msra.mxu2 %v1459_v45  ;;  %1092 = vmatpush.bf16.msra.mxu3 %v994_v38 }
  0x69   :  { %712 = vmatpush.bf16.msra.mxu0 %v982_v60  ;;  %771 = vmatpush.bf16.msra.mxu1 %v1485_v61 }
  0x6a   :  { %150 = vadd.xlane.f32.xlu0 %v115_v57  ;;  %v989_v57 = vld [vmem:[%s2210_s1 + $0x20] sm:$0xf]  ;;  %1093 = vmatpush.bf16.msra.mxu3 %v982_v60 }
  0x6b   :  { %v1487_v62 = vor.u32 %v1068_v58, %v989_v57 }
  0x6d   :  { %830 = vmatpush.bf16.msra.mxu2 %v1487_v62  ;;  %713 = vmatpush.bf16.msra.mxu0 %v970_v13 }
  0x6e   :  { %772 = vmatpush.bf16.msra.mxu1 %v1509_v28  ;;  %1094 = vmatpush.bf16.msra.mxu3 %v970_v13 }
  0x71   :  { %831 = vmatpush.bf16.msra.mxu2 %v1511_v29 }
  0x72   :  { %1095 = vmatpush.bf16.msrb.mxu3 %v1337_v46 }
  0x75   :  { %v45_v42 = vpop.xlane.xlu2 %44  ;;  %v41_v43 = vpop.xlane.xlu0 %40 }
  0x76   :  { %v1461_v48 = vmul.f32 0.0078125, %v41_v43  ;;  %v1519_v36 = vmul.f32 0.0078125, %v45_v42  ;;  %1096 = vmatpush.bf16.msrb.mxu3 %v1361_v55 }
  0x77   :  { %v121_v49 = vpop.xlane.xlu1 %120 }
  0x78   :  { %v180_v53 = vmul.f32 %v1461_v48, %v1461_v48  ;;  %v160_v59 = vmul.f32 0.0078125, %v121_v49  ;;  %v182_v49 = vmul.f32 %v1519_v36, %v1519_v36 }
  0x7a   :  { %v200_v63 = vsub.f32 %v160_v59, %v180_v53  ;;  %1097 = vmatpush.bf16.msrb.mxu3 %v1385_v5 }
  0x7c   :  { %v240_v21 = vadd.f32 1e-05, %v200_v63 }
  0x7d   :  { %v47_v25 = vpop.xlane.xlu2 %46  ;;  %v43_v27 = vpop.xlane.xlu0 %42 }
  0x7e   :  { %v1513_v30 = vmul.f32 0.0078125, %v43_v27  ;;  %1113 = vrsqrt.f32 %v240_v21  ;;  %v1522_v39 = vmul.f32 0.0078125, %v47_v25  ;;  %1098 = vmatpush.bf16.msrb.mxu3 %v1409_v22  ;;  %vm266_vm1 = vweird.f32 %v240_v21 }
  0x7f   :  { %v123_v31 = vpop.xlane.xlu1 %122  ;;  %v220_v22 = vsub.f32 %v1197_v1, %v1461_v48  ;;  %v1564_v48 = vld [vmem:[%s2208_s3] ss:$0 sm:$0xff] }
  0x80   :  { %v181_v32 = vmul.f32 %v1513_v30, %v1513_v30  ;;  %v161_v35 = vmul.f32 0.0078125, %v123_v31  ;;  %v183_v46 = vmul.f32 %v1522_v39, %v1522_v39 }
  0x82   :  { %v201_v37 = vsub.f32 %v161_v35, %v181_v32  ;;  %1099 = vmatpush.bf16.msrb.mxu3 %v1433_v33 }
  0x84   :  { %v1114_v38 = vpop.eup %1113  ;;  %v241_v40 = vadd.f32 1e-05, %v201_v37 }
  0x85   :  { %v49_v41 = vpop.xlane.xlu2 %48  ;;  %v125_v43 = vpop.xlane.xlu0 %124  ;;  %v261_v50 = vmul.f32 %v1114_v38, %v240_v21  ;;  %vm267_vm0 = vweird.f32 %v1114_v38 }
  0x86   :  { %v162_v51 = vmul.f32 0.0078125, %v125_v43  ;;  %1115 = vrsqrt.f32 %v241_v40  ;;  %vm1537_vm2 = vmor %vm266_vm1, %vm267_vm0  ;;  %v1550_v32 = vmul.f32 0.0078125, %v49_v41  ;;  %vm276_vm4 = vweird.f32 %v241_v40  ;;  %1100 = vmatpush.bf16.msrb.mxu3 %v1457_v44  ;;  %v1580_v44 = vld [vmem:[%s2209_s4] ss:$0 sm:$0xff] }
  0x87   :  { %v127_v52 = vpop.xlane.xlu1 %126  ;;  %v262_v42 = vmul.f32 %v1114_v38, %v261_v50 }
  0x88   :  { %v202_v53 = vsub.f32 %v162_v51, %v182_v49  ;;  %v163_v54 = vmul.f32 0.0078125, %v127_v52 }
  0x89   :  { %v263_v57 = vmul.f32 0.5, %v262_v42 }
  0x8a   :  { %v1529_v58 = vadd.f32 1e-05, %v202_v53  ;;  %v203_v59 = vsub.f32 %v163_v54, %v183_v46  ;;  %1101 = vmatpush.bf16.msrb.mxu3 %v1485_v61 }
  0x8b   :  { %v264_v60 = vsub.f32 1.5, %v263_v57 }
  0x8c   :  { %1117 = vrsqrt.f32 %v1529_v58  ;;  %v1116_v63 = vpop.eup %1115  ;;  %v1533_v2 = vadd.f32 1e-05, %v203_v59  ;;  %vm286_vm10 = vweird.f32 %v1529_v58 }
  0x8d   :  { %v75_v55 = vpop.xlane.xlu2 %74  ;;  %v51_v8 = vpop.xlane.xlu0 %50  ;;  %v265_v12 = vmul.f32 %v1114_v38, %v264_v60  ;;  %v271_v13 = vmul.f32 %v1116_v63, %v241_v40  ;;  %vm277_vm3 = vweird.f32 %v1116_v63 }
  0x8e   :  { %1119 = vrsqrt.f32 %v1533_v2  ;;  %v1554_v35 = vmul.f32 0.0078125, %v51_v8  ;;  %vm278_vm5 = vmor %vm276_vm4, %vm277_vm3  ;;  %vm296_vm7 = vweird.f32 %v1533_v2  ;;  %1102 = vmatpush.bf16.msrb.mxu3 %v1509_v28 }
  0x8f   :  { %v73_v14 = vpop.xlane.xlu1 %72  ;;  %v272_v15 = vmul.f32 %v1116_v63, %v271_v13  ;;  %v269_v25 = vsel %vm1537_vm2, %v1114_v38, %v265_v12  ;;  %v221_v38 = vsub.f32 %v1206_v3, %v1513_v30  ;;  %v184_v3 = vmul.f32 %v1550_v32, %v1550_v32 }
  0x90   :  { %v1545_v31 = vmul.f32 0.0078125, %v73_v14  ;;  %v460_v1 = vmul.f32 %v269_v25, %v220_v22  ;;  %v185_v40 = vmul.f32 %v1554_v35, %v1554_v35 }
  0x91   :  { %v273_v27 = vmul.f32 0.5, %v272_v15 }
  0x92   :  { %v1541_v18 = vpop.eup %1117  ;;  %v196_v52 = vmul.f32 %v1545_v31, %v1545_v31  ;;  %v484_v13 = vmul.f32 %v1564_v48, %v460_v1 }
  0x93   :  { %v281_v21 = vmul.f32 %v1541_v18, %v1529_v58  ;;  %v274_v37 = vsub.f32 1.5, %v273_v27  ;;  %vm287_vm8 = vweird.f32 %v1541_v18 }
  0x94   :  { %v1556_v43 = vpop.eup %1119  ;;  %v508_v61 = vadd.f32 %v1580_v44, %v484_v13  ;;  %vm1615_vm11 = vmor %vm286_vm10, %vm287_vm8 }
  0x95   :  { %v282_v33 = vmul.f32 %v1541_v18, %v281_v21  ;;  %v153_v49 = vpop.xlane.xlu2 %152  ;;  %v129_v50 = vpop.xlane.xlu0 %128  ;;  %v275_v41 = vmul.f32 %v1116_v63, %v274_v37  ;;  %v291_v51 = vmul.f32 %v1556_v43, %v1533_v2  ;;  %vm297_vm6 = vweird.f32 %v1556_v43 }
  0x96   :  { %v176_v42 = vmul.f32 0.0078125, %v153_v49  ;;  %v164_v53 = vmul.f32 0.0078125, %v129_v50  ;;  %vm1603_vm9 = vmor %vm296_vm7, %vm297_vm6 }
  0x97   :  { %v283_v30 = vmul.f32 0.5, %v282_v33  ;;  %v131_v46 = vpop.xlane.xlu1 %130  ;;  %v279_v54 = vsel %vm278_vm5, %v1116_v63, %v275_v41  ;;  %v292_v57 = vmul.f32 %v1556_v43, %v291_v51  ;;  %v1585_v63 = vmul.f32 0.0078125, %v75_v55 }
  0x98   :  { %v216_v59 = vsub.f32 %v176_v42, %v196_v52  ;;  %v165_v60 = vmul.f32 0.0078125, %v131_v46  ;;  %v204_v8 = vsub.f32 %v164_v53, %v184_v3  ;;  %v461_v12 = vmul.f32 %v279_v54, %v221_v38 }
  0x99   :  { %v284_v14 = vsub.f32 1.5, %v283_v30  ;;  %v293_v15 = vmul.f32 0.5, %v292_v57  ;;  %v197_v1 = vmul.f32 %v1585_v63, %v1585_v63  ;;  %v223_v3 = vsub.f32 %v1211_v4, %v1522_v39 }
  0x9a   :  { %v1582_v5 = vadd.f32 1e-05, %v216_v59  ;;  %v205_v25 = vsub.f32 %v165_v60, %v185_v40  ;;  %v1587_v27 = vadd.f32 1e-05, %v204_v8  ;;  %v485_v22 = vmul.f32 %v1564_v48, %v461_v12 }
  0x9b   :  { %v294_v21 = vsub.f32 1.5, %v293_v15  ;;  %v285_v49 = vmul.f32 %v1541_v18, %v284_v14  ;;  %v222_v4 = vsub.f32 %v1192_v0, %v1519_v36  ;;  %v236_v12 = vsub.f32 %v1240_v11, %v1545_v31 }
  0x9c   :  { %1121 = vrsqrt.f32 %v1582_v5  ;;  %v1592_v37 = vadd.f32 1e-05, %v205_v25  ;;  %v509_v55 = vadd.f32 %v1580_v44, %v485_v22  ;;  %vm426_vm12 = vweird.f32 %v1582_v5 }
  0x9d   :  { %1123 = vrsqrt.f32 %v1587_v27  ;;  %v55_v38 = vpop.xlane.xlu2 %54  ;;  %v155_v33 = vpop.xlane.xlu0 %154  ;;  %v295_v50 = vmul.f32 %v1556_v43, %v294_v21  ;;  %v289_v58 = vsel %vm1615_vm11, %v1541_v18, %v285_v49  ;;  %vm306_vm3 = vweird.f32 %v1587_v27 }
  0x9e   :  { %1125 = vrsqrt.f32 %v1592_v37  ;;  %v177_v41 = vmul.f32 0.0078125, %v155_v33  ;;  %v528_v52 = vpack.c.bf16 %v509_v55, %v508_v61  ;;  %v462_v36 = vmul.f32 %v289_v58, %v222_v4 }
  0x9f   :  { %v53_v51 = vpop.xlane.xlu1 %52  ;;  %v299_v42 = vsel %vm1603_vm9, %v1556_v43, %v295_v50  ;;  %vm316_vm13 = vweird.f32 %v1592_v37  ;;  %v1651_v55 = vmul.f32 0.0078125, %v55_v38 }
  0xa0   :  { %v217_v30 = vsub.f32 %v177_v41, %v197_v1  ;;  %714 = vmatmul.bf16.vlgmr.msra.gmra.mxu0 %v528_v52  ;;  %773 = vmatmul.bf16.vlgmr.msra.gmra.mxu1 %v528_v52  ;;  %v1624_v53 = vmul.f32 0.0078125, %v53_v51  ;;  %v463_v54 = vmul.f32 %v299_v42, %v223_v3  ;;  %v486_v2 = vmul.f32 %v1564_v48, %v462_v36 }
  0xa1   :  { %832 = vmatmul.bf16.vlgmr.msra.gmra.mxu2 %v528_v52  ;;  %v187_v28 = vmul.f32 %v1651_v55, %v1651_v55 }
  0xa2   :  { %v1619_v40 = vpop.eup %1121  ;;  %v1632_v46 = vadd.f32 1e-05, %v217_v30  ;;  %v186_v14 = vmul.f32 %v1624_v53, %v1624_v53  ;;  %v487_v33 = vmul.f32 %v1564_v48, %v463_v54 }
  0xa3   :  { %v1626_v43 = vpop.eup %1123  ;;  %v421_v39 = vmul.f32 %v1619_v40, %v1582_v5  ;;  %vm427_vm14 = vweird.f32 %v1619_v40 }
  0xa4   :  { %v1634_v57 = vpop.eup %1125  ;;  %v301_v59 = vmul.f32 %v1626_v43, %v1587_v27  ;;  %1127 = vrsqrt.f32 %v1632_v46  ;;  %v511_v3 = vadd.f32 %v1580_v44, %v487_v33  ;;  %vm307_vm0 = vweird.f32 %v1626_v43  ;;  %vm1674_vm1 = vmor %vm426_vm12, %vm427_vm14 }
  0xa5   :  { %v422_v18 = vmul.f32 %v1619_v40, %v421_v39  ;;  %v311_v60 = vmul.f32 %v1634_v57, %v1592_v37  ;;  %v133_v8 = vpop.xlane.xlu2 %132  ;;  %v77_v0 = vpop.xlane.xlu0 %76  ;;  %vm317_vm15 = vweird.f32 %v1634_v57  ;;  %vm1703_vm4 = vmor %vm306_vm3, %vm307_vm0  ;;  %v225_v27 = vsub.f32 %v1235_v10, %v1554_v35 }
  0xa6   :  { %v302_v13 = vmul.f32 %v1626_v43, %v301_v59  ;;  %v166_v15 = vmul.f32 0.0078125, %v133_v8  ;;  %v1663_v42 = vmul.f32 0.0078125, %v77_v0  ;;  %vm1690_vm2 = vmor %vm316_vm13, %vm317_vm15  ;;  %v224_v10 = vsub.f32 %v1222_v7, %v1550_v32 }
  0xa7   :  { %v423_v25 = vmul.f32 0.5, %v422_v18  ;;  %v312_v22 = vmul.f32 %v1634_v57, %v311_v60  ;;  %v79_v21 = vpop.xlane.xlu1 %78  ;;  %v510_v60 = vadd.f32 %v1580_v44, %v486_v2  ;;  %vm436_vm6 = vweird.f32 %v1632_v46 }
  0xa8   :  { %v303_v61 = vmul.f32 0.5, %v302_v13  ;;  %v206_v11 = vsub.f32 %v166_v15, %v186_v14  ;;  %v1653_v50 = vmul.f32 0.0078125, %v79_v21 }
  0xa9   :  { %v424_v31 = vsub.f32 1.5, %v423_v25  ;;  %v313_v49 = vmul.f32 0.5, %v312_v22  ;;  %v529_v25 = vpack.c.bf16 %v511_v3, %v510_v60 }
  0xaa   :  { %v304_v1 = vsub.f32 1.5, %v303_v61  ;;  %v1658_v41 = vadd.f32 1e-05, %v206_v11  ;;  %v1660_v51 = vpop.eup %1127  ;;  %v199_v54 = vmul.f32 %v1653_v50, %v1653_v50 }
  0xab   :  { %v425_v52 = vmul.f32 %v1619_v40, %v424_v31  ;;  %v314_v38 = vsub.f32 1.5, %v313_v49  ;;  %v431_v30 = vmul.f32 %v1660_v51, %v1632_v46  ;;  %vm437_vm5 = vweird.f32 %v1660_v51 }
  0xac   :  { %1129 = vrsqrt.f32 %v1658_v41  ;;  %v305_v4 = vmul.f32 %v1626_v43, %v304_v1  ;;  %vm438_vm7 = vmor %vm436_vm6, %vm437_vm5  ;;  %vm326_vm9 = vweird.f32 %v1658_v41 }
  0xad   :  { %v315_v39 = vmul.f32 %v1634_v57, %v314_v38  ;;  %v159_v59 = vpop.xlane.xlu2 %158  ;;  %v135_v18 = vpop.xlane.xlu0 %134  ;;  %v429_v8 = vsel %vm1674_vm1, %v1619_v40, %v425_v52  ;;  %v432_v0 = vmul.f32 %v1660_v51, %v431_v30  ;;  %v198_v40 = vmul.f32 %v1663_v42, %v1663_v42 }
  0xae   :  { %v179_v36 = vmul.f32 0.0078125, %v159_v59  ;;  %v167_v13 = vmul.f32 0.0078125, %v135_v18  ;;  %v476_v11 = vmul.f32 %v429_v8, %v236_v12  ;;  %v237_v38 = vsub.f32 %v1230_v9, %v1585_v63 }
  0xaf   :  { %v319_v14 = vsel %vm1690_vm2, %v1634_v57, %v315_v39  ;;  %v157_v15 = vpop.xlane.xlu1 %156  ;;  %v433_v22 = vmul.f32 0.5, %v432_v0  ;;  %v309_v57 = vsel %vm1703_vm4, %v1626_v43, %v305_v4  ;;  %v227_v0 = vsub.f32 %v1256_v16, %v1651_v55 }
  0xb0   :  { %v219_v21 = vsub.f32 %v179_v36, %v199_v54  ;;  %v207_v33 = vsub.f32 %v167_v13, %v187_v28  ;;  %v178_v61 = vmul.f32 0.0078125, %v157_v15  ;;  %719 = vmatmul.bf16.gmra.mxu0 %v529_v25  ;;  %778 = vmatmul.bf16.gmra.mxu1 %v529_v25  ;;  %v465_v43 = vmul.f32 %v319_v14, %v225_v27 }
  0xb1   :  { %v434_v49 = vsub.f32 1.5, %v433_v22  ;;  %837 = vmatmul.bf16.gmra.mxu2 %v529_v25  ;;  %v464_v30 = vmul.f32 %v309_v57, %v224_v10  ;;  %v500_v46 = vmul.f32 %v1564_v48, %v476_v11  ;;  %v226_v36 = vsub.f32 %v1261_v17, %v1624_v53 }
  0xb2   :  { %v1713_v31 = vpop.eup %1129  ;;  %v1715_v2 = vadd.f32 1e-05, %v219_v21  ;;  %v1717_v1 = vadd.f32 1e-05, %v207_v33  ;;  %v218_v52 = vsub.f32 %v178_v61, %v198_v40  ;;  %v489_v59 = vmul.f32 %v1564_v48, %v465_v43 }
  0xb3   :  { %v321_v35 = vmul.f32 %v1713_v31, %v1658_v41  ;;  %v435_v12 = vmul.f32 %v1660_v51, %v434_v49  ;;  %v524_v25 = vadd.f32 %v1580_v44, %v500_v46  ;;  %vm327_vm8 = vweird.f32 %v1713_v31 }
  0xb4   :  { %1131 = vrsqrt.f32 %v1715_v2  ;;  %v1732_v7 = vadd.f32 1e-05, %v218_v52  ;;  %v513_v22 = vadd.f32 %v1580_v44, %v489_v59  ;;  %v239_v21 = vsub.f32 %v1275_v20, %v1653_v50  ;;  %vm1788_vm11 = vmor %vm326_vm9, %vm327_vm8 }
  0xb5   :  { %v322_v3 = vmul.f32 %v1713_v31, %v321_v35  ;;  %1133 = vrsqrt.f32 %v1717_v1  ;;  %v57_v32 = vpop.xlane.xlu0 %56  ;;  %v137_v28 = vpop.xlane.xlu2 %136  ;;  %v439_v9 = vsel %vm438_vm7, %v1660_v51, %v435_v12  ;;  %v488_v51 = vmul.f32 %v1564_v48, %v464_v30 }
  0xb6   :  { %v1735_v63 = vmul.f32 0.0078125, %v57_v32  ;;  %v168_v58 = vmul.f32 0.0078125, %v137_v28  ;;  %1135 = vrsqrt.f32 %v1732_v7  ;;  %v477_v54 = vmul.f32 %v439_v9, %v237_v38 }
  0xb7   :  { %v323_v4 = vmul.f32 0.5, %v322_v3  ;;  %v59_v39 = vpop.xlane.xlu1 %58  ;;  %v512_v35 = vadd.f32 %v1580_v44, %v488_v51  ;;  %vm456_vm10 = vweird.f32 %v1715_v2  ;;  %vm336_vm14 = vweird.f32 %v1717_v1 }
  0xb8   :  { %v188_v18 = vmul.f32 %v1735_v63, %v1735_v63  ;;  %v1742_v60 = vmul.f32 0.0078125, %v59_v39  ;;  %v501_v8 = vmul.f32 %v1564_v48, %v477_v54  ;;  %vm446_vm15 = vweird.f32 %v1732_v7 }
  0xb9   :  { %v324_v13 = vsub.f32 1.5, %v323_v4  ;;  %v530_v30 = vpack.c.bf16 %v513_v22, %v512_v35 }
  0xba   :  { %v1746_v5 = vpop.eup %1131  ;;  %v208_v14 = vsub.f32 %v168_v58, %v188_v18  ;;  %v525_v37 = vadd.f32 %v1580_v44, %v501_v8  ;;  %v189_v11 = vmul.f32 %v1742_v60, %v1742_v60 }
  0xbb   :  { %v1752_v40 = vpop.eup %1133  ;;  %v451_v15 = vmul.f32 %v1746_v5, %v1715_v2  ;;  %v325_v43 = vmul.f32 %v1713_v31, %v324_v13  ;;  %vm457_vm12 = vweird.f32 %v1746_v5 }
  0xbc   :  { %v331_v33 = vmul.f32 %v1752_v40, %v1717_v1  ;;  %v1764_v61 = vadd.f32 1e-05, %v208_v14  ;;  %v1766_v27 = vpop.eup %1135  ;;  %v1771_v52 = vpack.c.bf16 %v525_v37, %v524_v25  ;;  %vm337_vm13 = vweird.f32 %v1752_v40  ;;  %vm1810_vm0 = vmor %vm456_vm10, %vm457_vm12 }
  0xbd   :  { %v452_v57 = vmul.f32 %v1746_v5, %v451_v15  ;;  %v139_v49 = vpop.xlane.xlu0 %138  ;;  %v63_v10 = vpop.xlane.xlu2 %62  ;;  %v441_v12 = vmul.f32 %v1766_v27, %v1732_v7  ;;  %v329_v54 = vsel %vm1788_vm11, %v1713_v31, %v325_v43  ;;  %vm447_vm1 = vweird.f32 %v1766_v27  ;;  %vm338_vm2 = vmor %vm336_vm14, %vm337_vm13 }
  0xbe   :  { %v332_v38 = vmul.f32 %v1752_v40, %v331_v33  ;;  %1137 = vrsqrt.f32 %v1764_v61  ;;  %v169_v32 = vmul.f32 0.0078125, %v139_v49  ;;  %754 = vmatmul.bf16.vlgmr.msra.gmra.mxu3 %v1771_v52  ;;  %v1797_v18 = vmul.f32 0.0078125, %v63_v10  ;;  %vm448_vm3 = vmor %vm446_vm15, %vm447_vm1 }
  0xbf   :  { %v453_v3 = vmul.f32 0.5, %v452_v57  ;;  %v61_v28 = vpop.xlane.xlu1 %60  ;;  %v442_v58 = vmul.f32 %v1766_v27, %v441_v12  ;;  %1103 = vmatpush.bf16.msra.mxu3 %v1339_v47  ;;  %v466_v33 = vmul.f32 %v329_v54, %v226_v36  ;;  %v238_v49 = vsub.f32 %v1270_v19, %v1663_v42 }
  0xc0   :  { %v333_v9 = vmul.f32 0.5, %v332_v38  ;;  %v1783_v46 = vmul.f32 0.0078125, %v61_v28  ;;  %v209_v39 = vsub.f32 %v169_v32, %v189_v11  ;;  %724 = vmatmul.bf16.gmra.mxu0 %v530_v30  ;;  %783 = vmatmul.bf16.gmra.mxu1 %v530_v30  ;;  %vm346_vm5 = vweird.f32 %v1764_v61 }
  0xc1   :  { %v454_v41 = vsub.f32 1.5, %v453_v3  ;;  %v443_v47 = vmul.f32 0.5, %v442_v58  ;;  %842 = vmatmul.bf16.gmra.mxu2 %v530_v30  ;;  %v490_v43 = vmul.f32 %v1564_v48, %v466_v33 }
  0xc2   :  { %v334_v59 = vsub.f32 1.5, %v333_v9  ;;  %v1802_v51 = vadd.f32 1e-05, %v209_v39  ;;  %v190_v1 = vmul.f32 %v1783_v46, %v1783_v46 }
  0xc3   :  { %v455_v8 = vmul.f32 %v1746_v5, %v454_v41  ;;  %v444_v15 = vsub.f32 1.5, %v443_v47  ;;  %1104 = vmatpush.bf16.msra.mxu3 %v1363_v56  ;;  %v514_v30 = vadd.f32 %v1580_v44, %v490_v43 }
  0xc4   :  { %v1804_v13 = vpop.eup %1137  ;;  %v335_v14 = vmul.f32 %v1752_v40, %v334_v59  ;;  %1139 = vrsqrt.f32 %v1802_v51  ;;  %vm356_vm8 = vweird.f32 %v1802_v51 }
  0xc5   :  { %v459_v25 = vsel %vm1810_vm0, %v1746_v5, %v455_v8  ;;  %v341_v2 = vmul.f32 %v1804_v13, %v1764_v61  ;;  %v141_v37 = vpop.xlane.xlu0 %140  ;;  %v65_v22 = vpop.xlane.xlu2 %64  ;;  %v445_v57 = vmul.f32 %v1766_v27, %v444_v15  ;;  %v191_v5 = vmul.f32 %v1797_v18, %v1797_v18 }
  0xc6   :  { %v339_v56 = vsel %vm338_vm2, %v1752_v40, %v335_v14  ;;  %v170_v11 = vmul.f32 0.0078125, %v141_v37  ;;  %v479_v19 = vmul.f32 %v459_v25, %v239_v21  ;;  %v1849_v7 = vmul.f32 0.0078125, %v65_v22 }
  0xc7   :  { %v342_v10 = vmul.f32 %v1804_v13, %v341_v2  ;;  %v143_v17 = vpop.xlane.xlu1 %142  ;;  %v467_v53 = vmul.f32 %v339_v56, %v227_v0  ;;  %v449_v36 = vsel %vm448_vm3, %v1766_v27, %v445_v57  ;;  %1105 = vmatpush.bf16.msra.mxu3 %v1387_v6  ;;  %vm347_vm4 = vweird.f32 %v1804_v13 }
  0xc8   :  { %v210_v40 = vsub.f32 %v170_v11, %v190_v1  ;;  %v171_v35 = vmul.f32 0.0078125, %v143_v17  ;;  %v478_v55 = vmul.f32 %v449_v36, %v238_v49  ;;  %v503_v20 = vmul.f32 %v1564_v48, %v479_v19  ;;  %vm1883_vm6 = vmor %vm346_vm5, %vm347_vm4 }
  0xc9   :  { %v343_v42 = vmul.f32 0.5, %v342_v10  ;;  %v491_v38 = vmul.f32 %v1564_v48, %v467_v53  ;;  %v192_v50 = vmul.f32 %v1849_v7, %v1849_v7  ;;  %v228_v22 = vsub.f32 %v1288_v24, %v1735_v63 }
  0xca   :  { %v1853_v12 = vadd.f32 1e-05, %v210_v40  ;;  %v211_v16 = vsub.f32 %v171_v35, %v191_v5  ;;  %v1855_v0 = vpop.eup %1139  ;;  %v502_v9 = vmul.f32 %v1564_v48, %v478_v55  ;;  %v527_v47 = vadd.f32 %v1580_v44, %v503_v20 }
  0xcb   :  { %v344_v27 = vsub.f32 1.5, %v343_v42  ;;  %v515_v3 = vadd.f32 %v1580_v44, %v491_v38  ;;  %v351_v6 = vmul.f32 %v1855_v0, %v1802_v51  ;;  %1106 = vmatpush.bf16.msra.mxu3 %v1411_v23  ;;  %vm357_vm7 = vweird.f32 %v1855_v0 }
  0xcc   :  { %1141 = vrsqrt.f32 %v1853_v12  ;;  %v1866_v21 = vadd.f32 1e-05, %v211_v16  ;;  %v526_v59 = vadd.f32 %v1580_v44, %v502_v9  ;;  %vm1909_vm9 = vmor %vm356_vm8, %vm357_vm7  ;;  %vm366_vm13 = vweird.f32 %v1853_v12 }
  0xcd   :  { %v67_v32 = vpop.xlane.xlu0 %66  ;;  %v147_v28 = vpop.xlane.xlu2 %146  ;;  %v345_v58 = vmul.f32 %v1804_v13, %v344_v27  ;;  %v352_v4 = vmul.f32 %v1855_v0, %v351_v6  ;;  %v531_v54 = vpack.c.bf16 %v515_v3, %v514_v30 }
  0xce   :  { %v1872_v41 = vmul.f32 0.0078125, %v67_v32  ;;  %v173_v39 = vmul.f32 0.0078125, %v147_v28  ;;  %1143 = vrsqrt.f32 %v1866_v21  ;;  %v1888_v1 = vpack.c.bf16 %v527_v47, %v526_v59 }
  0xcf   :  { %v145_v23 = vpop.xlane.xlu1 %144  ;;  %v353_v8 = vmul.f32 0.5, %v352_v4  ;;  %1107 = vmatpush.bf16.msra.mxu3 %v1435_v34  ;;  %v349_v25 = vsel %vm1883_vm6, %v1804_v13, %v345_v58  ;;  %vm376_vm10 = vweird.f32 %v1866_v21 }
  0xd0   :  { %v193_v31 = vmul.f32 %v1872_v41, %v1872_v41  ;;  %v172_v14 = vmul.f32 0.0078125, %v145_v23  ;;  %729 = vmatmul.bf16.gmra.mxu0 %v531_v54  ;;  %788 = vmatmul.bf16.gmra.mxu1 %v531_v54  ;;  %v468_v10 = vmul.f32 %v349_v25, %v228_v22 }
  0xd1   :  { %v354_v2 = vsub.f32 1.5, %v353_v8  ;;  %847 = vmatmul.bf16.gmra.mxu2 %v531_v54  ;;  %759 = vmatmul.bf16.gmra.mxu3 %v1888_v1 }
  0xd2   :  { %v1890_v61 = vpop.eup %1141  ;;  %v213_v34 = vsub.f32 %v173_v39, %v193_v31  ;;  %v212_v37 = vsub.f32 %v172_v14, %v192_v50  ;;  %v492_v38 = vmul.f32 %v1564_v48, %v468_v10  ;;  %v1154_v14 = vld [vmem:[%s2207_s0 + $0x50] sm:$0xff] }
  0xd3   :  { %v361_v33 = vmul.f32 %v1890_v61, %v1853_v12  ;;  %v355_v56 = vmul.f32 %v1855_v0, %v354_v2  ;;  %1108 = vmatpush.bf16.msra.mxu3 %v1459_v45  ;;  %v229_v45 = vsub.f32 %v1295_v26, %v1742_v60  ;;  %vm367_vm12 = vweird.f32 %v1890_v61  ;;  %v1153_v12 = vld [vmem:[%s2207_s0 + $0x58] sm:$0xff] }
  0xd4   :  { %v1902_v57 = vadd.f32 1e-05, %v213_v34  ;;  %v1904_v5 = vadd.f32 1e-05, %v212_v37  ;;  %v1144_v13 = vpop.eup %1143  ;;  %v516_v32 = vadd.f32 %v1580_v44, %v492_v38  ;;  %vm368_vm15 = vmor %vm366_vm13, %vm367_vm12  ;;  %v230_v15 = vsub.f32 %v1154_v14, %v1783_v46 }
  0xd5   :  { %v362_v63 = vmul.f32 %v1890_v61, %v361_v33  ;;  %v69_v11 = vpop.xlane.xlu0 %68  ;;  %v149_v49 = vpop.xlane.xlu2 %148  ;;  %v359_v51 = vsel %vm1909_vm9, %v1855_v0, %v355_v56  ;;  %v371_v17 = vmul.f32 %v1144_v13, %v1866_v21  ;;  %vm377_vm11 = vweird.f32 %v1144_v13 }
  0xd6   :  { %1145 = vrsqrt.f32 %v1902_v57  ;;  %v1922_v35 = vmul.f32 0.0078125, %v69_v11  ;;  %v174_v19 = vmul.f32 0.0078125, %v149_v49  ;;  %v469_v43 = vmul.f32 %v359_v51, %v229_v45  ;;  %vm1950_vm14 = vmor %vm376_vm10, %vm377_vm11 }
  0xd7   :  { %v363_v53 = vmul.f32 0.5, %v362_v63  ;;  %1147 = vrsqrt.f32 %v1904_v5  ;;  %v71_v36 = vpop.xlane.xlu1 %70  ;;  %v372_v40 = vmul.f32 %v1144_v13, %v371_v17  ;;  %1109 = vmatpush.bf16.msra.mxu3 %v1487_v62  ;;  %v231_v21 = vsub.f32 %v1153_v12, %v1797_v18 }
  0xd8   :  { %v1925_v42 = vmul.f32 0.0078125, %v71_v36  ;;  %v194_v26 = vmul.f32 %v1922_v35, %v1922_v35  ;;  %v493_v60 = vmul.f32 %v1564_v48, %v469_v43  ;;  %vm396_vm0 = vweird.f32 %v1902_v57  ;;  %v1155_v36 = vld [vmem:[%s2207_s0 + $0x60] sm:$0xff] }
  0xd9   :  { %v364_v16 = vsub.f32 1.5, %v363_v53  ;;  %v373_v55 = vmul.f32 0.5, %v372_v40  ;;  %vm386_vm2 = vweird.f32 %v1904_v5  ;;  %v232_v40 = vsub.f32 %v1155_v36, %v1849_v7 }
  0xda   :  { %v214_v3 = vsub.f32 %v174_v19, %v194_v26  ;;  %v195_v6 = vmul.f32 %v1925_v42, %v1925_v42  ;;  %v517_v28 = vadd.f32 %v1580_v44, %v493_v60  ;;  %v1156_v19 = vld [vmem:[%s2207_s0 + $0x68] sm:$0xff] }
  0xdb   :  { %v374_v27 = vsub.f32 1.5, %v373_v55  ;;  %1110 = vmatpush.bf16.msra.mxu3 %v1511_v29  ;;  %v365_v30 = vmul.f32 %v1890_v61, %v364_v16  ;;  %v233_v43 = vsub.f32 %v1156_v19, %v1872_v41 }
  0xdc   :  { %v1931_v0 = vpop.eup %1145  ;;  %v532_v39 = vpack.c.bf16 %v517_v28, %v516_v32  ;;  %v1958_v47 = vadd.f32 1e-05, %v214_v3  ;;  %v1157_v28 = vld [vmem:[%s2207_s0 + $0x78] sm:$0xff] }
  0xdd   :  { %v1935_v62 = vpop.eup %1147  ;;  %v391_v20 = vmul.f32 %v1931_v0, %v1902_v57  ;;  %v151_v50 = vpop.xlane.xlu0 %150  ;;  %v375_v9 = vmul.f32 %v1144_v13, %v374_v27  ;;  %v369_v31 = vsel %vm368_vm15, %v1890_v61, %v365_v30  ;;  %vm397_vm1 = vweird.f32 %v1931_v0 }
  0xde   :  { %v381_v29 = vmul.f32 %v1935_v62, %v1904_v5  ;;  %v175_v4 = vmul.f32 0.0078125, %v151_v50  ;;  %1149 = vrsqrt.f32 %v1958_v47  ;;  %v470_v18 = vmul.f32 %v369_v31, %v230_v15  ;;  %vm1980_vm4 = vmor %vm396_vm0, %vm397_vm1 }
  0xdf   :  { %v379_v23 = vsel %vm1950_vm14, %v1144_v13, %v375_v9  ;;  %v392_v54 = vmul.f32 %v1931_v0, %v391_v20  ;;  %vm387_vm3 = vweird.f32 %v1935_v62  ;;  %vm406_vm8 = vweird.f32 %v1958_v47 }
  0xe0   :  { %v382_v59 = vmul.f32 %v1935_v62, %v381_v29  ;;  %v215_v8 = vsub.f32 %v175_v4, %v195_v6  ;;  %734 = vmatmul.bf16.gmra.mxu0 %v532_v39  ;;  %793 = vmatmul.bf16.gmra.mxu1 %v532_v39  ;;  %v471_v2 = vmul.f32 %v379_v23, %v231_v21  ;;  %vm388_vm5 = vmor %vm386_vm2, %vm387_vm3  ;;  %v1158_v29 = vld [vmem:[%s2207_s0 + $0x70] sm:$0xff] }
  0xe1   :  { %852 = vmatmul.bf16.gmra.mxu2 %v532_v39  ;;  %813 = vmatmul.bf16.vlgmr.msrb.gmra.mxu3 %v1771_v52  ;;  %v393_v34 = vmul.f32 0.5, %v392_v54  ;;  %v494_v56 = vmul.f32 %v1564_v48, %v470_v18  ;;  %v235_v30 = vsub.f32 %v1157_v28, %v1925_v42  ;;  %v234_v58 = vsub.f32 %v1158_v29, %v1922_v35 }
  0xe2   :  { %v255_v25 = vadd.f32 1e-05, %v215_v8  ;;  %v383_v37 = vmul.f32 0.5, %v382_v59  ;;  %v495_v22 = vmul.f32 %v1564_v48, %v471_v2 }
  0xe3   :  { %v394_v61 = vsub.f32 1.5, %v393_v34  ;;  %v518_v57 = vadd.f32 %v1580_v44, %v494_v56 }
  0xe4   :  { %1151 = vrsqrt.f32 %v255_v25  ;;  %v384_v33 = vsub.f32 1.5, %v383_v37  ;;  %v1150_v13 = vpop.eup %1149  ;;  %v519_v24 = vadd.f32 %v1580_v44, %v495_v22  ;;  %vm416_vm6 = vweird.f32 %v255_v25 }
  0xe5   :  { %v395_v63 = vmul.f32 %v1931_v0, %v394_v61  ;;  %v401_v51 = vmul.f32 %v1150_v13, %v1958_v47  ;;  %vm407_vm9 = vweird.f32 %v1150_v13 }
  0xe6   :  { %v385_v11 = vmul.f32 %v1935_v62, %v384_v33  ;;  %v533_v17 = vpack.c.bf16 %v519_v24, %v518_v57  ;;  %vm408_vm11 = vmor %vm406_vm8, %vm407_vm9 }
  0xe7   :  { %v399_v5 = vsel %vm1980_vm4, %v1931_v0, %v395_v63  ;;  %v402_v38 = vmul.f32 %v1150_v13, %v401_v51 }
  0xe8   :  { %v389_v45 = vsel %vm388_vm5, %v1935_v62, %v385_v11  ;;  %v473_v55 = vmul.f32 %v399_v5, %v233_v43 }
  0xe9   :  { %v472_v16 = vmul.f32 %v389_v45, %v232_v40  ;;  %v403_v60 = vmul.f32 0.5, %v402_v38 }
  0xea   :  { %v1152_v46 = vpop.eup %1151  ;;  %v497_v7 = vmul.f32 %v1564_v48, %v473_v55 }
  0xeb   :  { %v411_v49 = vmul.f32 %v1152_v46, %v255_v25  ;;  %v496_v0 = vmul.f32 %v1564_v48, %v472_v16  ;;  %v404_v3 = vsub.f32 1.5, %v403_v60  ;;  %vm417_vm7 = vweird.f32 %v1152_v46 }
  0xec   :  { %v521_v62 = vadd.f32 %v1580_v44, %v497_v7  ;;  %vm418_vm10 = vmor %vm416_vm6, %vm417_vm7 }
  0xed   :  { %v412_v53 = vmul.f32 %v1152_v46, %v411_v49  ;;  %v520_v41 = vadd.f32 %v1580_v44, %v496_v0  ;;  %v405_v6 = vmul.f32 %v1150_v13, %v404_v3 }
  0xef   :  { %v413_v26 = vmul.f32 0.5, %v412_v53  ;;  %v534_v50 = vpack.c.bf16 %v521_v62, %v520_v41  ;;  %v409_v9 = vsel %vm408_vm11, %v1150_v13, %v405_v6 }
  0xf0   :  { %739 = vmatmul.bf16.gmra.mxu0 %v533_v17  ;;  %798 = vmatmul.bf16.gmra.mxu1 %v533_v17  ;;  %v474_v39 = vmul.f32 %v409_v9, %v234_v58 }
  0xf1   :  { %857 = vmatmul.bf16.gmra.mxu2 %v533_v17  ;;  %818 = vmatmul.bf16.gmra.mxu3 %v1888_v1  ;;  %v414_v27 = vsub.f32 1.5, %v413_v26 }
  0xf2   :  { %v498_v54 = vmul.f32 %v1564_v48, %v474_v39 }
  0xf3   :  { %v415_v20 = vmul.f32 %v1152_v46, %v414_v27 }
  0xf4   :  { %v522_v59 = vadd.f32 %v1580_v44, %v498_v54 }
  0xf5   :  { %v419_v32 = vsel %vm418_vm10, %v1152_v46, %v415_v20 }
  0xf6   :  { %v475_v4 = vmul.f32 %v419_v32, %v235_v30 }
  0xf8   :  { %v499_v23 = vmul.f32 %v1564_v48, %v475_v4 }
  0xfa   :  { %v523_v42 = vadd.f32 %v1580_v44, %v499_v23 }
  0xfc   :  { %v535_v47 = vpack.c.bf16 %v523_v42, %v522_v59 }
 0x100   :  { %744 = vmatmul.bf16.gmra.mxu0 %v534_v50  ;;  %803 = vmatmul.bf16.gmra.mxu1 %v534_v50 }
 0x101   :  { %862 = vmatmul.bf16.gmra.mxu2 %v534_v50  ;;  %872 = vmatmul.bf16.vlgmr.msra.gmra.mxu3 %v1771_v52  ;;  %v570_v52 = vld [vmem:[%s2211_s2] sm:$0x7] }
 0x102   :  { %v2021_v35 = vperm.slane %v570_v52, 0  ;;  %v2023_v12 = vperm.slane %v570_v52, 1  ;;  %v2027_v14 = vperm.slane %v570_v52, 2 }
 0x110   :  { %749 = vmatmul.bf16.gmra.mxu0 %v535_v47  ;;  %808 = vmatmul.bf16.gmra.mxu1 %v535_v47 }
 0x111   :  { %867 = vmatmul.bf16.gmra.mxu2 %v535_v47  ;;  %877 = vmatmul.bf16.gmra.mxu3 %v1888_v1 }
 0x11d   :  { %v715_v21 = vpop.f32.mrf.mxu0  ;;  %v774_v48 = vpop.f32.mrf.mxu1 }
 0x11e   :  { %v716_v8 = vadd.f32 %v715_v21, %v2021_v35  ;;  %v775_v44 = vadd.f32 %v774_v48, %v2023_v12 }
 0x120   :  { %v883_v31 = vpack.c.bf16 %v775_v44, %v716_v8 }
 0x122   :  { %923 = vst [vmem:[%s2212_s5] sm:$0xff] %v883_v31 }
 0x124   :  { %v833_v1 = vpop.f32.mrf.mxu2 }
 0x125   :  { %v834_v15 = vadd.f32 %v833_v1, %v2027_v14  ;;  %v717_v25 = vpop.f32.mrf.mxu0  ;;  %v776_v2 = vpop.f32.mrf.mxu1 }
 0x126   :  { %v718_v34 = vadd.f32 %v717_v25, %v2021_v35  ;;  %v777_v37 = vadd.f32 %v776_v2, %v2023_v12 }
 0x127   :  { %v884_v18 = vpack.c.bf16 %v834_v15, %v834_v15 }
 0x128   :  { %v885_v22 = vpack.c.bf16 %v777_v37, %v718_v34 }
 0x129   :  { %924 = vst [vmem:[%s2212_s5 + $0x8] sm:$0xf] %v884_v18 }
 0x12a   :  { %925 = vst [vmem:[%s2212_s5 + $0xc] sm:$0xff] %v885_v22 }
 0x12c   :  { %v835_v61 = vpop.f32.mrf.mxu2 }
 0x12d   :  { %v836_v33 = vadd.f32 %v835_v61, %v2027_v14  ;;  %v720_v56 = vpop.f32.mrf.mxu0  ;;  %v779_v13 = vpop.f32.mrf.mxu1 }
 0x12e   :  { %v721_v46 = vadd.f32 %v720_v56, %v2021_v35  ;;  %v780_v24 = vadd.f32 %v779_v13, %v2023_v12 }
 0x12f   :  { %v886_v63 = vpack.c.bf16 %v836_v33, %v836_v33 }
 0x130   :  { %v887_v11 = vpack.c.bf16 %v780_v24, %v721_v46 }
 0x131   :  { %926 = vst [vmem:[%s2212_s5 + $0x14] sm:$0xf] %v886_v63 }
 0x132   :  { %927 = vst [vmem:[%s2212_s5 + $0x18] sm:$0xff] %v887_v11 }
 0x134   :  { %v838_v49 = vpop.f32.mrf.mxu2 }
 0x135   :  { %v839_v10 = vadd.f32 %v838_v49, %v2027_v14  ;;  %v722_v57 = vpop.f32.mrf.mxu0  ;;  %v781_v51 = vpop.f32.mrf.mxu1 }
 0x136   :  { %v723_v17 = vadd.f32 %v722_v57, %v2021_v35  ;;  %v782_v5 = vadd.f32 %v781_v51, %v2023_v12 }
 0x137   :  { %v888_v45 = vpack.c.bf16 %v839_v10, %v839_v10 }
 0x138   :  { %v889_v53 = vpack.c.bf16 %v782_v5, %v723_v17 }
 0x139   :  { %928 = vst [vmem:[%s2212_s5 + $0x20] sm:$0xf] %v888_v45 }
 0x13a   :  { %929 = vst [vmem:[%s2212_s5 + $0x24] sm:$0xff] %v889_v53 }
 0x13c   :  { %v840_v36 = vpop.f32.mrf.mxu2 }
 0x13d   :  { %v841_v40 = vadd.f32 %v840_v36, %v2027_v14  ;;  %v725_v19 = vpop.f32.mrf.mxu0  ;;  %v784_v43 = vpop.f32.mrf.mxu1 }
 0x13e   :  { %v726_v38 = vadd.f32 %v725_v19, %v2021_v35  ;;  %v785_v16 = vadd.f32 %v784_v43, %v2023_v12 }
 0x13f   :  { %v890_v55 = vpack.c.bf16 %v841_v40, %v841_v40 }
 0x140   :  { %v891_v26 = vpack.c.bf16 %v785_v16, %v726_v38 }
 0x141   :  { %930 = vst [vmem:[%s2212_s5 + $0x2c] sm:$0xf] %v890_v55  ;;  %v755_v60 = vpop.f32.mrf.mxu3 }
 0x142   :  { %931 = vst [vmem:[%s2212_s5 + $0x30] sm:$0xff] %v891_v26  ;;  %v756_v13 = vadd.f32 %v755_v60, %v2021_v35 }
 0x144   :  { %v843_v0 = vpop.f32.mrf.mxu2 }
 0x145   :  { %v844_v7 = vadd.f32 %v843_v0, %v2027_v14  ;;  %v727_v27 = vpop.f32.mrf.mxu0  ;;  %v786_v3 = vpop.f32.mrf.mxu1 }
 0x146   :  { %v728_v41 = vadd.f32 %v727_v27, %v2021_v35  ;;  %v787_v62 = vadd.f32 %v786_v3, %v2023_v12 }
 0x147   :  { %v892_v20 = vpack.c.bf16 %v844_v7, %v844_v7 }
 0x148   :  { %v893_v6 = vpack.c.bf16 %v787_v62, %v728_v41 }
 0x149   :  { %932 = vst [vmem:[%s2212_s5 + $0x38] sm:$0xf] %v892_v20  ;;  %v757_v50 = vpop.f32.mrf.mxu3 }
 0x14a   :  { %933 = vst [vmem:[%s2212_s5 + $0x3c] sm:$0xff] %v893_v6  ;;  %v758_v53 = vadd.f32 %v757_v50, %v2021_v35 }
 0x14c   :  { %v845_v32 = vpop.f32.mrf.mxu2 }
 0x14d   :  { %v846_v28 = vadd.f32 %v845_v32, %v2027_v14  ;;  %v730_v30 = vpop.f32.mrf.mxu0  ;;  %v789_v9 = vpop.f32.mrf.mxu1 }
 0x14e   :  { %v731_v29 = vadd.f32 %v730_v30, %v2021_v35  ;;  %v790_v58 = vadd.f32 %v789_v9, %v2023_v12 }
 0x14f   :  { %v894_v4 = vpack.c.bf16 %v846_v28, %v846_v28 }
 0x150   :  { %v895_v39 = vpack.c.bf16 %v790_v58, %v731_v29 }
 0x151   :  { %934 = vst [vmem:[%s2212_s5 + $0x44] sm:$0xf] %v894_v4 }
 0x152   :  { %935 = vst [vmem:[%s2212_s5 + $0x48] sm:$0xff] %v895_v39 }
 0x154   :  { %v848_v23 = vpop.f32.mrf.mxu2  ;;  %v760_v54 = vpop.f32.mrf.mxu3 }
 0x155   :  { %v849_v42 = vadd.f32 %v848_v23, %v2027_v14  ;;  %v732_v59 = vpop.f32.mrf.mxu0  ;;  %v791_v52 = vpop.f32.mrf.mxu1  ;;  %v761_v27 = vadd.f32 %v760_v54, %v2021_v35 }
 0x156   :  { %v733_v47 = vadd.f32 %v732_v59, %v2021_v35  ;;  %v792_v48 = vadd.f32 %v791_v52, %v2023_v12 }
 0x157   :  { %v896_v21 = vpack.c.bf16 %v849_v42, %v849_v42 }
 0x158   :  { %v897_v8 = vpack.c.bf16 %v792_v48, %v733_v47 }
 0x159   :  { %936 = vst [vmem:[%s2212_s5 + $0x50] sm:$0xf] %v896_v21 }
 0x15a   :  { %937 = vst [vmem:[%s2212_s5 + $0x54] sm:$0xff] %v897_v8 }
 0x15c   :  { %v850_v44 = vpop.f32.mrf.mxu2  ;;  %v762_v31 = vpop.f32.mrf.mxu3 }
 0x15d   :  { %v851_v1 = vadd.f32 %v850_v44, %v2027_v14  ;;  %v735_v15 = vpop.f32.mrf.mxu0  ;;  %v794_v2 = vpop.f32.mrf.mxu1  ;;  %v763_v58 = vadd.f32 %v762_v31, %v2021_v35 }
 0x15e   :  { %v736_v25 = vadd.f32 %v735_v15, %v2021_v35  ;;  %v795_v37 = vadd.f32 %v794_v2, %v2023_v12 }
 0x15f   :  { %v898_v34 = vpack.c.bf16 %v851_v1, %v851_v1 }
 0x160   :  { %v899_v18 = vpack.c.bf16 %v795_v37, %v736_v25 }
 0x161   :  { %938 = vst [vmem:[%s2212_s5 + $0x5c] sm:$0xf] %v898_v34 }
 0x162   :  { %939 = vst [vmem:[%s2212_s5 + $0x60] sm:$0xff] %v899_v18 }
 0x164   :  { %v853_v22 = vpop.f32.mrf.mxu2  ;;  %v814_v61 = vpop.f32.mrf.mxu3 }
 0x165   :  { %v854_v33 = vadd.f32 %v853_v22, %v2027_v14  ;;  %v737_v56 = vpop.f32.mrf.mxu0  ;;  %v815_v46 = vadd.f32 %v814_v61, %v2023_v12  ;;  %v796_v63 = vpop.f32.mrf.mxu1 }
 0x166   :  { %v738_v24 = vadd.f32 %v737_v56, %v2021_v35  ;;  %v797_v49 = vadd.f32 %v796_v63, %v2023_v12 }
 0x167   :  { %v900_v11 = vpack.c.bf16 %v854_v33, %v854_v33  ;;  %v915_v10 = vpack.c.bf16 %v815_v46, %v756_v13 }
 0x168   :  { %v901_v57 = vpack.c.bf16 %v797_v49, %v738_v24 }
 0x169   :  { %940 = vst [vmem:[%s2212_s5 + $0x68] sm:$0xf] %v900_v11 }
 0x16a   :  { %955 = vst [vmem:[%s2212_s5 + $0xc0] sm:$0xff] %v915_v10 }
 0x16b   :  { %941 = vst [vmem:[%s2212_s5 + $0x6c] sm:$0xff] %v901_v57 }
 0x16c   :  { %v855_v51 = vpop.f32.mrf.mxu2  ;;  %v816_v17 = vpop.f32.mrf.mxu3 }
 0x16d   :  { %v856_v5 = vadd.f32 %v855_v51, %v2027_v14  ;;  %v740_v45 = vpop.f32.mrf.mxu0  ;;  %v817_v36 = vadd.f32 %v816_v17, %v2023_v12  ;;  %v799_v19 = vpop.f32.mrf.mxu1 }
 0x16e   :  { %v741_v40 = vadd.f32 %v740_v45, %v2021_v35  ;;  %v800_v38 = vadd.f32 %v799_v19, %v2023_v12 }
 0x16f   :  { %v902_v43 = vpack.c.bf16 %v856_v5, %v856_v5  ;;  %v917_v16 = vpack.c.bf16 %v817_v36, %v758_v53 }
 0x170   :  { %v903_v55 = vpack.c.bf16 %v800_v38, %v741_v40 }
 0x171   :  { %942 = vst [vmem:[%s2212_s5 + $0x74] sm:$0xf] %v902_v43 }
 0x172   :  { %957 = vst [vmem:[%s2212_s5 + $0xcc] sm:$0xff] %v917_v16 }
 0x173   :  { %943 = vst [vmem:[%s2212_s5 + $0x78] sm:$0xff] %v903_v55 }
 0x174   :  { %v858_v26 = vpop.f32.mrf.mxu2  ;;  %v819_v60 = vpop.f32.mrf.mxu3 }
 0x175   :  { %v859_v0 = vadd.f32 %v858_v26, %v2027_v14  ;;  %v742_v7 = vpop.f32.mrf.mxu0  ;;  %v820_v3 = vadd.f32 %v819_v60, %v2023_v12  ;;  %v801_v62 = vpop.f32.mrf.mxu1 }
 0x176   :  { %v743_v41 = vadd.f32 %v742_v7, %v2021_v35  ;;  %v802_v6 = vadd.f32 %v801_v62, %v2023_v12 }
 0x177   :  { %v904_v20 = vpack.c.bf16 %v859_v0, %v859_v0  ;;  %v919_v50 = vpack.c.bf16 %v820_v3, %v761_v27 }
 0x178   :  { %v905_v32 = vpack.c.bf16 %v802_v6, %v743_v41 }
 0x179   :  { %944 = vst [vmem:[%s2212_s5 + $0x80] sm:$0xf] %v904_v20 }
 0x17a   :  { %959 = vst [vmem:[%s2212_s5 + $0xd8] sm:$0xff] %v919_v50 }
 0x17b   :  { %945 = vst [vmem:[%s2212_s5 + $0x84] sm:$0xff] %v905_v32 }
 0x17c   :  { %v860_v28 = vpop.f32.mrf.mxu2  ;;  %v821_v30 = vpop.f32.mrf.mxu3 }
 0x17d   :  { %v861_v9 = vadd.f32 %v860_v28, %v2027_v14  ;;  %v745_v29 = vpop.f32.mrf.mxu0  ;;  %v822_v4 = vadd.f32 %v821_v30, %v2023_v12  ;;  %v804_v23 = vpop.f32.mrf.mxu1 }
 0x17e   :  { %v746_v39 = vadd.f32 %v745_v29, %v2021_v35  ;;  %v805_v42 = vadd.f32 %v804_v23, %v2023_v12 }
 0x17f   :  { %v906_v54 = vpack.c.bf16 %v861_v9, %v861_v9  ;;  %v921_v59 = vpack.c.bf16 %v822_v4, %v763_v58 }
 0x180   :  { %v907_v47 = vpack.c.bf16 %v805_v42, %v746_v39 }
 0x181   :  { %946 = vst [vmem:[%s2212_s5 + $0x8c] sm:$0xf] %v906_v54 }
 0x182   :  { %961 = vst [vmem:[%s2212_s5 + $0xe4] sm:$0xff] %v921_v59 }
 0x183   :  { %947 = vst [vmem:[%s2212_s5 + $0x90] sm:$0xff] %v907_v47 }
 0x184   :  { %v863_v52 = vpop.f32.mrf.mxu2  ;;  %v873_v48 = vpop.f32.mrf.mxu3 }
 0x185   :  { %v864_v21 = vadd.f32 %v863_v52, %v2027_v14  ;;  %v747_v8 = vpop.f32.mrf.mxu0  ;;  %v874_v44 = vadd.f32 %v873_v48, %v2027_v14  ;;  %v806_v1 = vpop.f32.mrf.mxu1 }
 0x186   :  { %v748_v31 = vadd.f32 %v747_v8, %v2021_v35  ;;  %v807_v25 = vadd.f32 %v806_v1, %v2023_v12 }
 0x187   :  { %v908_v15 = vpack.c.bf16 %v864_v21, %v864_v21  ;;  %v916_v2 = vpack.c.bf16 %v874_v44, %v874_v44 }
 0x188   :  { %v909_v34 = vpack.c.bf16 %v807_v25, %v748_v31 }
 0x189   :  { %948 = vst [vmem:[%s2212_s5 + $0x98] sm:$0xf] %v908_v15 }
 0x18a   :  { %956 = vst [vmem:[%s2212_s5 + $0xc8] sm:$0xf] %v916_v2 }
 0x18b   :  { %949 = vst [vmem:[%s2212_s5 + $0x9c] sm:$0xff] %v909_v34 }
 0x18c   :  { %v865_v37 = vpop.f32.mrf.mxu2  ;;  %v875_v22 = vpop.f32.mrf.mxu3 }
 0x18d   :  { %v866_v18 = vadd.f32 %v865_v37, %v2027_v14  ;;  %v750_v61 = vpop.f32.mrf.mxu0  ;;  %v876_v33 = vadd.f32 %v875_v22, %v2027_v14  ;;  %v809_v13 = vpop.f32.mrf.mxu1 }
 0x18e   :  { %v751_v56 = vadd.f32 %v750_v61, %v2021_v35  ;;  %v810_v24 = vadd.f32 %v809_v13, %v2023_v12 }
 0x18f   :  { %v910_v46 = vpack.c.bf16 %v866_v18, %v866_v18  ;;  %v918_v63 = vpack.c.bf16 %v876_v33, %v876_v33 }
 0x190   :  { %v911_v11 = vpack.c.bf16 %v810_v24, %v751_v56 }
 0x191   :  { %950 = vst [vmem:[%s2212_s5 + $0xa4] sm:$0xf] %v910_v46 }
 0x192   :  { %958 = vst [vmem:[%s2212_s5 + $0xd4] sm:$0xf] %v918_v63 }
 0x193   :  { %951 = vst [vmem:[%s2212_s5 + $0xa8] sm:$0xff] %v911_v11 }
 0x194   :  { %v868_v49 = vpop.f32.mrf.mxu2  ;;  %v878_v57 = vpop.f32.mrf.mxu3 }
 0x195   :  { %v869_v10 = vadd.f32 %v868_v49, %v2027_v14  ;;  %v752_v51 = vpop.f32.mrf.mxu0  ;;  %v879_v17 = vadd.f32 %v878_v57, %v2027_v14  ;;  %v811_v45 = vpop.f32.mrf.mxu1 }
 0x196   :  { %v753_v5 = vadd.f32 %v752_v51, %v2021_v35  ;;  %v812_v36 = vadd.f32 %v811_v45, %v2023_v12 }
 0x197   :  { %v912_v53 = vpack.c.bf16 %v869_v10, %v869_v10  ;;  %v920_v40 = vpack.c.bf16 %v879_v17, %v879_v17 }
 0x198   :  { %v913_v19 = vpack.c.bf16 %v812_v36, %v753_v5 }
 0x199   :  { %952 = vst [vmem:[%s2212_s5 + $0xb0] sm:$0xf] %v912_v53 }
 0x19a   :  { %960 = vst [vmem:[%s2212_s5 + $0xe0] sm:$0xf] %v920_v40 }
 0x19b   :  { %953 = vst [vmem:[%s2212_s5 + $0xb4] sm:$0xff] %v913_v19 }
 0x19c   :  { %v870_v43 = vpop.f32.mrf.mxu2  ;;  %v880_v38 = vpop.f32.mrf.mxu3 }
 0x19d   :  { %v871_v35 = vadd.f32 %v870_v43, %v2027_v14  ;;  %v881_v12 = vadd.f32 %v880_v38, %v2027_v14 }
 0x19f   :  { %v914_v16 = vpack.c.bf16 %v871_v35, %v871_v35  ;;  %v922_v55 = vpack.c.bf16 %v881_v12, %v881_v12 }
 0x1a1   :  { %954 = vst [vmem:[%s2212_s5 + $0xbc] sm:$0xf] %v914_v16 }
 0x1a2   :  { %962 = vst [vmem:[%s2212_s5 + $0xec] sm:$0xf] %v922_v55 }

// kernel: uvit_forward.32
= control target key start
LH: loop header
LB: loop body
LE: loop exit
PB: predicated region body
PF: predicated region fallthrough
CT: control target
= control target key end

     0   :  { %s627_s1 = inlined_call_operand.vmem [shape: bf16[128,128], index: 1, kind: input, shape index: {}]   ;;  %s628_s2 = inlined_call_operand.vmem [shape: f32[1,128], index: 2, kind: input, shape index: {}]   ;;  %s629_s0 = inlined_call_operand.vmem [shape: bf16[160,128], index: 0, kind: input, shape index: {}]   ;;  %s630_s3 = inlined_call_operand.vmem [shape: f32[160,128], index: 3, kind: input, shape index: {}]   ;;  %s631_s4 = inlined_call_operand.vmem [shape: f32[160,128], index: 4, kind: output, shape index: {}]  }
   0x1   :  { %v377_v0 = vld [vmem:[%s627_s1 + $0x38] sm:$0xff]  ;;  %v376_v1 = vld [vmem:[%s627_s1 + $0x30] sm:$0xff]  ;;  %v375_v2 = vld [vmem:[%s627_s1 + $0x28] sm:$0xff] }
   0x2   :  { %379 = vmatpush.bf16.msra.mxu2 %v377_v0  ;;  %380 = vmatpush.bf16.msra.mxu3 %v377_v0  ;;  %v374_v3 = vld [vmem:[%s627_s1 + $0x20] sm:$0xff]  ;;  %v373_v4 = vld [vmem:[%s627_s1 + $0x18] sm:$0xff]  ;;  %v372_v5 = vld [vmem:[%s627_s1 + $0x10] sm:$0xff] }
   0x3   :  { %165 = vmatpush.bf16.msra.mxu0 %v377_v0  ;;  %378 = vmatpush.bf16.msra.mxu1 %v377_v0  ;;  %v371_v6 = vld [vmem:[%s627_s1 + $0x8] sm:$0xff]  ;;  %v370_v7 = vld [vmem:[%s627_s1] sm:$0xff]  ;;  %v367_v9 = vld [vmem:[%s629_s0 + $0x38] sm:$0xff] }
   0x4   :  { %v364_v8 = vld [vmem:[%s629_s0 + $0x20] sm:$0xff]  ;;  %v362_v11 = vld [vmem:[%s629_s0 + $0x10] sm:$0xff]  ;;  %v365_v12 = vld [vmem:[%s629_s0 + $0x28] sm:$0xff] }
   0x5   :  { %v360_v10 = vld [vmem:[%s629_s0] sm:$0xff]  ;;  %v361_v14 = vld [vmem:[%s629_s0 + $0x8] sm:$0xff]  ;;  %v363_v15 = vld [vmem:[%s629_s0 + $0x18] sm:$0xff] }
   0x6   :  { %382 = vmatpush.bf16.msra.mxu2 %v376_v1  ;;  %383 = vmatpush.bf16.msra.mxu3 %v376_v1  ;;  %v368_v13 = vld [vmem:[%s629_s0 + $0x40] sm:$0xff]  ;;  %v366_v16 = vld [vmem:[%s629_s0 + $0x30] sm:$0xff]  ;;  %v369_v17 = vld [vmem:[%s629_s0 + $0x48] sm:$0xff] }
   0x7   :  { %166 = vmatpush.bf16.msra.mxu0 %v376_v1  ;;  %381 = vmatpush.bf16.msra.mxu1 %v376_v1  ;;  %v485_v18 = vld [vmem:[%s628_s2] ss:$0 sm:$0xff]  ;;  %v238_v30 = vld [vmem:[%s630_s3 + $0x70] sm:$0xff]  ;;  %v225_v36 = vld [vmem:[%s630_s3 + $0x8] sm:$0xff] }
   0x8   :  { %v224_v20 = vld [vmem:[%s630_s3] sm:$0xff]  ;;  %v229_v38 = vld [vmem:[%s630_s3 + $0x28] sm:$0xff]  ;;  %v239_v46 = vld [vmem:[%s630_s3 + $0x78] sm:$0xff] }
   0x9   :  { %v228_v22 = vld [vmem:[%s630_s3 + $0x20] sm:$0xff]  ;;  %v233_v44 = vld [vmem:[%s630_s3 + $0x48] sm:$0xff]  ;;  %v226_v52 = vld [vmem:[%s630_s3 + $0x10] sm:$0xff] }
   0xa   :  { %385 = vmatpush.bf16.msra.mxu2 %v375_v2  ;;  %386 = vmatpush.bf16.msra.mxu3 %v375_v2  ;;  %v232_v28 = vld [vmem:[%s630_s3 + $0x40] sm:$0xff]  ;;  %v230_v54 = vld [vmem:[%s630_s3 + $0x30] sm:$0xff] }
   0xb   :  { %167 = vmatpush.bf16.msra.mxu0 %v375_v2  ;;  %384 = vmatpush.bf16.msra.mxu1 %v375_v2  ;;  %v234_v60 = vld [vmem:[%s630_s3 + $0x50] sm:$0xff]  ;;  %v240_v62 = vld [vmem:[%s630_s3 + $0x80] sm:$0xff] }
   0xe   :  { %388 = vmatpush.bf16.msra.mxu2 %v374_v3  ;;  %389 = vmatpush.bf16.msra.mxu3 %v374_v3 }
   0xf   :  { %168 = vmatpush.bf16.msra.mxu0 %v374_v3  ;;  %387 = vmatpush.bf16.msra.mxu1 %v374_v3 }
  0x12   :  { %391 = vmatpush.bf16.msra.mxu2 %v373_v4  ;;  %392 = vmatpush.bf16.msra.mxu3 %v373_v4 }
  0x13   :  { %169 = vmatpush.bf16.msra.mxu0 %v373_v4  ;;  %390 = vmatpush.bf16.msra.mxu1 %v373_v4  ;;  %v227_v4 = vld [vmem:[%s630_s3 + $0x18] sm:$0xff] }
  0x16   :  { %394 = vmatpush.bf16.msra.mxu2 %v372_v5  ;;  %395 = vmatpush.bf16.msra.mxu3 %v372_v5 }
  0x17   :  { %170 = vmatpush.bf16.msra.mxu0 %v372_v5  ;;  %393 = vmatpush.bf16.msra.mxu1 %v372_v5 }
  0x1a   :  { %397 = vmatpush.bf16.msra.mxu2 %v371_v6  ;;  %398 = vmatpush.bf16.msra.mxu3 %v371_v6 }
  0x1b   :  { %171 = vmatpush.bf16.msra.mxu0 %v371_v6  ;;  %396 = vmatpush.bf16.msra.mxu1 %v371_v6  ;;  %v231_v6 = vld [vmem:[%s630_s3 + $0x38] sm:$0xff] }
  0x1e   :  { %400 = vmatpush.bf16.msra.mxu2 %v370_v7  ;;  %401 = vmatpush.bf16.msra.mxu3 %v370_v7 }
  0x1f   :  { %172 = vmatpush.bf16.msra.mxu0 %v370_v7  ;;  %399 = vmatpush.bf16.msra.mxu1 %v370_v7 }
  0x21   :  { %193 = vmatmul.bf16.vlgmr.msra.gmra.mxu2 %v364_v8  ;;  %208 = vmatmul.bf16.vlgmr.msra.gmra.mxu3 %v367_v9 }
  0x22   :  { %173 = vmatmul.bf16.vlgmr.msra.gmra.mxu0 %v360_v10  ;;  %183 = vmatmul.bf16.vlgmr.msra.gmra.mxu1 %v362_v11 }
  0x31   :  { %198 = vmatmul.bf16.gmra.mxu2 %v365_v12  ;;  %213 = vmatmul.bf16.gmra.mxu3 %v368_v13  ;;  %v235_v12 = vld [vmem:[%s630_s3 + $0x58] sm:$0xff] }
  0x32   :  { %178 = vmatmul.bf16.gmra.mxu0 %v361_v14  ;;  %188 = vmatmul.bf16.gmra.mxu1 %v363_v15  ;;  %v241_v14 = vld [vmem:[%s630_s3 + $0x88] sm:$0xff] }
  0x41   :  { %203 = vmatmul.bf16.gmra.mxu2 %v366_v16  ;;  %218 = vmatmul.bf16.gmra.mxu3 %v369_v17 }
  0x9f   :  { %v174_v19 = vpop.f32.mrf.mxu0  ;;  %v184_v21 = vpop.f32.mrf.mxu1 }
  0xa0   :  { %v175_v23 = vadd.f32 %v485_v18, %v174_v19  ;;  %v185_v24 = vadd.f32 %v485_v18, %v184_v21  ;;  %v236_v21 = vld [vmem:[%s630_s3 + $0x60] sm:$0xff] }
  0xa2   :  { %v244_v25 = vadd.f32 %v224_v20, %v175_v23  ;;  %v248_v26 = vadd.f32 %v228_v22, %v185_v24  ;;  %v242_v23 = vld [vmem:[%s630_s3 + $0x90] sm:$0xff] }
  0xa4   :  { %v194_v27 = vpop.f32.mrf.mxu2  ;;  %v209_v29 = vpop.f32.mrf.mxu3  ;;  %264 = vst [vmem:[%s631_s4] sm:$0xff] %v244_v25 }
  0xa5   :  { %v195_v31 = vadd.f32 %v485_v18, %v194_v27  ;;  %v210_v32 = vadd.f32 %v485_v18, %v209_v29  ;;  %268 = vst [vmem:[%s631_s4 + $0x20] sm:$0xff] %v248_v26  ;;  %v237_v29 = vld [vmem:[%s630_s3 + $0x68] sm:$0xff] }
  0xa7   :  { %v252_v33 = vadd.f32 %v232_v28, %v195_v31  ;;  %v258_v34 = vadd.f32 %v238_v30, %v210_v32  ;;  %v176_v35 = vpop.f32.mrf.mxu0  ;;  %v186_v37 = vpop.f32.mrf.mxu1  ;;  %v243_v31 = vld [vmem:[%s630_s3 + $0x98] sm:$0xff] }
  0xa8   :  { %v177_v39 = vadd.f32 %v485_v18, %v176_v35  ;;  %v187_v40 = vadd.f32 %v485_v18, %v186_v37 }
  0xa9   :  { %272 = vst [vmem:[%s631_s4 + $0x40] sm:$0xff] %v252_v33 }
  0xaa   :  { %278 = vst [vmem:[%s631_s4 + $0x70] sm:$0xff] %v258_v34  ;;  %v245_v41 = vadd.f32 %v225_v36, %v177_v39  ;;  %v249_v42 = vadd.f32 %v229_v38, %v187_v40 }
  0xac   :  { %v196_v43 = vpop.f32.mrf.mxu2  ;;  %v211_v45 = vpop.f32.mrf.mxu3  ;;  %265 = vst [vmem:[%s631_s4 + $0x8] sm:$0xff] %v245_v41 }
  0xad   :  { %v197_v47 = vadd.f32 %v485_v18, %v196_v43  ;;  %v212_v48 = vadd.f32 %v485_v18, %v211_v45  ;;  %269 = vst [vmem:[%s631_s4 + $0x28] sm:$0xff] %v249_v42 }
  0xaf   :  { %v253_v49 = vadd.f32 %v233_v44, %v197_v47  ;;  %v259_v50 = vadd.f32 %v239_v46, %v212_v48  ;;  %v179_v51 = vpop.f32.mrf.mxu0  ;;  %v189_v53 = vpop.f32.mrf.mxu1 }
  0xb0   :  { %v180_v55 = vadd.f32 %v485_v18, %v179_v51  ;;  %v190_v56 = vadd.f32 %v485_v18, %v189_v53 }
  0xb1   :  { %273 = vst [vmem:[%s631_s4 + $0x48] sm:$0xff] %v253_v49 }
  0xb2   :  { %279 = vst [vmem:[%s631_s4 + $0x78] sm:$0xff] %v259_v50  ;;  %v246_v57 = vadd.f32 %v226_v52, %v180_v55  ;;  %v250_v58 = vadd.f32 %v230_v54, %v190_v56 }
  0xb4   :  { %v199_v59 = vpop.f32.mrf.mxu2  ;;  %v214_v61 = vpop.f32.mrf.mxu3  ;;  %266 = vst [vmem:[%s631_s4 + $0x10] sm:$0xff] %v246_v57 }
  0xb5   :  { %v200_v63 = vadd.f32 %v485_v18, %v199_v59  ;;  %v215_v0 = vadd.f32 %v485_v18, %v214_v61  ;;  %270 = vst [vmem:[%s631_s4 + $0x30] sm:$0xff] %v250_v58 }
  0xb7   :  { %v254_v1 = vadd.f32 %v234_v60, %v200_v63  ;;  %v260_v2 = vadd.f32 %v240_v62, %v215_v0  ;;  %v181_v3 = vpop.f32.mrf.mxu0  ;;  %v191_v5 = vpop.f32.mrf.mxu1 }
  0xb8   :  { %v182_v7 = vadd.f32 %v485_v18, %v181_v3  ;;  %v192_v8 = vadd.f32 %v485_v18, %v191_v5 }
  0xb9   :  { %274 = vst [vmem:[%s631_s4 + $0x50] sm:$0xff] %v254_v1 }
  0xba   :  { %280 = vst [vmem:[%s631_s4 + $0x80] sm:$0xff] %v260_v2  ;;  %v247_v9 = vadd.f32 %v227_v4, %v182_v7  ;;  %v251_v10 = vadd.f32 %v231_v6, %v192_v8 }
  0xbc   :  { %v201_v11 = vpop.f32.mrf.mxu2  ;;  %v216_v13 = vpop.f32.mrf.mxu3  ;;  %267 = vst [vmem:[%s631_s4 + $0x18] sm:$0xff] %v247_v9 }
  0xbd   :  { %v202_v15 = vadd.f32 %v485_v18, %v201_v11  ;;  %v217_v16 = vadd.f32 %v485_v18, %v216_v13  ;;  %271 = vst [vmem:[%s631_s4 + $0x38] sm:$0xff] %v251_v10 }
  0xbf   :  { %v255_v17 = vadd.f32 %v235_v12, %v202_v15  ;;  %v261_v19 = vadd.f32 %v241_v14, %v217_v16 }
  0xc1   :  { %275 = vst [vmem:[%s631_s4 + $0x58] sm:$0xff] %v255_v17 }
  0xc2   :  { %281 = vst [vmem:[%s631_s4 + $0x88] sm:$0xff] %v261_v19 }
  0xc4   :  { %v204_v20 = vpop.f32.mrf.mxu2  ;;  %v219_v22 = vpop.f32.mrf.mxu3 }
  0xc5   :  { %v205_v24 = vadd.f32 %v485_v18, %v204_v20  ;;  %v220_v25 = vadd.f32 %v485_v18, %v219_v22 }
  0xc7   :  { %v256_v26 = vadd.f32 %v236_v21, %v205_v24  ;;  %v262_v27 = vadd.f32 %v242_v23, %v220_v25 }
  0xc9   :  { %276 = vst [vmem:[%s631_s4 + $0x60] sm:$0xff] %v256_v26 }
  0xca   :  { %282 = vst [vmem:[%s631_s4 + $0x90] sm:$0xff] %v262_v27 }
  0xcc   :  { %v206_v28 = vpop.f32.mrf.mxu2  ;;  %v221_v30 = vpop.f32.mrf.mxu3 }
  0xcd   :  { %v207_v32 = vadd.f32 %v485_v18, %v206_v28  ;;  %v222_v33 = vadd.f32 %v485_v18, %v221_v30 }
  0xcf   :  { %v257_v34 = vadd.f32 %v237_v29, %v207_v32  ;;  %v263_v35 = vadd.f32 %v243_v31, %v222_v33 }
  0xd1   :  { %277 = vst [vmem:[%s631_s4 + $0x68] sm:$0xff] %v257_v34 }
  0xd2   :  { %283 = vst [vmem:[%s631_s4 + $0x98] sm:$0xff] %v263_v35 }

// kernel: uvit_forward.34
= control target key start
LH: loop header
LB: loop body
LE: loop exit
PB: predicated region body
PF: predicated region fallthrough
CT: control target
= control target key end

     0   :  { %s1684_s1 = inlined_call_operand.vmem [shape: bf16[512,128], index: 1, kind: input, shape index: {}]   ;;  %s1685_s2 = inlined_call_operand.vmem [shape: f32[1,128], index: 2, kind: input, shape index: {}]   ;;  %s1686_s0 = inlined_call_operand.vmem [shape: bf16[160,512], index: 0, kind: input, shape index: {}]   ;;  %s1687_s3 = inlined_call_operand.vmem [shape: f32[160,128], index: 3, kind: input, shape index: {}]   ;;  %s1688_s4 = inlined_call_operand.vmem [shape: f32[160,128], index: 4, kind: output, shape index: {}]  }
   0x1   :  { %v1152_v0 = vld [vmem:[%s1684_s1 + $0x38] sm:$0xff]  ;;  %v1151_v4 = vld [vmem:[%s1684_s1 + $0x30] sm:$0xff]  ;;  %v1150_v8 = vld [vmem:[%s1684_s1 + $0x28] sm:$0xff] }
   0x2   :  { %v1160_v1 = vld [vmem:[%s1684_s1 + $0x78] sm:$0xff]  ;;  %517 = vmatpush.bf16.msra.mxu0 %v1152_v0  ;;  %v1159_v5 = vld [vmem:[%s1684_s1 + $0x70] sm:$0xff]  ;;  %v1158_v9 = vld [vmem:[%s1684_s1 + $0x68] sm:$0xff] }
   0x3   :  { %v1168_v2 = vld [vmem:[%s1684_s1 + $0xb8] sm:$0xff]  ;;  %576 = vmatpush.bf16.msra.mxu1 %v1160_v1  ;;  %v1167_v6 = vld [vmem:[%s1684_s1 + $0xb0] sm:$0xff]  ;;  %v1166_v10 = vld [vmem:[%s1684_s1 + $0xa8] sm:$0xff] }
   0x4   :  { %v1176_v3 = vld [vmem:[%s1684_s1 + $0xf8] sm:$0xff]  ;;  %635 = vmatpush.bf16.msra.mxu2 %v1168_v2  ;;  %v1175_v7 = vld [vmem:[%s1684_s1 + $0xf0] sm:$0xff]  ;;  %v1174_v11 = vld [vmem:[%s1684_s1 + $0xe8] sm:$0xff] }
   0x5   :  { %694 = vmatpush.bf16.msra.mxu3 %v1176_v3  ;;  %v1149_v12 = vld [vmem:[%s1684_s1 + $0x20] sm:$0xff]  ;;  %v1148_v16 = vld [vmem:[%s1684_s1 + $0x18] sm:$0xff]  ;;  %v1147_v20 = vld [vmem:[%s1684_s1 + $0x10] sm:$0xff] }
   0x6   :  { %518 = vmatpush.bf16.msra.mxu0 %v1151_v4  ;;  %v1157_v13 = vld [vmem:[%s1684_s1 + $0x60] sm:$0xff]  ;;  %v1156_v17 = vld [vmem:[%s1684_s1 + $0x58] sm:$0xff]  ;;  %v1155_v21 = vld [vmem:[%s1684_s1 + $0x50] sm:$0xff] }
   0x7   :  { %577 = vmatpush.bf16.msra.mxu1 %v1159_v5  ;;  %v1165_v14 = vld [vmem:[%s1684_s1 + $0xa0] sm:$0xff]  ;;  %v1164_v18 = vld [vmem:[%s1684_s1 + $0x98] sm:$0xff]  ;;  %v1163_v22 = vld [vmem:[%s1684_s1 + $0x90] sm:$0xff] }
   0x8   :  { %636 = vmatpush.bf16.msra.mxu2 %v1167_v6  ;;  %v1173_v15 = vld [vmem:[%s1684_s1 + $0xe0] sm:$0xff]  ;;  %v1172_v19 = vld [vmem:[%s1684_s1 + $0xd8] sm:$0xff]  ;;  %v1171_v23 = vld [vmem:[%s1684_s1 + $0xd0] sm:$0xff] }
   0x9   :  { %695 = vmatpush.bf16.msra.mxu3 %v1175_v7  ;;  %v1146_v24 = vld [vmem:[%s1684_s1 + $0x8] sm:$0xff]  ;;  %v1145_v28 = vld [vmem:[%s1684_s1] sm:$0xff]  ;;  %v1107_v33 = vld [vmem:[%s1686_s0 + $0xc] sm:$0xf0] }
   0xa   :  { %519 = vmatpush.bf16.msra.mxu0 %v1150_v8  ;;  %v1154_v25 = vld [vmem:[%s1684_s1 + $0x48] sm:$0xff]  ;;  %v1153_v29 = vld [vmem:[%s1684_s1 + $0x40] sm:$0xff]  ;;  %v821_v35 = vld [vmem:[%s1686_s0 + $0x10] sm:$0xf0] }
   0xb   :  { %578 = vmatpush.bf16.msra.mxu1 %v1158_v9  ;;  %v1162_v26 = vld [vmem:[%s1684_s1 + $0x88] sm:$0xff]  ;;  %v1161_v30 = vld [vmem:[%s1684_s1 + $0x80] sm:$0xff]  ;;  %v1108_v37 = vld [vmem:[%s1686_s0 + $0x14] sm:$0xf0] }
   0xc   :  { %637 = vmatpush.bf16.msra.mxu2 %v1166_v10  ;;  %v1170_v27 = vld [vmem:[%s1684_s1 + $0xc8] sm:$0xff]  ;;  %v1169_v31 = vld [vmem:[%s1684_s1 + $0xc0] sm:$0xff]  ;;  %v829_v39 = vld [vmem:[%s1686_s0 + $0x18] sm:$0xf0] }
   0xd   :  { %696 = vmatpush.bf16.msra.mxu3 %v1174_v11  ;;  %v819_v32 = vld [vmem:[%s1686_s0] sm:$0xf]  ;;  %v1105_v34 = vld [vmem:[%s1686_s0 + $0x4] sm:$0xf]  ;;  %v827_v36 = vld [vmem:[%s1686_s0 + $0x8] sm:$0xf] }
   0xe   :  { %520 = vmatpush.bf16.msra.mxu0 %v1149_v12  ;;  %v1106_v38 = vld [vmem:[%s1686_s0 + $0xc] sm:$0xf]  ;;  %v820_v40 = vor.u32 %v1107_v33, %v819_v32  ;;  %v824_v41 = vor.u32 %v1105_v34, %v821_v35  ;;  %v828_v42 = vor.u32 %v1108_v37, %v827_v36  ;;  %v835_v44 = vld [vmem:[%s1686_s0 + $0x20] sm:$0xf]  ;;  %v1111_v45 = vld [vmem:[%s1686_s0 + $0x2c] sm:$0xf0] }
   0xf   :  { %579 = vmatpush.bf16.msra.mxu1 %v1157_v13  ;;  %v832_v43 = vor.u32 %v1106_v38, %v829_v39  ;;  %v1109_v46 = vld [vmem:[%s1686_s0 + $0x24] sm:$0xf]  ;;  %v837_v47 = vld [vmem:[%s1686_s0 + $0x30] sm:$0xf0]  ;;  %v843_v48 = vld [vmem:[%s1686_s0 + $0x28] sm:$0xf]  ;;  %v836_v52 = vor.u32 %v1111_v45, %v835_v44 }
  0x10   :  { %638 = vmatpush.bf16.msra.mxu2 %v1165_v14  ;;  %v1112_v49 = vld [vmem:[%s1686_s0 + $0x34] sm:$0xf0]  ;;  %v1110_v50 = vld [vmem:[%s1686_s0 + $0x2c] sm:$0xf]  ;;  %v845_v51 = vld [vmem:[%s1686_s0 + $0x38] sm:$0xf0]  ;;  %v840_v53 = vor.u32 %v1109_v46, %v837_v47 }
  0x11   :  { %697 = vmatpush.bf16.msra.mxu3 %v1173_v15  ;;  %v844_v54 = vor.u32 %v1112_v49, %v843_v48  ;;  %v848_v55 = vor.u32 %v1110_v50, %v845_v51  ;;  %v851_v56 = vld [vmem:[%s1686_s0 + $0x40] sm:$0xf]  ;;  %v1115_v57 = vld [vmem:[%s1686_s0 + $0x4c] sm:$0xf0]  ;;  %v1113_v58 = vld [vmem:[%s1686_s0 + $0x44] sm:$0xf] }
  0x12   :  { %521 = vmatpush.bf16.msra.mxu0 %v1148_v16  ;;  %v853_v59 = vld [vmem:[%s1686_s0 + $0x50] sm:$0xf0]  ;;  %v859_v60 = vld [vmem:[%s1686_s0 + $0x48] sm:$0xf]  ;;  %v1116_v61 = vld [vmem:[%s1686_s0 + $0x54] sm:$0xf0]  ;;  %v852_v0 = vor.u32 %v1115_v57, %v851_v56 }
  0x13   :  { %580 = vmatpush.bf16.msra.mxu1 %v1156_v17  ;;  %v1114_v62 = vld [vmem:[%s1686_s0 + $0x4c] sm:$0xf]  ;;  %v861_v63 = vld [vmem:[%s1686_s0 + $0x58] sm:$0xf0]  ;;  %v856_v1 = vor.u32 %v1113_v58, %v853_v59  ;;  %v860_v2 = vor.u32 %v1116_v61, %v859_v60  ;;  %v867_v4 = vld [vmem:[%s1686_s0 + $0x60] sm:$0xf] }
  0x14   :  { %639 = vmatpush.bf16.msra.mxu2 %v1164_v18  ;;  %v864_v3 = vor.u32 %v1114_v62, %v861_v63  ;;  %v1119_v5 = vld [vmem:[%s1686_s0 + $0x6c] sm:$0xf0]  ;;  %v1117_v6 = vld [vmem:[%s1686_s0 + $0x64] sm:$0xf]  ;;  %v869_v7 = vld [vmem:[%s1686_s0 + $0x70] sm:$0xf0] }
  0x15   :  { %698 = vmatpush.bf16.msra.mxu3 %v1172_v19  ;;  %v875_v8 = vld [vmem:[%s1686_s0 + $0x68] sm:$0xf]  ;;  %v1120_v9 = vld [vmem:[%s1686_s0 + $0x74] sm:$0xf0]  ;;  %v1118_v10 = vld [vmem:[%s1686_s0 + $0x6c] sm:$0xf]  ;;  %v868_v12 = vor.u32 %v1119_v5, %v867_v4  ;;  %v872_v13 = vor.u32 %v1117_v6, %v869_v7 }
  0x16   :  { %522 = vmatpush.bf16.msra.mxu0 %v1147_v20  ;;  %v877_v11 = vld [vmem:[%s1686_s0 + $0x78] sm:$0xf0]  ;;  %v876_v14 = vor.u32 %v1120_v9, %v875_v8  ;;  %v883_v16 = vld [vmem:[%s1686_s0 + $0x80] sm:$0xf]  ;;  %v1123_v17 = vld [vmem:[%s1686_s0 + $0x8c] sm:$0xf0] }
  0x17   :  { %581 = vmatpush.bf16.msra.mxu1 %v1155_v21  ;;  %v880_v15 = vor.u32 %v1118_v10, %v877_v11  ;;  %v1121_v18 = vld [vmem:[%s1686_s0 + $0x84] sm:$0xf]  ;;  %v885_v19 = vld [vmem:[%s1686_s0 + $0x90] sm:$0xf0]  ;;  %v891_v20 = vld [vmem:[%s1686_s0 + $0x88] sm:$0xf] }
  0x18   :  { %640 = vmatpush.bf16.msra.mxu2 %v1163_v22  ;;  %v1124_v21 = vld [vmem:[%s1686_s0 + $0x94] sm:$0xf0]  ;;  %v1122_v22 = vld [vmem:[%s1686_s0 + $0x8c] sm:$0xf]  ;;  %v907_v32 = vld [vmem:[%s1686_s0 + $0xa8] sm:$0xf] }
  0x19   :  { %699 = vmatpush.bf16.msra.mxu3 %v1171_v23  ;;  %v893_v23 = vld [vmem:[%s1686_s0 + $0x98] sm:$0xf0]  ;;  %v1128_v33 = vld [vmem:[%s1686_s0 + $0xb4] sm:$0xf0]  ;;  %v1126_v34 = vld [vmem:[%s1686_s0 + $0xac] sm:$0xf] }
  0x1a   :  { %523 = vmatpush.bf16.msra.mxu0 %v1146_v24  ;;  %v884_v24 = vor.u32 %v1123_v17, %v883_v16  ;;  %v909_v35 = vld [vmem:[%s1686_s0 + $0xb8] sm:$0xf0]  ;;  %v908_v38 = vor.u32 %v1128_v33, %v907_v32  ;;  %v923_v44 = vld [vmem:[%s1686_s0 + $0xc8] sm:$0xf]  ;;  %v1132_v45 = vld [vmem:[%s1686_s0 + $0xd4] sm:$0xf0] }
  0x1b   :  { %582 = vmatpush.bf16.msra.mxu1 %v1154_v25  ;;  %v888_v25 = vor.u32 %v1121_v18, %v885_v19  ;;  %v912_v39 = vor.u32 %v1126_v34, %v909_v35  ;;  %v1130_v46 = vld [vmem:[%s1686_s0 + $0xcc] sm:$0xf]  ;;  %v925_v47 = vld [vmem:[%s1686_s0 + $0xd8] sm:$0xf0]  ;;  %v924_v50 = vor.u32 %v1132_v45, %v923_v44  ;;  %v939_v56 = vld [vmem:[%s1686_s0 + $0xe8] sm:$0xf] }
  0x1c   :  { %641 = vmatpush.bf16.msra.mxu2 %v1162_v26  ;;  %v892_v26 = vor.u32 %v1124_v21, %v891_v20  ;;  %v928_v51 = vor.u32 %v1130_v46, %v925_v47  ;;  %v1136_v57 = vld [vmem:[%s1686_s0 + $0xf4] sm:$0xf0]  ;;  %v1134_v58 = vld [vmem:[%s1686_s0 + $0xec] sm:$0xf]  ;;  %v941_v59 = vld [vmem:[%s1686_s0 + $0xf8] sm:$0xf0] }
  0x1d   :  { %700 = vmatpush.bf16.msra.mxu3 %v1170_v27  ;;  %v896_v27 = vor.u32 %v1122_v22, %v893_v23  ;;  %v940_v62 = vor.u32 %v1136_v57, %v939_v56  ;;  %v944_v63 = vor.u32 %v1134_v58, %v941_v59  ;;  %v949_v4 = vld [vmem:[%s1686_s0 + $0x110] sm:$0xf0]  ;;  %v955_v5 = vld [vmem:[%s1686_s0 + $0x108] sm:$0xf]  ;;  %v1140_v6 = vld [vmem:[%s1686_s0 + $0x114] sm:$0xf0] }
  0x1e   :  { %524 = vmatpush.bf16.msra.mxu0 %v1145_v28  ;;  %v899_v28 = vld [vmem:[%s1686_s0 + $0xa0] sm:$0xf]  ;;  %v1138_v7 = vld [vmem:[%s1686_s0 + $0x10c] sm:$0xf]  ;;  %v957_v8 = vld [vmem:[%s1686_s0 + $0x118] sm:$0xf0] }
  0x1f   :  { %583 = vmatpush.bf16.msra.mxu1 %v1153_v29  ;;  %v1127_v29 = vld [vmem:[%s1686_s0 + $0xac] sm:$0xf0]  ;;  %v753_v22 = vld [vmem:[%s1687_s3] sm:$0xff]  ;;  %v1142_v32 = vld [vmem:[%s1686_s0 + $0x12c] sm:$0xf] }
  0x20   :  { %642 = vmatpush.bf16.msra.mxu2 %v1161_v30  ;;  %v1125_v30 = vld [vmem:[%s1686_s0 + $0xa4] sm:$0xf]  ;;  %v900_v36 = vor.u32 %v1127_v29, %v899_v28  ;;  %v965_v29 = vld [vmem:[%s1686_s0 + $0x130] sm:$0xf0]  ;;  %v973_v33 = vld [vmem:[%s1686_s0 + $0x138] sm:$0xf0] }
  0x21   :  { %701 = vmatpush.bf16.msra.mxu3 %v1169_v31  ;;  %525 = vmatmul.bf16.vlgmr.msra.gmra.mxu0 %v820_v40  ;;  %v901_v31 = vld [vmem:[%s1686_s0 + $0xb0] sm:$0xf0]  ;;  %v915_v40 = vld [vmem:[%s1686_s0 + $0xc0] sm:$0xf]  ;;  %v1141_v28 = vld [vmem:[%s1686_s0 + $0x124] sm:$0xf] }
  0x22   :  { %584 = vmatmul.bf16.vlgmr.msra.gmra.mxu1 %v824_v41  ;;  %v904_v37 = vor.u32 %v1125_v30, %v901_v31  ;;  %v1131_v41 = vld [vmem:[%s1686_s0 + $0xcc] sm:$0xf0]  ;;  %v971_v30 = vld [vmem:[%s1686_s0 + $0x128] sm:$0xf]  ;;  %v1144_v31 = vld [vmem:[%s1686_s0 + $0x134] sm:$0xf0] }
  0x23   :  { %643 = vmatmul.bf16.vlgmr.msra.gmra.mxu2 %v828_v42  ;;  %v1129_v42 = vld [vmem:[%s1686_s0 + $0xc4] sm:$0xf]  ;;  %v916_v48 = vor.u32 %v1131_v41, %v915_v40  ;;  %v754_v44 = vld [vmem:[%s1687_s3 + $0x8] sm:$0xff] }
  0x24   :  { %702 = vmatmul.bf16.vlgmr.msra.gmra.mxu3 %v832_v43  ;;  %v917_v43 = vld [vmem:[%s1686_s0 + $0xd0] sm:$0xf0] }
  0x25   :  { %v920_v49 = vor.u32 %v1129_v42, %v917_v43  ;;  %v972_v42 = vor.u32 %v1144_v31, %v971_v30  ;;  %v976_v43 = vor.u32 %v1142_v32, %v973_v33  ;;  %v759_v31 = vld [vmem:[%s1687_s3 + $0x30] sm:$0xff] }
  0x31   :  { %530 = vmatmul.bf16.gmra.mxu0 %v836_v52  ;;  %v931_v52 = vld [vmem:[%s1686_s0 + $0xe0] sm:$0xf] }
  0x32   :  { %589 = vmatmul.bf16.gmra.mxu1 %v840_v53  ;;  %v1135_v53 = vld [vmem:[%s1686_s0 + $0xec] sm:$0xf0] }
  0x33   :  { %648 = vmatmul.bf16.gmra.mxu2 %v844_v54  ;;  %v1133_v54 = vld [vmem:[%s1686_s0 + $0xe4] sm:$0xf]  ;;  %v932_v60 = vor.u32 %v1135_v53, %v931_v52 }
  0x34   :  { %707 = vmatmul.bf16.gmra.mxu3 %v848_v55  ;;  %v933_v55 = vld [vmem:[%s1686_s0 + $0xf0] sm:$0xf0] }
  0x35   :  { %v936_v61 = vor.u32 %v1133_v54, %v933_v55  ;;  %v755_v54 = vld [vmem:[%s1687_s3 + $0x10] sm:$0xff] }
  0x41   :  { %535 = vmatmul.bf16.gmra.mxu0 %v852_v0  ;;  %v1494_v0 = vld [vmem:[%s1685_s2] ss:$0 sm:$0xff] }
  0x42   :  { %594 = vmatmul.bf16.gmra.mxu1 %v856_v1  ;;  %v947_v1 = vld [vmem:[%s1686_s0 + $0x100] sm:$0xf] }
  0x43   :  { %653 = vmatmul.bf16.gmra.mxu2 %v860_v2  ;;  %v1139_v2 = vld [vmem:[%s1686_s0 + $0x10c] sm:$0xf0] }
  0x44   :  { %712 = vmatmul.bf16.gmra.mxu3 %v864_v3  ;;  %v1137_v3 = vld [vmem:[%s1686_s0 + $0x104] sm:$0xf]  ;;  %v948_v9 = vor.u32 %v1139_v2, %v947_v1  ;;  %v756_v1 = vld [vmem:[%s1687_s3 + $0x18] sm:$0xff] }
  0x45   :  { %v952_v10 = vor.u32 %v1137_v3, %v949_v4 }
  0x51   :  { %540 = vmatmul.bf16.gmra.mxu0 %v868_v12 }
  0x52   :  { %599 = vmatmul.bf16.gmra.mxu1 %v872_v13  ;;  %v956_v13 = vor.u32 %v1140_v6, %v955_v5 }
  0x53   :  { %658 = vmatmul.bf16.gmra.mxu2 %v876_v14  ;;  %v960_v14 = vor.u32 %v1138_v7, %v957_v8 }
  0x54   :  { %717 = vmatmul.bf16.gmra.mxu3 %v880_v15 }
  0x61   :  { %545 = vmatmul.bf16.gmra.mxu0 %v884_v24 }
  0x62   :  { %604 = vmatmul.bf16.gmra.mxu1 %v888_v25  ;;  %v963_v25 = vld [vmem:[%s1686_s0 + $0x120] sm:$0xf] }
  0x63   :  { %663 = vmatmul.bf16.gmra.mxu2 %v892_v26  ;;  %v1143_v26 = vld [vmem:[%s1686_s0 + $0x12c] sm:$0xf0] }
  0x64   :  { %722 = vmatmul.bf16.gmra.mxu3 %v896_v27 }
  0x71   :  { %550 = vmatmul.bf16.gmra.mxu0 %v900_v36 }
  0x72   :  { %609 = vmatmul.bf16.gmra.mxu1 %v904_v37  ;;  %v964_v37 = vor.u32 %v1143_v26, %v963_v25 }
  0x73   :  { %668 = vmatmul.bf16.gmra.mxu2 %v908_v38  ;;  %v968_v38 = vor.u32 %v1141_v28, %v965_v29 }
  0x74   :  { %727 = vmatmul.bf16.gmra.mxu3 %v912_v39 }
  0x81   :  { %555 = vmatmul.bf16.gmra.mxu0 %v916_v48 }
  0x82   :  { %614 = vmatmul.bf16.gmra.mxu1 %v920_v49 }
  0x83   :  { %673 = vmatmul.bf16.gmra.mxu2 %v924_v50 }
  0x84   :  { %732 = vmatmul.bf16.gmra.mxu3 %v928_v51 }
  0x91   :  { %560 = vmatmul.bf16.gmra.mxu0 %v932_v60 }
  0x92   :  { %619 = vmatmul.bf16.gmra.mxu1 %v936_v61 }
  0x93   :  { %678 = vmatmul.bf16.gmra.mxu2 %v940_v62 }
  0x94   :  { %737 = vmatmul.bf16.gmra.mxu3 %v944_v63 }
  0x9e   :  { %v526_v11 = vpop.f32.mrf.mxu0 }
  0x9f   :  { %v585_v12 = vpop.f32.mrf.mxu1  ;;  %v527_v15 = vadd.f32 %v1494_v0, %v526_v11  ;;  %v757_v11 = vld [vmem:[%s1687_s3 + $0x20] sm:$0xff] }
  0xa1   :  { %565 = vmatmul.bf16.gmra.mxu0 %v948_v9  ;;  %v586_v16 = vadd.f32 %v585_v12, %v527_v15 }
  0xa2   :  { %624 = vmatmul.bf16.gmra.mxu1 %v952_v10 }
  0xa3   :  { %683 = vmatmul.bf16.gmra.mxu2 %v956_v13 }
  0xa4   :  { %742 = vmatmul.bf16.gmra.mxu3 %v960_v14 }
  0xa6   :  { %v644_v17 = vpop.f32.mrf.mxu2  ;;  %v528_v20 = vpop.f32.mrf.mxu0 }
  0xa7   :  { %v703_v18 = vpop.f32.mrf.mxu3  ;;  %v645_v19 = vadd.f32 %v644_v17, %v586_v16  ;;  %v587_v21 = vpop.f32.mrf.mxu1  ;;  %v529_v24 = vadd.f32 %v1494_v0, %v528_v20 }
  0xa9   :  { %v704_v23 = vadd.f32 %v703_v18, %v645_v19  ;;  %v588_v34 = vadd.f32 %v587_v21, %v529_v24  ;;  %v758_v21 = vld [vmem:[%s1687_s3 + $0x28] sm:$0xff] }
  0xab   :  { %v773_v27 = vadd.f32 %v753_v22, %v704_v23 }
  0xad   :  { %793 = vst [vmem:[%s1688_s4] sm:$0xff] %v773_v27 }
  0xae   :  { %v646_v35 = vpop.f32.mrf.mxu2  ;;  %v531_v40 = vpop.f32.mrf.mxu0 }
  0xaf   :  { %v705_v36 = vpop.f32.mrf.mxu3  ;;  %v647_v39 = vadd.f32 %v646_v35, %v588_v34  ;;  %v590_v41 = vpop.f32.mrf.mxu1  ;;  %v532_v45 = vadd.f32 %v1494_v0, %v531_v40 }
  0xb1   :  { %v706_v46 = vadd.f32 %v705_v36, %v647_v39  ;;  %570 = vmatmul.bf16.gmra.mxu0 %v964_v37  ;;  %v591_v48 = vadd.f32 %v590_v41, %v532_v45  ;;  %v760_v41 = vld [vmem:[%s1687_s3 + $0x38] sm:$0xff] }
  0xb2   :  { %629 = vmatmul.bf16.gmra.mxu1 %v968_v38 }
  0xb3   :  { %v774_v47 = vadd.f32 %v754_v44, %v706_v46  ;;  %688 = vmatmul.bf16.gmra.mxu2 %v972_v42 }
  0xb4   :  { %747 = vmatmul.bf16.gmra.mxu3 %v976_v43 }
  0xb5   :  { %794 = vst [vmem:[%s1688_s4 + $0x8] sm:$0xff] %v774_v47 }
  0xb6   :  { %v649_v49 = vpop.f32.mrf.mxu2  ;;  %v533_v52 = vpop.f32.mrf.mxu0 }
  0xb7   :  { %v708_v50 = vpop.f32.mrf.mxu3  ;;  %v650_v51 = vadd.f32 %v649_v49, %v591_v48  ;;  %v592_v53 = vpop.f32.mrf.mxu1  ;;  %v534_v56 = vadd.f32 %v1494_v0, %v533_v52 }
  0xb9   :  { %v709_v55 = vadd.f32 %v708_v50, %v650_v51  ;;  %v593_v58 = vadd.f32 %v592_v53, %v534_v56  ;;  %v761_v51 = vld [vmem:[%s1687_s3 + $0x40] sm:$0xff] }
  0xbb   :  { %v775_v57 = vadd.f32 %v755_v54, %v709_v55 }
  0xbd   :  { %795 = vst [vmem:[%s1688_s4 + $0x10] sm:$0xff] %v775_v57 }
  0xbe   :  { %v651_v59 = vpop.f32.mrf.mxu2  ;;  %v536_v62 = vpop.f32.mrf.mxu0 }
  0xbf   :  { %v710_v60 = vpop.f32.mrf.mxu3  ;;  %v652_v61 = vadd.f32 %v651_v59, %v593_v58  ;;  %v595_v63 = vpop.f32.mrf.mxu1  ;;  %v537_v2 = vadd.f32 %v1494_v0, %v536_v62 }
  0xc1   :  { %v711_v3 = vadd.f32 %v710_v60, %v652_v61  ;;  %v596_v5 = vadd.f32 %v595_v63, %v537_v2  ;;  %v762_v61 = vld [vmem:[%s1687_s3 + $0x48] sm:$0xff] }
  0xc3   :  { %v776_v4 = vadd.f32 %v756_v1, %v711_v3 }
  0xc5   :  { %796 = vst [vmem:[%s1688_s4 + $0x18] sm:$0xff] %v776_v4 }
  0xc6   :  { %v654_v6 = vpop.f32.mrf.mxu2  ;;  %v538_v9 = vpop.f32.mrf.mxu0 }
  0xc7   :  { %v713_v7 = vpop.f32.mrf.mxu3  ;;  %v655_v8 = vadd.f32 %v654_v6, %v596_v5  ;;  %v597_v10 = vpop.f32.mrf.mxu1  ;;  %v539_v13 = vadd.f32 %v1494_v0, %v538_v9 }
  0xc9   :  { %v714_v12 = vadd.f32 %v713_v7, %v655_v8  ;;  %v598_v15 = vadd.f32 %v597_v10, %v539_v13  ;;  %v763_v8 = vld [vmem:[%s1687_s3 + $0x50] sm:$0xff] }
  0xcb   :  { %v777_v14 = vadd.f32 %v757_v11, %v714_v12 }
  0xcd   :  { %797 = vst [vmem:[%s1688_s4 + $0x20] sm:$0xff] %v777_v14 }
  0xce   :  { %v656_v16 = vpop.f32.mrf.mxu2  ;;  %v541_v19 = vpop.f32.mrf.mxu0 }
  0xcf   :  { %v715_v17 = vpop.f32.mrf.mxu3  ;;  %v657_v18 = vadd.f32 %v656_v16, %v598_v15  ;;  %v600_v20 = vpop.f32.mrf.mxu1  ;;  %v542_v22 = vadd.f32 %v1494_v0, %v541_v19 }
  0xd1   :  { %v716_v23 = vadd.f32 %v715_v17, %v657_v18  ;;  %v601_v25 = vadd.f32 %v600_v20, %v542_v22  ;;  %v764_v18 = vld [vmem:[%s1687_s3 + $0x58] sm:$0xff] }
  0xd3   :  { %v778_v24 = vadd.f32 %v758_v21, %v716_v23 }
  0xd5   :  { %798 = vst [vmem:[%s1688_s4 + $0x28] sm:$0xff] %v778_v24 }
  0xd6   :  { %v659_v26 = vpop.f32.mrf.mxu2  ;;  %v543_v29 = vpop.f32.mrf.mxu0 }
  0xd7   :  { %v718_v27 = vpop.f32.mrf.mxu3  ;;  %v660_v28 = vadd.f32 %v659_v26, %v601_v25  ;;  %v602_v30 = vpop.f32.mrf.mxu1  ;;  %v544_v33 = vadd.f32 %v1494_v0, %v543_v29 }
  0xd9   :  { %v719_v32 = vadd.f32 %v718_v27, %v660_v28  ;;  %v603_v35 = vadd.f32 %v602_v30, %v544_v33  ;;  %v765_v28 = vld [vmem:[%s1687_s3 + $0x60] sm:$0xff] }
  0xdb   :  { %v779_v34 = vadd.f32 %v759_v31, %v719_v32 }
  0xdd   :  { %799 = vst [vmem:[%s1688_s4 + $0x30] sm:$0xff] %v779_v34 }
  0xde   :  { %v661_v36 = vpop.f32.mrf.mxu2  ;;  %v546_v39 = vpop.f32.mrf.mxu0 }
  0xdf   :  { %v720_v37 = vpop.f32.mrf.mxu3  ;;  %v662_v38 = vadd.f32 %v661_v36, %v603_v35  ;;  %v605_v40 = vpop.f32.mrf.mxu1  ;;  %v547_v42 = vadd.f32 %v1494_v0, %v546_v39 }
  0xe1   :  { %v721_v43 = vadd.f32 %v720_v37, %v662_v38  ;;  %v606_v45 = vadd.f32 %v605_v40, %v547_v42  ;;  %v766_v38 = vld [vmem:[%s1687_s3 + $0x68] sm:$0xff] }
  0xe3   :  { %v780_v44 = vadd.f32 %v760_v41, %v721_v43 }
  0xe5   :  { %800 = vst [vmem:[%s1688_s4 + $0x38] sm:$0xff] %v780_v44 }
  0xe6   :  { %v664_v46 = vpop.f32.mrf.mxu2  ;;  %v548_v49 = vpop.f32.mrf.mxu0 }
  0xe7   :  { %v723_v47 = vpop.f32.mrf.mxu3  ;;  %v665_v48 = vadd.f32 %v664_v46, %v606_v45  ;;  %v607_v50 = vpop.f32.mrf.mxu1  ;;  %v549_v53 = vadd.f32 %v1494_v0, %v548_v49 }
  0xe9   :  { %v724_v52 = vadd.f32 %v723_v47, %v665_v48  ;;  %v608_v55 = vadd.f32 %v607_v50, %v549_v53  ;;  %v767_v48 = vld [vmem:[%s1687_s3 + $0x70] sm:$0xff] }
  0xeb   :  { %v781_v54 = vadd.f32 %v761_v51, %v724_v52 }
  0xed   :  { %801 = vst [vmem:[%s1688_s4 + $0x40] sm:$0xff] %v781_v54 }
  0xee   :  { %v666_v56 = vpop.f32.mrf.mxu2  ;;  %v551_v59 = vpop.f32.mrf.mxu0 }
  0xef   :  { %v725_v57 = vpop.f32.mrf.mxu3  ;;  %v667_v58 = vadd.f32 %v666_v56, %v608_v55  ;;  %v610_v60 = vpop.f32.mrf.mxu1  ;;  %v552_v62 = vadd.f32 %v1494_v0, %v551_v59 }
  0xf1   :  { %v726_v63 = vadd.f32 %v725_v57, %v667_v58  ;;  %v611_v2 = vadd.f32 %v610_v60, %v552_v62  ;;  %v768_v58 = vld [vmem:[%s1687_s3 + $0x78] sm:$0xff] }
  0xf3   :  { %v782_v1 = vadd.f32 %v762_v61, %v726_v63 }
  0xf5   :  { %802 = vst [vmem:[%s1688_s4 + $0x48] sm:$0xff] %v782_v1 }
  0xf6   :  { %v669_v3 = vpop.f32.mrf.mxu2  ;;  %v553_v6 = vpop.f32.mrf.mxu0 }
  0xf7   :  { %v728_v4 = vpop.f32.mrf.mxu3  ;;  %v670_v5 = vadd.f32 %v669_v3, %v611_v2  ;;  %v612_v7 = vpop.f32.mrf.mxu1  ;;  %v554_v10 = vadd.f32 %v1494_v0, %v553_v6 }
  0xf9   :  { %v729_v9 = vadd.f32 %v728_v4, %v670_v5  ;;  %v613_v12 = vadd.f32 %v612_v7, %v554_v10  ;;  %v769_v4 = vld [vmem:[%s1687_s3 + $0x80] sm:$0xff] }
  0xfb   :  { %v783_v11 = vadd.f32 %v763_v8, %v729_v9 }
  0xfd   :  { %803 = vst [vmem:[%s1688_s4 + $0x50] sm:$0xff] %v783_v11 }
  0xfe   :  { %v671_v13 = vpop.f32.mrf.mxu2  ;;  %v556_v16 = vpop.f32.mrf.mxu0 }
  0xff   :  { %v730_v14 = vpop.f32.mrf.mxu3  ;;  %v672_v15 = vadd.f32 %v671_v13, %v613_v12  ;;  %v615_v17 = vpop.f32.mrf.mxu1  ;;  %v557_v19 = vadd.f32 %v1494_v0, %v556_v16 }
 0x101   :  { %v731_v20 = vadd.f32 %v730_v14, %v672_v15  ;;  %v616_v22 = vadd.f32 %v615_v17, %v557_v19  ;;  %v770_v14 = vld [vmem:[%s1687_s3 + $0x88] sm:$0xff] }
 0x103   :  { %v784_v21 = vadd.f32 %v764_v18, %v731_v20 }
 0x105   :  { %804 = vst [vmem:[%s1688_s4 + $0x58] sm:$0xff] %v784_v21 }
 0x106   :  { %v674_v23 = vpop.f32.mrf.mxu2  ;;  %v558_v26 = vpop.f32.mrf.mxu0 }
 0x107   :  { %v733_v24 = vpop.f32.mrf.mxu3  ;;  %v675_v25 = vadd.f32 %v674_v23, %v616_v22  ;;  %v617_v27 = vpop.f32.mrf.mxu1  ;;  %v559_v30 = vadd.f32 %v1494_v0, %v558_v26 }
 0x109   :  { %v734_v29 = vadd.f32 %v733_v24, %v675_v25  ;;  %v618_v32 = vadd.f32 %v617_v27, %v559_v30  ;;  %v771_v24 = vld [vmem:[%s1687_s3 + $0x90] sm:$0xff] }
 0x10b   :  { %v785_v31 = vadd.f32 %v765_v28, %v734_v29 }
 0x10d   :  { %805 = vst [vmem:[%s1688_s4 + $0x60] sm:$0xff] %v785_v31 }
 0x10e   :  { %v676_v33 = vpop.f32.mrf.mxu2  ;;  %v561_v36 = vpop.f32.mrf.mxu0 }
 0x10f   :  { %v735_v34 = vpop.f32.mrf.mxu3  ;;  %v677_v35 = vadd.f32 %v676_v33, %v618_v32  ;;  %v620_v37 = vpop.f32.mrf.mxu1  ;;  %v562_v39 = vadd.f32 %v1494_v0, %v561_v36  ;;  %v772_v33 = vld [vmem:[%s1687_s3 + $0x98] sm:$0xff] }
 0x111   :  { %v736_v40 = vadd.f32 %v735_v34, %v677_v35  ;;  %v621_v42 = vadd.f32 %v620_v37, %v562_v39 }
 0x113   :  { %v786_v41 = vadd.f32 %v766_v38, %v736_v40 }
 0x115   :  { %806 = vst [vmem:[%s1688_s4 + $0x68] sm:$0xff] %v786_v41 }
 0x116   :  { %v679_v43 = vpop.f32.mrf.mxu2  ;;  %v563_v46 = vpop.f32.mrf.mxu0 }
 0x117   :  { %v738_v44 = vpop.f32.mrf.mxu3  ;;  %v680_v45 = vadd.f32 %v679_v43, %v621_v42  ;;  %v622_v47 = vpop.f32.mrf.mxu1  ;;  %v564_v50 = vadd.f32 %v1494_v0, %v563_v46 }
 0x119   :  { %v739_v49 = vadd.f32 %v738_v44, %v680_v45  ;;  %v623_v52 = vadd.f32 %v622_v47, %v564_v50 }
 0x11b   :  { %v787_v51 = vadd.f32 %v767_v48, %v739_v49 }
 0x11d   :  { %807 = vst [vmem:[%s1688_s4 + $0x70] sm:$0xff] %v787_v51 }
 0x11e   :  { %v681_v53 = vpop.f32.mrf.mxu2  ;;  %v566_v56 = vpop.f32.mrf.mxu0 }
 0x11f   :  { %v740_v54 = vpop.f32.mrf.mxu3  ;;  %v682_v55 = vadd.f32 %v681_v53, %v623_v52  ;;  %v625_v57 = vpop.f32.mrf.mxu1  ;;  %v567_v59 = vadd.f32 %v1494_v0, %v566_v56 }
 0x121   :  { %v741_v60 = vadd.f32 %v740_v54, %v682_v55  ;;  %v626_v62 = vadd.f32 %v625_v57, %v567_v59 }
 0x123   :  { %v788_v61 = vadd.f32 %v768_v58, %v741_v60 }
 0x125   :  { %808 = vst [vmem:[%s1688_s4 + $0x78] sm:$0xff] %v788_v61 }
 0x126   :  { %v684_v63 = vpop.f32.mrf.mxu2  ;;  %v568_v3 = vpop.f32.mrf.mxu0 }
 0x127   :  { %v743_v1 = vpop.f32.mrf.mxu3  ;;  %v685_v2 = vadd.f32 %v684_v63, %v626_v62  ;;  %v627_v5 = vpop.f32.mrf.mxu1  ;;  %v569_v7 = vadd.f32 %v1494_v0, %v568_v3 }
 0x129   :  { %v744_v6 = vadd.f32 %v743_v1, %v685_v2  ;;  %v628_v9 = vadd.f32 %v627_v5, %v569_v7 }
 0x12b   :  { %v789_v8 = vadd.f32 %v769_v4, %v744_v6 }
 0x12d   :  { %809 = vst [vmem:[%s1688_s4 + $0x80] sm:$0xff] %v789_v8 }
 0x12e   :  { %v686_v10 = vpop.f32.mrf.mxu2  ;;  %v571_v13 = vpop.f32.mrf.mxu0 }
 0x12f   :  { %v745_v11 = vpop.f32.mrf.mxu3  ;;  %v687_v12 = vadd.f32 %v686_v10, %v628_v9  ;;  %v572_v15 = vadd.f32 %v1494_v0, %v571_v13  ;;  %v630_v17 = vpop.f32.mrf.mxu1 }
 0x131   :  { %v746_v16 = vadd.f32 %v745_v11, %v687_v12  ;;  %v631_v19 = vadd.f32 %v630_v17, %v572_v15 }
 0x133   :  { %v790_v18 = vadd.f32 %v770_v14, %v746_v16 }
 0x135   :  { %810 = vst [vmem:[%s1688_s4 + $0x88] sm:$0xff] %v790_v18 }
 0x136   :  { %v689_v20 = vpop.f32.mrf.mxu2  ;;  %v573_v23 = vpop.f32.mrf.mxu0 }
 0x137   :  { %v748_v21 = vpop.f32.mrf.mxu3  ;;  %v690_v22 = vadd.f32 %v689_v20, %v631_v19  ;;  %v574_v26 = vadd.f32 %v1494_v0, %v573_v23  ;;  %v632_v28 = vpop.f32.mrf.mxu1 }
 0x139   :  { %v749_v25 = vadd.f32 %v748_v21, %v690_v22  ;;  %v633_v29 = vadd.f32 %v632_v28, %v574_v26 }
 0x13b   :  { %v791_v27 = vadd.f32 %v771_v24, %v749_v25 }
 0x13d   :  { %811 = vst [vmem:[%s1688_s4 + $0x90] sm:$0xff] %v791_v27 }
 0x13e   :  { %v691_v30 = vpop.f32.mrf.mxu2 }
 0x13f   :  { %v692_v31 = vadd.f32 %v691_v30, %v633_v29  ;;  %v750_v32 = vpop.f32.mrf.mxu3 }
 0x141   :  { %v751_v34 = vadd.f32 %v750_v32, %v692_v31 }
 0x143   :  { %v792_v35 = vadd.f32 %v772_v33, %v751_v34 }
 0x145   :  { %812 = vst [vmem:[%s1688_s4 + $0x98] sm:$0xff] %v792_v35 }

// kernel: uvit_forward.45
= control target key start
LH: loop header
LB: loop body
LE: loop exit
PB: predicated region body
PF: predicated region fallthrough
CT: control target
= control target key end

     0   :  { %s718_s1 = inlined_call_operand.vmem [shape: bf16[256,128], index: 1, kind: input, shape index: {}]   ;;  %s719_s2 = inlined_call_operand.vmem [shape: f32[1,128], index: 2, kind: input, shape index: {}]   ;;  %s720_s0 = inlined_call_operand.vmem [shape: f32[160,256], index: 0, kind: input, shape index: {}]   ;;  %s721_s3 = inlined_call_operand.vmem [shape: f32[160,128], index: 3, kind: output, shape index: {}]  }
   0x1   :  { %v419_v0 = vld [vmem:[%s718_s1 + $0x38] sm:$0xff]  ;;  %v418_v2 = vld [vmem:[%s718_s1 + $0x30] sm:$0xff]  ;;  %v417_v4 = vld [vmem:[%s718_s1 + $0x28] sm:$0xff] }
   0x2   :  { %v427_v1 = vld [vmem:[%s718_s1 + $0x78] sm:$0xff]  ;;  %206 = vmatpush.bf16.msra.mxu0 %v419_v0  ;;  %428 = vmatpush.bf16.msra.mxu2 %v419_v0  ;;  %v426_v3 = vld [vmem:[%s718_s1 + $0x70] sm:$0xff]  ;;  %v425_v5 = vld [vmem:[%s718_s1 + $0x68] sm:$0xff] }
   0x3   :  { %265 = vmatpush.bf16.msra.mxu1 %v427_v1  ;;  %436 = vmatpush.bf16.msra.mxu3 %v427_v1  ;;  %v416_v6 = vld [vmem:[%s718_s1 + $0x20] sm:$0xff]  ;;  %v415_v8 = vld [vmem:[%s718_s1 + $0x18] sm:$0xff]  ;;  %v414_v10 = vld [vmem:[%s718_s1 + $0x10] sm:$0xff] }
   0x4   :  { %v424_v7 = vld [vmem:[%s718_s1 + $0x60] sm:$0xff]  ;;  %v423_v9 = vld [vmem:[%s718_s1 + $0x58] sm:$0xff]  ;;  %v422_v11 = vld [vmem:[%s718_s1 + $0x50] sm:$0xff] }
   0x5   :  { %v413_v12 = vld [vmem:[%s718_s1 + $0x8] sm:$0xff]  ;;  %v412_v14 = vld [vmem:[%s718_s1] sm:$0xff]  ;;  %v16_v17 = vld [vmem:[%s720_s0 + $0x10] sm:$0xff] }
   0x6   :  { %207 = vmatpush.bf16.msra.mxu0 %v418_v2  ;;  %429 = vmatpush.bf16.msra.mxu2 %v418_v2  ;;  %v421_v13 = vld [vmem:[%s718_s1 + $0x48] sm:$0xff]  ;;  %v420_v15 = vld [vmem:[%s718_s1 + $0x40] sm:$0xff]  ;;  %v36_v19 = vld [vmem:[%s720_s0 + $0xb0] sm:$0xff] }
   0x7   :  { %266 = vmatpush.bf16.msra.mxu1 %v426_v3  ;;  %437 = vmatpush.bf16.msra.mxu3 %v426_v3  ;;  %v14_v16 = vld [vmem:[%s720_s0] sm:$0xff]  ;;  %v15_v20 = vld [vmem:[%s720_s0 + $0x8] sm:$0xff]  ;;  %v17_v21 = vld [vmem:[%s720_s0 + $0x18] sm:$0xff] }
   0x8   :  { %v34_v18 = vld [vmem:[%s720_s0 + $0xa0] sm:$0xff]  ;;  %v35_v22 = vld [vmem:[%s720_s0 + $0xa8] sm:$0xff]  ;;  %v37_v23 = vld [vmem:[%s720_s0 + $0xb8] sm:$0xff]  ;;  %v54_v24 = vpack.c.bf16 %v16_v17, %v14_v16  ;;  %v55_v26 = vpack.c.bf16 %v17_v21, %v15_v20 }
   0x9   :  { %v64_v25 = vpack.c.bf16 %v36_v19, %v34_v18  ;;  %v65_v27 = vpack.c.bf16 %v37_v23, %v35_v22  ;;  %v18_v28 = vld [vmem:[%s720_s0 + $0x20] sm:$0xff]  ;;  %v20_v29 = vld [vmem:[%s720_s0 + $0x30] sm:$0xff]  ;;  %v19_v32 = vld [vmem:[%s720_s0 + $0x28] sm:$0xff] }
   0xa   :  { %208 = vmatpush.bf16.msra.mxu0 %v417_v4  ;;  %430 = vmatpush.bf16.msra.mxu2 %v417_v4  ;;  %v38_v30 = vld [vmem:[%s720_s0 + $0xc0] sm:$0xff]  ;;  %v40_v31 = vld [vmem:[%s720_s0 + $0xd0] sm:$0xff]  ;;  %v21_v33 = vld [vmem:[%s720_s0 + $0x38] sm:$0xff]  ;;  %v56_v36 = vpack.c.bf16 %v20_v29, %v18_v28 }
   0xb   :  { %267 = vmatpush.bf16.msra.mxu1 %v425_v5  ;;  %438 = vmatpush.bf16.msra.mxu3 %v425_v5  ;;  %v39_v34 = vld [vmem:[%s720_s0 + $0xc8] sm:$0xff]  ;;  %v41_v35 = vld [vmem:[%s720_s0 + $0xd8] sm:$0xff]  ;;  %v66_v37 = vpack.c.bf16 %v40_v31, %v38_v30  ;;  %v57_v38 = vpack.c.bf16 %v21_v33, %v19_v32  ;;  %v22_v40 = vld [vmem:[%s720_s0 + $0x40] sm:$0xff] }
   0xc   :  { %v67_v39 = vpack.c.bf16 %v41_v35, %v39_v34  ;;  %v24_v41 = vld [vmem:[%s720_s0 + $0x50] sm:$0xff]  ;;  %v42_v42 = vld [vmem:[%s720_s0 + $0xe0] sm:$0xff]  ;;  %v23_v44 = vld [vmem:[%s720_s0 + $0x48] sm:$0xff] }
   0xd   :  { %v44_v43 = vld [vmem:[%s720_s0 + $0xf0] sm:$0xff]  ;;  %v25_v45 = vld [vmem:[%s720_s0 + $0x58] sm:$0xff]  ;;  %v43_v46 = vld [vmem:[%s720_s0 + $0xe8] sm:$0xff]  ;;  %v58_v48 = vpack.c.bf16 %v24_v41, %v22_v40 }
   0xe   :  { %209 = vmatpush.bf16.msra.mxu0 %v416_v6  ;;  %431 = vmatpush.bf16.msra.mxu2 %v416_v6  ;;  %v45_v47 = vld [vmem:[%s720_s0 + $0xf8] sm:$0xff]  ;;  %v68_v49 = vpack.c.bf16 %v44_v43, %v42_v42  ;;  %v59_v50 = vpack.c.bf16 %v25_v45, %v23_v44  ;;  %v26_v52 = vld [vmem:[%s720_s0 + $0x60] sm:$0xff]  ;;  %v28_v53 = vld [vmem:[%s720_s0 + $0x70] sm:$0xff] }
   0xf   :  { %268 = vmatpush.bf16.msra.mxu1 %v424_v7  ;;  %439 = vmatpush.bf16.msra.mxu3 %v424_v7  ;;  %v69_v51 = vpack.c.bf16 %v45_v47, %v43_v46  ;;  %v46_v54 = vld [vmem:[%s720_s0 + $0x100] sm:$0xff]  ;;  %v48_v55 = vld [vmem:[%s720_s0 + $0x110] sm:$0xff]  ;;  %v27_v56 = vld [vmem:[%s720_s0 + $0x68] sm:$0xff]  ;;  %v60_v60 = vpack.c.bf16 %v28_v53, %v26_v52 }
  0x10   :  { %v29_v57 = vld [vmem:[%s720_s0 + $0x78] sm:$0xff]  ;;  %v47_v58 = vld [vmem:[%s720_s0 + $0x108] sm:$0xff]  ;;  %v70_v61 = vpack.c.bf16 %v48_v55, %v46_v54  ;;  %v30_v0 = vld [vmem:[%s720_s0 + $0x80] sm:$0xff] }
  0x11   :  { %v49_v59 = vld [vmem:[%s720_s0 + $0x118] sm:$0xff]  ;;  %v61_v62 = vpack.c.bf16 %v29_v57, %v27_v56  ;;  %v32_v1 = vld [vmem:[%s720_s0 + $0x90] sm:$0xff]  ;;  %v50_v2 = vld [vmem:[%s720_s0 + $0x120] sm:$0xff] }
  0x12   :  { %210 = vmatpush.bf16.msra.mxu0 %v415_v8  ;;  %432 = vmatpush.bf16.msra.mxu2 %v415_v8  ;;  %v71_v63 = vpack.c.bf16 %v49_v59, %v47_v58  ;;  %v52_v3 = vld [vmem:[%s720_s0 + $0x130] sm:$0xff]  ;;  %v31_v4 = vld [vmem:[%s720_s0 + $0x88] sm:$0xff]  ;;  %v33_v5 = vld [vmem:[%s720_s0 + $0x98] sm:$0xff]  ;;  %v62_v8 = vpack.c.bf16 %v32_v1, %v30_v0 }
  0x13   :  { %269 = vmatpush.bf16.msra.mxu1 %v423_v9  ;;  %440 = vmatpush.bf16.msra.mxu3 %v423_v9  ;;  %v51_v6 = vld [vmem:[%s720_s0 + $0x128] sm:$0xff]  ;;  %v53_v7 = vld [vmem:[%s720_s0 + $0x138] sm:$0xff]  ;;  %v72_v9 = vpack.c.bf16 %v52_v3, %v50_v2 }
  0x16   :  { %211 = vmatpush.bf16.msra.mxu0 %v414_v10  ;;  %433 = vmatpush.bf16.msra.mxu2 %v414_v10  ;;  %v63_v10 = vpack.c.bf16 %v33_v5, %v31_v4 }
  0x17   :  { %270 = vmatpush.bf16.msra.mxu1 %v422_v11  ;;  %441 = vmatpush.bf16.msra.mxu3 %v422_v11  ;;  %v73_v11 = vpack.c.bf16 %v53_v7, %v51_v6 }
  0x1a   :  { %212 = vmatpush.bf16.msra.mxu0 %v413_v12  ;;  %434 = vmatpush.bf16.msra.mxu2 %v413_v12  ;;  %v636_v12 = vld [vmem:[%s719_s2] ss:$0 sm:$0xff] }
  0x1b   :  { %271 = vmatpush.bf16.msra.mxu1 %v421_v13  ;;  %442 = vmatpush.bf16.msra.mxu3 %v421_v13 }
  0x1e   :  { %213 = vmatpush.bf16.msra.mxu0 %v412_v14  ;;  %435 = vmatpush.bf16.msra.mxu2 %v412_v14 }
  0x1f   :  { %272 = vmatpush.bf16.msra.mxu1 %v420_v15  ;;  %443 = vmatpush.bf16.msra.mxu3 %v420_v15 }
  0x21   :  { %214 = vmatmul.bf16.vlgmr.msra.gmra.mxu0 %v54_v24  ;;  %239 = vmatmul.bf16.vlgmr.msra.gmra.mxu2 %v64_v25 }
  0x22   :  { %273 = vmatmul.bf16.vlgmr.msra.gmra.mxu1 %v55_v26  ;;  %298 = vmatmul.bf16.vlgmr.msra.gmra.mxu3 %v65_v27 }
  0x31   :  { %219 = vmatmul.bf16.gmra.mxu0 %v56_v36  ;;  %244 = vmatmul.bf16.gmra.mxu2 %v66_v37 }
  0x32   :  { %278 = vmatmul.bf16.gmra.mxu1 %v57_v38  ;;  %303 = vmatmul.bf16.gmra.mxu3 %v67_v39 }
  0x41   :  { %224 = vmatmul.bf16.gmra.mxu0 %v58_v48  ;;  %249 = vmatmul.bf16.gmra.mxu2 %v68_v49 }
  0x42   :  { %283 = vmatmul.bf16.gmra.mxu1 %v59_v50  ;;  %308 = vmatmul.bf16.gmra.mxu3 %v69_v51 }
  0x51   :  { %229 = vmatmul.bf16.gmra.mxu0 %v60_v60  ;;  %254 = vmatmul.bf16.gmra.mxu2 %v70_v61 }
  0x52   :  { %288 = vmatmul.bf16.gmra.mxu1 %v61_v62  ;;  %313 = vmatmul.bf16.gmra.mxu3 %v71_v63 }
  0x61   :  { %234 = vmatmul.bf16.gmra.mxu0 %v62_v8  ;;  %259 = vmatmul.bf16.gmra.mxu2 %v72_v9 }
  0x62   :  { %293 = vmatmul.bf16.gmra.mxu1 %v63_v10  ;;  %318 = vmatmul.bf16.gmra.mxu3 %v73_v11 }
  0x9e   :  { %v215_v13 = vpop.f32.mrf.mxu0 }
  0x9f   :  { %v216_v14 = vadd.f32 %v636_v12, %v215_v13  ;;  %v274_v15 = vpop.f32.mrf.mxu1 }
  0xa1   :  { %v275_v16 = vadd.f32 %v274_v15, %v216_v14 }
  0xa3   :  { %324 = vst [vmem:[%s721_s3] sm:$0xff] %v275_v16 }
  0xa4   :  { %v240_v17 = vpop.f32.mrf.mxu2 }
  0xa5   :  { %v241_v18 = vadd.f32 %v636_v12, %v240_v17  ;;  %v299_v19 = vpop.f32.mrf.mxu3 }
  0xa6   :  { %v217_v20 = vpop.f32.mrf.mxu0 }
  0xa7   :  { %v300_v21 = vadd.f32 %v299_v19, %v241_v18  ;;  %v218_v22 = vadd.f32 %v636_v12, %v217_v20  ;;  %v276_v23 = vpop.f32.mrf.mxu1 }
  0xa9   :  { %334 = vst [vmem:[%s721_s3 + $0x50] sm:$0xff] %v300_v21  ;;  %v277_v24 = vadd.f32 %v276_v23, %v218_v22 }
  0xab   :  { %325 = vst [vmem:[%s721_s3 + $0x8] sm:$0xff] %v277_v24 }
  0xac   :  { %v242_v25 = vpop.f32.mrf.mxu2 }
  0xad   :  { %v243_v26 = vadd.f32 %v636_v12, %v242_v25  ;;  %v301_v27 = vpop.f32.mrf.mxu3 }
  0xae   :  { %v220_v28 = vpop.f32.mrf.mxu0 }
  0xaf   :  { %v302_v29 = vadd.f32 %v301_v27, %v243_v26  ;;  %v221_v30 = vadd.f32 %v636_v12, %v220_v28  ;;  %v279_v31 = vpop.f32.mrf.mxu1 }
  0xb1   :  { %335 = vst [vmem:[%s721_s3 + $0x58] sm:$0xff] %v302_v29  ;;  %v280_v32 = vadd.f32 %v279_v31, %v221_v30 }
  0xb3   :  { %326 = vst [vmem:[%s721_s3 + $0x10] sm:$0xff] %v280_v32 }
  0xb4   :  { %v245_v33 = vpop.f32.mrf.mxu2 }
  0xb5   :  { %v246_v34 = vadd.f32 %v636_v12, %v245_v33  ;;  %v304_v35 = vpop.f32.mrf.mxu3 }
  0xb6   :  { %v222_v36 = vpop.f32.mrf.mxu0 }
  0xb7   :  { %v305_v37 = vadd.f32 %v304_v35, %v246_v34  ;;  %v223_v38 = vadd.f32 %v636_v12, %v222_v36  ;;  %v281_v39 = vpop.f32.mrf.mxu1 }
  0xb9   :  { %336 = vst [vmem:[%s721_s3 + $0x60] sm:$0xff] %v305_v37  ;;  %v282_v40 = vadd.f32 %v281_v39, %v223_v38 }
  0xbb   :  { %327 = vst [vmem:[%s721_s3 + $0x18] sm:$0xff] %v282_v40 }
  0xbc   :  { %v247_v41 = vpop.f32.mrf.mxu2 }
  0xbd   :  { %v248_v42 = vadd.f32 %v636_v12, %v247_v41  ;;  %v306_v43 = vpop.f32.mrf.mxu3 }
  0xbe   :  { %v225_v44 = vpop.f32.mrf.mxu0 }
  0xbf   :  { %v307_v45 = vadd.f32 %v306_v43, %v248_v42  ;;  %v226_v46 = vadd.f32 %v636_v12, %v225_v44  ;;  %v284_v47 = vpop.f32.mrf.mxu1 }
  0xc1   :  { %337 = vst [vmem:[%s721_s3 + $0x68] sm:$0xff] %v307_v45  ;;  %v285_v48 = vadd.f32 %v284_v47, %v226_v46 }
  0xc3   :  { %328 = vst [vmem:[%s721_s3 + $0x20] sm:$0xff] %v285_v48 }
  0xc4   :  { %v250_v49 = vpop.f32.mrf.mxu2 }
  0xc5   :  { %v251_v50 = vadd.f32 %v636_v12, %v250_v49  ;;  %v309_v51 = vpop.f32.mrf.mxu3 }
  0xc6   :  { %v227_v52 = vpop.f32.mrf.mxu0 }
  0xc7   :  { %v310_v53 = vadd.f32 %v309_v51, %v251_v50  ;;  %v228_v54 = vadd.f32 %v636_v12, %v227_v52  ;;  %v286_v55 = vpop.f32.mrf.mxu1 }
  0xc9   :  { %338 = vst [vmem:[%s721_s3 + $0x70] sm:$0xff] %v310_v53  ;;  %v287_v56 = vadd.f32 %v286_v55, %v228_v54 }
  0xcb   :  { %329 = vst [vmem:[%s721_s3 + $0x28] sm:$0xff] %v287_v56 }
  0xcc   :  { %v252_v57 = vpop.f32.mrf.mxu2 }
  0xcd   :  { %v253_v58 = vadd.f32 %v636_v12, %v252_v57  ;;  %v311_v59 = vpop.f32.mrf.mxu3 }
  0xce   :  { %v230_v60 = vpop.f32.mrf.mxu0 }
  0xcf   :  { %v312_v61 = vadd.f32 %v311_v59, %v253_v58  ;;  %v231_v62 = vadd.f32 %v636_v12, %v230_v60  ;;  %v289_v63 = vpop.f32.mrf.mxu1 }
  0xd1   :  { %339 = vst [vmem:[%s721_s3 + $0x78] sm:$0xff] %v312_v61  ;;  %v290_v0 = vadd.f32 %v289_v63, %v231_v62 }
  0xd3   :  { %330 = vst [vmem:[%s721_s3 + $0x30] sm:$0xff] %v290_v0 }
  0xd4   :  { %v255_v1 = vpop.f32.mrf.mxu2 }
  0xd5   :  { %v256_v2 = vadd.f32 %v636_v12, %v255_v1  ;;  %v314_v3 = vpop.f32.mrf.mxu3 }
  0xd6   :  { %v232_v4 = vpop.f32.mrf.mxu0 }
  0xd7   :  { %v315_v5 = vadd.f32 %v314_v3, %v256_v2  ;;  %v233_v6 = vadd.f32 %v636_v12, %v232_v4  ;;  %v291_v7 = vpop.f32.mrf.mxu1 }
  0xd9   :  { %340 = vst [vmem:[%s721_s3 + $0x80] sm:$0xff] %v315_v5  ;;  %v292_v8 = vadd.f32 %v291_v7, %v233_v6 }
  0xdb   :  { %331 = vst [vmem:[%s721_s3 + $0x38] sm:$0xff] %v292_v8 }
  0xdc   :  { %v257_v9 = vpop.f32.mrf.mxu2 }
  0xdd   :  { %v258_v10 = vadd.f32 %v636_v12, %v257_v9  ;;  %v316_v11 = vpop.f32.mrf.mxu3 }
  0xde   :  { %v235_v13 = vpop.f32.mrf.mxu0 }
  0xdf   :  { %v317_v14 = vadd.f32 %v316_v11, %v258_v10  ;;  %v236_v15 = vadd.f32 %v636_v12, %v235_v13  ;;  %v294_v16 = vpop.f32.mrf.mxu1 }
  0xe1   :  { %341 = vst [vmem:[%s721_s3 + $0x88] sm:$0xff] %v317_v14  ;;  %v295_v17 = vadd.f32 %v294_v16, %v236_v15 }
  0xe3   :  { %332 = vst [vmem:[%s721_s3 + $0x40] sm:$0xff] %v295_v17 }
  0xe4   :  { %v260_v18 = vpop.f32.mrf.mxu2 }
  0xe5   :  { %v261_v19 = vadd.f32 %v636_v12, %v260_v18  ;;  %v319_v20 = vpop.f32.mrf.mxu3 }
  0xe6   :  { %v237_v21 = vpop.f32.mrf.mxu0 }
  0xe7   :  { %v320_v22 = vadd.f32 %v319_v20, %v261_v19  ;;  %v238_v23 = vadd.f32 %v636_v12, %v237_v21  ;;  %v296_v24 = vpop.f32.mrf.mxu1 }
  0xe9   :  { %342 = vst [vmem:[%s721_s3 + $0x90] sm:$0xff] %v320_v22  ;;  %v297_v25 = vadd.f32 %v296_v24, %v238_v23 }
  0xeb   :  { %333 = vst [vmem:[%s721_s3 + $0x48] sm:$0xff] %v297_v25 }
  0xec   :  { %v262_v26 = vpop.f32.mrf.mxu2 }
  0xed   :  { %v263_v27 = vadd.f32 %v636_v12, %v262_v26  ;;  %v321_v28 = vpop.f32.mrf.mxu3 }
  0xef   :  { %v322_v29 = vadd.f32 %v321_v28, %v263_v27 }
  0xf1   :  { %343 = vst [vmem:[%s721_s3 + $0x98] sm:$0xff] %v322_v29 }

// kernel: uvit_forward.33
= control target key start
LH: loop header
LB: loop body
LE: loop exit
PB: predicated region body
PF: predicated region fallthrough
CT: control target
= control target key end

     0   :  { %s3710_s0 = inlined_call_operand.vmem [shape: f32[160,128], index: 0, kind: input, shape index: {}]   ;;  %s3711_s3 = inlined_call_operand.vmem [shape: f32[1,128], index: 3, kind: input, shape index: {}]   ;;  %s3712_s4 = inlined_call_operand.vmem [shape: f32[1,128], index: 4, kind: input, shape index: {}]   ;;  %s3713_s1 = inlined_call_operand.vmem [shape: bf16[128,512], index: 1, kind: input, shape index: {}]   ;;  %s3714_s2 = inlined_call_operand.vmem [shape: f32[1,512], index: 2, kind: input, shape index: {}]   ;;  %s3715_s5 = inlined_call_operand.vmem [shape: bf16[160,512], index: 5, kind: output, shape index: {}]  }
   0x1   :  { %v2183_v0 = vld [vmem:[%s3710_s0] sm:$0xff]  ;;  %v2188_v1 = vld [vmem:[%s3710_s0 + $0x10] sm:$0xff]  ;;  %v2197_v3 = vld [vmem:[%s3710_s0 + $0x8] sm:$0xff] }
   0x2   :  { %40 = vadd.xlane.f32.xlu0 %v2183_v0  ;;  %44 = vadd.xlane.f32.xlu2 %v2188_v1  ;;  %v100_v2 = vmul.f32 %v2183_v0, %v2183_v0  ;;  %v2202_v4 = vld [vmem:[%s3710_s0 + $0x18] sm:$0xff]  ;;  %v101_v5 = vmul.f32 %v2197_v3, %v2197_v3  ;;  %v102_v6 = vmul.f32 %v2188_v1, %v2188_v1  ;;  %v2213_v7 = vld [vmem:[%s3710_s0 + $0x20] sm:$0xff]  ;;  %v2221_v9 = vld [vmem:[%s3710_s0 + $0x28] sm:$0xff] }
   0x3   :  { %v103_v8 = vmul.f32 %v2202_v4, %v2202_v4  ;;  %v105_v10 = vmul.f32 %v2221_v9, %v2221_v9  ;;  %v104_v11 = vmul.f32 %v2213_v7, %v2213_v7  ;;  %v2231_v12 = vld [vmem:[%s3710_s0 + $0x30] sm:$0xff]  ;;  %v2238_v14 = vld [vmem:[%s3710_s0 + $0x38] sm:$0xff]  ;;  %v2247_v16 = vld [vmem:[%s3710_s0 + $0x48] sm:$0xff] }
   0x4   :  { %120 = vadd.xlane.f32.xlu1 %v100_v2  ;;  %v106_v13 = vmul.f32 %v2231_v12, %v2231_v12  ;;  %v107_v15 = vmul.f32 %v2238_v14, %v2238_v14  ;;  %v2252_v17 = vld [vmem:[%s3710_s0 + $0x40] sm:$0xff]  ;;  %v2261_v19 = vld [vmem:[%s3710_s0 + $0x50] sm:$0xff]  ;;  %v109_v20 = vmul.f32 %v2247_v16, %v2247_v16  ;;  %v2269_v21 = vld [vmem:[%s3710_s0 + $0x58] sm:$0xff] }
   0x5   :  { %v108_v18 = vmul.f32 %v2252_v17, %v2252_v17  ;;  %v111_v22 = vmul.f32 %v2269_v21, %v2269_v21  ;;  %v110_v23 = vmul.f32 %v2261_v19, %v2261_v19  ;;  %v32_v24 = vld [vmem:[%s3710_s0 + $0x60] sm:$0xff]  ;;  %v33_v26 = vld [vmem:[%s3710_s0 + $0x68] sm:$0xff]  ;;  %v35_v28 = vld [vmem:[%s3710_s0 + $0x78] sm:$0xff] }
   0x6   :  { %v112_v25 = vmul.f32 %v32_v24, %v32_v24  ;;  %v113_v27 = vmul.f32 %v33_v26, %v33_v26  ;;  %v34_v29 = vld [vmem:[%s3710_s0 + $0x70] sm:$0xff]  ;;  %v36_v31 = vld [vmem:[%s3710_s0 + $0x80] sm:$0xff]  ;;  %v115_v32 = vmul.f32 %v35_v28, %v35_v28  ;;  %v37_v33 = vld [vmem:[%s3710_s0 + $0x88] sm:$0xff] }
   0x7   :  { %v114_v30 = vmul.f32 %v34_v29, %v34_v29  ;;  %v117_v34 = vmul.f32 %v37_v33, %v37_v33  ;;  %v116_v35 = vmul.f32 %v36_v31, %v36_v31  ;;  %v38_v36 = vld [vmem:[%s3710_s0 + $0x90] sm:$0xff]  ;;  %v1894_v38 = vld [vmem:[%s3713_s1 + $0xe0] sm:$0xf]  ;;  %v1936_v40 = vld [vmem:[%s3713_s1 + $0xe4] sm:$0xf] }
   0x8   :  { %v118_v37 = vmul.f32 %v38_v36, %v38_v36  ;;  %v1938_v39 = vld [vmem:[%s3713_s1 + $0xec] sm:$0xf0]  ;;  %v1896_v42 = vld [vmem:[%s3713_s1 + $0xf0] sm:$0xf0]  ;;  %v1902_v43 = vld [vmem:[%s3713_s1 + $0xe8] sm:$0xf] }
   0x9   :  { %v1895_v41 = vor.u32 %v1938_v39, %v1894_v38  ;;  %v1939_v44 = vld [vmem:[%s3713_s1 + $0xf4] sm:$0xf0]  ;;  %v1899_v46 = vor.u32 %v1936_v40, %v1896_v42  ;;  %v1937_v48 = vld [vmem:[%s3713_s1 + $0xec] sm:$0xf]  ;;  %v1904_v49 = vld [vmem:[%s3713_s1 + $0xf8] sm:$0xf0] }
   0xa   :  { %42 = vadd.xlane.f32.xlu0 %v2197_v3  ;;  %46 = vadd.xlane.f32.xlu2 %v2202_v4  ;;  %v39_v45 = vld [vmem:[%s3710_s0 + $0x98] sm:$0xff]  ;;  %v1903_v47 = vor.u32 %v1939_v44, %v1902_v43  ;;  %v1907_v50 = vor.u32 %v1937_v48, %v1904_v49  ;;  %v1878_v51 = vld [vmem:[%s3713_s1 + $0xc0] sm:$0xf]  ;;  %v1934_v52 = vld [vmem:[%s3713_s1 + $0xcc] sm:$0xf0] }
   0xb   :  { %740 = vmatpush.bf16.msra.mxu0 %v1895_v41  ;;  %799 = vmatpush.bf16.msra.mxu1 %v1899_v46  ;;  %v1932_v53 = vld [vmem:[%s3713_s1 + $0xc4] sm:$0xf]  ;;  %v1879_v54 = vor.u32 %v1934_v52, %v1878_v51  ;;  %v1880_v55 = vld [vmem:[%s3713_s1 + $0xd0] sm:$0xf0]  ;;  %v1886_v56 = vld [vmem:[%s3713_s1 + $0xc8] sm:$0xf]  ;;  %v119_v62 = vmul.f32 %v39_v45, %v39_v45 }
   0xc   :  { %122 = vadd.xlane.f32.xlu1 %v101_v5  ;;  %858 = vmatpush.bf16.msra.mxu2 %v1903_v47  ;;  %v1935_v57 = vld [vmem:[%s3713_s1 + $0xd4] sm:$0xf0]  ;;  %v1883_v58 = vor.u32 %v1932_v53, %v1880_v55  ;;  %v1933_v60 = vld [vmem:[%s3713_s1 + $0xcc] sm:$0xf]  ;;  %v1888_v61 = vld [vmem:[%s3713_s1 + $0xd8] sm:$0xf0] }
   0xd   :  { %917 = vmatpush.bf16.msra.mxu3 %v1907_v50  ;;  %v1887_v59 = vor.u32 %v1935_v57, %v1886_v56  ;;  %v1891_v63 = vor.u32 %v1933_v60, %v1888_v61  ;;  %v1862_v2 = vld [vmem:[%s3713_s1 + $0xa0] sm:$0xf]  ;;  %v1930_v5 = vld [vmem:[%s3713_s1 + $0xac] sm:$0xf0]  ;;  %v1920_v38 = vld [vmem:[%s3713_s1 + $0x64] sm:$0xf] }
   0xe   :  { %v1832_v40 = vld [vmem:[%s3713_s1 + $0x70] sm:$0xf0]  ;;  %v1838_v41 = vld [vmem:[%s3713_s1 + $0x68] sm:$0xf]  ;;  %v1923_v42 = vld [vmem:[%s3713_s1 + $0x74] sm:$0xf0] }
   0xf   :  { %741 = vmatpush.bf16.msra.mxu0 %v1879_v54  ;;  %800 = vmatpush.bf16.msra.mxu1 %v1883_v58  ;;  %v1835_v43 = vor.u32 %v1920_v38, %v1832_v40  ;;  %v1839_v44 = vor.u32 %v1923_v42, %v1838_v41  ;;  %v1840_v46 = vld [vmem:[%s3713_s1 + $0x78] sm:$0xf0]  ;;  %v1814_v48 = vld [vmem:[%s3713_s1 + $0x40] sm:$0xf]  ;;  %v1918_v49 = vld [vmem:[%s3713_s1 + $0x4c] sm:$0xf0] }
  0x10   :  { %859 = vmatpush.bf16.msra.mxu2 %v1887_v59  ;;  %v1916_v50 = vld [vmem:[%s3713_s1 + $0x44] sm:$0xf]  ;;  %v1815_v51 = vor.u32 %v1918_v49, %v1814_v48  ;;  %v1816_v52 = vld [vmem:[%s3713_s1 + $0x50] sm:$0xf0]  ;;  %v1822_v53 = vld [vmem:[%s3713_s1 + $0x48] sm:$0xf] }
  0x11   :  { %918 = vmatpush.bf16.msra.mxu3 %v1891_v63  ;;  %v1919_v54 = vld [vmem:[%s3713_s1 + $0x54] sm:$0xf0]  ;;  %v1819_v57 = vor.u32 %v1916_v50, %v1816_v52  ;;  %v1917_v59 = vld [vmem:[%s3713_s1 + $0x4c] sm:$0xf]  ;;  %v1824_v60 = vld [vmem:[%s3713_s1 + $0x58] sm:$0xf0] }
  0x12   :  { %124 = vadd.xlane.f32.xlu0 %v102_v6  ;;  %48 = vadd.xlane.f32.xlu2 %v2213_v7  ;;  %v1928_v6 = vld [vmem:[%s3713_s1 + $0xa4] sm:$0xf]  ;;  %v1823_v58 = vor.u32 %v1919_v54, %v1822_v53  ;;  %v1790_v38 = vld [vmem:[%s3713_s1 + $0x8] sm:$0xf]  ;;  %v1909_v40 = vld [vmem:[%s3713_s1 + $0xc] sm:$0xf] }
  0x14   :  { %126 = vadd.xlane.f32.xlu1 %v103_v8  ;;  %v1863_v8 = vor.u32 %v1930_v5, %v1862_v2 }
  0x16   :  { %742 = vmatpush.bf16.msra.mxu0 %v1863_v8  ;;  %v1914_v8 = vld [vmem:[%s3713_s1 + $0x2c] sm:$0xf0] }
  0x1a   :  { %50 = vadd.xlane.f32.xlu0 %v2221_v9  ;;  %130 = vadd.xlane.f32.xlu2 %v105_v10  ;;  %v1864_v10 = vld [vmem:[%s3713_s1 + $0xb0] sm:$0xf0] }
  0x1c   :  { %128 = vadd.xlane.f32.xlu1 %v104_v11  ;;  %v1870_v11 = vld [vmem:[%s3713_s1 + $0xa8] sm:$0xf] }
  0x22   :  { %52 = vadd.xlane.f32.xlu0 %v2231_v12  ;;  %132 = vadd.xlane.f32.xlu2 %v106_v13  ;;  %v1931_v13 = vld [vmem:[%s3713_s1 + $0xb4] sm:$0xf0] }
  0x24   :  { %54 = vadd.xlane.f32.xlu1 %v2238_v14 }
  0x2a   :  { %134 = vadd.xlane.f32.xlu0 %v107_v15  ;;  %58 = vadd.xlane.f32.xlu2 %v2247_v16  ;;  %v1867_v15 = vor.u32 %v1928_v6, %v1864_v10  ;;  %v1798_v6 = vld [vmem:[%s3713_s1 + $0x20] sm:$0xf] }
  0x2b   :  { %v1799_v10 = vor.u32 %v1914_v8, %v1798_v6 }
  0x2c   :  { %56 = vadd.xlane.f32.xlu1 %v2252_v17  ;;  %801 = vmatpush.bf16.msra.mxu1 %v1867_v15  ;;  %v1806_v15 = vld [vmem:[%s3713_s1 + $0x28] sm:$0xf] }
  0x32   :  { %136 = vadd.xlane.f32.xlu0 %v108_v18  ;;  %60 = vadd.xlane.f32.xlu2 %v2261_v19  ;;  %v1871_v18 = vor.u32 %v1931_v13, %v1870_v11  ;;  %v1912_v11 = vld [vmem:[%s3713_s1 + $0x24] sm:$0xf]  ;;  %v1800_v13 = vld [vmem:[%s3713_s1 + $0x30] sm:$0xf0] }
  0x34   :  { %138 = vadd.xlane.f32.xlu1 %v109_v20  ;;  %v1929_v20 = vld [vmem:[%s3713_s1 + $0xac] sm:$0xf]  ;;  %860 = vmatpush.bf16.msra.mxu2 %v1871_v18 }
  0x3a   :  { %62 = vadd.xlane.f32.xlu0 %v2269_v21  ;;  %142 = vadd.xlane.f32.xlu2 %v111_v22  ;;  %v1872_v22 = vld [vmem:[%s3713_s1 + $0xb8] sm:$0xf0] }
  0x3c   :  { %140 = vadd.xlane.f32.xlu1 %v110_v23  ;;  %v1875_v23 = vor.u32 %v1929_v20, %v1872_v22  ;;  %v1803_v20 = vor.u32 %v1912_v11, %v1800_v13  ;;  %v1915_v22 = vld [vmem:[%s3713_s1 + $0x34] sm:$0xf0] }
  0x3e   :  { %919 = vmatpush.bf16.msra.mxu3 %v1875_v23  ;;  %v1913_v23 = vld [vmem:[%s3713_s1 + $0x2c] sm:$0xf] }
  0x42   :  { %64 = vadd.xlane.f32.xlu0 %v32_v24  ;;  %144 = vadd.xlane.f32.xlu2 %v112_v25  ;;  %v1846_v24 = vld [vmem:[%s3713_s1 + $0x80] sm:$0xf]  ;;  %v1926_v25 = vld [vmem:[%s3713_s1 + $0x8c] sm:$0xf0] }
  0x44   :  { %66 = vadd.xlane.f32.xlu1 %v33_v26  ;;  %v1924_v26 = vld [vmem:[%s3713_s1 + $0x84] sm:$0xf] }
  0x4a   :  { %146 = vadd.xlane.f32.xlu0 %v113_v27  ;;  %70 = vadd.xlane.f32.xlu2 %v35_v28  ;;  %v1847_v27 = vor.u32 %v1926_v25, %v1846_v24  ;;  %v1848_v28 = vld [vmem:[%s3713_s1 + $0x90] sm:$0xf0]  ;;  %v1808_v24 = vld [vmem:[%s3713_s1 + $0x38] sm:$0xf0]  ;;  %v1807_v25 = vor.u32 %v1915_v22, %v1806_v15 }
  0x4c   :  { %68 = vadd.xlane.f32.xlu1 %v34_v29  ;;  %v1854_v29 = vld [vmem:[%s3713_s1 + $0x88] sm:$0xf]  ;;  %743 = vmatpush.bf16.msra.mxu0 %v1847_v27 }
  0x52   :  { %148 = vadd.xlane.f32.xlu0 %v114_v30  ;;  %72 = vadd.xlane.f32.xlu2 %v36_v31  ;;  %v1927_v30 = vld [vmem:[%s3713_s1 + $0x94] sm:$0xf0]  ;;  %v1851_v31 = vor.u32 %v1924_v26, %v1848_v28  ;;  %v1811_v26 = vor.u32 %v1913_v23, %v1808_v24 }
  0x54   :  { %150 = vadd.xlane.f32.xlu1 %v115_v32  ;;  %v1855_v32 = vor.u32 %v1927_v30, %v1854_v29  ;;  %802 = vmatpush.bf16.msra.mxu1 %v1851_v31  ;;  %v1782_v30 = vld [vmem:[%s3713_s1] sm:$0xf]  ;;  %v1910_v31 = vld [vmem:[%s3713_s1 + $0xc] sm:$0xf0] }
  0x56   :  { %861 = vmatpush.bf16.msra.mxu2 %v1855_v32 }
  0x58   :  { %803 = vmatpush.bf16.msra.mxu1 %v1835_v43  ;;  %v1792_v43 = vld [vmem:[%s3713_s1 + $0x18] sm:$0xf0] }
  0x5a   :  { %74 = vadd.xlane.f32.xlu0 %v37_v33  ;;  %154 = vadd.xlane.f32.xlu2 %v117_v34  ;;  %v1925_v33 = vld [vmem:[%s3713_s1 + $0x8c] sm:$0xf]  ;;  %v1856_v34 = vld [vmem:[%s3713_s1 + $0x98] sm:$0xf0] }
  0x5b   :  { %862 = vmatpush.bf16.msra.mxu2 %v1839_v44 }
  0x5c   :  { %152 = vadd.xlane.f32.xlu1 %v116_v35  ;;  %v1859_v35 = vor.u32 %v1925_v33, %v1856_v34  ;;  %804 = vmatpush.bf16.msra.mxu1 %v1819_v57  ;;  %v1783_v33 = vor.u32 %v1910_v31, %v1782_v30  ;;  %v1908_v34 = vld [vmem:[%s3713_s1 + $0x4] sm:$0xf] }
  0x5e   :  { %920 = vmatpush.bf16.msra.mxu3 %v1859_v35  ;;  %v1784_v35 = vld [vmem:[%s3713_s1 + $0x10] sm:$0xf0] }
  0x5f   :  { %863 = vmatpush.bf16.msra.mxu2 %v1823_v58 }
  0x60   :  { %805 = vmatpush.bf16.msra.mxu1 %v1803_v20 }
  0x62   :  { %76 = vadd.xlane.f32.xlu0 %v38_v36  ;;  %156 = vadd.xlane.f32.xlu2 %v118_v37  ;;  %v1830_v36 = vld [vmem:[%s3713_s1 + $0x60] sm:$0xf]  ;;  %v1922_v37 = vld [vmem:[%s3713_s1 + $0x6c] sm:$0xf0] }
  0x63   :  { %v1831_v39 = vor.u32 %v1922_v37, %v1830_v36  ;;  %864 = vmatpush.bf16.msra.mxu2 %v1807_v25  ;;  %v1787_v37 = vor.u32 %v1908_v34, %v1784_v35 }
  0x64   :  { %78 = vadd.xlane.f32.xlu1 %v39_v45  ;;  %v1921_v45 = vld [vmem:[%s3713_s1 + $0x6c] sm:$0xf] }
  0x65   :  { %v1843_v47 = vor.u32 %v1921_v45, %v1840_v46  ;;  %744 = vmatpush.bf16.msra.mxu0 %v1831_v39  ;;  %v1911_v39 = vld [vmem:[%s3713_s1 + $0x14] sm:$0xf0]  ;;  %806 = vmatpush.bf16.msra.mxu1 %v1787_v37  ;;  %v1795_v46 = vor.u32 %v1909_v40, %v1792_v43 }
  0x66   :  { %v1791_v45 = vor.u32 %v1911_v39, %v1790_v38 }
  0x67   :  { %921 = vmatpush.bf16.msra.mxu3 %v1843_v47 }
  0x68   :  { %865 = vmatpush.bf16.msra.mxu2 %v1791_v45 }
  0x69   :  { %745 = vmatpush.bf16.msra.mxu0 %v1815_v51 }
  0x6a   :  { %158 = vadd.xlane.f32.xlu0 %v119_v62  ;;  %v1827_v62 = vor.u32 %v1917_v59, %v1824_v60 }
  0x6c   :  { %922 = vmatpush.bf16.msra.mxu3 %v1827_v62 }
  0x6d   :  { %746 = vmatpush.bf16.msra.mxu0 %v1799_v10 }
  0x70   :  { %923 = vmatpush.bf16.msra.mxu3 %v1811_v26 }
  0x71   :  { %747 = vmatpush.bf16.msra.mxu0 %v1783_v33 }
  0x74   :  { %924 = vmatpush.bf16.msra.mxu3 %v1795_v46 }
  0x75   :  { %v41_v55 = vpop.xlane.xlu0 %40  ;;  %v45_v56 = vpop.xlane.xlu2 %44 }
  0x76   :  { %v2444_v61 = vmul.f32 0.0078125, %v41_v55  ;;  %v2498_v41 = vmul.f32 0.0078125, %v45_v56 }
  0x77   :  { %v121_v63 = vpop.xlane.xlu1 %120 }
  0x78   :  { %v180_v2 = vmul.f32 %v2444_v61, %v2444_v61  ;;  %v160_v5 = vmul.f32 0.0078125, %v121_v63  ;;  %v182_v49 = vmul.f32 %v2498_v41, %v2498_v41  ;;  %v220_v34 = vsub.f32 %v2183_v0, %v2444_v61  ;;  %v2543_v0 = vld [vmem:[%s3711_s3] ss:$0 sm:$0xff] }
  0x7a   :  { %v200_v18 = vsub.f32 %v160_v5, %v180_v2 }
  0x7c   :  { %v2472_v27 = vadd.f32 1e-05, %v200_v18 }
  0x7d   :  { %v43_v28 = vpop.xlane.xlu0 %42  ;;  %v47_v29 = vpop.xlane.xlu2 %46 }
  0x7e   :  { %v2480_v32 = vmul.f32 0.0078125, %v43_v28  ;;  %1942 = vrsqrt.f32 %v2472_v27  ;;  %v2505_v47 = vmul.f32 0.0078125, %v47_v29  ;;  %vm266_vm1 = vweird.f32 %v2472_v27 }
  0x7f   :  { %v123_v36 = vpop.xlane.xlu1 %122 }
  0x80   :  { %v181_v42 = vmul.f32 %v2480_v32, %v2480_v32  ;;  %v161_v44 = vmul.f32 0.0078125, %v123_v36  ;;  %v183_v56 = vmul.f32 %v2505_v47, %v2505_v47  ;;  %v221_v46 = vsub.f32 %v2197_v3, %v2480_v32 }
  0x82   :  { %v201_v48 = vsub.f32 %v161_v44, %v181_v42 }
  0x84   :  { %v1943_v50 = vpop.eup %1942  ;;  %v241_v51 = vadd.f32 1e-05, %v201_v48 }
  0x85   :  { %v125_v52 = vpop.xlane.xlu0 %124  ;;  %v49_v53 = vpop.xlane.xlu2 %48  ;;  %v261_v54 = vmul.f32 %v1943_v50, %v2472_v27  ;;  %vm267_vm0 = vweird.f32 %v1943_v50 }
  0x86   :  { %v162_v55 = vmul.f32 0.0078125, %v125_v52  ;;  %1944 = vrsqrt.f32 %v241_v51  ;;  %v2514_v2 = vmul.f32 0.0078125, %v49_v53  ;;  %vm268_vm2 = vmor %vm266_vm1, %vm267_vm0  ;;  %vm276_vm4 = vweird.f32 %v241_v51 }
  0x87   :  { %v127_v57 = vpop.xlane.xlu1 %126  ;;  %v262_v58 = vmul.f32 %v1943_v50, %v261_v54 }
  0x88   :  { %v202_v59 = vsub.f32 %v162_v55, %v182_v49  ;;  %v163_v60 = vmul.f32 0.0078125, %v127_v57  ;;  %v184_v22 = vmul.f32 %v2514_v2, %v2514_v2 }
  0x89   :  { %v263_v62 = vmul.f32 0.5, %v262_v58 }
  0x8a   :  { %v2512_v63 = vadd.f32 1e-05, %v202_v59  ;;  %v203_v5 = vsub.f32 %v163_v60, %v183_v56  ;;  %v2558_v56 = vld [vmem:[%s3712_s4] ss:$0 sm:$0xff] }
  0x8b   :  { %v264_v6 = vsub.f32 1.5, %v263_v62 }
  0x8c   :  { %1946 = vrsqrt.f32 %v2512_v63  ;;  %v1945_v8 = vpop.eup %1944  ;;  %v2517_v10 = vadd.f32 1e-05, %v203_v5  ;;  %vm286_vm10 = vweird.f32 %v2512_v63 }
  0x8d   :  { %v51_v11 = vpop.xlane.xlu0 %50  ;;  %v131_v13 = vpop.xlane.xlu2 %130  ;;  %v265_v15 = vmul.f32 %v1943_v50, %v264_v6  ;;  %v271_v18 = vmul.f32 %v1945_v8, %v241_v51  ;;  %vm277_vm3 = vweird.f32 %v1945_v8 }
  0x8e   :  { %v2519_v20 = vmul.f32 0.0078125, %v51_v11  ;;  %1948 = vrsqrt.f32 %v2517_v10  ;;  %v165_v23 = vmul.f32 0.0078125, %v131_v13  ;;  %vm278_vm5 = vmor %vm276_vm4, %vm277_vm3  ;;  %vm296_vm7 = vweird.f32 %v2517_v10 }
  0x8f   :  { %v129_v24 = vpop.xlane.xlu1 %128  ;;  %v272_v25 = vmul.f32 %v1945_v8, %v271_v18  ;;  %v269_v30 = vsel %vm268_vm2, %v1943_v50, %v265_v15 }
  0x90   :  { %v185_v26 = vmul.f32 %v2519_v20, %v2519_v20  ;;  %v164_v28 = vmul.f32 0.0078125, %v129_v24  ;;  %v460_v39 = vmul.f32 %v269_v30, %v220_v34 }
  0x91   :  { %v273_v31 = vmul.f32 0.5, %v272_v25 }
  0x92   :  { %v2527_v29 = vpop.eup %1946  ;;  %v205_v33 = vsub.f32 %v165_v23, %v185_v26  ;;  %v204_v36 = vsub.f32 %v164_v28, %v184_v22  ;;  %v484_v55 = vmul.f32 %v2543_v0, %v460_v39 }
  0x93   :  { %v281_v35 = vmul.f32 %v2527_v29, %v2512_v63  ;;  %v274_v37 = vsub.f32 1.5, %v273_v31  ;;  %vm287_vm6 = vweird.f32 %v2527_v29 }
  0x94   :  { %v2533_v27 = vadd.f32 1e-05, %v205_v33  ;;  %v2535_v38 = vpop.eup %1948  ;;  %v2538_v42 = vadd.f32 1e-05, %v204_v36  ;;  %v508_v13 = vadd.f32 %v2558_v56, %v484_v55  ;;  %vm288_vm11 = vmor %vm286_vm10, %vm287_vm6 }
  0x95   :  { %v282_v40 = vmul.f32 %v2527_v29, %v281_v35  ;;  %v53_v43 = vpop.xlane.xlu0 %52  ;;  %v275_v61 = vmul.f32 %v1945_v8, %v274_v37  ;;  %v291_v44 = vmul.f32 %v2535_v38, %v2517_v10  ;;  %v133_v45 = vpop.xlane.xlu2 %132  ;;  %vm297_vm8 = vweird.f32 %v2535_v38 }
  0x96   :  { %1950 = vrsqrt.f32 %v2533_v27  ;;  %v2552_v53 = vmul.f32 0.0078125, %v53_v43  ;;  %v166_v54 = vmul.f32 0.0078125, %v133_v45  ;;  %vm2582_vm9 = vmor %vm296_vm7, %vm297_vm8  ;;  %v223_v35 = vsub.f32 %v2202_v4, %v2505_v47 }
  0x97   :  { %v283_v48 = vmul.f32 0.5, %v282_v40  ;;  %1952 = vrsqrt.f32 %v2538_v42  ;;  %v55_v49 = vpop.xlane.xlu1 %54  ;;  %v279_v50 = vsel %vm278_vm5, %v1945_v8, %v275_v61  ;;  %v292_v52 = vmul.f32 %v2535_v38, %v291_v44 }
  0x98   :  { %v461_v51 = vmul.f32 %v279_v50, %v221_v46  ;;  %v186_v57 = vmul.f32 %v2552_v53, %v2552_v53  ;;  %v2562_v58 = vmul.f32 0.0078125, %v55_v49  ;;  %vm316_vm12 = vweird.f32 %v2533_v27 }
  0x99   :  { %v284_v3 = vsub.f32 1.5, %v283_v48  ;;  %v293_v32 = vmul.f32 0.5, %v292_v52  ;;  %vm306_vm14 = vweird.f32 %v2538_v42 }
  0x9a   :  { %v485_v59 = vmul.f32 %v2543_v0, %v461_v51  ;;  %v206_v8 = vsub.f32 %v166_v54, %v186_v57  ;;  %v187_v23 = vmul.f32 %v2562_v58, %v2562_v58 }
  0x9b   :  { %v294_v62 = vsub.f32 1.5, %v293_v32  ;;  %v285_v18 = vmul.f32 %v2527_v29, %v284_v3 }
  0x9c   :  { %v2565_v60 = vpop.eup %1950  ;;  %v509_v15 = vadd.f32 %v2558_v56, %v485_v59  ;;  %v2596_v36 = vadd.f32 1e-05, %v206_v8 }
  0x9d   :  { %v2570_v5 = vpop.eup %1952  ;;  %v311_v6 = vmul.f32 %v2565_v60, %v2533_v27  ;;  %v135_v11 = vpop.xlane.xlu0 %134  ;;  %v295_v22 = vmul.f32 %v2535_v38, %v294_v62  ;;  %v289_v63 = vsel %vm288_vm11, %v2527_v29, %v285_v18  ;;  %vm317_vm13 = vweird.f32 %v2565_v60 }
  0x9e   :  { %v301_v10 = vmul.f32 %v2570_v5, %v2538_v42  ;;  %v167_v25 = vmul.f32 0.0078125, %v135_v11  ;;  %v528_v28 = vpack.c.bf16 %v509_v15, %v508_v13  ;;  %v59_v30 = vpop.xlane.xlu2 %58  ;;  %1954 = vrsqrt.f32 %v2596_v36  ;;  %vm2626_vm0 = vmor %vm316_vm12, %vm317_vm13 }
  0x9f   :  { %v57_v26 = vpop.xlane.xlu1 %56  ;;  %v299_v31 = vsel %vm2582_vm9, %v2535_v38, %v295_v22  ;;  %v312_v33 = vmul.f32 %v2565_v60, %v311_v6  ;;  %v222_v38 = vsub.f32 %v2188_v1, %v2498_v41  ;;  %v2601_v40 = vmul.f32 0.0078125, %v59_v30 }
  0xa0   :  { %v302_v34 = vmul.f32 %v2570_v5, %v301_v10  ;;  %748 = vmatmul.bf16.vlgmr.msra.gmra.mxu0 %v528_v28  ;;  %807 = vmatmul.bf16.vlgmr.msra.gmra.mxu1 %v528_v28  ;;  %v207_v37 = vsub.f32 %v167_v25, %v187_v23  ;;  %v463_v39 = vmul.f32 %v299_v31, %v223_v35  ;;  %v2606_v44 = vmul.f32 0.0078125, %v57_v26 }
  0xa1   :  { %866 = vmatmul.bf16.vlgmr.msra.gmra.mxu2 %v528_v28  ;;  %925 = vmatmul.bf16.vlgmr.msra.gmra.mxu3 %v528_v28  ;;  %v313_v43 = vmul.f32 0.5, %v312_v33  ;;  %v462_v61 = vmul.f32 %v289_v63, %v222_v38  ;;  %v189_v45 = vmul.f32 %v2601_v40, %v2601_v40  ;;  %vm307_vm15 = vweird.f32 %v2570_v5 }
  0xa2   :  { %v303_v4 = vmul.f32 0.5, %v302_v34  ;;  %v2603_v47 = vadd.f32 1e-05, %v207_v37  ;;  %v487_v1 = vmul.f32 %v2543_v0, %v463_v39  ;;  %v188_v49 = vmul.f32 %v2606_v44, %v2606_v44  ;;  %vm2635_vm1 = vmor %vm306_vm14, %vm307_vm15 }
  0xa3   :  { %v314_v41 = vsub.f32 1.5, %v313_v43  ;;  %v486_v54 = vmul.f32 %v2543_v0, %v462_v61  ;;  %v224_v25 = vsub.f32 %v2213_v7, %v2514_v2  ;;  %v225_v26 = vsub.f32 %v2221_v9, %v2519_v20 }
  0xa4   :  { %1956 = vrsqrt.f32 %v2603_v47  ;;  %v304_v48 = vsub.f32 1.5, %v303_v4  ;;  %v2617_v55 = vpop.eup %1954  ;;  %v511_v32 = vadd.f32 %v2558_v56, %v487_v1  ;;  %vm336_vm2 = vweird.f32 %v2603_v47 }
  0xa5   :  { %v137_v29 = vpop.xlane.xlu0 %136  ;;  %v315_v59 = vmul.f32 %v2565_v60, %v314_v41  ;;  %v510_v11 = vadd.f32 %v2558_v56, %v486_v54  ;;  %v321_v13 = vmul.f32 %v2617_v55, %v2596_v36  ;;  %vm326_vm4 = vweird.f32 %v2596_v36 }
  0xa6   :  { %v168_v50 = vmul.f32 0.0078125, %v137_v29  ;;  %v61_v51 = vpop.xlane.xlu2 %60  ;;  %v305_v62 = vmul.f32 %v2570_v5, %v304_v48  ;;  %vm327_vm5 = vweird.f32 %v2617_v55 }
  0xa7   :  { %v139_v46 = vpop.xlane.xlu1 %138  ;;  %v529_v18 = vpack.c.bf16 %v511_v32, %v510_v11  ;;  %v319_v10 = vsel %vm2626_vm0, %v2565_v60, %v315_v59  ;;  %v322_v30 = vmul.f32 %v2617_v55, %v321_v13  ;;  %v2658_v33 = vmul.f32 0.0078125, %v61_v51  ;;  %vm2689_vm7 = vmor %vm326_vm4, %vm327_vm5 }
  0xa8   :  { %v169_v52 = vmul.f32 0.0078125, %v139_v46  ;;  %v208_v8 = vsub.f32 %v168_v50, %v188_v49  ;;  %v309_v23 = vsel %vm2635_vm1, %v2570_v5, %v305_v62  ;;  %v465_v31 = vmul.f32 %v319_v10, %v225_v26 }
  0xa9   :  { %v464_v5 = vmul.f32 %v309_v23, %v224_v25  ;;  %v323_v9 = vmul.f32 0.5, %v322_v30  ;;  %v190_v63 = vmul.f32 %v2658_v33, %v2658_v33 }
  0xaa   :  { %v209_v3 = vsub.f32 %v169_v52, %v189_v45  ;;  %v2620_v57 = vpop.eup %1956  ;;  %v2652_v28 = vadd.f32 1e-05, %v208_v8  ;;  %v489_v39 = vmul.f32 %v2543_v0, %v465_v31 }
  0xab   :  { %v331_v27 = vmul.f32 %v2620_v57, %v2603_v47  ;;  %v488_v38 = vmul.f32 %v2543_v0, %v464_v5  ;;  %v324_v61 = vsub.f32 1.5, %v323_v9  ;;  %vm337_vm3 = vweird.f32 %v2620_v57 }
  0xac   :  { %v2639_v42 = vadd.f32 1e-05, %v209_v3  ;;  %v513_v48 = vadd.f32 %v2558_v56, %v489_v39  ;;  %vm2680_vm6 = vmor %vm336_vm2, %vm337_vm3  ;;  %vm346_vm10 = vweird.f32 %v2652_v28 }
  0xad   :  { %v63_v22 = vpop.xlane.xlu0 %62  ;;  %v332_v24 = vmul.f32 %v2620_v57, %v331_v27  ;;  %v512_v41 = vadd.f32 %v2558_v56, %v488_v38  ;;  %v325_v52 = vmul.f32 %v2617_v55, %v324_v61  ;;  %v227_v27 = vsub.f32 %v2238_v14, %v2562_v58 }
  0xae   :  { %v2655_v60 = vmul.f32 0.0078125, %v63_v22  ;;  %1958 = vrsqrt.f32 %v2639_v42  ;;  %v143_v7 = vpop.xlane.xlu2 %142  ;;  %vm356_vm8 = vweird.f32 %v2639_v42 }
  0xaf   :  { %v333_v2 = vmul.f32 0.5, %v332_v24  ;;  %v141_v34 = vpop.xlane.xlu1 %140  ;;  %1960 = vrsqrt.f32 %v2652_v28  ;;  %v171_v35 = vmul.f32 0.0078125, %v143_v7  ;;  %v530_v32 = vpack.c.bf16 %v513_v48, %v512_v41 }
  0xb0   :  { %753 = vmatmul.bf16.gmra.mxu0 %v529_v18  ;;  %812 = vmatmul.bf16.gmra.mxu1 %v529_v18  ;;  %v191_v20 = vmul.f32 %v2655_v60, %v2655_v60  ;;  %v170_v37 = vmul.f32 0.0078125, %v141_v34  ;;  %v329_v8 = vsel %vm2689_vm7, %v2617_v55, %v325_v52 }
  0xb1   :  { %871 = vmatmul.bf16.gmra.mxu2 %v529_v18  ;;  %930 = vmatmul.bf16.gmra.mxu3 %v529_v18  ;;  %v334_v43 = vsub.f32 1.5, %v333_v2 }
  0xb2   :  { %v211_v29 = vsub.f32 %v171_v35, %v191_v20  ;;  %v210_v1 = vsub.f32 %v170_v37, %v190_v63 }
  0xb3   :  { %v335_v49 = vmul.f32 %v2620_v57, %v334_v43  ;;  %v229_v43 = vsub.f32 %v2247_v16, %v2601_v40 }
  0xb4   :  { %v2667_v4 = vpop.eup %1958  ;;  %v2687_v54 = vadd.f32 1e-05, %v211_v29  ;;  %v2693_v3 = vadd.f32 1e-05, %v210_v1 }
  0xb5   :  { %v65_v45 = vpop.xlane.xlu0 %64  ;;  %v2671_v46 = vpop.eup %1960  ;;  %v351_v47 = vmul.f32 %v2667_v4, %v2639_v42  ;;  %v339_v59 = vsel %vm2680_vm6, %v2620_v57, %v335_v49  ;;  %v226_v57 = vsub.f32 %v2231_v12, %v2552_v53  ;;  %vm357_vm9 = vweird.f32 %v2667_v4 }
  0xb6   :  { %v341_v51 = vmul.f32 %v2671_v46, %v2652_v28  ;;  %1962 = vrsqrt.f32 %v2687_v54  ;;  %v2706_v13 = vmul.f32 0.0078125, %v65_v45  ;;  %v467_v15 = vmul.f32 %v339_v59, %v227_v27  ;;  %v145_v58 = vpop.xlane.xlu2 %144  ;;  %vm2733_vm12 = vmor %vm356_vm8, %vm357_vm9 }
  0xb7   :  { %v352_v62 = vmul.f32 %v2667_v4, %v351_v47  ;;  %v67_v6 = vpop.xlane.xlu1 %66  ;;  %1964 = vrsqrt.f32 %v2693_v3  ;;  %v466_v55 = vmul.f32 %v329_v8, %v226_v57  ;;  %v172_v24 = vmul.f32 0.0078125, %v145_v58 }
  0xb8   :  { %v342_v11 = vmul.f32 %v2671_v46, %v341_v51  ;;  %v2711_v14 = vmul.f32 0.0078125, %v67_v6  ;;  %v192_v23 = vmul.f32 %v2706_v13, %v2706_v13  ;;  %v491_v12 = vmul.f32 %v2543_v0, %v467_v15 }
  0xb9   :  { %v353_v18 = vmul.f32 0.5, %v352_v62  ;;  %v490_v5 = vmul.f32 %v2543_v0, %v466_v55  ;;  %vm347_vm11 = vweird.f32 %v2671_v46  ;;  %vm376_vm14 = vweird.f32 %v2687_v54 }
  0xba   :  { %v343_v10 = vmul.f32 0.5, %v342_v11  ;;  %v193_v25 = vmul.f32 %v2711_v14, %v2711_v14  ;;  %v212_v2 = vsub.f32 %v172_v24, %v192_v23  ;;  %v515_v20 = vadd.f32 %v2558_v56, %v491_v12  ;;  %vm2743_vm13 = vmor %vm346_vm10, %vm347_vm11 }
  0xbb   :  { %v354_v30 = vsub.f32 1.5, %v353_v18  ;;  %v514_v38 = vadd.f32 %v2558_v56, %v490_v5  ;;  %vm366_vm0 = vweird.f32 %v2693_v3  ;;  %v231_v5 = vsub.f32 %v2269_v21, %v2655_v60 }
  0xbc   :  { %v2718_v53 = vpop.eup %1962  ;;  %v344_v7 = vsub.f32 1.5, %v343_v10  ;;  %v2739_v39 = vadd.f32 1e-05, %v212_v2 }
  0xbd   :  { %v147_v22 = vpop.xlane.xlu0 %146  ;;  %v2720_v31 = vpop.eup %1964  ;;  %v355_v35 = vmul.f32 %v2667_v4, %v354_v30  ;;  %v371_v63 = vmul.f32 %v2718_v53, %v2687_v54  ;;  %v531_v45 = vpack.c.bf16 %v515_v20, %v514_v38  ;;  %vm377_vm15 = vweird.f32 %v2718_v53 }
  0xbe   :  { %v173_v26 = vmul.f32 0.0078125, %v147_v22  ;;  %v361_v37 = vmul.f32 %v2720_v31, %v2693_v3  ;;  %v345_v28 = vmul.f32 %v2671_v46, %v344_v7  ;;  %v71_v49 = vpop.xlane.xlu2 %70  ;;  %1966 = vrsqrt.f32 %v2739_v39  ;;  %vm2781_vm2 = vmor %vm376_vm14, %vm377_vm15 }
  0xbf   :  { %v69_v34 = vpop.xlane.xlu1 %68  ;;  %v359_v1 = vsel %vm2733_vm12, %v2667_v4, %v355_v35  ;;  %v372_v41 = vmul.f32 %v2718_v53, %v371_v63  ;;  %v228_v4 = vsub.f32 %v2252_v17, %v2606_v44  ;;  %v2763_v50 = vmul.f32 0.0078125, %v71_v49 }
  0xc0   :  { %758 = vmatmul.bf16.gmra.mxu0 %v530_v32  ;;  %817 = vmatmul.bf16.gmra.mxu1 %v530_v32  ;;  %v213_v9 = vsub.f32 %v173_v26, %v193_v25  ;;  %v362_v48 = vmul.f32 %v2720_v31, %v361_v37  ;;  %v349_v16 = vsel %vm2743_vm13, %v2671_v46, %v345_v28  ;;  %v2758_v40 = vmul.f32 0.0078125, %v69_v34 }
  0xc1   :  { %876 = vmatmul.bf16.gmra.mxu2 %v530_v32  ;;  %935 = vmatmul.bf16.gmra.mxu3 %v530_v32  ;;  %v469_v47 = vmul.f32 %v359_v1, %v229_v43  ;;  %v373_v51 = vmul.f32 0.5, %v372_v41  ;;  %v468_v59 = vmul.f32 %v349_v16, %v228_v4  ;;  %v195_v6 = vmul.f32 %v2763_v50, %v2763_v50 }
  0xc2   :  { %v2747_v29 = vadd.f32 1e-05, %v213_v9  ;;  %v363_v36 = vmul.f32 0.5, %v362_v48  ;;  %v194_v46 = vmul.f32 %v2758_v40, %v2758_v40  ;;  %vm367_vm1 = vweird.f32 %v2720_v31 }
  0xc3   :  { %v493_v17 = vmul.f32 %v2543_v0, %v469_v47  ;;  %v374_v8 = vsub.f32 1.5, %v373_v51  ;;  %v492_v58 = vmul.f32 %v2543_v0, %v468_v59  ;;  %vm2790_vm3 = vmor %vm366_vm0, %vm367_vm1  ;;  %v230_v30 = vsub.f32 %v2261_v19, %v2658_v33 }
  0xc4   :  { %1968 = vrsqrt.f32 %v2747_v29  ;;  %v2770_v44 = vpop.eup %1966  ;;  %v364_v11 = vsub.f32 1.5, %v363_v36  ;;  %vm386_vm4 = vweird.f32 %v2739_v39  ;;  %vm396_vm6 = vweird.f32 %v2747_v29 }
  0xc5   :  { %v149_v52 = vpop.xlane.xlu0 %148  ;;  %v517_v55 = vadd.f32 %v2558_v56, %v493_v17  ;;  %v375_v10 = vmul.f32 %v2718_v53, %v374_v8  ;;  %v381_v24 = vmul.f32 %v2770_v44, %v2739_v39  ;;  %v516_v26 = vadd.f32 %v2558_v56, %v492_v58 }
  0xc6   :  { %v174_v62 = vmul.f32 0.0078125, %v149_v52  ;;  %v73_v15 = vpop.xlane.xlu2 %72  ;;  %v365_v54 = vmul.f32 %v2720_v31, %v364_v11  ;;  %vm387_vm5 = vweird.f32 %v2770_v44  ;;  %v2143_v11 = vld [vmem:[%s3710_s0 + $0x68] sm:$0xff] }
  0xc7   :  { %v151_v32 = vpop.xlane.xlu1 %150  ;;  %v532_v2 = vpack.c.bf16 %v517_v55, %v516_v26  ;;  %v379_v9 = vsel %vm2781_vm2, %v2718_v53, %v375_v10  ;;  %v382_v35 = vmul.f32 %v2770_v44, %v381_v24  ;;  %v2815_v33 = vmul.f32 0.0078125, %v73_v15  ;;  %vm2836_vm8 = vmor %vm386_vm4, %vm387_vm5 }
  0xc8   :  { %v175_v27 = vmul.f32 0.0078125, %v151_v32  ;;  %v214_v18 = vsub.f32 %v174_v62, %v194_v46  ;;  %v369_v20 = vsel %vm2790_vm3, %v2720_v31, %v365_v54  ;;  %v471_v21 = vmul.f32 %v379_v9, %v231_v5 }
  0xc9   :  { %v470_v60 = vmul.f32 %v369_v20, %v230_v30  ;;  %v383_v31 = vmul.f32 0.5, %v382_v35  ;;  %v196_v43 = vmul.f32 %v2815_v33, %v2815_v33  ;;  %v233_v15 = vsub.f32 %v2143_v11, %v2711_v14 }
  0xca   :  { %v2772_v57 = vpop.eup %1968  ;;  %v215_v22 = vsub.f32 %v175_v27, %v195_v6  ;;  %v2795_v12 = vadd.f32 1e-05, %v214_v18  ;;  %v495_v1 = vmul.f32 %v2543_v0, %v471_v21  ;;  %v2142_v6 = vld [vmem:[%s3710_s0 + $0x60] sm:$0xff] }
  0xcb   :  { %v391_v3 = vmul.f32 %v2772_v57, %v2747_v29  ;;  %v384_v48 = vsub.f32 1.5, %v383_v31  ;;  %vm397_vm7 = vweird.f32 %v2772_v57  ;;  %v232_v27 = vsub.f32 %v2142_v6, %v2706_v13 }
  0xcc   :  { %v2801_v7 = vadd.f32 1e-05, %v215_v22  ;;  %1970 = vrsqrt.f32 %v2795_v12  ;;  %v519_v32 = vadd.f32 %v2558_v56, %v495_v1  ;;  %vm2843_vm9 = vmor %vm396_vm6, %vm397_vm7  ;;  %vm406_vm10 = vweird.f32 %v2795_v12  ;;  %v2144_v1 = vld [vmem:[%s3710_s0 + $0x70] sm:$0xff] }
  0xcd   :  { %v75_v34 = vpop.xlane.xlu0 %74  ;;  %v392_v63 = vmul.f32 %v2772_v57, %v391_v3  ;;  %v385_v59 = vmul.f32 %v2770_v44, %v384_v48  ;;  %v234_v48 = vsub.f32 %v2144_v1, %v2758_v40 }
  0xce   :  { %v2812_v19 = vmul.f32 0.0078125, %v75_v34  ;;  %1972 = vrsqrt.f32 %v2801_v7  ;;  %v155_v53 = vpop.xlane.xlu2 %154  ;;  %vm416_vm12 = vweird.f32 %v2801_v7 }
  0xcf   :  { %v393_v37 = vmul.f32 0.5, %v392_v63  ;;  %v153_v42 = vpop.xlane.xlu1 %152  ;;  %v177_v28 = vmul.f32 0.0078125, %v155_v53  ;;  %v389_v55 = vsel %vm2836_vm8, %v2770_v44, %v385_v59 }
  0xd0   :  { %763 = vmatmul.bf16.gmra.mxu0 %v531_v45  ;;  %822 = vmatmul.bf16.gmra.mxu1 %v531_v45  ;;  %v197_v38 = vmul.f32 %v2812_v19, %v2812_v19  ;;  %v176_v61 = vmul.f32 0.0078125, %v153_v42  ;;  %v472_v3 = vmul.f32 %v389_v55, %v232_v27 }
  0xd1   :  { %881 = vmatmul.bf16.gmra.mxu2 %v531_v45  ;;  %940 = vmatmul.bf16.gmra.mxu3 %v531_v45  ;;  %v494_v45 = vmul.f32 %v2543_v0, %v470_v60  ;;  %v394_v49 = vsub.f32 1.5, %v393_v37 }
  0xd2   :  { %v2823_v41 = vpop.eup %1970  ;;  %v217_v47 = vsub.f32 %v177_v28, %v197_v38  ;;  %v216_v51 = vsub.f32 %v176_v61, %v196_v43  ;;  %v496_v9 = vmul.f32 %v2543_v0, %v472_v3  ;;  %v2148_v38 = vld [vmem:[%s3710_s0 + $0x90] sm:$0xff] }
  0xd3   :  { %v401_v52 = vmul.f32 %v2823_v41, %v2795_v12  ;;  %v518_v36 = vadd.f32 %v2558_v56, %v494_v45  ;;  %v395_v39 = vmul.f32 %v2772_v57, %v394_v49  ;;  %vm407_vm11 = vweird.f32 %v2823_v41  ;;  %v2145_v49 = vld [vmem:[%s3710_s0 + $0x78] sm:$0xff] }
  0xd4   :  { %v2825_v4 = vpop.eup %1972  ;;  %v2851_v17 = vadd.f32 1e-05, %v217_v47  ;;  %v2858_v18 = vadd.f32 1e-05, %v216_v51  ;;  %v520_v37 = vadd.f32 %v2558_v56, %v496_v9  ;;  %vm2890_vm14 = vmor %vm406_vm10, %vm407_vm11 }
  0xd5   :  { %v77_v16 = vpop.xlane.xlu0 %76  ;;  %v411_v29 = vmul.f32 %v2825_v4, %v2801_v7  ;;  %v402_v58 = vmul.f32 %v2823_v41, %v401_v52  ;;  %v533_v22 = vpack.c.bf16 %v519_v32, %v518_v36  ;;  %v399_v13 = vsel %vm2843_vm9, %v2772_v57, %v395_v39 }
  0xd6   :  { %v2867_v23 = vmul.f32 0.0078125, %v77_v16  ;;  %v157_v54 = vpop.xlane.xlu2 %156  ;;  %1974 = vrsqrt.f32 %v2851_v17  ;;  %v473_v44 = vmul.f32 %v399_v13, %v233_v15  ;;  %vm417_vm13 = vweird.f32 %v2825_v4 }
  0xd7   :  { %v79_v8 = vpop.xlane.xlu1 %78  ;;  %v412_v10 = vmul.f32 %v2825_v4, %v411_v29  ;;  %v403_v25 = vmul.f32 0.5, %v402_v58  ;;  %1976 = vrsqrt.f32 %v2858_v18  ;;  %v178_v30 = vmul.f32 0.0078125, %v157_v54  ;;  %vm2901_vm15 = vmor %vm416_vm12, %vm417_vm13 }
  0xd8   :  { %v2869_v14 = vmul.f32 0.0078125, %v79_v8  ;;  %v198_v26 = vmul.f32 %v2867_v23, %v2867_v23  ;;  %v497_v20 = vmul.f32 %v2543_v0, %v473_v44  ;;  %v235_v16 = vsub.f32 %v2145_v49, %v2763_v50 }
  0xd9   :  { %v413_v57 = vmul.f32 0.5, %v412_v10  ;;  %v404_v34 = vsub.f32 1.5, %v403_v25  ;;  %vm436_vm0 = vweird.f32 %v2851_v17  ;;  %vm426_vm2 = vweird.f32 %v2858_v18  ;;  %v2146_v10 = vld [vmem:[%s3710_s0 + $0x80] sm:$0xff] }
  0xda   :  { %v199_v5 = vmul.f32 %v2869_v14, %v2869_v14  ;;  %v218_v21 = vsub.f32 %v178_v30, %v198_v26  ;;  %v521_v42 = vadd.f32 %v2558_v56, %v497_v20  ;;  %v236_v54 = vsub.f32 %v2146_v10, %v2815_v33  ;;  %v570_v20 = vld [vmem:[%s3714_s2] sm:$0xf] }
  0xdb   :  { %v414_v63 = vsub.f32 1.5, %v413_v57  ;;  %v405_v31 = vmul.f32 %v2823_v41, %v404_v34 }
  0xdc   :  { %v2879_v35 = vpop.eup %1974  ;;  %v2899_v43 = vadd.f32 1e-05, %v218_v21  ;;  %v534_v52 = vpack.c.bf16 %v521_v42, %v520_v37 }
  0xdd   :  { %v159_v24 = vpop.xlane.xlu0 %158  ;;  %v2881_v60 = vpop.eup %1976  ;;  %v415_v28 = vmul.f32 %v2825_v4, %v414_v63  ;;  %v431_v12 = vmul.f32 %v2879_v35, %v2851_v17  ;;  %v409_v47 = vsel %vm2890_vm14, %v2823_v41, %v405_v31  ;;  %vm437_vm1 = vweird.f32 %v2879_v35 }
  0xde   :  { %v421_v7 = vmul.f32 %v2881_v60, %v2858_v18  ;;  %1978 = vrsqrt.f32 %v2899_v43  ;;  %v474_v40 = vmul.f32 %v409_v47, %v234_v48  ;;  %vm427_vm3 = vweird.f32 %v2881_v60  ;;  %vm2942_vm4 = vmor %vm436_vm0, %vm437_vm1 }
  0xdf   :  { %v419_v51 = vsel %vm2901_vm15, %v2825_v4, %v415_v28  ;;  %v432_v36 = vmul.f32 %v2879_v35, %v431_v12  ;;  %vm2947_vm5 = vmor %vm426_vm2, %vm427_vm3  ;;  %vm446_vm6 = vweird.f32 %v2899_v43  ;;  %v2988_v31 = vperm.slane %v570_v20, 1  ;;  %v2149_v12 = vld [vmem:[%s3710_s0 + $0x98] sm:$0xff] }
  0xe0   :  { %768 = vmatmul.bf16.gmra.mxu0 %v532_v2  ;;  %827 = vmatmul.bf16.gmra.mxu1 %v532_v2  ;;  %v422_v32 = vmul.f32 %v2881_v60, %v421_v7  ;;  %v475_v50 = vmul.f32 %v419_v51, %v235_v16  ;;  %v498_v4 = vmul.f32 %v2543_v0, %v474_v40 }
  0xe1   :  { %886 = vmatmul.bf16.gmra.mxu2 %v532_v2  ;;  %945 = vmatmul.bf16.gmra.mxu3 %v532_v2  ;;  %v179_v2 = vmul.f32 0.0078125, %v159_v24  ;;  %v433_v41 = vmul.f32 0.5, %v432_v36  ;;  %v2147_v24 = vld [vmem:[%s3710_s0 + $0x88] sm:$0xff]  ;;  %v238_v28 = vsub.f32 %v2148_v38, %v2867_v23  ;;  %v239_v7 = vsub.f32 %v2149_v12, %v2869_v14 }
  0xe2   :  { %v423_v59 = vmul.f32 0.5, %v422_v32  ;;  %v499_v29 = vmul.f32 %v2543_v0, %v475_v50  ;;  %v522_v11 = vadd.f32 %v2558_v56, %v498_v4  ;;  %v237_v3 = vsub.f32 %v2147_v24, %v2812_v19 }
  0xe3   :  { %v219_v53 = vsub.f32 %v179_v2, %v199_v5  ;;  %v434_v62 = vsub.f32 1.5, %v433_v41  ;;  %v3008_v14 = vperm.slane %v570_v20, 2  ;;  %v3010_v36 = vperm.slane %v570_v20, 3 }
  0xe4   :  { %v2925_v46 = vpop.eup %1978  ;;  %v424_v6 = vsub.f32 1.5, %v423_v59  ;;  %v523_v15 = vadd.f32 %v2558_v56, %v499_v29 }
  0xe5   :  { %v2905_v45 = vadd.f32 1e-05, %v219_v53  ;;  %v441_v27 = vmul.f32 %v2925_v46, %v2899_v43  ;;  %v435_v58 = vmul.f32 %v2879_v35, %v434_v62  ;;  %vm447_vm7 = vweird.f32 %v2925_v46 }
  0xe6   :  { %v425_v18 = vmul.f32 %v2881_v60, %v424_v6  ;;  %v535_v44 = vpack.c.bf16 %v523_v15, %v522_v11  ;;  %vm2977_vm10 = vmor %vm446_vm6, %vm447_vm7  ;;  %v2986_v53 = vperm.slane %v570_v20, 0 }
  0xe7   :  { %1980 = vrsqrt.f32 %v2905_v45  ;;  %v442_v55 = vmul.f32 %v2925_v46, %v441_v27  ;;  %v439_v25 = vsel %vm2942_vm4, %v2879_v35, %v435_v58  ;;  %vm456_vm8 = vweird.f32 %v2905_v45 }
  0xe8   :  { %v429_v57 = vsel %vm2947_vm5, %v2881_v60, %v425_v18  ;;  %v477_v33 = vmul.f32 %v439_v25, %v237_v3 }
  0xe9   :  { %v443_v26 = vmul.f32 0.5, %v442_v55  ;;  %v476_v5 = vmul.f32 %v429_v57, %v236_v54 }
  0xea   :  { %v501_v9 = vmul.f32 %v2543_v0, %v477_v33 }
  0xeb   :  { %v444_v2 = vsub.f32 1.5, %v443_v26  ;;  %v500_v19 = vmul.f32 %v2543_v0, %v476_v5 }
  0xec   :  { %v525_v42 = vadd.f32 %v2558_v56, %v501_v9 }
  0xed   :  { %v2927_v39 = vpop.eup %1980  ;;  %v445_v35 = vmul.f32 %v2925_v46, %v444_v2  ;;  %v524_v37 = vadd.f32 %v2558_v56, %v500_v19 }
  0xee   :  { %v451_v8 = vmul.f32 %v2927_v39, %v2905_v45  ;;  %vm457_vm9 = vweird.f32 %v2927_v39 }
  0xef   :  { %vm2982_vm11 = vmor %vm456_vm8, %vm457_vm9  ;;  %v449_v43 = vsel %vm2977_vm10, %v2925_v46, %v445_v35  ;;  %v536_v49 = vpack.c.bf16 %v525_v42, %v524_v37 }
  0xf0   :  { %773 = vmatmul.bf16.gmra.mxu0 %v533_v22  ;;  %832 = vmatmul.bf16.gmra.mxu1 %v533_v22  ;;  %v452_v13 = vmul.f32 %v2927_v39, %v451_v8  ;;  %v478_v16 = vmul.f32 %v449_v43, %v238_v28 }
  0xf1   :  { %891 = vmatmul.bf16.gmra.mxu2 %v533_v22  ;;  %950 = vmatmul.bf16.gmra.mxu3 %v533_v22 }
  0xf2   :  { %v453_v30 = vmul.f32 0.5, %v452_v13 }
  0xf4   :  { %v454_v34 = vsub.f32 1.5, %v453_v30 }
  0xf6   :  { %v455_v21 = vmul.f32 %v2927_v39, %v454_v34 }
  0xf8   :  { %v459_v61 = vsel %vm2982_vm11, %v2927_v39, %v455_v21  ;;  %v502_v39 = vmul.f32 %v2543_v0, %v478_v16 }
  0xf9   :  { %v479_v47 = vmul.f32 %v459_v61, %v239_v7 }
  0xfa   :  { %v526_v13 = vadd.f32 %v2558_v56, %v502_v39 }
  0xfb   :  { %v503_v4 = vmul.f32 %v2543_v0, %v479_v47 }
  0xfd   :  { %v527_v0 = vadd.f32 %v2558_v56, %v503_v4 }
  0xff   :  { %v537_v2 = vpack.c.bf16 %v527_v0, %v526_v13 }
 0x100   :  { %778 = vmatmul.bf16.gmra.mxu0 %v534_v52  ;;  %837 = vmatmul.bf16.gmra.mxu1 %v534_v52 }
 0x101   :  { %896 = vmatmul.bf16.gmra.mxu2 %v534_v52  ;;  %955 = vmatmul.bf16.gmra.mxu3 %v534_v52 }
 0x110   :  { %783 = vmatmul.bf16.gmra.mxu0 %v535_v44  ;;  %842 = vmatmul.bf16.gmra.mxu1 %v535_v44 }
 0x111   :  { %901 = vmatmul.bf16.gmra.mxu2 %v535_v44  ;;  %960 = vmatmul.bf16.gmra.mxu3 %v535_v44 }
 0x11d   :  { %v749_v45 = vpop.f32.mrf.mxu0  ;;  %v808_v1 = vpop.f32.mrf.mxu1 }
 0x11e   :  { %v750_v48 = vadd.f32 %v749_v45, %v2986_v53  ;;  %v809_v23 = vadd.f32 %v808_v1, %v2988_v31 }
 0x120   :  { %v1056_v52 = vmul.f32 0.044715, %v750_v48  ;;  %v1057_v51 = vmul.f32 0.044715, %v809_v23  ;;  %788 = vmatmul.bf16.gmra.mxu0 %v536_v49  ;;  %847 = vmatmul.bf16.gmra.mxu1 %v536_v49  ;;  %v976_v26 = vmul.f32 0.5, %v750_v48  ;;  %v977_v35 = vmul.f32 0.5, %v809_v23 }
 0x121   :  { %906 = vmatmul.bf16.gmra.mxu2 %v536_v49  ;;  %965 = vmatmul.bf16.gmra.mxu3 %v536_v49 }
 0x122   :  { %v1136_v32 = vmul.f32 %v1056_v52, %v750_v48  ;;  %v1137_v40 = vmul.f32 %v1057_v51, %v809_v23 }
 0x124   :  { %v1216_v50 = vmul.f32 %v1136_v32, %v750_v48  ;;  %v1217_v41 = vmul.f32 %v1137_v40, %v809_v23  ;;  %v867_v59 = vpop.f32.mrf.mxu2  ;;  %v926_v46 = vpop.f32.mrf.mxu3 }
 0x125   :  { %v868_v29 = vadd.f32 %v867_v59, %v3008_v14  ;;  %v927_v62 = vadd.f32 %v926_v46, %v3010_v36  ;;  %v751_v6 = vpop.f32.mrf.mxu0  ;;  %v810_v27 = vpop.f32.mrf.mxu1 }
 0x126   :  { %v1296_v8 = vadd.f32 %v1216_v50, %v750_v48  ;;  %v1297_v11 = vadd.f32 %v1217_v41, %v809_v23  ;;  %v752_v15 = vadd.f32 %v751_v6, %v2986_v53  ;;  %v3018_v58 = vadd.f32 %v810_v27, %v2988_v31 }
 0x127   :  { %v1058_v17 = vmul.f32 0.044715, %v868_v29  ;;  %v1059_v18 = vmul.f32 0.044715, %v927_v62  ;;  %v3025_v63 = vmul.f32 0.5, %v868_v29  ;;  %v979_v43 = vmul.f32 0.5, %v927_v62 }
 0x128   :  { %v1376_v22 = vmul.f32 0.7978846, %v1296_v8  ;;  %v1377_v55 = vmul.f32 0.7978846, %v1297_v11  ;;  %v1060_v24 = vmul.f32 0.044715, %v752_v15 }
 0x129   :  { %v1138_v10 = vmul.f32 %v1058_v17, %v868_v29  ;;  %v1139_v54 = vmul.f32 %v1059_v18, %v927_v62  ;;  %v1061_v3 = vmul.f32 0.044715, %v3018_v58  ;;  %v980_v59 = vmul.f32 0.5, %v752_v15 }
 0x12a   :  { %1982 = vtanh.f32 %v1376_v22  ;;  %v1140_v57 = vmul.f32 %v1060_v24, %v752_v15  ;;  %v981_v17 = vmul.f32 0.5, %v3018_v58 }
 0x12b   :  { %1984 = vtanh.f32 %v1377_v55  ;;  %v1218_v44 = vmul.f32 %v1138_v10, %v868_v29  ;;  %v1219_v25 = vmul.f32 %v1139_v54, %v927_v62  ;;  %v1141_v30 = vmul.f32 %v1061_v3, %v3018_v58 }
 0x12c   :  { %v869_v33 = vpop.f32.mrf.mxu2  ;;  %v928_v5 = vpop.f32.mrf.mxu3  ;;  %v1220_v9 = vmul.f32 %v1140_v57, %v752_v15 }
 0x12d   :  { %v1298_v34 = vadd.f32 %v1218_v44, %v868_v29  ;;  %v1299_v19 = vadd.f32 %v1219_v25, %v927_v62  ;;  %v870_v56 = vadd.f32 %v869_v33, %v3008_v14  ;;  %v754_v20 = vpop.f32.mrf.mxu0  ;;  %v1221_v21 = vmul.f32 %v1141_v30, %v3018_v58  ;;  %v813_v37 = vpop.f32.mrf.mxu1 }
 0x12e   :  { %v3029_v60 = vadd.f32 %v928_v5, %v3010_v36  ;;  %v1300_v28 = vadd.f32 %v1220_v9, %v752_v15  ;;  %v3032_v12 = vadd.f32 %v754_v20, %v2986_v53  ;;  %v3037_v16 = vadd.f32 %v813_v37, %v2988_v31 }
 0x12f   :  { %v1378_v42 = vmul.f32 0.7978846, %v1298_v34  ;;  %v1379_v38 = vmul.f32 0.7978846, %v1299_v19  ;;  %v1301_v61 = vadd.f32 %v1221_v21, %v3018_v58  ;;  %v1062_v45 = vmul.f32 0.044715, %v870_v56 }
 0x130   :  { %v1983_v7 = vpop.eup %1982  ;;  %v1063_v1 = vmul.f32 0.044715, %v3029_v60  ;;  %793 = vmatmul.bf16.gmra.mxu0 %v537_v2  ;;  %852 = vmatmul.bf16.gmra.mxu1 %v537_v2  ;;  %v1380_v49 = vmul.f32 0.7978846, %v1300_v28  ;;  %v1064_v50 = vmul.f32 0.044715, %v3032_v12 }
 0x131   :  { %v1985_v48 = vpop.eup %1984  ;;  %v1536_v23 = vadd.f32 1.0, %v1983_v7  ;;  %1986 = vtanh.f32 %v1378_v42  ;;  %911 = vmatmul.bf16.gmra.mxu2 %v537_v2  ;;  %970 = vmatmul.bf16.gmra.mxu3 %v537_v2  ;;  %v1381_v52 = vmul.f32 0.7978846, %v1301_v61  ;;  %v1142_v51 = vmul.f32 %v1062_v45, %v870_v56 }
 0x132   :  { %v1537_v47 = vadd.f32 1.0, %v1985_v48  ;;  %1988 = vtanh.f32 %v1379_v38  ;;  %v1143_v40 = vmul.f32 %v1063_v1, %v3029_v60  ;;  %v1144_v62 = vmul.f32 %v1064_v50, %v3032_v12 }
 0x133   :  { %v1616_v32 = vmul.f32 %v1536_v23, %v976_v26  ;;  %1990 = vtanh.f32 %v1380_v49  ;;  %v1222_v46 = vmul.f32 %v1142_v51, %v870_v56  ;;  %v1065_v6 = vmul.f32 0.044715, %v3037_v16 }
 0x134   :  { %v1617_v41 = vmul.f32 %v1537_v47, %v977_v35  ;;  %1992 = vtanh.f32 %v1381_v52  ;;  %v872_v39 = vpop.f32.mrf.mxu2  ;;  %v931_v4 = vpop.f32.mrf.mxu3  ;;  %v1223_v29 = vmul.f32 %v1143_v40, %v3029_v60  ;;  %v3048_v18 = vmul.f32 0.5, %v870_v56 }
 0x135   :  { %v3045_v27 = vadd.f32 %v872_v39, %v3008_v14  ;;  %v756_v8 = vpop.f32.mrf.mxu0  ;;  %v1302_v15 = vadd.f32 %v1222_v46, %v870_v56  ;;  %v1224_v13 = vmul.f32 %v1144_v62, %v3032_v12  ;;  %v1145_v0 = vmul.f32 %v1065_v6, %v3037_v16  ;;  %v815_v35 = vpop.f32.mrf.mxu1 }
 0x136   :  { %v1696_v11 = vpack.c.bf16 %v1617_v41, %v1616_v32  ;;  %v1303_v55 = vadd.f32 %v1223_v29, %v3029_v60  ;;  %v3054_v10 = vadd.f32 %v931_v4, %v3010_v36  ;;  %v3061_v44 = vadd.f32 %v756_v8, %v2986_v53 }
 0x137   :  { %v1987_v22 = vpop.eup %1986  ;;  %v1382_v58 = vmul.f32 0.7978846, %v1302_v15  ;;  %v1066_v3 = vmul.f32 0.044715, %v3045_v27  ;;  %v1304_v30 = vadd.f32 %v1224_v13, %v3032_v12  ;;  %v1225_v33 = vmul.f32 %v1145_v0, %v3037_v16 }
 0x138   :  { %v1989_v54 = vpop.eup %1988  ;;  %1736 = vst [vmem:[%s3715_s5] sm:$0xff] %v1696_v11  ;;  %v1538_v24 = vadd.f32 1.0, %v1987_v22  ;;  %v1383_v26 = vmul.f32 0.7978846, %v1303_v55  ;;  %v1067_v38 = vmul.f32 0.044715, %v3054_v10  ;;  %v984_v47 = vmul.f32 0.5, %v3032_v12 }
 0x139   :  { %v1991_v25 = vpop.eup %1990  ;;  %v1539_v57 = vadd.f32 1.0, %v1989_v54  ;;  %1994 = vtanh.f32 %v1382_v58  ;;  %v1146_v19 = vmul.f32 %v1066_v3, %v3045_v27  ;;  %v1384_v20 = vmul.f32 0.7978846, %v1304_v30 }
 0x13a   :  { %v1993_v5 = vpop.eup %1992  ;;  %v1618_v2 = vmul.f32 %v1538_v24, %v3025_v63  ;;  %v1540_v34 = vadd.f32 1.0, %v1991_v25  ;;  %1996 = vtanh.f32 %v1383_v26  ;;  %v1305_v37 = vadd.f32 %v1225_v33, %v3037_v16 }
 0x13b   :  { %v1619_v9 = vmul.f32 %v1539_v57, %v979_v43  ;;  %v1541_v56 = vadd.f32 1.0, %v1993_v5  ;;  %v1226_v42 = vmul.f32 %v1146_v19, %v3045_v27  ;;  %v983_v63 = vmul.f32 0.5, %v3029_v60 }
 0x13c   :  { %v1620_v21 = vmul.f32 %v1540_v34, %v980_v59  ;;  %v874_v28 = vpop.f32.mrf.mxu2  ;;  %1998 = vtanh.f32 %v1384_v20  ;;  %v1385_v45 = vmul.f32 0.7978846, %v1305_v37  ;;  %v1147_v1 = vmul.f32 %v1067_v38, %v3054_v10  ;;  %v933_v23 = vpop.f32.mrf.mxu3 }
 0x13d   :  { %v1697_v7 = vpack.c.bf16 %v1619_v9, %v1618_v2  ;;  %v1621_v61 = vmul.f32 %v1541_v56, %v981_v17  ;;  %v1306_v43 = vadd.f32 %v1226_v42, %v3045_v27  ;;  %v1068_v48 = vmul.f32 0.044715, %v3061_v44  ;;  %v759_v4 = vpop.f32.mrf.mxu0  ;;  %v818_v25 = vpop.f32.mrf.mxu1 }
 0x13e   :  { %v816_v52 = vadd.f32 %v815_v35, %v2988_v31  ;;  %v3080_v60 = vadd.f32 %v874_v28, %v3008_v14  ;;  %2000 = vtanh.f32 %v1385_v45  ;;  %v1227_v40 = vmul.f32 %v1147_v1, %v3054_v10 }
 0x13f   :  { %1737 = vst [vmem:[%s3715_s5 + $0x8] sm:$0xff] %v1697_v7  ;;  %v1698_v49 = vpack.c.bf16 %v1621_v61, %v1620_v21  ;;  %v1995_v51 = vpop.eup %1994  ;;  %v1386_v32 = vmul.f32 0.7978846, %v1306_v43  ;;  %v1148_v50 = vmul.f32 %v1068_v48, %v3061_v44  ;;  %v985_v12 = vmul.f32 0.5, %v3037_v16 }
 0x140   :  { %v1997_v41 = vpop.eup %1996  ;;  %v1542_v59 = vadd.f32 1.0, %v1995_v51  ;;  %v1069_v46 = vmul.f32 0.044715, %v816_v52  ;;  %v3089_v39 = vadd.f32 %v933_v23, %v3010_v36  ;;  %v1307_v62 = vadd.f32 %v1227_v40, %v3054_v10 }
 0x141   :  { %1738 = vst [vmem:[%s3715_s5 + $0x10] sm:$0xff] %v1698_v49  ;;  %v1543_v29 = vadd.f32 1.0, %v1997_v41  ;;  %2002 = vtanh.f32 %v1386_v32  ;;  %v1228_v6 = vmul.f32 %v1148_v50, %v3061_v44  ;;  %v986_v17 = vmul.f32 0.5, %v3045_v27 }
 0x142   :  { %v1999_v8 = vpop.eup %1998  ;;  %v1622_v11 = vmul.f32 %v1542_v59, %v3048_v18  ;;  %v1149_v15 = vmul.f32 %v1069_v46, %v816_v52  ;;  %v1070_v22 = vmul.f32 0.044715, %v3080_v60  ;;  %v1387_v13 = vmul.f32 0.7978846, %v1307_v62 }
 0x143   :  { %v1623_v16 = vmul.f32 %v1543_v29, %v983_v63  ;;  %v1544_v55 = vadd.f32 1.0, %v1999_v8  ;;  %v1308_v0 = vadd.f32 %v1228_v6, %v3061_v44  ;;  %v1071_v58 = vmul.f32 0.044715, %v3089_v39 }
 0x144   :  { %v1229_v54 = vmul.f32 %v1149_v15, %v816_v52  ;;  %v1150_v24 = vmul.f32 %v1070_v22, %v3080_v60  ;;  %v3100_v3 = vadd.f32 %v759_v4, %v2986_v53  ;;  %v2001_v18 = vpop.eup %2000  ;;  %2004 = vtanh.f32 %v1387_v13  ;;  %v877_v30 = vpop.f32.mrf.mxu2 }
 0x145   :  { %v1699_v57 = vpack.c.bf16 %v1623_v16, %v1622_v11  ;;  %v1624_v27 = vmul.f32 %v1544_v55, %v984_v47  ;;  %v1388_v26 = vmul.f32 0.7978846, %v1308_v0  ;;  %v1545_v33 = vadd.f32 1.0, %v2001_v18  ;;  %v761_v1 = vpop.f32.mrf.mxu0 }
 0x146   :  { %v1309_v5 = vadd.f32 %v1229_v54, %v816_v52  ;;  %v1230_v2 = vmul.f32 %v1150_v24, %v3080_v60  ;;  %v1151_v34 = vmul.f32 %v1071_v58, %v3089_v39  ;;  %v987_v9 = vmul.f32 0.5, %v3054_v10  ;;  %v936_v10 = vpop.f32.mrf.mxu3 }
 0x147   :  { %v2003_v19 = vpop.eup %2002  ;;  %1739 = vst [vmem:[%s3715_s5 + $0x18] sm:$0xff] %v1699_v57  ;;  %2006 = vtanh.f32 %v1388_v26  ;;  %v1072_v56 = vmul.f32 0.044715, %v3100_v3  ;;  %v3110_v20 = vadd.f32 %v818_v25, %v2988_v31  ;;  %v1625_v35 = vmul.f32 %v1545_v33, %v985_v12 }
 0x148   :  { %v1546_v21 = vadd.f32 1.0, %v2003_v19  ;;  %v1389_v37 = vmul.f32 0.7978846, %v1309_v5  ;;  %v1310_v42 = vadd.f32 %v1230_v2, %v3080_v60  ;;  %v988_v38 = vmul.f32 0.5, %v3061_v44 }
 0x149   :  { %v1231_v28 = vmul.f32 %v1151_v34, %v3089_v39  ;;  %v1152_v7 = vmul.f32 %v1072_v56, %v3100_v3  ;;  %v1073_v61 = vmul.f32 0.044715, %v3110_v20  ;;  %v1700_v63 = vpack.c.bf16 %v1625_v35, %v1624_v27 }
 0x14a   :  { %v989_v45 = vmul.f32 0.5, %v816_v52  ;;  %2008 = vtanh.f32 %v1389_v37  ;;  %v1390_v43 = vmul.f32 0.7978846, %v1310_v42  ;;  %v2005_v48 = vpop.eup %2004  ;;  %v3121_v44 = vadd.f32 %v877_v30, %v3008_v14 }
 0x14b   :  { %v1311_v23 = vadd.f32 %v1231_v28, %v3089_v39  ;;  %v1232_v49 = vmul.f32 %v1152_v7, %v3100_v3  ;;  %v1153_v47 = vmul.f32 %v1073_v61, %v3110_v20  ;;  %1740 = vst [vmem:[%s3715_s5 + $0x20] sm:$0xff] %v1700_v63  ;;  %v1626_v51 = vmul.f32 %v1546_v21, %v986_v17  ;;  %v820_v17 = vpop.f32.mrf.mxu1 }
 0x14c   :  { %v1547_v32 = vadd.f32 1.0, %v2005_v48  ;;  %2010 = vtanh.f32 %v1390_v43  ;;  %v3127_v52 = vadd.f32 %v936_v10, %v3010_v36  ;;  %v990_v50 = vmul.f32 0.5, %v3080_v60  ;;  %v879_v60 = vpop.f32.mrf.mxu2 }
 0x14d   :  { %v2007_v40 = vpop.eup %2006  ;;  %v1391_v41 = vmul.f32 0.7978846, %v1311_v23  ;;  %v1312_v59 = vadd.f32 %v1232_v49, %v3100_v3  ;;  %v1233_v12 = vmul.f32 %v1153_v47, %v3110_v20  ;;  %v1074_v29 = vmul.f32 0.044715, %v3121_v44 }
 0x14e   :  { %v1627_v46 = vmul.f32 %v1547_v32, %v987_v9  ;;  %v1548_v4 = vadd.f32 1.0, %v2007_v40  ;;  %v3134_v62 = vadd.f32 %v761_v1, %v2986_v53  ;;  %v1075_v11 = vmul.f32 0.044715, %v3127_v52  ;;  %v938_v19 = vpop.f32.mrf.mxu3  ;;  %v764_v9 = vpop.f32.mrf.mxu0 }
 0x14f   :  { %2012 = vtanh.f32 %v1391_v41  ;;  %v1392_v6 = vmul.f32 0.7978846, %v1312_v59  ;;  %v1313_v8 = vadd.f32 %v1233_v12, %v3110_v20  ;;  %v991_v55 = vmul.f32 0.5, %v3089_v39 }
 0x150   :  { %v2009_v15 = vpop.eup %2008  ;;  %v1701_v22 = vpack.c.bf16 %v1627_v46, %v1626_v51  ;;  %v1628_v16 = vmul.f32 %v1548_v4, %v988_v38  ;;  %v1154_v13 = vmul.f32 %v1074_v29, %v3121_v44  ;;  %v1155_v24 = vmul.f32 %v1075_v11, %v3127_v52 }
 0x151   :  { %v1549_v0 = vadd.f32 1.0, %v2009_v15  ;;  %2014 = vtanh.f32 %v1392_v6  ;;  %v1393_v54 = vmul.f32 0.7978846, %v1313_v8  ;;  %v1076_v18 = vmul.f32 0.044715, %v3134_v62 }
 0x152   :  { %v2011_v58 = vpop.eup %2010  ;;  %1741 = vst [vmem:[%s3715_s5 + $0x28] sm:$0xff] %v1701_v22  ;;  %v1234_v25 = vmul.f32 %v1154_v13, %v3121_v44  ;;  %v3147_v57 = vadd.f32 %v820_v17, %v2988_v31  ;;  %v3150_v39 = vadd.f32 %v879_v60, %v3008_v14  ;;  %v1235_v30 = vmul.f32 %v1155_v24, %v3127_v52 }
 0x153   :  { %v1629_v27 = vmul.f32 %v1549_v0, %v989_v45  ;;  %v1550_v26 = vadd.f32 1.0, %v2011_v58  ;;  %2016 = vtanh.f32 %v1393_v54  ;;  %v992_v33 = vmul.f32 0.5, %v3100_v3  ;;  %v823_v32 = vpop.f32.mrf.mxu1 }
 0x154   :  { %v1314_v5 = vadd.f32 %v1234_v25, %v3121_v44  ;;  %v1156_v2 = vmul.f32 %v1076_v18, %v3134_v62  ;;  %v1077_v34 = vmul.f32 0.044715, %v3147_v57  ;;  %v993_v37 = vmul.f32 0.5, %v3110_v20  ;;  %v882_v12 = vpop.f32.mrf.mxu2 }
 0x155   :  { %v2013_v56 = vpop.eup %2012  ;;  %v1702_v35 = vpack.c.bf16 %v1629_v27, %v1628_v16  ;;  %v1630_v21 = vmul.f32 %v1550_v26, %v990_v50  ;;  %v1315_v42 = vadd.f32 %v1235_v30, %v3127_v52  ;;  %v1078_v63 = vmul.f32 0.044715, %v3150_v39 }
 0x156   :  { %v1551_v38 = vadd.f32 1.0, %v2013_v56  ;;  %v1394_v28 = vmul.f32 0.7978846, %v1314_v5  ;;  %v1236_v7 = vmul.f32 %v1156_v2, %v3134_v62  ;;  %v1157_v3 = vmul.f32 %v1077_v34, %v3147_v57  ;;  %v941_v18 = vpop.f32.mrf.mxu3  ;;  %v766_v27 = vpop.f32.mrf.mxu0 }
 0x157   :  { %v2015_v61 = vpop.eup %2014  ;;  %1742 = vst [vmem:[%s3715_s5 + $0x30] sm:$0xff] %v1702_v35  ;;  %v1395_v10 = vmul.f32 0.7978846, %v1315_v42  ;;  %v3166_v45 = vadd.f32 %v938_v19, %v3010_v36  ;;  %v3169_v20 = vadd.f32 %v764_v9, %v2986_v53  ;;  %v994_v49 = vmul.f32 0.5, %v3121_v44 }
 0x158   :  { %v1631_v43 = vmul.f32 %v1551_v38, %v991_v55  ;;  %v1552_v1 = vadd.f32 1.0, %v2015_v61  ;;  %2018 = vtanh.f32 %v1394_v28  ;;  %v1316_v48 = vadd.f32 %v1236_v7, %v3134_v62 }
 0x159   :  { %v2017_v23 = vpop.eup %2016  ;;  %2020 = vtanh.f32 %v1395_v10  ;;  %v1237_v47 = vmul.f32 %v1157_v3, %v3147_v57  ;;  %v1158_v51 = vmul.f32 %v1078_v63, %v3150_v39  ;;  %v995_v46 = vmul.f32 0.5, %v3127_v52 }
 0x15a   :  { %v1703_v40 = vpack.c.bf16 %v1631_v43, %v1630_v21  ;;  %v1632_v50 = vmul.f32 %v1552_v1, %v992_v33  ;;  %v1553_v41 = vadd.f32 1.0, %v2017_v23  ;;  %v1396_v59 = vmul.f32 0.7978846, %v1316_v48 }
 0x15b   :  { %v1317_v4 = vadd.f32 %v1237_v47, %v3147_v57  ;;  %v1238_v29 = vmul.f32 %v1158_v51, %v3150_v39  ;;  %v1079_v6 = vmul.f32 0.044715, %v3166_v45  ;;  %v1080_v8 = vmul.f32 0.044715, %v3169_v20  ;;  %v825_v28 = vpop.f32.mrf.mxu1 }
 0x15c   :  { %1743 = vst [vmem:[%s3715_s5 + $0x38] sm:$0xff] %v1703_v40  ;;  %v1633_v44 = vmul.f32 %v1553_v41, %v993_v37  ;;  %2022 = vtanh.f32 %v1396_v59  ;;  %v3184_v11 = vadd.f32 %v823_v32, %v2988_v31  ;;  %v3189_v15 = vadd.f32 %v882_v12, %v3008_v14  ;;  %v884_v23 = vpop.f32.mrf.mxu2 }
 0x15d   :  { %v1397_v17 = vmul.f32 0.7978846, %v1317_v4  ;;  %v1318_v52 = vadd.f32 %v1238_v29, %v3150_v39  ;;  %v1159_v60 = vmul.f32 %v1079_v6, %v3166_v45  ;;  %v996_v55 = vmul.f32 0.5, %v3134_v62 }
 0x15e   :  { %v2019_v22 = vpop.eup %2018  ;;  %v1704_v16 = vpack.c.bf16 %v1633_v44, %v1632_v50  ;;  %v1160_v13 = vmul.f32 %v1080_v8, %v3169_v20  ;;  %v1081_v0 = vmul.f32 0.044715, %v3184_v11  ;;  %v997_v30 = vmul.f32 0.5, %v3147_v57  ;;  %v943_v44 = vpop.f32.mrf.mxu3 }
 0x15f   :  { %v2021_v54 = vpop.eup %2020  ;;  %v1554_v24 = vadd.f32 1.0, %v2019_v22  ;;  %2024 = vtanh.f32 %v1397_v17  ;;  %v1398_v58 = vmul.f32 0.7978846, %v1318_v52  ;;  %v1239_v25 = vmul.f32 %v1159_v60, %v3166_v45  ;;  %v769_v8 = vpop.f32.mrf.mxu0 }
 0x160   :  { %1744 = vst [vmem:[%s3715_s5 + $0x40] sm:$0xff] %v1704_v16  ;;  %v1555_v26 = vadd.f32 1.0, %v2021_v54  ;;  %v1240_v62 = vmul.f32 %v1160_v13, %v3169_v20  ;;  %v1161_v33 = vmul.f32 %v1081_v0, %v3184_v11  ;;  %v1082_v34 = vmul.f32 0.044715, %v3189_v15 }
 0x161   :  { %v1634_v5 = vmul.f32 %v1554_v24, %v994_v49  ;;  %2026 = vtanh.f32 %v1398_v58  ;;  %v1319_v2 = vadd.f32 %v1239_v25, %v3166_v45  ;;  %v3206_v21 = vadd.f32 %v941_v18, %v3010_v36 }
 0x162   :  { %v2023_v19 = vpop.eup %2022  ;;  %v1635_v9 = vmul.f32 %v1555_v26, %v995_v46  ;;  %v1320_v56 = vadd.f32 %v1240_v62, %v3169_v20  ;;  %v1241_v35 = vmul.f32 %v1161_v33, %v3184_v11  ;;  %v1162_v42 = vmul.f32 %v1082_v34, %v3189_v15 }
 0x163   :  { %v1556_v57 = vadd.f32 1.0, %v2023_v19  ;;  %v1399_v37 = vmul.f32 0.7978846, %v1319_v2  ;;  %v3210_v38 = vadd.f32 %v766_v27, %v2986_v53  ;;  %v998_v3 = vmul.f32 0.5, %v3150_v39 }
 0x164   :  { %v1705_v7 = vpack.c.bf16 %v1635_v9, %v1634_v5  ;;  %v1400_v61 = vmul.f32 0.7978846, %v1320_v56  ;;  %v1321_v10 = vadd.f32 %v1241_v35, %v3184_v11  ;;  %v999_v43 = vmul.f32 0.5, %v3166_v45  ;;  %v887_v35 = vpop.f32.mrf.mxu2 }
 0x165   :  { %v2025_v63 = vpop.eup %2024  ;;  %2028 = vtanh.f32 %v1399_v37  ;;  %v1242_v1 = vmul.f32 %v1162_v42, %v3189_v15  ;;  %v1083_v48 = vmul.f32 0.044715, %v3206_v21  ;;  %v1636_v49 = vmul.f32 %v1556_v57, %v996_v55 }
 0x166   :  { %1745 = vst [vmem:[%s3715_s5 + $0x48] sm:$0xff] %v1705_v7  ;;  %v1557_v47 = vadd.f32 1.0, %v2025_v63  ;;  %2030 = vtanh.f32 %v1400_v61  ;;  %v1401_v39 = vmul.f32 0.7978846, %v1321_v10  ;;  %v1084_v45 = vmul.f32 0.044715, %v3210_v38 }
 0x167   :  { %v2027_v51 = vpop.eup %2026  ;;  %v1322_v32 = vadd.f32 %v1242_v1, %v3189_v15  ;;  %v1163_v40 = vmul.f32 %v1083_v48, %v3206_v21  ;;  %v3224_v50 = vadd.f32 %v825_v28, %v2988_v31  ;;  %v3227_v12 = vadd.f32 %v884_v23, %v3008_v14 }
 0x168   :  { %v1637_v41 = vmul.f32 %v1557_v47, %v997_v30  ;;  %v1558_v59 = vadd.f32 1.0, %v2027_v51  ;;  %2032 = vtanh.f32 %v1401_v39  ;;  %v1000_v46 = vmul.f32 0.5, %v3169_v20  ;;  %v828_v30 = vpop.f32.mrf.mxu1 }
 0x169   :  { %v1402_v4 = vmul.f32 0.7978846, %v1322_v32  ;;  %v1243_v29 = vmul.f32 %v1163_v40, %v3206_v21  ;;  %v1164_v6 = vmul.f32 %v1084_v45, %v3210_v38  ;;  %v1001_v60 = vmul.f32 0.5, %v3184_v11  ;;  %v946_v32 = vpop.f32.mrf.mxu3  ;;  %v771_v40 = vpop.f32.mrf.mxu0 }
 0x16a   :  { %v1706_v17 = vpack.c.bf16 %v1637_v41, %v1636_v49  ;;  %v1638_v52 = vmul.f32 %v1558_v59, %v998_v3  ;;  %v1085_v22 = vmul.f32 0.044715, %v3224_v50  ;;  %v1086_v20 = vmul.f32 0.044715, %v3227_v12 }
 0x16b   :  { %v2029_v16 = vpop.eup %2028  ;;  %2034 = vtanh.f32 %v1402_v4  ;;  %v1323_v55 = vadd.f32 %v1243_v29, %v3206_v21  ;;  %v1244_v13 = vmul.f32 %v1164_v6, %v3210_v38  ;;  %v3242_v11 = vadd.f32 %v943_v44, %v3010_v36 }
 0x16c   :  { %v2031_v0 = vpop.eup %2030  ;;  %1746 = vst [vmem:[%s3715_s5 + $0x50] sm:$0xff] %v1706_v17  ;;  %v1559_v54 = vadd.f32 1.0, %v2029_v16  ;;  %v1165_v24 = vmul.f32 %v1085_v22, %v3224_v50  ;;  %v3245_v58 = vadd.f32 %v769_v8, %v2986_v53  ;;  %v1166_v26 = vmul.f32 %v1086_v20, %v3227_v12 }
 0x16d   :  { %v1560_v25 = vadd.f32 1.0, %v2031_v0  ;;  %v1403_v18 = vmul.f32 0.7978846, %v1323_v55  ;;  %v1324_v27 = vadd.f32 %v1244_v13, %v3210_v38  ;;  %v1002_v5 = vmul.f32 0.5, %v3189_v15 }
 0x16e   :  { %v2033_v62 = vpop.eup %2032  ;;  %v1639_v33 = vmul.f32 %v1559_v54, %v999_v43  ;;  %v1245_v2 = vmul.f32 %v1165_v24, %v3224_v50  ;;  %v1087_v34 = vmul.f32 0.044715, %v3242_v11  ;;  %v1246_v42 = vmul.f32 %v1166_v26, %v3227_v12  ;;  %v889_v24 = vpop.f32.mrf.mxu2 }
 0x16f   :  { %v1640_v19 = vmul.f32 %v1560_v25, %v1000_v46  ;;  %v1561_v9 = vadd.f32 1.0, %v2033_v62  ;;  %2036 = vtanh.f32 %v1403_v18  ;;  %v1404_v56 = vmul.f32 0.7978846, %v1324_v27 }
 0x170   :  { %v1707_v57 = vpack.c.bf16 %v1639_v33, %v1638_v52  ;;  %v1325_v37 = vadd.f32 %v1245_v2, %v3224_v50  ;;  %v1167_v28 = vmul.f32 %v1087_v34, %v3242_v11  ;;  %v1003_v15 = vmul.f32 0.5, %v3206_v21 }
 0x171   :  { %v2035_v7 = vpop.eup %2034  ;;  %v1641_v3 = vmul.f32 %v1561_v9, %v1001_v60  ;;  %2038 = vtanh.f32 %v1404_v56  ;;  %v1088_v61 = vmul.f32 0.044715, %v3245_v58  ;;  %v1326_v43 = vadd.f32 %v1246_v42, %v3227_v12 }
 0x172   :  { %1747 = vst [vmem:[%s3715_s5 + $0x58] sm:$0xff] %v1707_v57  ;;  %v1562_v10 = vadd.f32 1.0, %v2035_v7  ;;  %v1405_v63 = vmul.f32 0.7978846, %v1325_v37  ;;  %v1247_v1 = vmul.f32 %v1167_v28, %v3242_v11  ;;  %v3264_v49 = vadd.f32 %v828_v30, %v2988_v31 }
 0x173   :  { %v1708_v48 = vpack.c.bf16 %v1641_v3, %v1640_v19  ;;  %v1168_v23 = vmul.f32 %v1088_v61, %v3245_v58  ;;  %v3267_v21 = vadd.f32 %v887_v35, %v3008_v14  ;;  %v1004_v47 = vmul.f32 0.5, %v3210_v38 }
 0x174   :  { %2040 = vtanh.f32 %v1405_v63  ;;  %v1406_v39 = vmul.f32 0.7978846, %v1326_v43  ;;  %v1327_v51 = vadd.f32 %v1247_v1, %v3242_v11  ;;  %v1642_v41 = vmul.f32 %v1562_v10, %v1002_v5  ;;  %v774_v43 = vpop.f32.mrf.mxu0 }
 0x175   :  { %v2037_v45 = vpop.eup %2036  ;;  %1748 = vst [vmem:[%s3715_s5 + $0x60] sm:$0xff] %v1708_v48  ;;  %v1005_v59 = vmul.f32 0.5, %v3224_v50  ;;  %v1248_v46 = vmul.f32 %v1168_v23, %v3245_v58  ;;  %v1089_v4 = vmul.f32 0.044715, %v3264_v49  ;;  %v1090_v6 = vmul.f32 0.044715, %v3267_v21  ;;  %v830_v50 = vpop.f32.mrf.mxu1 }
 0x176   :  { %v1563_v29 = vadd.f32 1.0, %v2037_v45  ;;  %2042 = vtanh.f32 %v1406_v39  ;;  %v1407_v38 = vmul.f32 0.7978846, %v1327_v51  ;;  %v3281_v52 = vadd.f32 %v946_v32, %v3010_v36 }
 0x177   :  { %v2039_v44 = vpop.eup %2038  ;;  %v1328_v8 = vadd.f32 %v1248_v46, %v3245_v58  ;;  %v1169_v17 = vmul.f32 %v1089_v4, %v3264_v49  ;;  %v3284_v60 = vadd.f32 %v771_v40, %v2986_v53  ;;  %v1170_v55 = vmul.f32 %v1090_v6, %v3267_v21 }
 0x178   :  { %v1643_v22 = vmul.f32 %v1563_v29, %v1003_v15  ;;  %v1564_v16 = vadd.f32 1.0, %v2039_v44  ;;  %2044 = vtanh.f32 %v1407_v38  ;;  %v1006_v13 = vmul.f32 0.5, %v3227_v12  ;;  %v948_v15 = vpop.f32.mrf.mxu3  ;;  %v892_v44 = vpop.f32.mrf.mxu2 }
 0x179   :  { %v1408_v20 = vmul.f32 0.7978846, %v1328_v8  ;;  %v1249_v0 = vmul.f32 %v1169_v17, %v3264_v49  ;;  %v1091_v54 = vmul.f32 0.044715, %v3281_v52  ;;  %v1007_v26 = vmul.f32 0.5, %v3242_v11 }
 0x17a   :  { %v2041_v25 = vpop.eup %2040  ;;  %v1709_v18 = vpack.c.bf16 %v1643_v22, %v1642_v41  ;;  %v1644_v27 = vmul.f32 %v1564_v16, %v1004_v47  ;;  %v1250_v30 = vmul.f32 %v1170_v55, %v3267_v21  ;;  %v1092_v34 = vmul.f32 0.044715, %v3284_v60 }
 0x17b   :  { %v1565_v62 = vadd.f32 1.0, %v2041_v25  ;;  %2046 = vtanh.f32 %v1408_v20  ;;  %v1329_v33 = vadd.f32 %v1249_v0, %v3264_v49  ;;  %v1171_v5 = vmul.f32 %v1091_v54, %v3281_v52 }
 0x17c   :  { %v2043_v12 = vpop.eup %2042  ;;  %1749 = vst [vmem:[%s3715_s5 + $0x68] sm:$0xff] %v1709_v18  ;;  %v1330_v2 = vadd.f32 %v1250_v30, %v3267_v21  ;;  %v831_v19 = vadd.f32 %v830_v50, %v2988_v31  ;;  %v3301_v11 = vadd.f32 %v889_v24, %v3008_v14  ;;  %v1008_v42 = vmul.f32 0.5, %v3245_v58 }
 0x17d   :  { %v1645_v9 = vmul.f32 %v1565_v62, %v1005_v59  ;;  %v1566_v56 = vadd.f32 1.0, %v2043_v12  ;;  %v1409_v35 = vmul.f32 0.7978846, %v1329_v33  ;;  %v1251_v57 = vmul.f32 %v1171_v5, %v3281_v52  ;;  %v833_v40 = vpop.f32.mrf.mxu1 }
 0x17e   :  { %v2045_v37 = vpop.eup %2044  ;;  %v1410_v28 = vmul.f32 0.7978846, %v1330_v2  ;;  %v1172_v7 = vmul.f32 %v1092_v34, %v3284_v60  ;;  %v1093_v3 = vmul.f32 0.044715, %v831_v19  ;;  %v1009_v39 = vmul.f32 0.5, %v3264_v49 }
 0x17f   :  { %v1710_v61 = vpack.c.bf16 %v1645_v9, %v1644_v27  ;;  %v1646_v10 = vmul.f32 %v1566_v56, %v1006_v13  ;;  %v1567_v63 = vadd.f32 1.0, %v2045_v37  ;;  %2048 = vtanh.f32 %v1409_v35  ;;  %v776_v9 = vpop.f32.mrf.mxu0 }
 0x180   :  { %2050 = vtanh.f32 %v1410_v28  ;;  %v1331_v1 = vadd.f32 %v1251_v57, %v3281_v52  ;;  %v1252_v48 = vmul.f32 %v1172_v7, %v3284_v60  ;;  %v1173_v23 = vmul.f32 %v1093_v3, %v831_v19  ;;  %v951_v33 = vpop.f32.mrf.mxu3 }
 0x181   :  { %v2047_v47 = vpop.eup %2046  ;;  %1750 = vst [vmem:[%s3715_s5 + $0x70] sm:$0xff] %v1710_v61  ;;  %v1647_v58 = vmul.f32 %v1567_v63, %v1007_v26  ;;  %v1094_v51 = vmul.f32 0.044715, %v3301_v11  ;;  %v3314_v32 = vadd.f32 %v948_v15, %v3010_v36  ;;  %v1010_v29 = vmul.f32 0.5, %v3267_v21 }
 0x182   :  { %v1568_v45 = vadd.f32 1.0, %v2047_v47  ;;  %v1411_v41 = vmul.f32 0.7978846, %v1331_v1  ;;  %v1332_v59 = vadd.f32 %v1252_v48, %v3284_v60  ;;  %v1253_v46 = vmul.f32 %v1173_v23, %v831_v19 }
 0x183   :  { %v1711_v4 = vpack.c.bf16 %v1647_v58, %v1646_v10  ;;  %v1174_v38 = vmul.f32 %v1094_v51, %v3301_v11  ;;  %v1095_v6 = vmul.f32 0.044715, %v3314_v32  ;;  %v3326_v21 = vadd.f32 %v774_v43, %v2986_v53  ;;  %v894_v51 = vpop.f32.mrf.mxu2 }
 0x184   :  { %v1648_v49 = vmul.f32 %v1568_v45, %v1008_v42  ;;  %2052 = vtanh.f32 %v1411_v41  ;;  %v1412_v8 = vmul.f32 0.7978846, %v1332_v59  ;;  %v1333_v17 = vadd.f32 %v1253_v46, %v831_v19 }
 0x185   :  { %v2049_v50 = vpop.eup %2048  ;;  %1751 = vst [vmem:[%s3715_s5 + $0x78] sm:$0xff] %v1711_v4  ;;  %v1254_v22 = vmul.f32 %v1174_v38, %v3301_v11  ;;  %v1175_v16 = vmul.f32 %v1095_v6, %v3314_v32  ;;  %v3329_v55 = vadd.f32 %v833_v40, %v2988_v31  ;;  %v3332_v54 = vadd.f32 %v892_v44, %v3008_v14  ;;  %v835_v7 = vpop.f32.mrf.mxu1 }
 0x186   :  { %v2051_v13 = vpop.eup %2050  ;;  %v1569_v20 = vadd.f32 1.0, %v2049_v50  ;;  %2054 = vtanh.f32 %v1412_v8  ;;  %v1413_v0 = vmul.f32 0.7978846, %v1333_v17  ;;  %v1011_v25 = vmul.f32 0.5, %v3281_v52 }
 0x187   :  { %v1570_v24 = vadd.f32 1.0, %v2051_v13  ;;  %v1334_v18 = vadd.f32 %v1254_v22, %v3301_v11  ;;  %v1255_v27 = vmul.f32 %v1175_v16, %v3314_v32  ;;  %v1012_v30 = vmul.f32 0.5, %v3284_v60 }
 0x188   :  { %v1649_v26 = vmul.f32 %v1569_v20, %v1009_v39  ;;  %2056 = vtanh.f32 %v1413_v0  ;;  %v1096_v62 = vmul.f32 0.044715, %v3326_v21  ;;  %v1013_v5 = vmul.f32 0.5, %v831_v19  ;;  %v953_v22 = vpop.f32.mrf.mxu3 }
 0x189   :  { %v1414_v12 = vmul.f32 0.7978846, %v1334_v18  ;;  %v1335_v2 = vadd.f32 %v1255_v27, %v3314_v32  ;;  %v1097_v34 = vmul.f32 0.044715, %v3329_v55  ;;  %v1650_v35 = vmul.f32 %v1570_v24, %v1010_v29  ;;  %v779_v24 = vpop.f32.mrf.mxu0 }
 0x18a   :  { %v2053_v56 = vpop.eup %2052  ;;  %v1712_v52 = vpack.c.bf16 %v1649_v26, %v1648_v49  ;;  %v1176_v57 = vmul.f32 %v1096_v62, %v3326_v21  ;;  %v1098_v37 = vmul.f32 0.044715, %v3332_v54  ;;  %v3350_v61 = vadd.f32 %v951_v33, %v3010_v36 }
 0x18b   :  { %v1571_v42 = vadd.f32 1.0, %v2053_v56  ;;  %2058 = vtanh.f32 %v1414_v12  ;;  %v1415_v60 = vmul.f32 0.7978846, %v1335_v2  ;;  %v1177_v28 = vmul.f32 %v1097_v34, %v3329_v55 }
 0x18c   :  { %v2055_v19 = vpop.eup %2054  ;;  %1752 = vst [vmem:[%s3715_s5 + $0x80] sm:$0xff] %v1712_v52  ;;  %v1256_v3 = vmul.f32 %v1176_v57, %v3326_v21  ;;  %v1178_v15 = vmul.f32 %v1098_v37, %v3332_v54  ;;  %v3353_v10 = vadd.f32 %v776_v9, %v2986_v53  ;;  %v1014_v23 = vmul.f32 0.5, %v3301_v11 }
 0x18d   :  { %v1651_v63 = vmul.f32 %v1571_v42, %v1011_v25  ;;  %v1572_v43 = vadd.f32 1.0, %v2055_v19  ;;  %2060 = vtanh.f32 %v1415_v60  ;;  %v1257_v1 = vmul.f32 %v1177_v28, %v3329_v55  ;;  %v838_v33 = vpop.f32.mrf.mxu1 }
 0x18e   :  { %v2057_v48 = vpop.eup %2056  ;;  %v1336_v47 = vadd.f32 %v1256_v3, %v3326_v21  ;;  %v1258_v58 = vmul.f32 %v1178_v15, %v3332_v54  ;;  %v1099_v39 = vmul.f32 0.044715, %v3350_v61  ;;  %v1015_v46 = vmul.f32 0.5, %v3314_v32 }
 0x18f   :  { %v1713_v40 = vpack.c.bf16 %v1651_v63, %v1650_v35  ;;  %v1652_v45 = vmul.f32 %v1572_v43, %v1012_v30  ;;  %v1573_v41 = vadd.f32 1.0, %v2057_v48  ;;  %v1337_v59 = vadd.f32 %v1257_v1, %v3329_v55 }
 0x190   :  { %v1416_v4 = vmul.f32 0.7978846, %v1336_v47  ;;  %v1338_v29 = vadd.f32 %v1258_v58, %v3332_v54  ;;  %v1179_v38 = vmul.f32 %v1099_v39, %v3350_v61  ;;  %v1100_v49 = vmul.f32 0.044715, %v3353_v10 }
 0x191   :  { %v2059_v11 = vpop.eup %2058  ;;  %1753 = vst [vmem:[%s3715_s5 + $0x88] sm:$0xff] %v1713_v40  ;;  %v1653_v6 = vmul.f32 %v1573_v41, %v1013_v5  ;;  %v1417_v44 = vmul.f32 0.7978846, %v1337_v59  ;;  %v3369_v8 = vadd.f32 %v835_v7, %v2988_v31  ;;  %v1016_v20 = vmul.f32 0.5, %v3326_v21 }
 0x192   :  { %v1574_v17 = vadd.f32 1.0, %v2059_v11  ;;  %2062 = vtanh.f32 %v1416_v4  ;;  %v1418_v32 = vmul.f32 0.7978846, %v1338_v29  ;;  %v1259_v50 = vmul.f32 %v1179_v38, %v3350_v61  ;;  %v956_v4 = vpop.f32.mrf.mxu3 }
 0x193   :  { %v2061_v16 = vpop.eup %2060  ;;  %v1714_v13 = vpack.c.bf16 %v1653_v6, %v1652_v45  ;;  %2064 = vtanh.f32 %v1417_v44  ;;  %v1180_v0 = vmul.f32 %v1100_v49, %v3353_v10  ;;  %v1101_v30 = vmul.f32 0.044715, %v3369_v8 }
 0x194   :  { %v1654_v25 = vmul.f32 %v1574_v17, %v1014_v23  ;;  %v1575_v18 = vadd.f32 1.0, %v2061_v16  ;;  %2066 = vtanh.f32 %v1418_v32  ;;  %v1339_v27 = vadd.f32 %v1259_v50, %v3350_v61  ;;  %v781_v50 = vpop.f32.mrf.mxu0 }
 0x195   :  { %1754 = vst [vmem:[%s3715_s5 + $0x90] sm:$0xff] %v1714_v13  ;;  %v1260_v26 = vmul.f32 %v1180_v0, %v3353_v10  ;;  %v895_v62 = vadd.f32 %v894_v51, %v3008_v14  ;;  %v3382_v21 = vadd.f32 %v953_v22, %v3010_v36  ;;  %v1017_v12 = vmul.f32 0.5, %v3329_v55  ;;  %v897_v55 = vpop.f32.mrf.mxu2 }
 0x196   :  { %v1655_v5 = vmul.f32 %v1575_v18, %v1015_v46  ;;  %v1419_v2 = vmul.f32 0.7978846, %v1339_v27  ;;  %v3386_v34 = vadd.f32 %v779_v24, %v2986_v53  ;;  %v1018_v9 = vmul.f32 0.5, %v3332_v54 }
 0x197   :  { %v1340_v56 = vadd.f32 %v1260_v26, %v3353_v10  ;;  %v1181_v52 = vmul.f32 %v1101_v30, %v3369_v8  ;;  %v1102_v35 = vmul.f32 0.044715, %v895_v62  ;;  %v1103_v42 = vmul.f32 0.044715, %v3382_v21 }
 0x198   :  { %v2063_v57 = vpop.eup %2062  ;;  %v1715_v37 = vpack.c.bf16 %v1655_v5, %v1654_v25  ;;  %2068 = vtanh.f32 %v1419_v2  ;;  %v3393_v60 = vadd.f32 %v838_v33, %v2988_v31  ;;  %v1019_v43 = vmul.f32 0.5, %v3350_v61  ;;  %v840_v33 = vpop.f32.mrf.mxu1 }
 0x199   :  { %v2065_v28 = vpop.eup %2064  ;;  %v1576_v7 = vadd.f32 1.0, %v2063_v57  ;;  %v1420_v19 = vmul.f32 0.7978846, %v1340_v56  ;;  %v1261_v3 = vmul.f32 %v1181_v52, %v3369_v8  ;;  %v1182_v54 = vmul.f32 %v1102_v35, %v895_v62 }
 0x19a   :  { %v2067_v15 = vpop.eup %2066  ;;  %1755 = vst [vmem:[%s3715_s5 + $0x98] sm:$0xff] %v1715_v37  ;;  %v1577_v63 = vadd.f32 1.0, %v2065_v28  ;;  %v1183_v1 = vmul.f32 %v1103_v42, %v3382_v21  ;;  %v1104_v48 = vmul.f32 0.044715, %v3386_v34  ;;  %v1020_v59 = vmul.f32 0.5, %v3353_v10 }
 0x19b   :  { %v1656_v23 = vmul.f32 %v1576_v7, %v1016_v20  ;;  %v1578_v47 = vadd.f32 1.0, %v2067_v15  ;;  %2070 = vtanh.f32 %v1420_v19  ;;  %v1341_v58 = vadd.f32 %v1261_v3, %v3369_v8 }
 0x19c   :  { %v1657_v39 = vmul.f32 %v1577_v63, %v1017_v12  ;;  %v1262_v51 = vmul.f32 %v1182_v54, %v895_v62  ;;  %v1263_v40 = vmul.f32 %v1183_v1, %v3382_v21  ;;  %v1184_v45 = vmul.f32 %v1104_v48, %v3386_v34 }
 0x19d   :  { %v1658_v41 = vmul.f32 %v1578_v47, %v1018_v9  ;;  %v1421_v46 = vmul.f32 0.7978846, %v1341_v58  ;;  %v1105_v61 = vmul.f32 0.044715, %v3393_v60  ;;  %v3411_v32 = vadd.f32 %v897_v55, %v3008_v14  ;;  %v899_v5 = vpop.f32.mrf.mxu2 }
 0x19e   :  { %v2069_v29 = vpop.eup %2068  ;;  %v1716_v38 = vpack.c.bf16 %v1657_v39, %v1656_v23  ;;  %v1342_v11 = vadd.f32 %v1262_v51, %v895_v62  ;;  %v1343_v6 = vadd.f32 %v1263_v40, %v3382_v21  ;;  %v1264_v44 = vmul.f32 %v1184_v45, %v3386_v34  ;;  %v958_v23 = vpop.f32.mrf.mxu3 }
 0x19f   :  { %v1579_v49 = vadd.f32 1.0, %v2069_v29  ;;  %2072 = vtanh.f32 %v1421_v46  ;;  %v1185_v17 = vmul.f32 %v1105_v61, %v3393_v60  ;;  %v3418_v13 = vadd.f32 %v956_v4, %v3010_v36  ;;  %v784_v40 = vpop.f32.mrf.mxu0 }
 0x1a0   :  { %1756 = vst [vmem:[%s3715_s5 + $0xa0] sm:$0xff] %v1716_v38  ;;  %v1422_v10 = vmul.f32 0.7978846, %v1342_v11  ;;  %v1423_v22 = vmul.f32 0.7978846, %v1343_v6  ;;  %v1344_v16 = vadd.f32 %v1264_v44, %v3386_v34  ;;  %v1021_v24 = vmul.f32 0.5, %v3369_v8 }
 0x1a1   :  { %v2071_v20 = vpop.eup %2070  ;;  %v1659_v0 = vmul.f32 %v1579_v49, %v1019_v43  ;;  %v1265_v25 = vmul.f32 %v1185_v17, %v3393_v60  ;;  %v1106_v18 = vmul.f32 0.044715, %v3411_v32  ;;  %v1022_v26 = vmul.f32 0.5, %v895_v62 }
 0x1a2   :  { %v1580_v27 = vadd.f32 1.0, %v2071_v20  ;;  %2074 = vtanh.f32 %v1422_v10  ;;  %v1424_v30 = vmul.f32 0.7978846, %v1344_v16  ;;  %v1023_v56 = vmul.f32 0.5, %v3382_v21 }
 0x1a3   :  { %v1717_v12 = vpack.c.bf16 %v1659_v0, %v1658_v41  ;;  %2076 = vtanh.f32 %v1423_v22  ;;  %v1345_v2 = vadd.f32 %v1265_v25, %v3393_v60  ;;  %v1186_v9 = vmul.f32 %v1106_v18, %v3411_v32 }
 0x1a4   :  { %2078 = vtanh.f32 %v1424_v30  ;;  %v1107_v8 = vmul.f32 0.044715, %v3418_v13  ;;  %v3428_v52 = vadd.f32 %v781_v50, %v2986_v53  ;;  %v3435_v37 = vadd.f32 %v840_v33, %v2988_v31 }
 0x1a5   :  { %v2073_v35 = vpop.eup %2072  ;;  %1757 = vst [vmem:[%s3715_s5 + $0xa8] sm:$0xff] %v1717_v12  ;;  %v1425_v62 = vmul.f32 0.7978846, %v1345_v2  ;;  %v1266_v57 = vmul.f32 %v1186_v9, %v3411_v32  ;;  %v3438_v42 = vadd.f32 %v899_v5, %v3008_v14  ;;  %v1660_v21 = vmul.f32 %v1580_v27, %v1020_v59 }
 0x1a6   :  { %v1581_v55 = vadd.f32 1.0, %v2073_v35  ;;  %v1187_v28 = vmul.f32 %v1107_v8, %v3418_v13  ;;  %v1108_v7 = vmul.f32 0.044715, %v3428_v52  ;;  %v1024_v19 = vmul.f32 0.5, %v3386_v34 }
 0x1a7   :  { %2080 = vtanh.f32 %v1425_v62  ;;  %v1346_v3 = vadd.f32 %v1266_v57, %v3411_v32  ;;  %v1109_v54 = vmul.f32 0.044715, %v3435_v37  ;;  %v1025_v43 = vmul.f32 0.5, %v3393_v60 }
 0x1a8   :  { %v2075_v15 = vpop.eup %2074  ;;  %v1661_v63 = vmul.f32 %v1581_v55, %v1021_v24  ;;  %v1267_v1 = vmul.f32 %v1187_v28, %v3418_v13  ;;  %v1188_v48 = vmul.f32 %v1108_v7, %v3428_v52  ;;  %v1110_v34 = vmul.f32 0.044715, %v3438_v42  ;;  %v843_v24 = vpop.f32.mrf.mxu1 }
 0x1a9   :  { %v2077_v47 = vpop.eup %2076  ;;  %v1582_v58 = vadd.f32 1.0, %v2075_v15  ;;  %v1426_v39 = vmul.f32 0.7978846, %v1346_v3  ;;  %v1189_v51 = vmul.f32 %v1109_v54, %v3435_v37  ;;  %v3460_v10 = vadd.f32 %v958_v23, %v3010_v36 }
 0x1aa   :  { %v2079_v45 = vpop.eup %2078  ;;  %v1718_v41 = vpack.c.bf16 %v1661_v63, %v1660_v21  ;;  %v1583_v59 = vadd.f32 1.0, %v2077_v47  ;;  %v1347_v46 = vadd.f32 %v1267_v1, %v3418_v13  ;;  %v1268_v60 = vmul.f32 %v1188_v48, %v3428_v52 }
 0x1ab   :  { %v1662_v61 = vmul.f32 %v1582_v58, %v1022_v26  ;;  %v1584_v4 = vadd.f32 1.0, %v2079_v45  ;;  %2082 = vtanh.f32 %v1426_v39  ;;  %v1269_v29 = vmul.f32 %v1189_v51, %v3435_v37  ;;  %v902_v26 = vpop.f32.mrf.mxu2 }
 0x1ac   :  { %1758 = vst [vmem:[%s3715_s5 + $0xb0] sm:$0xff] %v1718_v41  ;;  %v1663_v38 = vmul.f32 %v1583_v59, %v1023_v56  ;;  %v1427_v11 = vmul.f32 0.7978846, %v1347_v46  ;;  %v1348_v6 = vadd.f32 %v1268_v60, %v3428_v52  ;;  %v1190_v44 = vmul.f32 %v1110_v34, %v3438_v42 }
 0x1ad   :  { %v2081_v49 = vpop.eup %2080  ;;  %v1664_v17 = vmul.f32 %v1584_v4, %v1024_v19  ;;  %v1349_v50 = vadd.f32 %v1269_v29, %v3435_v37  ;;  %v3463_v22 = vadd.f32 %v784_v40, %v2986_v53  ;;  %v1111_v27 = vmul.f32 0.044715, %v3460_v10  ;;  %v786_v19 = vpop.f32.mrf.mxu0 }
 0x1ae   :  { %v1719_v16 = vpack.c.bf16 %v1663_v38, %v1662_v61  ;;  %v1585_v20 = vadd.f32 1.0, %v2081_v49  ;;  %2084 = vtanh.f32 %v1427_v11  ;;  %v1428_v0 = vmul.f32 0.7978846, %v1348_v6 }
 0x1af   :  { %v1429_v25 = vmul.f32 0.7978846, %v1349_v50  ;;  %v1270_v18 = vmul.f32 %v1190_v44, %v3438_v42  ;;  %v1026_v33 = vmul.f32 0.5, %v3411_v32  ;;  %v1112_v5 = vmul.f32 0.044715, %v3463_v22  ;;  %v961_v32 = vpop.f32.mrf.mxu3 }
 0x1b0   :  { %1759 = vst [vmem:[%s3715_s5 + $0xb8] sm:$0xff] %v1719_v16  ;;  %v1665_v30 = vmul.f32 %v1585_v20, %v1025_v43  ;;  %2086 = vtanh.f32 %v1428_v0  ;;  %v1191_v9 = vmul.f32 %v1111_v27, %v3460_v10  ;;  %v3475_v56 = vadd.f32 %v843_v24, %v2988_v31  ;;  %v845_v4 = vpop.f32.mrf.mxu1 }
 0x1b1   :  { %v2083_v12 = vpop.eup %2082  ;;  %2088 = vtanh.f32 %v1429_v25  ;;  %v1350_v2 = vadd.f32 %v1270_v18, %v3438_v42  ;;  %v1192_v62 = vmul.f32 %v1112_v5, %v3463_v22  ;;  %v3479_v57 = vadd.f32 %v902_v26, %v3008_v14 }
 0x1b2   :  { %v1720_v8 = vpack.c.bf16 %v1665_v30, %v1664_v17  ;;  %v1586_v35 = vadd.f32 1.0, %v2083_v12  ;;  %v1027_v21 = vmul.f32 0.5, %v3418_v13  ;;  %v1271_v28 = vmul.f32 %v1191_v9, %v3460_v10 }
 0x1b3   :  { %v1430_v55 = vmul.f32 0.7978846, %v1350_v2  ;;  %v1113_v7 = vmul.f32 0.044715, %v3475_v56  ;;  %v1028_v15 = vmul.f32 0.5, %v3428_v52  ;;  %v1272_v63 = vmul.f32 %v1192_v62, %v3463_v22  ;;  %v904_v17 = vpop.f32.mrf.mxu2 }
 0x1b4   :  { %v2085_v3 = vpop.eup %2084  ;;  %1760 = vst [vmem:[%s3715_s5 + $0xc0] sm:$0xff] %v1720_v8  ;;  %v1666_v54 = vmul.f32 %v1586_v35, %v1026_v33  ;;  %v1114_v43 = vmul.f32 0.044715, %v3479_v57  ;;  %v1351_v13 = vadd.f32 %v1271_v28, %v3460_v10  ;;  %v3495_v39 = vadd.f32 %v961_v32, %v3010_v36 }
 0x1b5   :  { %v1587_v1 = vadd.f32 1.0, %v2085_v3  ;;  %2090 = vtanh.f32 %v1430_v55  ;;  %v1193_v48 = vmul.f32 %v1113_v7, %v3475_v56  ;;  %v1352_v47 = vadd.f32 %v1272_v63, %v3463_v22  ;;  %v789_v9 = vpop.f32.mrf.mxu0 }
 0x1b6   :  { %v2087_v23 = vpop.eup %2086  ;;  %v1194_v58 = vmul.f32 %v1114_v43, %v3479_v57  ;;  %v3498_v52 = vadd.f32 %v786_v19, %v2986_v53  ;;  %v1431_v45 = vmul.f32 0.7978846, %v1351_v13  ;;  %v1029_v59 = vmul.f32 0.5, %v3435_v37 }
 0x1b7   :  { %v2089_v51 = vpop.eup %2088  ;;  %v1667_v34 = vmul.f32 %v1587_v1, %v1027_v21  ;;  %v1588_v40 = vadd.f32 1.0, %v2087_v23  ;;  %v1273_v41 = vmul.f32 %v1193_v48, %v3475_v56  ;;  %v1432_v60 = vmul.f32 0.7978846, %v1352_v47  ;;  %v963_v26 = vpop.f32.mrf.mxu3 }
 0x1b8   :  { %v1589_v46 = vadd.f32 1.0, %v2089_v51  ;;  %v1274_v61 = vmul.f32 %v1194_v58, %v3479_v57  ;;  %2092 = vtanh.f32 %v1431_v45  ;;  %v1115_v49 = vmul.f32 0.044715, %v3495_v39  ;;  %v848_v51 = vpop.f32.mrf.mxu1 }
 0x1b9   :  { %v1721_v29 = vpack.c.bf16 %v1667_v34, %v1666_v54  ;;  %v1668_v38 = vmul.f32 %v1588_v40, %v1028_v15  ;;  %v1353_v11 = vadd.f32 %v1273_v41, %v3475_v56  ;;  %2094 = vtanh.f32 %v1432_v60 }
 0x1ba   :  { %v1669_v6 = vmul.f32 %v1589_v46, %v1029_v59  ;;  %v1354_v44 = vadd.f32 %v1274_v61, %v3479_v57  ;;  %v1030_v37 = vmul.f32 0.5, %v3438_v42  ;;  %v1116_v20 = vmul.f32 0.044715, %v3498_v52 }
 0x1bb   :  { %v2091_v50 = vpop.eup %2090  ;;  %1761 = vst [vmem:[%s3715_s5 + $0xc8] sm:$0xff] %v1721_v29  ;;  %v1433_v16 = vmul.f32 0.7978846, %v1353_v11  ;;  %v3512_v0 = vadd.f32 %v845_v4, %v2988_v31  ;;  %v1195_v27 = vmul.f32 %v1115_v49, %v3495_v39  ;;  %v1031_v30 = vmul.f32 0.5, %v3460_v10  ;;  %v907_v59 = vpop.f32.mrf.mxu2 }
 0x1bc   :  { %v1722_v24 = vpack.c.bf16 %v1669_v6, %v1668_v38  ;;  %v1590_v25 = vadd.f32 1.0, %v2091_v50  ;;  %v1434_v18 = vmul.f32 0.7978846, %v1354_v44  ;;  %v1196_v33 = vmul.f32 %v1116_v20, %v3498_v52 }
 0x1bd   :  { %2096 = vtanh.f32 %v1433_v16  ;;  %v1117_v5 = vmul.f32 0.044715, %v3512_v0  ;;  %v1032_v42 = vmul.f32 0.5, %v3463_v22  ;;  %v1275_v12 = vmul.f32 %v1195_v27, %v3495_v39 }
 0x1be   :  { %1762 = vst [vmem:[%s3715_s5 + $0xd0] sm:$0xff] %v1722_v24  ;;  %2098 = vtanh.f32 %v1434_v18  ;;  %v3524_v2 = vadd.f32 %v904_v17, %v3008_v14  ;;  %v2093_v8 = vpop.eup %2092  ;;  %v1033_v10 = vmul.f32 0.5, %v3475_v56  ;;  %v1276_v35 = vmul.f32 %v1196_v33, %v3498_v52  ;;  %v791_v18 = vpop.f32.mrf.mxu0 }
 0x1bf   :  { %v1197_v62 = vmul.f32 %v1117_v5, %v3512_v0  ;;  %v3530_v32 = vadd.f32 %v963_v26, %v3010_v36  ;;  %v2095_v21 = vpop.eup %2094  ;;  %v1670_v55 = vmul.f32 %v1590_v25, %v1030_v37  ;;  %v1591_v22 = vadd.f32 1.0, %v2093_v8  ;;  %v966_v49 = vpop.f32.mrf.mxu3 }
 0x1c0   :  { %v1355_v28 = vadd.f32 %v1275_v12, %v3495_v39  ;;  %v1118_v7 = vmul.f32 0.044715, %v3524_v2  ;;  %v1592_v19 = vadd.f32 1.0, %v2095_v21  ;;  %v1356_v3 = vadd.f32 %v1276_v35, %v3498_v52 }
 0x1c1   :  { %v1277_v54 = vmul.f32 %v1197_v62, %v3512_v0  ;;  %v3537_v56 = vadd.f32 %v789_v9, %v2986_v53  ;;  %v1671_v15 = vmul.f32 %v1591_v22, %v1031_v30  ;;  %v1119_v1 = vmul.f32 0.044715, %v3530_v32 }
 0x1c2   :  { %v1435_v63 = vmul.f32 0.7978846, %v1355_v28  ;;  %v1198_v43 = vmul.f32 %v1118_v7, %v3524_v2  ;;  %v1672_v48 = vmul.f32 %v1592_v19, %v1032_v42  ;;  %v1034_v23 = vmul.f32 0.5, %v3479_v57  ;;  %v850_v28 = vpop.f32.mrf.mxu1 }
 0x1c3   :  { %v2097_v13 = vpop.eup %2096  ;;  %v1436_v47 = vmul.f32 0.7978846, %v1356_v3  ;;  %v1357_v58 = vadd.f32 %v1277_v54, %v3512_v0  ;;  %v1723_v40 = vpack.c.bf16 %v1671_v15, %v1670_v55  ;;  %v1199_v61 = vmul.f32 %v1119_v1, %v3530_v32  ;;  %v909_v15 = vpop.f32.mrf.mxu2 }
 0x1c4   :  { %v2099_v34 = vpop.eup %2098  ;;  %v1593_v45 = vadd.f32 1.0, %v2097_v13  ;;  %2100 = vtanh.f32 %v1435_v63  ;;  %v1278_v41 = vmul.f32 %v1198_v43, %v3524_v2  ;;  %v1120_v29 = vmul.f32 0.044715, %v3537_v56 }
 0x1c5   :  { %v1594_v46 = vadd.f32 1.0, %v2099_v34  ;;  %2102 = vtanh.f32 %v1436_v47  ;;  %v1437_v60 = vmul.f32 0.7978846, %v1357_v58  ;;  %1763 = vst [vmem:[%s3715_s5 + $0xd8] sm:$0xff] %v1723_v40  ;;  %v3551_v38 = vadd.f32 %v848_v51, %v2988_v31 }
 0x1c6   :  { %v1673_v57 = vmul.f32 %v1593_v45, %v1033_v10  ;;  %v1358_v4 = vadd.f32 %v1278_v41, %v3524_v2  ;;  %v1035_v11 = vmul.f32 0.5, %v3495_v39  ;;  %v1279_v6 = vmul.f32 %v1199_v61, %v3530_v32 }
 0x1c7   :  { %2104 = vtanh.f32 %v1437_v60  ;;  %v3556_v44 = vadd.f32 %v907_v59, %v3008_v14  ;;  %v1036_v50 = vmul.f32 0.5, %v3498_v52  ;;  %v1200_v16 = vmul.f32 %v1120_v29, %v3537_v56  ;;  %v968_v60 = vpop.f32.mrf.mxu3 }
 0x1c8   :  { %v1724_v17 = vpack.c.bf16 %v1673_v57, %v1672_v48  ;;  %v1438_v37 = vmul.f32 0.7978846, %v1358_v4  ;;  %v1037_v20 = vmul.f32 0.5, %v3512_v0  ;;  %v1359_v24 = vadd.f32 %v1279_v6, %v3530_v32 }
 0x1c9   :  { %v1121_v25 = vmul.f32 0.044715, %v3551_v38  ;;  %v1122_v39 = vmul.f32 0.044715, %v3556_v44  ;;  %v1674_v26 = vmul.f32 %v1594_v46, %v1034_v23  ;;  %v1280_v52 = vmul.f32 %v1200_v16, %v3537_v56 }
 0x1ca   :  { %v2101_v27 = vpop.eup %2100  ;;  %1764 = vst [vmem:[%s3715_s5 + $0xe0] sm:$0xff] %v1724_v17  ;;  %2106 = vtanh.f32 %v1438_v37  ;;  %v3569_v30 = vadd.f32 %v966_v49, %v3010_v36  ;;  %v1439_v5 = vmul.f32 0.7978846, %v1359_v24  ;;  %v3576_v35 = vadd.f32 %v791_v18, %v2986_v53 }
 0x1cb   :  { %v2103_v0 = vpop.eup %2102  ;;  %v1595_v33 = vadd.f32 1.0, %v2101_v27  ;;  %v1201_v42 = vmul.f32 %v1121_v25, %v3551_v38  ;;  %v1202_v12 = vmul.f32 %v1122_v39, %v3556_v44  ;;  %v1360_v8 = vadd.f32 %v1280_v52, %v3537_v56  ;;  %v853_v52 = vpop.f32.mrf.mxu1 }
 0x1cc   :  { %v1596_v9 = vadd.f32 1.0, %v2103_v0  ;;  %v1123_v10 = vmul.f32 0.044715, %v3569_v30  ;;  %2108 = vtanh.f32 %v1439_v5  ;;  %v1038_v43 = vmul.f32 0.5, %v3524_v2 }
 0x1cd   :  { %v2105_v62 = vpop.eup %2104  ;;  %v1675_v21 = vmul.f32 %v1595_v33, %v1035_v11  ;;  %v1281_v55 = vmul.f32 %v1201_v42, %v3551_v38  ;;  %v1282_v22 = vmul.f32 %v1202_v12, %v3556_v44  ;;  %v1440_v3 = vmul.f32 0.7978846, %v1360_v8  ;;  %v794_v11 = vpop.f32.mrf.mxu0 }
 0x1ce   :  { %v1676_v7 = vmul.f32 %v1596_v9, %v1036_v50  ;;  %v1597_v19 = vadd.f32 1.0, %v2105_v62  ;;  %v1203_v54 = vmul.f32 %v1123_v10, %v3569_v30  ;;  %v1124_v58 = vmul.f32 0.044715, %v3576_v35  ;;  %v912_v12 = vpop.f32.mrf.mxu2 }
 0x1cf   :  { %v1725_v63 = vpack.c.bf16 %v1675_v21, %v1674_v26  ;;  %v1361_v1 = vadd.f32 %v1281_v55, %v3551_v38  ;;  %v1362_v13 = vadd.f32 %v1282_v22, %v3556_v44  ;;  %2110 = vtanh.f32 %v1440_v3 }
 0x1d0   :  { %v2107_v48 = vpop.eup %2106  ;;  %v1677_v23 = vmul.f32 %v1597_v19, %v1037_v20  ;;  %v1283_v47 = vmul.f32 %v1203_v54, %v3569_v30  ;;  %v3590_v2 = vadd.f32 %v850_v28, %v2988_v31  ;;  %v1204_v59 = vmul.f32 %v1124_v58, %v3576_v35 }
 0x1d1   :  { %1765 = vst [vmem:[%s3715_s5 + $0xe8] sm:$0xff] %v1725_v63  ;;  %v1598_v51 = vadd.f32 1.0, %v2107_v48  ;;  %v1441_v34 = vmul.f32 0.7978846, %v1361_v1  ;;  %v1442_v40 = vmul.f32 0.7978846, %v1362_v13  ;;  %v3595_v46 = vadd.f32 %v909_v15, %v3008_v14  ;;  %v971_v13 = vpop.f32.mrf.mxu3 }
 0x1d2   :  { %v1726_v45 = vpack.c.bf16 %v1677_v23, %v1676_v7  ;;  %v1363_v41 = vadd.f32 %v1283_v47, %v3569_v30  ;;  %v2109_v61 = vpop.eup %2108  ;;  %v1039_v4 = vmul.f32 0.5, %v3530_v32  ;;  %v1125_v29 = vmul.f32 0.044715, %v3590_v2 }
 0x1d3   :  { %v1678_v57 = vmul.f32 %v1598_v51, %v1038_v43  ;;  %2112 = vtanh.f32 %v1441_v34  ;;  %v1599_v6 = vadd.f32 1.0, %v2109_v61  ;;  %v1284_v17 = vmul.f32 %v1204_v59, %v3576_v35 }
 0x1d4   :  { %1766 = vst [vmem:[%s3715_s5 + $0xf0] sm:$0xff] %v1726_v45  ;;  %2114 = vtanh.f32 %v1442_v40  ;;  %v1443_v49 = vmul.f32 0.7978846, %v1363_v41  ;;  %v1040_v50 = vmul.f32 0.5, %v3537_v56  ;;  %v1205_v37 = vmul.f32 %v1125_v29, %v3590_v2 }
 0x1d5   :  { %v1126_v16 = vmul.f32 0.044715, %v3595_v46  ;;  %v3607_v32 = vadd.f32 %v968_v60, %v3010_v36  ;;  %v2111_v20 = vpop.eup %2110  ;;  %v1679_v24 = vmul.f32 %v1599_v6, %v1039_v4  ;;  %v1364_v25 = vadd.f32 %v1284_v17, %v3576_v35  ;;  %v796_v58 = vpop.f32.mrf.mxu0 }
 0x1d6   :  { %2116 = vtanh.f32 %v1443_v49  ;;  %v3611_v39 = vadd.f32 %v794_v11, %v2986_v53  ;;  %v1600_v18 = vadd.f32 1.0, %v2111_v20  ;;  %v1041_v27 = vmul.f32 0.5, %v3551_v38  ;;  %v855_v20 = vpop.f32.mrf.mxu1 }
 0x1d7   :  { %v1285_v56 = vmul.f32 %v1205_v37, %v3590_v2  ;;  %v1206_v26 = vmul.f32 %v1126_v16, %v3595_v46  ;;  %v1727_v0 = vpack.c.bf16 %v1679_v24, %v1678_v57  ;;  %v1042_v33 = vmul.f32 0.5, %v3556_v44  ;;  %v914_v24 = vpop.f32.mrf.mxu2 }
 0x1d8   :  { %v1444_v5 = vmul.f32 0.7978846, %v1364_v25  ;;  %v1127_v42 = vmul.f32 0.044715, %v3607_v32  ;;  %v1680_v8 = vmul.f32 %v1600_v18, %v1040_v50  ;;  %v1128_v38 = vmul.f32 0.044715, %v3611_v39 }
 0x1d9   :  { %v2113_v9 = vpop.eup %2112  ;;  %v1365_v10 = vadd.f32 %v1285_v56, %v3590_v2  ;;  %v1286_v62 = vmul.f32 %v1206_v26, %v3595_v46  ;;  %1767 = vst [vmem:[%s3715_s5 + $0xf8] sm:$0xff] %v1727_v0  ;;  %v3626_v22 = vadd.f32 %v853_v52, %v2988_v31  ;;  %v1043_v63 = vmul.f32 0.5, %v3569_v30 }
 0x1da   :  { %v2115_v21 = vpop.eup %2114  ;;  %v1601_v55 = vadd.f32 1.0, %v2113_v9  ;;  %2118 = vtanh.f32 %v1444_v5  ;;  %v1207_v44 = vmul.f32 %v1127_v42, %v3607_v32  ;;  %v1208_v3 = vmul.f32 %v1128_v38, %v3611_v39  ;;  %v973_v38 = vpop.f32.mrf.mxu3 }
 0x1db   :  { %v1602_v28 = vadd.f32 1.0, %v2115_v21  ;;  %v1445_v7 = vmul.f32 0.7978846, %v1365_v10  ;;  %v1366_v19 = vadd.f32 %v1286_v62, %v3595_v46  ;;  %v1129_v1 = vmul.f32 0.044715, %v3626_v22 }
 0x1dc   :  { %v2117_v54 = vpop.eup %2116  ;;  %v1681_v15 = vmul.f32 %v1601_v55, %v1041_v27  ;;  %v1287_v43 = vmul.f32 %v1207_v44, %v3607_v32  ;;  %v1288_v40 = vmul.f32 %v1208_v3, %v3611_v39  ;;  %v3637_v30 = vadd.f32 %v912_v12, %v3008_v14 }
 0x1dd   :  { %v1682_v48 = vmul.f32 %v1602_v28, %v1042_v33  ;;  %v1603_v23 = vadd.f32 1.0, %v2117_v54  ;;  %2120 = vtanh.f32 %v1445_v7  ;;  %v1446_v47 = vmul.f32 0.7978846, %v1366_v19 }
 0x1de   :  { %v1728_v51 = vpack.c.bf16 %v1681_v15, %v1680_v8  ;;  %v1367_v34 = vadd.f32 %v1287_v43, %v3607_v32  ;;  %v1209_v45 = vmul.f32 %v1129_v1, %v3626_v22  ;;  %v3640_v59 = vadd.f32 %v971_v13, %v3010_v36 }
 0x1df   :  { %v1683_v41 = vmul.f32 %v1603_v23, %v1043_v63  ;;  %2122 = vtanh.f32 %v1446_v47  ;;  %v1368_v57 = vadd.f32 %v1288_v40, %v3611_v39  ;;  %v3648_v29 = vadd.f32 %v796_v58, %v2986_v53 }
 0x1e0   :  { %v2119_v60 = vpop.eup %2118  ;;  %1768 = vst [vmem:[%s3715_s5 + $0x100] sm:$0xff] %v1728_v51  ;;  %v1447_v61 = vmul.f32 0.7978846, %v1367_v34  ;;  %v1289_v4 = vmul.f32 %v1209_v45, %v3626_v22  ;;  %v1044_v6 = vmul.f32 0.5, %v3576_v35  ;;  %v1130_v17 = vmul.f32 0.044715, %v3637_v30 }
 0x1e1   :  { %v1729_v11 = vpack.c.bf16 %v1683_v41, %v1682_v48  ;;  %v1604_v49 = vadd.f32 1.0, %v2119_v60  ;;  %v1045_v50 = vmul.f32 0.5, %v3590_v2  ;;  %v1448_v37 = vmul.f32 0.7978846, %v1368_v57 }
 0x1e2   :  { %2124 = vtanh.f32 %v1447_v61  ;;  %v1369_v16 = vadd.f32 %v1289_v4, %v3626_v22  ;;  %v1046_v18 = vmul.f32 0.5, %v3595_v46  ;;  %v1210_v35 = vmul.f32 %v1130_v17, %v3637_v30 }
 0x1e3   :  { %v2121_v25 = vpop.eup %2120  ;;  %1769 = vst [vmem:[%s3715_s5 + $0x108] sm:$0xff] %v1729_v11  ;;  %v1684_v53 = vmul.f32 %v1604_v49, %v1044_v6  ;;  %v1131_v27 = vmul.f32 0.044715, %v3640_v59  ;;  %2126 = vtanh.f32 %v1448_v37  ;;  %v1132_v26 = vmul.f32 0.044715, %v3648_v29 }
 0x1e4   :  { %v1605_v56 = vadd.f32 1.0, %v2121_v25  ;;  %v1449_v2 = vmul.f32 0.7978846, %v1369_v16  ;;  %v1290_v0 = vmul.f32 %v1210_v35, %v3637_v30  ;;  %v3664_v5 = vadd.f32 %v855_v20, %v2988_v31 }
 0x1e5   :  { %v2123_v52 = vpop.eup %2122  ;;  %v1211_v33 = vmul.f32 %v1131_v27, %v3640_v59  ;;  %v3667_v42 = vadd.f32 %v914_v24, %v3008_v14  ;;  %v1212_v9 = vmul.f32 %v1132_v26, %v3648_v29  ;;  %v1047_v31 = vmul.f32 0.5, %v3607_v32 }
 0x1e6   :  { %v1685_v46 = vmul.f32 %v1605_v56, %v1045_v50  ;;  %v1606_v12 = vadd.f32 1.0, %v2123_v52  ;;  %2128 = vtanh.f32 %v1449_v2  ;;  %v1370_v8 = vadd.f32 %v1290_v0, %v3637_v30 }
 0x1e7   :  { %v1291_v10 = vmul.f32 %v1211_v33, %v3640_v59  ;;  %v1133_v62 = vmul.f32 0.044715, %v3664_v5  ;;  %v1292_v14 = vmul.f32 %v1212_v9, %v3648_v29  ;;  %v1048_v15 = vmul.f32 0.5, %v3611_v39 }
 0x1e8   :  { %v2125_v21 = vpop.eup %2124  ;;  %v1730_v55 = vpack.c.bf16 %v1685_v46, %v1684_v53  ;;  %v1686_v44 = vmul.f32 %v1606_v12, %v1046_v18  ;;  %v1450_v7 = vmul.f32 0.7978846, %v1370_v8  ;;  %v1134_v43 = vmul.f32 0.044715, %v3667_v42 }
 0x1e9   :  { %v1607_v28 = vadd.f32 1.0, %v2125_v21  ;;  %v1371_v19 = vadd.f32 %v1291_v10, %v3640_v59  ;;  %v1213_v3 = vmul.f32 %v1133_v62, %v3664_v5  ;;  %v2127_v54 = vpop.eup %2126  ;;  %v1372_v63 = vadd.f32 %v1292_v14, %v3648_v29 }
 0x1ea   :  { %1770 = vst [vmem:[%s3715_s5 + $0x110] sm:$0xff] %v1730_v55  ;;  %v974_v32 = vadd.f32 %v973_v38, %v3010_v36  ;;  %v1608_v13 = vadd.f32 1.0, %v2127_v54  ;;  %2130 = vtanh.f32 %v1450_v7  ;;  %v1049_v47 = vmul.f32 0.5, %v3626_v22 }
 0x1eb   :  { %v1687_v1 = vmul.f32 %v1607_v28, %v1047_v31  ;;  %v1451_v48 = vmul.f32 0.7978846, %v1371_v19  ;;  %v1452_v58 = vmul.f32 0.7978846, %v1372_v63  ;;  %v1293_v51 = vmul.f32 %v1213_v3, %v3664_v5 }
 0x1ec   :  { %v2129_v23 = vpop.eup %2128  ;;  %v1214_v34 = vmul.f32 %v1134_v43, %v3667_v42  ;;  %v1688_v39 = vmul.f32 %v1608_v13, %v1048_v15  ;;  %v1135_v60 = vmul.f32 0.044715, %v974_v32  ;;  %v1050_v49 = vmul.f32 0.5, %v3637_v30 }
 0x1ed   :  { %v1731_v40 = vpack.c.bf16 %v1687_v1, %v1686_v44  ;;  %v1609_v45 = vadd.f32 1.0, %v2129_v23  ;;  %2132 = vtanh.f32 %v1451_v48  ;;  %v1373_v41 = vadd.f32 %v1293_v51, %v3664_v5 }
 0x1ee   :  { %2134 = vtanh.f32 %v1452_v58  ;;  %v1294_v36 = vmul.f32 %v1214_v34, %v3667_v42  ;;  %v1215_v4 = vmul.f32 %v1135_v60, %v974_v32  ;;  %v1051_v20 = vmul.f32 0.5, %v3640_v59 }
 0x1ef   :  { %1771 = vst [vmem:[%s3715_s5 + $0x118] sm:$0xff] %v1731_v40  ;;  %v1689_v22 = vmul.f32 %v1609_v45, %v1049_v47  ;;  %v1453_v61 = vmul.f32 0.7978846, %v1373_v41  ;;  %v1052_v30 = vmul.f32 0.5, %v3648_v29  ;;  %v1053_v0 = vmul.f32 0.5, %v3664_v5 }
 0x1f0   :  { %v1374_v57 = vadd.f32 %v1294_v36, %v3667_v42  ;;  %v2131_v11 = vpop.eup %2130  ;;  %v1295_v37 = vmul.f32 %v1215_v4, %v974_v32  ;;  %v1054_v8 = vmul.f32 0.5, %v3667_v42  ;;  %v1055_v62 = vmul.f32 0.5, %v974_v32 }
 0x1f1   :  { %v1732_v6 = vpack.c.bf16 %v1689_v22, %v1688_v39  ;;  %v1610_v17 = vadd.f32 1.0, %v2131_v11  ;;  %2136 = vtanh.f32 %v1453_v61 }
 0x1f2   :  { %v1454_v50 = vmul.f32 0.7978846, %v1374_v57  ;;  %v1375_v18 = vadd.f32 %v1295_v37, %v974_v32 }
 0x1f3   :  { %v2133_v16 = vpop.eup %2132  ;;  %1772 = vst [vmem:[%s3715_s5 + $0x120] sm:$0xff] %v1732_v6  ;;  %v1690_v25 = vmul.f32 %v1610_v17, %v1050_v49 }
 0x1f4   :  { %v2135_v24 = vpop.eup %2134  ;;  %v1611_v53 = vadd.f32 1.0, %v2133_v16  ;;  %2138 = vtanh.f32 %v1454_v50  ;;  %v1455_v56 = vmul.f32 0.7978846, %v1375_v18 }
 0x1f5   :  { %v1612_v35 = vadd.f32 1.0, %v2135_v24 }
 0x1f6   :  { %v1691_v27 = vmul.f32 %v1611_v53, %v1051_v20  ;;  %2140 = vtanh.f32 %v1455_v56 }
 0x1f7   :  { %v2137_v2 = vpop.eup %2136  ;;  %v1692_v52 = vmul.f32 %v1612_v35, %v1052_v30 }
 0x1f8   :  { %v1733_v26 = vpack.c.bf16 %v1691_v27, %v1690_v25  ;;  %v1613_v33 = vadd.f32 1.0, %v2137_v2 }
 0x1fa   :  { %v2139_v46 = vpop.eup %2138  ;;  %1773 = vst [vmem:[%s3715_s5 + $0x128] sm:$0xff] %v1733_v26  ;;  %v1693_v59 = vmul.f32 %v1613_v33, %v1053_v0 }
 0x1fb   :  { %v1614_v12 = vadd.f32 1.0, %v2139_v46 }
 0x1fc   :  { %v1734_v9 = vpack.c.bf16 %v1693_v59, %v1692_v52  ;;  %v2141_v10 = vpop.eup %2140 }
 0x1fd   :  { %v1694_v29 = vmul.f32 %v1614_v12, %v1054_v8  ;;  %v1615_v38 = vadd.f32 1.0, %v2141_v10 }
 0x1fe   :  { %1774 = vst [vmem:[%s3715_s5 + $0x130] sm:$0xff] %v1734_v9 }
 0x1ff   :  { %v1695_v5 = vmul.f32 %v1615_v38, %v1055_v62 }
 0x201   :  { %v1735_v21 = vpack.c.bf16 %v1695_v5, %v1694_v29 }
 0x203   :  { %1775 = vst [vmem:[%s3715_s5 + $0x138] sm:$0xff] %v1735_v21 }

// kernel: uvit_forward.57
= control target key start
LH: loop header
LB: loop body
LE: loop exit
PB: predicated region body
PF: predicated region fallthrough
CT: control target
= control target key end

     0   :  { %s1465_s0 = inlined_call_operand.vmem [shape: f32[160,128], index: 0, kind: input, shape index: {}]   ;;  %s1466_s3 = inlined_call_operand.vmem [shape: f32[1,128], index: 3, kind: input, shape index: {}]   ;;  %s1467_s4 = inlined_call_operand.vmem [shape: f32[1,128], index: 4, kind: input, shape index: {}]   ;;  %s1468_s1 = inlined_call_operand.vmem [shape: bf16[128,128], index: 1, kind: input, shape index: {}]   ;;  %s1469_s2 = inlined_call_operand.vmem [shape: f32[1,128], index: 2, kind: input, shape index: {}]   ;;  %s1470_s5 = inlined_call_operand.vmem [shape: f32[160,128], index: 5, kind: output, shape index: {}]  }
   0x1   :  { %v829_v0 = vld [vmem:[%s1465_s0 + $0x70] sm:$0xff]  ;;  %v834_v1 = vld [vmem:[%s1465_s0 + $0x40] sm:$0xff]  ;;  %v843_v3 = vld [vmem:[%s1465_s0 + $0x48] sm:$0xff] }
   0x2   :  { %68 = vadd.xlane.f32.xlu1 %v829_v0  ;;  %56 = vadd.xlane.f32.xlu0 %v834_v1  ;;  %v108_v2 = vmul.f32 %v834_v1, %v834_v1  ;;  %v848_v4 = vld [vmem:[%s1465_s0 + $0x78] sm:$0xff]  ;;  %v109_v5 = vmul.f32 %v843_v3, %v843_v3  ;;  %v114_v7 = vmul.f32 %v829_v0, %v829_v0  ;;  %v861_v8 = vld [vmem:[%s1465_s0 + $0x50] sm:$0xff]  ;;  %v867_v9 = vld [vmem:[%s1465_s0 + $0x80] sm:$0xff] }
   0x3   :  { %v115_v6 = vmul.f32 %v848_v4, %v848_v4  ;;  %v872_v10 = vld [vmem:[%s1465_s0 + $0x58] sm:$0xff]  ;;  %v877_v11 = vld [vmem:[%s1465_s0 + $0x88] sm:$0xff]  ;;  %v110_v13 = vmul.f32 %v861_v8, %v861_v8  ;;  %v116_v14 = vmul.f32 %v867_v9, %v867_v9  ;;  %v893_v16 = vld [vmem:[%s1465_s0] sm:$0xff] }
   0x4   :  { %136 = vadd.xlane.f32.xlu2 %v108_v2  ;;  %v111_v12 = vmul.f32 %v872_v10, %v872_v10  ;;  %v117_v15 = vmul.f32 %v877_v11, %v877_v11  ;;  %v898_v17 = vld [vmem:[%s1465_s0 + $0x8] sm:$0xff]  ;;  %v905_v18 = vld [vmem:[%s1465_s0 + $0x20] sm:$0xff]  ;;  %v100_v20 = vmul.f32 %v893_v16, %v893_v16  ;;  %v935_v26 = vld [vmem:[%s1465_s0 + $0x90] sm:$0xff] }
   0x5   :  { %v910_v19 = vld [vmem:[%s1465_s0 + $0x28] sm:$0xff]  ;;  %v101_v21 = vmul.f32 %v898_v17, %v898_v17  ;;  %v104_v22 = vmul.f32 %v905_v18, %v905_v18  ;;  %v925_v24 = vld [vmem:[%s1465_s0 + $0x60] sm:$0xff]  ;;  %v945_v28 = vld [vmem:[%s1465_s0 + $0x98] sm:$0xff]  ;;  %v118_v30 = vmul.f32 %v935_v26, %v935_v26 }
   0x6   :  { %v105_v23 = vmul.f32 %v910_v19, %v910_v19  ;;  %v930_v25 = vld [vmem:[%s1465_s0 + $0x68] sm:$0xff]  ;;  %v112_v27 = vmul.f32 %v925_v24, %v925_v24  ;;  %v119_v31 = vmul.f32 %v945_v28, %v945_v28  ;;  %v957_v32 = vld [vmem:[%s1465_s0 + $0x10] sm:$0xff]  ;;  %v963_v33 = vld [vmem:[%s1465_s0 + $0x18] sm:$0xff] }
   0x7   :  { %v113_v29 = vmul.f32 %v930_v25, %v930_v25  ;;  %v968_v34 = vld [vmem:[%s1465_s0 + $0x30] sm:$0xff]  ;;  %v973_v35 = vld [vmem:[%s1465_s0 + $0x38] sm:$0xff]  ;;  %v102_v36 = vmul.f32 %v957_v32, %v957_v32  ;;  %v103_v37 = vmul.f32 %v963_v33, %v963_v33  ;;  %v726_v42 = vld [vmem:[%s1468_s1 + $0x28] sm:$0xff] }
   0x8   :  { %v106_v38 = vmul.f32 %v968_v34, %v968_v34  ;;  %v728_v39 = vld [vmem:[%s1468_s1 + $0x38] sm:$0xff]  ;;  %v727_v40 = vld [vmem:[%s1468_s1 + $0x30] sm:$0xff]  ;;  %v107_v41 = vmul.f32 %v973_v35, %v973_v35  ;;  %v725_v43 = vld [vmem:[%s1468_s1 + $0x20] sm:$0xff] }
   0x9   :  { %730 = vmatpush.bf16.msra.mxu2 %v728_v39  ;;  %731 = vmatpush.bf16.msra.mxu3 %v728_v39  ;;  %v724_v44 = vld [vmem:[%s1468_s1 + $0x18] sm:$0xff]  ;;  %v723_v45 = vld [vmem:[%s1468_s1 + $0x10] sm:$0xff]  ;;  %v722_v51 = vld [vmem:[%s1468_s1 + $0x8] sm:$0xff] }
   0xa   :  { %70 = vadd.xlane.f32.xlu1 %v848_v4  ;;  %58 = vadd.xlane.f32.xlu0 %v843_v3  ;;  %v721_v54 = vld [vmem:[%s1468_s1] sm:$0xff] }
   0xb   :  { %606 = vmatpush.bf16.msra.mxu0 %v728_v39  ;;  %729 = vmatpush.bf16.msra.mxu1 %v728_v39 }
   0xc   :  { %138 = vadd.xlane.f32.xlu2 %v109_v5 }
   0xd   :  { %733 = vmatpush.bf16.msra.mxu2 %v727_v40  ;;  %734 = vmatpush.bf16.msra.mxu3 %v727_v40 }
   0xf   :  { %607 = vmatpush.bf16.msra.mxu0 %v727_v40  ;;  %732 = vmatpush.bf16.msra.mxu1 %v727_v40 }
  0x11   :  { %736 = vmatpush.bf16.msra.mxu2 %v726_v42  ;;  %737 = vmatpush.bf16.msra.mxu3 %v726_v42 }
  0x12   :  { %150 = vadd.xlane.f32.xlu1 %v115_v6  ;;  %148 = vadd.xlane.f32.xlu0 %v114_v7 }
  0x13   :  { %608 = vmatpush.bf16.msra.mxu0 %v726_v42  ;;  %735 = vmatpush.bf16.msra.mxu1 %v726_v42 }
  0x14   :  { %60 = vadd.xlane.f32.xlu2 %v861_v8 }
  0x15   :  { %739 = vmatpush.bf16.msra.mxu2 %v725_v43  ;;  %740 = vmatpush.bf16.msra.mxu3 %v725_v43 }
  0x17   :  { %609 = vmatpush.bf16.msra.mxu0 %v725_v43  ;;  %738 = vmatpush.bf16.msra.mxu1 %v725_v43 }
  0x19   :  { %742 = vmatpush.bf16.msra.mxu2 %v724_v44  ;;  %743 = vmatpush.bf16.msra.mxu3 %v724_v44 }
  0x1a   :  { %72 = vadd.xlane.f32.xlu1 %v867_v9  ;;  %62 = vadd.xlane.f32.xlu0 %v872_v10 }
  0x1b   :  { %610 = vmatpush.bf16.msra.mxu0 %v724_v44  ;;  %741 = vmatpush.bf16.msra.mxu1 %v724_v44 }
  0x1c   :  { %74 = vadd.xlane.f32.xlu2 %v877_v11 }
  0x1d   :  { %745 = vmatpush.bf16.msra.mxu2 %v723_v45  ;;  %746 = vmatpush.bf16.msra.mxu3 %v723_v45 }
  0x1f   :  { %611 = vmatpush.bf16.msra.mxu0 %v723_v45  ;;  %744 = vmatpush.bf16.msra.mxu1 %v723_v45 }
  0x21   :  { %748 = vmatpush.bf16.msra.mxu2 %v722_v51  ;;  %749 = vmatpush.bf16.msra.mxu3 %v722_v51 }
  0x22   :  { %142 = vadd.xlane.f32.xlu1 %v111_v12  ;;  %140 = vadd.xlane.f32.xlu0 %v110_v13 }
  0x23   :  { %612 = vmatpush.bf16.msra.mxu0 %v722_v51  ;;  %747 = vmatpush.bf16.msra.mxu1 %v722_v51 }
  0x24   :  { %152 = vadd.xlane.f32.xlu2 %v116_v14 }
  0x25   :  { %751 = vmatpush.bf16.msra.mxu2 %v721_v54  ;;  %752 = vmatpush.bf16.msra.mxu3 %v721_v54 }
  0x27   :  { %613 = vmatpush.bf16.msra.mxu0 %v721_v54  ;;  %750 = vmatpush.bf16.msra.mxu1 %v721_v54 }
  0x2a   :  { %154 = vadd.xlane.f32.xlu0 %v117_v15  ;;  %40 = vadd.xlane.f32.xlu1 %v893_v16 }
  0x2c   :  { %42 = vadd.xlane.f32.xlu2 %v898_v17 }
  0x32   :  { %48 = vadd.xlane.f32.xlu0 %v905_v18  ;;  %50 = vadd.xlane.f32.xlu1 %v910_v19 }
  0x34   :  { %120 = vadd.xlane.f32.xlu2 %v100_v20 }
  0x3a   :  { %122 = vadd.xlane.f32.xlu0 %v101_v21  ;;  %128 = vadd.xlane.f32.xlu1 %v104_v22 }
  0x3c   :  { %130 = vadd.xlane.f32.xlu2 %v105_v23 }
  0x42   :  { %64 = vadd.xlane.f32.xlu0 %v925_v24  ;;  %66 = vadd.xlane.f32.xlu1 %v930_v25 }
  0x44   :  { %76 = vadd.xlane.f32.xlu2 %v935_v26 }
  0x4a   :  { %78 = vadd.xlane.f32.xlu0 %v945_v28  ;;  %144 = vadd.xlane.f32.xlu1 %v112_v27 }
  0x4c   :  { %146 = vadd.xlane.f32.xlu2 %v113_v29 }
  0x52   :  { %156 = vadd.xlane.f32.xlu0 %v118_v30  ;;  %158 = vadd.xlane.f32.xlu1 %v119_v31 }
  0x54   :  { %44 = vadd.xlane.f32.xlu2 %v957_v32 }
  0x5a   :  { %46 = vadd.xlane.f32.xlu0 %v963_v33  ;;  %52 = vadd.xlane.f32.xlu1 %v968_v34 }
  0x5c   :  { %54 = vadd.xlane.f32.xlu2 %v973_v35 }
  0x62   :  { %124 = vadd.xlane.f32.xlu0 %v102_v36  ;;  %126 = vadd.xlane.f32.xlu1 %v103_v37 }
  0x64   :  { %132 = vadd.xlane.f32.xlu2 %v106_v38 }
  0x6a   :  { %134 = vadd.xlane.f32.xlu0 %v107_v41 }
  0x75   :  { %v69_v46 = vpop.xlane.xlu1 %68  ;;  %v57_v47 = vpop.xlane.xlu0 %56 }
  0x76   :  { %v1004_v48 = vmul.f32 0.0078125, %v57_v47  ;;  %v1020_v63 = vmul.f32 0.0078125, %v69_v46 }
  0x77   :  { %v137_v49 = vpop.xlane.xlu2 %136 }
  0x78   :  { %v188_v50 = vmul.f32 %v1004_v48, %v1004_v48  ;;  %v168_v52 = vmul.f32 0.0078125, %v137_v49  ;;  %v194_v14 = vmul.f32 %v1020_v63, %v1020_v63 }
  0x7a   :  { %v208_v53 = vsub.f32 %v168_v52, %v188_v50  ;;  %v234_v52 = vsub.f32 %v829_v0, %v1020_v63 }
  0x7c   :  { %v248_v55 = vadd.f32 1e-05, %v208_v53  ;;  %v228_v53 = vsub.f32 %v834_v1, %v1004_v48 }
  0x7d   :  { %v71_v56 = vpop.xlane.xlu1 %70  ;;  %v59_v57 = vpop.xlane.xlu0 %58 }
  0x7e   :  { %v1014_v58 = vmul.f32 0.0078125, %v59_v57  ;;  %756 = vrsqrt.f32 %v248_v55  ;;  %v1016_v60 = vmul.f32 0.0078125, %v71_v56  ;;  %vm346_vm1 = vweird.f32 %v248_v55 }
  0x7f   :  { %v139_v59 = vpop.xlane.xlu2 %138 }
  0x80   :  { %v189_v61 = vmul.f32 %v1014_v58, %v1014_v58  ;;  %v169_v62 = vmul.f32 0.0078125, %v139_v59  ;;  %v195_v5 = vmul.f32 %v1016_v60, %v1016_v60  ;;  %v229_v56 = vsub.f32 %v843_v3, %v1014_v58 }
  0x82   :  { %v209_v2 = vsub.f32 %v169_v62, %v189_v61 }
  0x84   :  { %v757_v6 = vpop.eup %756  ;;  %v249_v7 = vadd.f32 1e-05, %v209_v2 }
  0x85   :  { %v151_v12 = vpop.xlane.xlu1 %150  ;;  %v149_v13 = vpop.xlane.xlu0 %148  ;;  %v341_v15 = vmul.f32 %v757_v6, %v248_v55  ;;  %vm347_vm0 = vweird.f32 %v757_v6 }
  0x86   :  { %v175_v20 = vmul.f32 0.0078125, %v151_v12  ;;  %v174_v21 = vmul.f32 0.0078125, %v149_v13  ;;  %758 = vrsqrt.f32 %v249_v7  ;;  %vm1046_vm2 = vmor %vm346_vm1, %vm347_vm0  ;;  %vm356_vm4 = vweird.f32 %v249_v7 }
  0x87   :  { %v61_v22 = vpop.xlane.xlu2 %60  ;;  %v342_v23 = vmul.f32 %v757_v6, %v341_v15 }
  0x88   :  { %v215_v27 = vsub.f32 %v175_v20, %v195_v5  ;;  %v214_v29 = vsub.f32 %v174_v21, %v194_v14  ;;  %v1032_v45 = vmul.f32 0.0078125, %v61_v22  ;;  %v1071_v22 = vld [vmem:[%s1466_s3] ss:$0 sm:$0xff] }
  0x89   :  { %v343_v30 = vmul.f32 0.5, %v342_v23 }
  0x8a   :  { %v1026_v31 = vadd.f32 1e-05, %v215_v27  ;;  %v1028_v36 = vadd.f32 1e-05, %v214_v29  ;;  %v190_v61 = vmul.f32 %v1032_v45, %v1032_v45 }
  0x8b   :  { %v344_v37 = vsub.f32 1.5, %v343_v30 }
  0x8c   :  { %760 = vrsqrt.f32 %v1026_v31  ;;  %v759_v38 = vpop.eup %758  ;;  %vm416_vm8 = vweird.f32 %v1026_v31  ;;  %vm406_vm10 = vweird.f32 %v1028_v36 }
  0x8d   :  { %762 = vrsqrt.f32 %v1028_v36  ;;  %v73_v39 = vpop.xlane.xlu1 %72  ;;  %v63_v40 = vpop.xlane.xlu0 %62  ;;  %v351_v41 = vmul.f32 %v759_v38, %v249_v7  ;;  %v345_v43 = vmul.f32 %v757_v6, %v344_v37  ;;  %vm357_vm3 = vweird.f32 %v759_v38 }
  0x8e   :  { %v1034_v46 = vmul.f32 0.0078125, %v73_v39  ;;  %v1036_v47 = vmul.f32 0.0078125, %v63_v40  ;;  %vm358_vm5 = vmor %vm356_vm4, %vm357_vm3 }
  0x8f   :  { %v75_v42 = vpop.xlane.xlu2 %74  ;;  %v352_v44 = vmul.f32 %v759_v38, %v351_v41  ;;  %v349_v1 = vsel %vm1046_vm2, %v757_v6, %v345_v43 }
  0x90   :  { %v196_v62 = vmul.f32 %v1034_v46, %v1034_v46  ;;  %v191_v3 = vmul.f32 %v1036_v47, %v1036_v47  ;;  %v1066_v20 = vmul.f32 0.0078125, %v75_v42  ;;  %v468_v21 = vmul.f32 %v349_v1, %v228_v53  ;;  %v1086_v53 = vld [vmem:[%s1467_s4] ss:$0 sm:$0xff] }
  0x91   :  { %v353_v50 = vmul.f32 0.5, %v352_v44 }
  0x92   :  { %v1038_v49 = vpop.eup %760 }
  0x93   :  { %v1040_v51 = vpop.eup %762  ;;  %v411_v57 = vmul.f32 %v1038_v49, %v1026_v31  ;;  %v354_v55 = vsub.f32 1.5, %v353_v50  ;;  %vm417_vm6 = vweird.f32 %v1038_v49  ;;  %v492_v50 = vmul.f32 %v1071_v22, %v468_v21 }
  0x94   :  { %v401_v59 = vmul.f32 %v1040_v51, %v1028_v36  ;;  %vm407_vm7 = vweird.f32 %v1040_v51  ;;  %vm418_vm9 = vmor %vm416_vm8, %vm417_vm6 }
  0x95   :  { %v412_v48 = vmul.f32 %v1038_v49, %v411_v57  ;;  %v143_v58 = vpop.xlane.xlu1 %142  ;;  %v141_v2 = vpop.xlane.xlu0 %140  ;;  %v355_v5 = vmul.f32 %v759_v38, %v354_v55  ;;  %vm408_vm11 = vmor %vm406_vm10, %vm407_vm7 }
  0x96   :  { %v402_v12 = vmul.f32 %v1040_v51, %v401_v59  ;;  %v171_v13 = vmul.f32 0.0078125, %v143_v58  ;;  %v170_v14 = vmul.f32 0.0078125, %v141_v2 }
  0x97   :  { %v413_v15 = vmul.f32 0.5, %v412_v48  ;;  %v153_v6 = vpop.xlane.xlu2 %152  ;;  %v359_v7 = vsel %vm358_vm5, %v759_v38, %v355_v5  ;;  %v235_v38 = vsub.f32 %v848_v4, %v1016_v60  ;;  %v197_v60 = vmul.f32 %v1066_v20, %v1066_v20 }
  0x98   :  { %v403_v23 = vmul.f32 0.5, %v402_v12  ;;  %v211_v27 = vsub.f32 %v171_v13, %v191_v3  ;;  %v210_v29 = vsub.f32 %v170_v14, %v190_v61  ;;  %v176_v30 = vmul.f32 0.0078125, %v153_v6 }
  0x99   :  { %v414_v37 = vsub.f32 1.5, %v413_v15  ;;  %v469_v44 = vmul.f32 %v359_v7, %v229_v56  ;;  %v516_v48 = vadd.f32 %v1086_v53, %v492_v50 }
  0x9a   :  { %v404_v39 = vsub.f32 1.5, %v403_v23  ;;  %v1076_v40 = vadd.f32 1e-05, %v211_v27  ;;  %v1078_v41 = vadd.f32 1e-05, %v210_v29  ;;  %v216_v42 = vsub.f32 %v176_v30, %v196_v62 }
  0x9b   :  { %v415_v43 = vmul.f32 %v1038_v49, %v414_v37  ;;  %v493_v55 = vmul.f32 %v1071_v22, %v469_v44  ;;  %v230_v30 = vsub.f32 %v861_v8, %v1032_v45 }
  0x9c   :  { %v405_v54 = vmul.f32 %v1040_v51, %v404_v39  ;;  %764 = vrsqrt.f32 %v1076_v40  ;;  %v1096_v31 = vadd.f32 1e-05, %v216_v42  ;;  %v231_v39 = vsub.f32 %v872_v10, %v1036_v47 }
  0x9d   :  { %766 = vrsqrt.f32 %v1078_v41  ;;  %v155_v56 = vpop.xlane.xlu0 %154  ;;  %v41_v57 = vpop.xlane.xlu1 %40  ;;  %v419_v4 = vsel %vm418_vm9, %v1038_v49, %v415_v43  ;;  %v517_v62 = vadd.f32 %v1086_v53, %v493_v55  ;;  %vm376_vm12 = vweird.f32 %v1076_v40 }
  0x9e   :  { %v177_v59 = vmul.f32 0.0078125, %v155_v56  ;;  %v409_v36 = vsel %vm408_vm11, %v1040_v51, %v405_v54  ;;  %v475_v61 = vmul.f32 %v419_v4, %v235_v38  ;;  %768 = vrsqrt.f32 %v1096_v31 }
  0x9f   :  { %v43_v1 = vpop.xlane.xlu2 %42  ;;  %v474_v3 = vmul.f32 %v409_v36, %v234_v52  ;;  %v532_v49 = vpack.c.bf16 %v517_v62, %v516_v48  ;;  %v1117_v15 = vmul.f32 0.0078125, %v41_v57  ;;  %vm366_vm14 = vweird.f32 %v1078_v41 }
  0xa0   :  { %v217_v58 = vsub.f32 %v177_v59, %v197_v60  ;;  %v499_v5 = vmul.f32 %v1071_v22, %v475_v61  ;;  %v1134_v44 = vmul.f32 0.0078125, %v43_v1  ;;  %vm426_vm3 = vweird.f32 %v1096_v31 }
  0xa1   :  { %v498_v2 = vmul.f32 %v1071_v22, %v474_v3  ;;  %634 = vmatmul.bf16.vlgmr.msra.gmra.mxu2 %v532_v49  ;;  %v180_v43 = vmul.f32 %v1117_v15, %v1117_v15  ;;  %v220_v61 = vsub.f32 %v893_v16, %v1117_v15 }
  0xa2   :  { %v1111_v12 = vpop.eup %764  ;;  %v1113_v51 = vadd.f32 1e-05, %v217_v58  ;;  %v523_v63 = vadd.f32 %v1086_v53, %v499_v5  ;;  %v181_v59 = vmul.f32 %v1134_v44, %v1134_v44 }
  0xa3   :  { %v767_v13 = vpop.eup %766  ;;  %v371_v14 = vmul.f32 %v1111_v12, %v1076_v40  ;;  %v522_v0 = vadd.f32 %v1086_v53, %v498_v2  ;;  %vm377_vm13 = vweird.f32 %v1111_v12 }
  0xa4   :  { %v361_v52 = vmul.f32 %v767_v13, %v1078_v41  ;;  %770 = vrsqrt.f32 %v1113_v51  ;;  %v1123_v6 = vpop.eup %768  ;;  %vm367_vm15 = vweird.f32 %v767_v13  ;;  %vm1153_vm0 = vmor %vm376_vm12, %vm377_vm13  ;;  %vm436_vm6 = vweird.f32 %v1113_v51 }
  0xa5   :  { %v372_v21 = vmul.f32 %v1111_v12, %v371_v14  ;;  %v49_v23 = vpop.xlane.xlu0 %48  ;;  %v51_v27 = vpop.xlane.xlu1 %50  ;;  %v535_v29 = vpack.c.bf16 %v523_v63, %v522_v0  ;;  %v421_v7 = vmul.f32 %v1123_v6, %v1096_v31  ;;  %vm427_vm1 = vweird.f32 %v1123_v6  ;;  %vm368_vm2 = vmor %vm366_vm14, %vm367_vm15 }
  0xa6   :  { %v362_v37 = vmul.f32 %v767_v13, %v361_v52  ;;  %v1138_v45 = vmul.f32 0.0078125, %v49_v23  ;;  %v1141_v56 = vmul.f32 0.0078125, %v51_v27  ;;  %vm1173_vm4 = vmor %vm426_vm3, %vm427_vm1 }
  0xa7   :  { %v373_v42 = vmul.f32 0.5, %v372_v21  ;;  %649 = vmatmul.bf16.vlgmr.msra.gmra.mxu3 %v535_v29  ;;  %v121_v50 = vpop.xlane.xlu2 %120  ;;  %v422_v8 = vmul.f32 %v1123_v6, %v421_v7 }
  0xa8   :  { %v363_v38 = vmul.f32 0.5, %v362_v37  ;;  %v160_v10 = vmul.f32 0.0078125, %v121_v50  ;;  %v184_v41 = vmul.f32 %v1138_v45, %v1138_v45  ;;  %v185_v3 = vmul.f32 %v1141_v56, %v1141_v56 }
  0xa9   :  { %v374_v54 = vsub.f32 1.5, %v373_v42  ;;  %v423_v55 = vmul.f32 0.5, %v422_v8  ;;  %v236_v8 = vsub.f32 %v867_v9, %v1034_v46 }
  0xaa   :  { %v1143_v47 = vpop.eup %770  ;;  %v364_v57 = vsub.f32 1.5, %v363_v38  ;;  %v200_v36 = vsub.f32 %v160_v10, %v180_v43  ;;  %v237_v10 = vsub.f32 %v877_v11, %v1066_v20 }
  0xab   :  { %v375_v4 = vmul.f32 %v1111_v12, %v374_v54  ;;  %v431_v60 = vmul.f32 %v1143_v47, %v1113_v51  ;;  %v424_v48 = vsub.f32 1.5, %v423_v55  ;;  %vm437_vm5 = vweird.f32 %v1143_v47 }
  0xac   :  { %v365_v1 = vmul.f32 %v767_v13, %v364_v57  ;;  %v1163_v58 = vadd.f32 1e-05, %v200_v36  ;;  %vm438_vm7 = vmor %vm436_vm6, %vm437_vm5 }
  0xad   :  { %v432_v62 = vmul.f32 %v1143_v47, %v431_v60  ;;  %v123_v40 = vpop.xlane.xlu0 %122  ;;  %v129_v49 = vpop.xlane.xlu1 %128  ;;  %v379_v2 = vsel %vm1153_vm0, %v1111_v12, %v375_v4  ;;  %v425_v5 = vmul.f32 %v1123_v6, %v424_v48 }
  0xae   :  { %v161_v14 = vmul.f32 0.0078125, %v123_v40  ;;  %v164_v0 = vmul.f32 0.0078125, %v129_v49  ;;  %v369_v63 = vsel %vm368_vm2, %v767_v13, %v365_v1  ;;  %772 = vrsqrt.f32 %v1163_v58 }
  0xaf   :  { %v433_v52 = vmul.f32 0.5, %v432_v62  ;;  %v131_v21 = vpop.xlane.xlu2 %130  ;;  %v470_v23 = vmul.f32 %v369_v63, %v230_v30  ;;  %v471_v7 = vmul.f32 %v379_v2, %v231_v39  ;;  %v429_v13 = vsel %vm1173_vm4, %v1123_v6, %v425_v5 }
  0xb0   :  { %v201_v29 = vsub.f32 %v161_v14, %v181_v59  ;;  %v204_v12 = vsub.f32 %v164_v0, %v184_v41  ;;  %v165_v37 = vmul.f32 0.0078125, %v131_v21  ;;  %v476_v4 = vmul.f32 %v429_v13, %v236_v8 }
  0xb1   :  { %v434_v42 = vsub.f32 1.5, %v433_v52  ;;  %v494_v31 = vmul.f32 %v1071_v22, %v470_v23  ;;  %v495_v38 = vmul.f32 %v1071_v22, %v471_v7  ;;  %v221_v1 = vsub.f32 %v898_v17, %v1134_v44 }
  0xb2   :  { %v1182_v30 = vadd.f32 1e-05, %v201_v29  ;;  %v1184_v43 = vadd.f32 1e-05, %v204_v12  ;;  %v205_v50 = vsub.f32 %v165_v37, %v185_v3  ;;  %v500_v48 = vmul.f32 %v1071_v22, %v476_v4 }
  0xb3   :  { %v435_v39 = vmul.f32 %v1143_v47, %v434_v42  ;;  %v518_v54 = vadd.f32 %v1086_v53, %v494_v31  ;;  %v519_v46 = vadd.f32 %v1086_v53, %v495_v38  ;;  %v225_v62 = vsub.f32 %v910_v19, %v1141_v56 }
  0xb4   :  { %774 = vrsqrt.f32 %v1182_v30  ;;  %v1195_v6 = vadd.f32 1e-05, %v205_v50  ;;  %v1197_v57 = vpop.eup %772  ;;  %vm266_vm8 = vweird.f32 %v1163_v58  ;;  %vm276_vm9 = vweird.f32 %v1182_v30 }
  0xb5   :  { %776 = vrsqrt.f32 %v1184_v43  ;;  %v65_v55 = vpop.xlane.xlu0 %64  ;;  %v67_v9 = vpop.xlane.xlu1 %66  ;;  %v439_v51 = vsel %vm438_vm7, %v1143_v47, %v435_v39  ;;  %v261_v60 = vmul.f32 %v1197_v57, %v1163_v58  ;;  %v533_v11 = vpack.c.bf16 %v519_v46, %v518_v54 }
  0xb6   :  { %778 = vrsqrt.f32 %v1195_v6  ;;  %v477_v59 = vmul.f32 %v439_v51, %v237_v10  ;;  %v224_v47 = vsub.f32 %v905_v18, %v1138_v45  ;;  %v1217_v40 = vmul.f32 0.0078125, %v65_v55 }
  0xb7   :  { %v77_v20 = vpop.xlane.xlu2 %76  ;;  %v262_v36 = vmul.f32 %v1197_v57, %v261_v60  ;;  %639 = vmatmul.bf16.gmra.mxu2 %v533_v11  ;;  %v1226_v2 = vmul.f32 0.0078125, %v67_v9  ;;  %vm267_vm10 = vweird.f32 %v1197_v57  ;;  %v524_v12 = vadd.f32 %v1086_v53, %v500_v48 }
  0xb8   :  { %v501_v49 = vmul.f32 %v1071_v22, %v477_v59  ;;  %v1237_v23 = vmul.f32 0.0078125, %v77_v20  ;;  %v192_v42 = vmul.f32 %v1217_v40, %v1217_v40  ;;  %vm1251_vm11 = vmor %vm266_vm8, %vm267_vm10  ;;  %vm306_vm0 = vweird.f32 %v1184_v43 }
  0xb9   :  { %v263_v3 = vmul.f32 0.5, %v262_v36  ;;  %v193_v38 = vmul.f32 %v1226_v2, %v1226_v2  ;;  %vm316_vm1 = vweird.f32 %v1195_v6 }
  0xba   :  { %v1213_v41 = vpop.eup %774  ;;  %v525_v63 = vadd.f32 %v1086_v53, %v501_v49  ;;  %v198_v49 = vmul.f32 %v1237_v23, %v1237_v23 }
  0xbb   :  { %v1220_v16 = vpop.eup %776  ;;  %v271_v15 = vmul.f32 %v1213_v41, %v1182_v30  ;;  %v264_v14 = vsub.f32 1.5, %v263_v3  ;;  %vm277_vm12 = vweird.f32 %v1213_v41 }
  0xbc   :  { %v1228_v5 = vpop.eup %778  ;;  %v301_v0 = vmul.f32 %v1220_v16, %v1184_v43  ;;  %v536_v8 = vpack.c.bf16 %v525_v63, %v524_v12  ;;  %vm307_vm13 = vweird.f32 %v1220_v16  ;;  %vm1270_vm15 = vmor %vm276_vm9, %vm277_vm12 }
  0xbd   :  { %v272_v52 = vmul.f32 %v1213_v41, %v271_v15  ;;  %v311_v21 = vmul.f32 %v1228_v5, %v1195_v6  ;;  %v79_v27 = vpop.xlane.xlu0 %78  ;;  %v145_v29 = vpop.xlane.xlu1 %144  ;;  %v265_v37 = vmul.f32 %v1197_v57, %v264_v14  ;;  %vm317_vm14 = vweird.f32 %v1228_v5  ;;  %vm1280_vm2 = vmor %vm306_vm0, %vm307_vm13 }
  0xbe   :  { %v302_v7 = vmul.f32 %v1220_v16, %v301_v0  ;;  %v172_v31 = vmul.f32 0.0078125, %v145_v29  ;;  %654 = vmatmul.bf16.gmra.mxu3 %v536_v8  ;;  %v1261_v58 = vmul.f32 0.0078125, %v79_v27  ;;  %vm318_vm3 = vmor %vm316_vm1, %vm317_vm14 }
  0xbf   :  { %v273_v13 = vmul.f32 0.5, %v272_v52  ;;  %v312_v50 = vmul.f32 %v1228_v5, %v311_v21  ;;  %v147_v39 = vpop.xlane.xlu2 %146  ;;  %v269_v4 = vsel %vm1251_vm11, %v1197_v57, %v265_v37 }
  0xc0   :  { %v303_v10 = vmul.f32 0.5, %v302_v7  ;;  %v212_v55 = vsub.f32 %v172_v31, %v192_v42  ;;  %v173_v51 = vmul.f32 0.0078125, %v147_v39  ;;  %v460_v48 = vmul.f32 %v269_v4, %v220_v61 }
  0xc1   :  { %v274_v9 = vsub.f32 1.5, %v273_v13  ;;  %v313_v46 = vmul.f32 0.5, %v312_v50  ;;  %v199_v6 = vmul.f32 %v1261_v58, %v1261_v58  ;;  %v238_v61 = vsub.f32 %v935_v26, %v1237_v23 }
  0xc2   :  { %v304_v60 = vsub.f32 1.5, %v303_v10  ;;  %v1263_v11 = vadd.f32 1e-05, %v212_v55  ;;  %v213_v36 = vsub.f32 %v173_v51, %v193_v38  ;;  %v484_v29 = vmul.f32 %v1071_v22, %v460_v48 }
  0xc3   :  { %v275_v20 = vmul.f32 %v1213_v41, %v274_v9  ;;  %v314_v59 = vsub.f32 1.5, %v313_v46  ;;  %v233_v48 = vsub.f32 %v930_v25, %v1226_v2 }
  0xc4   :  { %v305_v57 = vmul.f32 %v1220_v16, %v304_v60  ;;  %780 = vrsqrt.f32 %v1263_v11  ;;  %v1287_v15 = vadd.f32 1e-05, %v213_v36  ;;  %v232_v36 = vsub.f32 %v925_v24, %v1217_v40 }
  0xc5   :  { %v315_v30 = vmul.f32 %v1228_v5, %v314_v59  ;;  %v157_v14 = vpop.xlane.xlu0 %156  ;;  %v159_v0 = vpop.xlane.xlu1 %158  ;;  %v279_v43 = vsel %vm1270_vm15, %v1213_v41, %v275_v20  ;;  %vm386_vm5 = vweird.f32 %v1263_v11 }
  0xc6   :  { %v178_v63 = vmul.f32 0.0078125, %v157_v14  ;;  %v179_v52 = vmul.f32 0.0078125, %v159_v0  ;;  %v461_v21 = vmul.f32 %v279_v43, %v221_v1  ;;  %782 = vrsqrt.f32 %v1287_v15 }
  0xc7   :  { %v45_v27 = vpop.xlane.xlu2 %44  ;;  %v309_v41 = vsel %vm1280_vm2, %v1220_v16, %v305_v57  ;;  %v319_v12 = vsel %vm318_vm3, %v1228_v5, %v315_v30  ;;  %v508_v5 = vadd.f32 %v1086_v53, %v484_v29  ;;  %vm396_vm8 = vweird.f32 %v1287_v15 }
  0xc8   :  { %v218_v37 = vsub.f32 %v178_v63, %v198_v49  ;;  %v219_v7 = vsub.f32 %v179_v52, %v199_v6  ;;  %v485_v42 = vmul.f32 %v1071_v22, %v461_v21  ;;  %v464_v17 = vmul.f32 %v309_v41, %v224_v47 }
  0xc9   :  { %v465_v44 = vmul.f32 %v319_v12, %v225_v62  ;;  %v1330_v46 = vmul.f32 0.0078125, %v45_v27 }
  0xca   :  { %v781_v1 = vpop.eup %780  ;;  %v1312_v31 = vadd.f32 1e-05, %v218_v37  ;;  %v1314_v13 = vadd.f32 1e-05, %v219_v7  ;;  %v509_v50 = vadd.f32 %v1086_v53, %v485_v42  ;;  %v488_v38 = vmul.f32 %v1071_v22, %v464_v17 }
  0xcb   :  { %v381_v16 = vmul.f32 %v781_v1, %v1263_v11  ;;  %v489_v18 = vmul.f32 %v1071_v22, %v465_v44  ;;  %vm387_vm4 = vweird.f32 %v781_v1  ;;  %v182_v40 = vmul.f32 %v1330_v46, %v1330_v46 }
  0xcc   :  { %784 = vrsqrt.f32 %v1312_v31  ;;  %v1322_v45 = vpop.eup %782  ;;  %v528_v62 = vpack.c.bf16 %v509_v50, %v508_v5  ;;  %v512_v10 = vadd.f32 %v1086_v53, %v488_v38  ;;  %vm1345_vm6 = vmor %vm386_vm5, %vm387_vm4  ;;  %vm446_vm12 = vweird.f32 %v1312_v31 }
  0xcd   :  { %v382_v19 = vmul.f32 %v781_v1, %v381_v16  ;;  %786 = vrsqrt.f32 %v1314_v13  ;;  %v47_v56 = vpop.xlane.xlu0 %46  ;;  %v53_v47 = vpop.xlane.xlu1 %52  ;;  %v391_v8 = vmul.f32 %v1322_v45, %v1287_v15  ;;  %v513_v55 = vadd.f32 %v1086_v53, %v489_v18 }
  0xce   :  { %614 = vmatmul.bf16.vlgmr.msra.gmra.mxu0 %v528_v62  ;;  %v1332_v4 = vmul.f32 0.0078125, %v47_v56  ;;  %v1334_v60 = vmul.f32 0.0078125, %v53_v47  ;;  %vm397_vm7 = vweird.f32 %v1322_v45  ;;  %v239_v56 = vsub.f32 %v945_v28, %v1261_v58 }
  0xcf   :  { %v383_v39 = vmul.f32 0.5, %v382_v19  ;;  %v55_v54 = vpop.xlane.xlu2 %54  ;;  %v392_v9 = vmul.f32 %v1322_v45, %v391_v8  ;;  %v530_v20 = vpack.c.bf16 %v513_v55, %v512_v10  ;;  %vm398_vm9 = vmor %vm396_vm8, %vm397_vm7  ;;  %vm456_vm14 = vweird.f32 %v1314_v13 }
  0xd0   :  { %v183_v2 = vmul.f32 %v1332_v4, %v1332_v4  ;;  %v186_v23 = vmul.f32 %v1334_v60, %v1334_v60  ;;  %v1361_v29 = vmul.f32 0.0078125, %v55_v54 }
  0xd1   :  { %v384_v51 = vsub.f32 1.5, %v383_v39  ;;  %v393_v3 = vmul.f32 0.5, %v392_v9  ;;  %624 = vmatmul.bf16.vlgmr.msra.gmra.mxu1 %v530_v20 }
  0xd2   :  { %v785_v59 = vpop.eup %784  ;;  %v187_v39 = vmul.f32 %v1361_v29, %v1361_v29 }
  0xd3   :  { %v787_v57 = vpop.eup %786  ;;  %v385_v30 = vmul.f32 %v781_v1, %v384_v51  ;;  %v441_v49 = vmul.f32 %v785_v59, %v1312_v31  ;;  %v394_v24 = vsub.f32 1.5, %v393_v3  ;;  %vm447_vm10 = vweird.f32 %v785_v59 }
  0xd4   :  { %v451_v25 = vmul.f32 %v787_v57, %v1314_v13  ;;  %vm457_vm11 = vweird.f32 %v787_v57  ;;  %vm448_vm13 = vmor %vm446_vm12, %vm447_vm10 }
  0xd5   :  { %v442_v26 = vmul.f32 %v785_v59, %v441_v49  ;;  %v125_v11 = vpop.xlane.xlu0 %124  ;;  %v127_v0 = vpop.xlane.xlu1 %126  ;;  %v389_v43 = vsel %vm1345_vm6, %v781_v1, %v385_v30  ;;  %v395_v6 = vmul.f32 %v1322_v45, %v394_v24  ;;  %vm458_vm15 = vmor %vm456_vm14, %vm457_vm11 }
  0xd6   :  { %v452_v63 = vmul.f32 %v787_v57, %v451_v25  ;;  %v162_v52 = vmul.f32 0.0078125, %v125_v11  ;;  %v163_v21 = vmul.f32 0.0078125, %v127_v0  ;;  %v472_v12 = vmul.f32 %v389_v43, %v232_v36 }
  0xd7   :  { %v443_v27 = vmul.f32 0.5, %v442_v26  ;;  %v133_v41 = vpop.xlane.xlu2 %132  ;;  %v399_v1 = vsel %vm398_vm9, %v1322_v45, %v395_v6 }
  0xd8   :  { %v453_v37 = vmul.f32 0.5, %v452_v63  ;;  %v202_v7 = vsub.f32 %v162_v52, %v182_v40  ;;  %v203_v42 = vsub.f32 %v163_v21, %v183_v2  ;;  %v166_v17 = vmul.f32 0.0078125, %v133_v41 }
  0xd9   :  { %v444_v44 = vsub.f32 1.5, %v443_v27  ;;  %v473_v18 = vmul.f32 %v399_v1, %v233_v48  ;;  %v496_v19 = vmul.f32 %v1071_v22, %v472_v12  ;;  %v222_v52 = vsub.f32 %v957_v32, %v1330_v46 }
  0xda   :  { %v454_v16 = vsub.f32 1.5, %v453_v37  ;;  %v242_v5 = vadd.f32 1e-05, %v202_v7  ;;  %v1366_v15 = vadd.f32 1e-05, %v203_v42  ;;  %v206_v50 = vsub.f32 %v166_v17, %v186_v23 }
  0xdb   :  { %v445_v38 = vmul.f32 %v785_v59, %v444_v44  ;;  %v497_v8 = vmul.f32 %v1071_v22, %v473_v18  ;;  %v520_v58 = vadd.f32 %v1086_v53, %v496_v19  ;;  %v223_v37 = vsub.f32 %v963_v33, %v1332_v4 }
  0xdc   :  { %v455_v47 = vmul.f32 %v787_v57, %v454_v16  ;;  %788 = vrsqrt.f32 %v242_v5  ;;  %v246_v45 = vadd.f32 1e-05, %v206_v50  ;;  %vm286_vm2 = vweird.f32 %v242_v5 }
  0xdd   :  { %790 = vrsqrt.f32 %v1366_v15  ;;  %v135_v62 = vpop.xlane.xlu0 %134  ;;  %v449_v31 = vsel %vm448_vm13, %v785_v59, %v445_v38  ;;  %v521_v13 = vadd.f32 %v1086_v53, %v497_v8  ;;  %vm296_vm4 = vweird.f32 %v1366_v15 }
  0xde   :  { %v167_v54 = vmul.f32 0.0078125, %v135_v62  ;;  %v459_v10 = vsel %vm458_vm15, %v787_v57, %v455_v47  ;;  %v478_v28 = vmul.f32 %v449_v31, %v238_v61  ;;  %792 = vrsqrt.f32 %v246_v45 }
  0xdf   :  { %v479_v55 = vmul.f32 %v459_v10, %v239_v56  ;;  %v534_v20 = vpack.c.bf16 %v521_v13, %v520_v58  ;;  %vm326_vm7 = vweird.f32 %v246_v45  ;;  %v226_v16 = vsub.f32 %v968_v34, %v1334_v60 }
  0xe0   :  { %v207_v9 = vsub.f32 %v167_v54, %v187_v39  ;;  %v502_v51 = vmul.f32 %v1071_v22, %v478_v28  ;;  %v227_v56 = vsub.f32 %v973_v35, %v1361_v29  ;;  %v755_v54 = vld [vmem:[%s1469_s2] ss:$0 sm:$0xff] }
  0xe1   :  { %v503_v36 = vmul.f32 %v1071_v22, %v479_v55  ;;  %644 = vmatmul.bf16.gmra.mxu2 %v534_v20 }
  0xe2   :  { %v789_v48 = vpop.eup %788  ;;  %v247_v59 = vadd.f32 1e-05, %v207_v9  ;;  %v526_v3 = vadd.f32 %v1086_v53, %v502_v51 }
  0xe3   :  { %v791_v30 = vpop.eup %790  ;;  %v281_v49 = vmul.f32 %v789_v48, %v242_v5  ;;  %v527_v57 = vadd.f32 %v1086_v53, %v503_v36  ;;  %vm287_vm0 = vweird.f32 %v789_v48 }
  0xe4   :  { %v291_v61 = vmul.f32 %v791_v30, %v1366_v15  ;;  %794 = vrsqrt.f32 %v247_v59  ;;  %v793_v14 = vpop.eup %792  ;;  %vm297_vm1 = vweird.f32 %v791_v30  ;;  %vm288_vm3 = vmor %vm286_vm2, %vm287_vm0  ;;  %vm336_vm10 = vweird.f32 %v247_v59 }
  0xe5   :  { %v282_v24 = vmul.f32 %v789_v48, %v281_v49  ;;  %v537_v25 = vpack.c.bf16 %v527_v57, %v526_v3  ;;  %v321_v26 = vmul.f32 %v793_v14, %v246_v45  ;;  %vm327_vm5 = vweird.f32 %v793_v14  ;;  %vm298_vm6 = vmor %vm296_vm4, %vm297_vm1 }
  0xe6   :  { %v292_v40 = vmul.f32 %v791_v30, %v291_v61  ;;  %vm328_vm8 = vmor %vm326_vm7, %vm327_vm5 }
  0xe7   :  { %v283_v2 = vmul.f32 0.5, %v282_v24  ;;  %659 = vmatmul.bf16.gmra.mxu3 %v537_v25  ;;  %v322_v11 = vmul.f32 %v793_v14, %v321_v26 }
  0xe8   :  { %v293_v23 = vmul.f32 0.5, %v292_v40 }
  0xe9   :  { %v284_v0 = vsub.f32 1.5, %v283_v2  ;;  %v323_v63 = vmul.f32 0.5, %v322_v11 }
  0xea   :  { %v795_v43 = vpop.eup %794  ;;  %v294_v6 = vsub.f32 1.5, %v293_v23 }
  0xeb   :  { %v285_v21 = vmul.f32 %v789_v48, %v284_v0  ;;  %v331_v27 = vmul.f32 %v795_v43, %v247_v59  ;;  %v324_v12 = vsub.f32 1.5, %v323_v63  ;;  %vm337_vm9 = vweird.f32 %v795_v43 }
  0xec   :  { %v295_v41 = vmul.f32 %v791_v30, %v294_v6  ;;  %vm338_vm11 = vmor %vm336_vm10, %vm337_vm9 }
  0xed   :  { %v332_v7 = vmul.f32 %v795_v43, %v331_v27  ;;  %v289_v42 = vsel %vm288_vm3, %v789_v48, %v285_v21  ;;  %v325_v17 = vmul.f32 %v793_v14, %v324_v12 }
  0xee   :  { %v299_v44 = vsel %vm298_vm6, %v791_v30, %v295_v41  ;;  %v462_v1 = vmul.f32 %v289_v42, %v222_v52 }
  0xef   :  { %v333_v32 = vmul.f32 0.5, %v332_v7  ;;  %v463_v46 = vmul.f32 %v299_v44, %v223_v37  ;;  %v329_v15 = vsel %vm328_vm8, %v793_v14, %v325_v17 }
  0xf0   :  { %v486_v5 = vmul.f32 %v1071_v22, %v462_v1  ;;  %v466_v38 = vmul.f32 %v329_v15, %v226_v16 }
  0xf1   :  { %v334_v50 = vsub.f32 1.5, %v333_v32  ;;  %v487_v33 = vmul.f32 %v1071_v22, %v463_v46 }
  0xf2   :  { %v510_v4 = vadd.f32 %v1086_v53, %v486_v5  ;;  %v490_v45 = vmul.f32 %v1071_v22, %v466_v38 }
  0xf3   :  { %v335_v18 = vmul.f32 %v795_v43, %v334_v50  ;;  %v511_v19 = vadd.f32 %v1086_v53, %v487_v33 }
  0xf4   :  { %v514_v8 = vadd.f32 %v1086_v53, %v490_v45 }
  0xf5   :  { %v529_v47 = vpack.c.bf16 %v511_v19, %v510_v4  ;;  %v339_v34 = vsel %vm338_vm11, %v795_v43, %v335_v18 }
  0xf6   :  { %v467_v60 = vmul.f32 %v339_v34, %v227_v56 }
  0xf7   :  { %619 = vmatmul.bf16.gmra.mxu0 %v529_v47 }
  0xf8   :  { %v491_v62 = vmul.f32 %v1071_v22, %v467_v60 }
  0xfa   :  { %v515_v31 = vadd.f32 %v1086_v53, %v491_v62 }
  0xfc   :  { %v531_v39 = vpack.c.bf16 %v515_v31, %v514_v8 }
  0xfe   :  { %629 = vmatmul.bf16.gmra.mxu1 %v531_v39 }
 0x124   :  { %v635_v35 = vpop.f32.mrf.mxu2 }
 0x125   :  { %v636_v29 = vadd.f32 %v755_v54, %v635_v35 }
 0x127   :  { %673 = vst [vmem:[%s1470_s5 + $0x40] sm:$0xff] %v636_v29 }
 0x12a   :  { %v650_v10 = vpop.f32.mrf.mxu3 }
 0x12b   :  { %v651_v28 = vadd.f32 %v755_v54, %v650_v10 }
 0x12c   :  { %v637_v22 = vpop.f32.mrf.mxu2 }
 0x12d   :  { %679 = vst [vmem:[%s1470_s5 + $0x70] sm:$0xff] %v651_v28  ;;  %v638_v53 = vadd.f32 %v755_v54, %v637_v22 }
 0x12f   :  { %674 = vst [vmem:[%s1470_s5 + $0x48] sm:$0xff] %v638_v53 }
 0x132   :  { %v652_v58 = vpop.f32.mrf.mxu3 }
 0x133   :  { %v653_v13 = vadd.f32 %v755_v54, %v652_v58 }
 0x135   :  { %680 = vst [vmem:[%s1470_s5 + $0x78] sm:$0xff] %v653_v13 }
 0x13a   :  { %v640_v55 = vpop.f32.mrf.mxu2 }
 0x13b   :  { %v641_v9 = vadd.f32 %v755_v54, %v640_v55 }
 0x13d   :  { %675 = vst [vmem:[%s1470_s5 + $0x50] sm:$0xff] %v641_v9 }
 0x141   :  { %v655_v20 = vpop.f32.mrf.mxu3 }
 0x142   :  { %v642_v51 = vpop.f32.mrf.mxu2  ;;  %v656_v48 = vadd.f32 %v755_v54, %v655_v20 }
 0x143   :  { %v643_v36 = vadd.f32 %v755_v54, %v642_v51 }
 0x144   :  { %681 = vst [vmem:[%s1470_s5 + $0x80] sm:$0xff] %v656_v48 }
 0x145   :  { %676 = vst [vmem:[%s1470_s5 + $0x58] sm:$0xff] %v643_v36 }
 0x149   :  { %v657_v59 = vpop.f32.mrf.mxu3 }
 0x14a   :  { %v658_v30 = vadd.f32 %v755_v54, %v657_v59 }
 0x14b   :  { %v615_v3 = vpop.f32.mrf.mxu0 }
 0x14c   :  { %v616_v49 = vadd.f32 %v755_v54, %v615_v3  ;;  %682 = vst [vmem:[%s1470_s5 + $0x88] sm:$0xff] %v658_v30 }
 0x14e   :  { %665 = vst [vmem:[%s1470_s5] sm:$0xff] %v616_v49  ;;  %v625_v57 = vpop.f32.mrf.mxu1 }
 0x14f   :  { %v626_v61 = vadd.f32 %v755_v54, %v625_v57 }
 0x151   :  { %669 = vst [vmem:[%s1470_s5 + $0x20] sm:$0xff] %v626_v61 }
 0x153   :  { %v617_v14 = vpop.f32.mrf.mxu0 }
 0x154   :  { %v618_v24 = vadd.f32 %v755_v54, %v617_v14 }
 0x156   :  { %666 = vst [vmem:[%s1470_s5 + $0x8] sm:$0xff] %v618_v24  ;;  %v627_v25 = vpop.f32.mrf.mxu1 }
 0x157   :  { %v628_v40 = vadd.f32 %v755_v54, %v627_v25 }
 0x159   :  { %670 = vst [vmem:[%s1470_s5 + $0x28] sm:$0xff] %v628_v40 }
 0x164   :  { %v645_v26 = vpop.f32.mrf.mxu2 }
 0x165   :  { %v646_v2 = vadd.f32 %v755_v54, %v645_v26 }
 0x167   :  { %677 = vst [vmem:[%s1470_s5 + $0x60] sm:$0xff] %v646_v2 }
 0x16a   :  { %v660_v23 = vpop.f32.mrf.mxu3 }
 0x16b   :  { %v661_v11 = vadd.f32 %v755_v54, %v660_v23 }
 0x16c   :  { %v647_v0 = vpop.f32.mrf.mxu2 }
 0x16d   :  { %683 = vst [vmem:[%s1470_s5 + $0x90] sm:$0xff] %v661_v11  ;;  %v648_v43 = vadd.f32 %v755_v54, %v647_v0 }
 0x16f   :  { %678 = vst [vmem:[%s1470_s5 + $0x68] sm:$0xff] %v648_v43 }
 0x172   :  { %v662_v6 = vpop.f32.mrf.mxu3 }
 0x173   :  { %v663_v63 = vadd.f32 %v755_v54, %v662_v6 }
 0x174   :  { %v620_v52 = vpop.f32.mrf.mxu0 }
 0x175   :  { %684 = vst [vmem:[%s1470_s5 + $0x98] sm:$0xff] %v663_v63  ;;  %v621_v21 = vadd.f32 %v755_v54, %v620_v52 }
 0x177   :  { %667 = vst [vmem:[%s1470_s5 + $0x10] sm:$0xff] %v621_v21 }
 0x17b   :  { %v630_v27 = vpop.f32.mrf.mxu1 }
 0x17c   :  { %v622_v41 = vpop.f32.mrf.mxu0  ;;  %v631_v12 = vadd.f32 %v755_v54, %v630_v27 }
 0x17d   :  { %v623_v37 = vadd.f32 %v755_v54, %v622_v41 }
 0x17e   :  { %671 = vst [vmem:[%s1470_s5 + $0x30] sm:$0xff] %v631_v12 }
 0x17f   :  { %668 = vst [vmem:[%s1470_s5 + $0x18] sm:$0xff] %v623_v37 }
 0x183   :  { %v632_v7 = vpop.f32.mrf.mxu1 }
 0x184   :  { %v633_v42 = vadd.f32 %v755_v54, %v632_v7 }
 0x186   :  { %672 = vst [vmem:[%s1470_s5 + $0x38] sm:$0xff] %v633_v42 }

</bundles_post_ra>
